<compile_context>
chip_gen: v6e
topology: v6e:2x2x1
jax: 0.10.0
libtpu: 0.0.40
codegen_flags: <defaults>
</compile_context>

<pallas_src>
from functools import partial

import numpy as np
import jax
import jax.numpy as jnp
from jax.experimental import pallas as pl
from jax.experimental.pallas import tpu as pltpu

F32 = jnp.float32
MXU_DTYPE = jnp.bfloat16        # MXU operand dtype (f32 accumulate). Set to F32 for exact f32.
SQRT2_INV = 0.7071067811865476


# ------------------------- generation-aware tuning ---------------------------

def _tpu_vmem_capacity_bytes():
    try:
        info = pltpu.get_tpu_info()
        cap = getattr(info, "vmem_capacity_bytes", None)
        if cap:
            return int(cap)
    except Exception:
        pass
    return 64 * 1024 * 1024


_VMEM_CAP = _tpu_vmem_capacity_bytes()
if _VMEM_CAP >= 96 * 1024 * 1024:            # v5e / v6e: 128 MiB physical VMEM
    _VMEM_LIMIT = 64 * 1024 * 1024
    _ROW_TILE_TARGET = 1024
else:                                        # v7x: 64 MiB per TensorCore
    _VMEM_LIMIT = 32 * 1024 * 1024
    _ROW_TILE_TARGET = 512

# Row-tiled kernel family: grid over M, "parallel" shards across TensorCores.
MM_PARAMS = pltpu.CompilerParams(
    dimension_semantics=("parallel",),
    vmem_limit_bytes=_VMEM_LIMIT,
)


# ------------------------------ kernel helpers -------------------------------

def _gelu(x):                      # exact (erf) GELU, matches nn.GELU()
    return 0.5 * x * (1.0 + jax.lax.erf(x * SQRT2_INV))


def _apply_act(y, act):
    if act == "relu":
        return jnp.maximum(y, 0.0)
    if act == "gelu":
        return _gelu(y)
    return y


def _ln(x, g, b, eps):
    mean = jnp.mean(x, axis=-1, keepdims=True)
    xc = x - mean
    var = jnp.mean(xc * xc, axis=-1, keepdims=True)
    return (xc * jax.lax.rsqrt(var + eps)) * g + b


def _tile_rows(M, target=None):
    """Pick (row_tile, padded_M).  Tile is a multiple of 8; if no divisor of M
    <= target works, M is padded up to a multiple of target (pad rows are
    zero and sliced off afterwards) so we never fall back to a whole-M block."""
    if target is None:
        target = _ROW_TILE_TARGET
    Mp8 = ((M + 7) // 8) * 8
    if Mp8 <= target:
        return Mp8, Mp8
    t = target - (target % 8)
    while t >= 8:
        if M % t == 0:
            return t, M
        t -= 8
    Mp = ((M + target - 1) // target) * target
    return target, Mp


def _pad_rows(a, mp):
    m = a.shape[0]
    if mp == m:
        return a
    return jnp.pad(a, ((0, mp - m),) + ((0, 0),) * (a.ndim - 1))


# ------------------------------ Pallas kernels -------------------------------

def _mm_kernel(x_ref, w_ref, *rest, act, has_bias, has_post):
    """o = act(x @ w [+ b]) [+ post_add]  -- fused epilogue (bn/bias/relu/x_t add)."""
    o_ref = rest[-1]
    y = jnp.dot(x_ref[...].astype(MXU_DTYPE), w_ref[...],
                preferred_element_type=jnp.float32)
    i = 0
    if has_bias:
        y = y + rest[i][...]
        i += 1
    y = _apply_act(y, act)
    if has_post:
        y = y + rest[i][...]
        i += 1
    o_ref[...] = y


def pl_matmul(x2d, w, b=None, post_add=None, act=None):
    M, K = x2d.shape
    N = w.shape[1]
    tm, Mp = _tile_rows(M)
    grid = (Mp // tm,)
    in_specs = [pl.BlockSpec((tm, K), lambda i: (i, 0)),
                pl.BlockSpec((K, N), lambda i: (0, 0))]
    args = [_pad_rows(x2d.astype(F32), Mp), w.astype(MXU_DTYPE)]
    if b is not None:
        in_specs.append(pl.BlockSpec((1, N), lambda i: (0, 0)))
        args.append(b.reshape(1, N).astype(F32))
    if post_add is not None:
        in_specs.append(pl.BlockSpec((tm, N), lambda i: (i, 0)))
        args.append(_pad_rows(post_add.astype(F32), Mp))
    out = pl.pallas_call(
        partial(_mm_kernel, act=act, has_bias=b is not None,
                has_post=post_add is not None),
        grid=grid,
        in_specs=in_specs,
        out_specs=pl.BlockSpec((tm, N), lambda i: (i, 0)),
        out_shape=jax.ShapeDtypeStruct((Mp, N), F32),
        compiler_params=MM_PARAMS,
    )(*args)
    return out if Mp == M else out[:M]


def _cnn_tail_kernel(*refs, has_hazy):
    """relu(h @ w2 + b2 + r @ wr + br) [+ com @ wh + bh]:
       pw2+bn2 + residual_conv+residual_bn + add + relu2 (+ fused hazy conv+add)."""
    if has_hazy:
        h_ref, r_ref, c_ref, w2_ref, b2_ref, wr_ref, br_ref, wh_ref, bh_ref, o_ref = refs
    else:
        h_ref, r_ref, w2_ref, b2_ref, wr_ref, br_ref, o_ref = refs
    y = jnp.dot(h_ref[...].astype(MXU_DTYPE), w2_ref[...],
                preferred_element_type=jnp.float32) + b2_ref[...]
    y = y + jnp.dot(r_ref[...].astype(MXU_DTYPE), wr_ref[...],
                    preferred_element_type=jnp.float32) + br_ref[...]
    y = jnp.maximum(y, 0.0)
    if has_hazy:
        y = y + jnp.dot(c_ref[...].astype(MXU_DTYPE), wh_ref[...],
                        preferred_element_type=jnp.float32) + bh_ref[...]
    o_ref[...] = y


def pl_cnn_tail(h2d, r2d, w2, b2, wr, br, hazy=None):
    # TODO(synk): merge the K-small matmuls into one dot via an in-kernel
    # [h | r] lane concat once unaligned lane concat is validated on all gens.
    M, K2 = h2d.shape
    Kr = r2d.shape[1]
    N = w2.shape[1]
    tm, Mp = _tile_rows(M)
    grid = (Mp // tm,)
    in_specs = [pl.BlockSpec((tm, K2), lambda i: (i, 0)),
                pl.BlockSpec((tm, Kr), lambda i: (i, 0))]
    args = [_pad_rows(h2d.astype(F32), Mp), _pad_rows(r2d.astype(F32), Mp)]
    if hazy is not None:
        c2d, wh, bh = hazy
        Kc = c2d.shape[1]
        in_specs.append(pl.BlockSpec((tm, Kc), lambda i: (i, 0)))
        args.append(_pad_rows(c2d.astype(F32), Mp))
    in_specs += [pl.BlockSpec((K2, N), lambda i: (0, 0)),
                 pl.BlockSpec((1, N), lambda i: (0, 0)),
                 pl.BlockSpec((Kr, N), lambda i: (0, 0)),
                 pl.BlockSpec((1, N), lambda i: (0, 0))]
    args += [w2.astype(MXU_DTYPE), b2.reshape(1, N).astype(F32),
             wr.astype(MXU_DTYPE), br.reshape(1, N).astype(F32)]
    if hazy is not None:
        in_specs += [pl.BlockSpec((Kc, N), lambda i: (0, 0)),
                     pl.BlockSpec((1, N), lambda i: (0, 0))]
        args += [wh.astype(MXU_DTYPE), bh.reshape(1, N).astype(F32)]
    out = pl.pallas_call(
        partial(_cnn_tail_kernel, has_hazy=hazy is not None),
        grid=grid,
        in_specs=in_specs,
        out_specs=pl.BlockSpec((tm, N), lambda i: (i, 0)),
        out_shape=jax.ShapeDtypeStruct((Mp, N), F32),
        compiler_params=MM_PARAMS,
    )(*args)
    return out if Mp == M else out[:M]


def _mm_ln_gelu_kernel(x_ref, w_ref, b_ref, g_ref, bt_ref, o_ref, *, eps):
    """FCUDown conv_project (1x1) + LayerNorm + GELU, fused."""
    y = jnp.dot(x_ref[...].astype(MXU_DTYPE), w_ref[...],
                preferred_element_type=jnp.float32) + b_ref[...]
    o_ref[...] = _gelu(_ln(y, g_ref[...], bt_ref[...], eps))


def pl_mm_ln_gelu(x2d, w, b, g, beta, eps):
    M, K = x2d.shape
    N = w.shape[1]
    tm, Mp = _tile_rows(M)
    grid = (Mp // tm,)
    out = pl.pallas_call(
        partial(_mm_ln_gelu_kernel, eps=eps),
        grid=grid,
        in_specs=[pl.BlockSpec((tm, K), lambda i: (i, 0)),
                  pl.BlockSpec((K, N), lambda i: (0, 0)),
                  pl.BlockSpec((1, N), lambda i: (0, 0)),
                  pl.BlockSpec((1, N), lambda i: (0, 0)),
                  pl.BlockSpec((1, N), lambda i: (0, 0))],
        out_specs=pl.BlockSpec((tm, N), lambda i: (i, 0)),
        out_shape=jax.ShapeDtypeStruct((Mp, N), F32),
        compiler_params=MM_PARAMS,
    )(_pad_rows(x2d.astype(F32), Mp), w.astype(MXU_DTYPE),
      b.reshape(1, N).astype(F32), g.reshape(1, N).astype(F32),
      beta.reshape(1, N).astype(F32))
    return out if Mp == M else out[:M]


def _trans_kernel(xst_ref, xt_ref, q_ref, kvw_ref, pw_ref, pb_ref,
                  n1g_ref, n1b_ref, n2g_ref, n2b_ref,
                  f1w_ref, f1b_ref, f2w_ref, f2b_ref, o_ref,
                  *, num_heads, scale, eps):
    """One fused Trans_block_mix step for one batch element:
       x0 = x_st + x_t; attn(norm1(x0), q) + x0; + mlp(norm2(.))."""
    T = xst_ref.shape[1]
    E = xst_ref.shape[2]
    hd = E // num_heads

    x0 = xst_ref[0] + xt_ref[0]                                    # (T, E) f32
    y1 = _ln(x0, n1g_ref[...], n1b_ref[...], eps)
    kv = jnp.dot(y1.astype(MXU_DTYPE), kvw_ref[...],
                 preferred_element_type=jnp.float32)               # (T, 2E)
    qf = q_ref[0]                                                  # (T, E) f32

    # proj(concat_h o_h) == sum_h o_h @ proj_w[h*hd:(h+1)*hd] -> accumulate the
    # projected heads directly (avoids an in-kernel lane concat).
    x1 = x0 + pb_ref[...]
    for h in range(num_heads):
        lo, hi = h * hd, (h + 1) * hd
        qh = qf[:, lo:hi].astype(MXU_DTYPE)
        kh = kv[:, lo:hi].astype(MXU_DTYPE)
        vh = kv[:, E + lo:E + hi].astype(MXU_DTYPE)
        s = jax.lax.dot_general(qh, kh, (((1,), (1,)), ((), ())),
                                preferred_element_type=jnp.float32) * scale
        s = s - jnp.max(s, axis=-1, keepdims=True)
        p = jnp.exp(s)
        p = p * pl.reciprocal(jnp.sum(p, axis=-1, keepdims=True), approx=True)
        oh = jnp.dot(p.astype(MXU_DTYPE), vh,
                     preferred_element_type=jnp.float32)           # (T, hd)
        x1 = x1 + jnp.dot(oh.astype(MXU_DTYPE), pw_ref[lo:hi, :],
                          preferred_element_type=jnp.float32)

    y2 = _ln(x1, n2g_ref[...], n2b_ref[...], eps)
    hmid = _gelu(jnp.dot(y2.astype(MXU_DTYPE), f1w_ref[...],
                         preferred_element_type=jnp.float32) + f1b_ref[...])
    x2 = x1 + jnp.dot(hmid.astype(MXU_DTYPE), f2w_ref[...],
                      preferred_element_type=jnp.float32) + f2b_ref[...]
    o_ref[0] = x2


def pl_trans_block(x_st, x_t, q, p, num_heads):
    """Both (tex/color) branches batched along axis 0; one fused kernel, grid
    over the 2B batch axis (parallel -> sharded across TensorCores)."""
    B2, T, E = x_t.shape
    hidden = p["fc1_w"].shape[1]
    scale = float((E // num_heads) ** -0.5)

    def row(v, n):
        return v.reshape(1, n).astype(F32)

    tok_spec = pl.BlockSpec((1, T, E), lambda i: (i, 0, 0))

    def full(shape):
        return pl.BlockSpec(shape, lambda i: tuple(0 for _ in shape))

    return pl.pallas_call(
        partial(_trans_kernel, num_heads=num_heads, scale=scale, eps=1e-5),
        grid=(B2,),
        in_specs=[tok_spec, tok_spec, tok_spec,
                  full((E, 2 * E)), full((E, E)), full((1, E)),
                  full((1, E)), full((1, E)), full((1, E)), full((1, E)),
                  full((E, hidden)), full((1, hidden)),
                  full((hidden, E)), full((1, E))],
        out_specs=tok_spec,
        out_shape=jax.ShapeDtypeStruct((B2, T, E), F32),
        compiler_params=pltpu.CompilerParams(
            dimension_semantics=("parallel",), vmem_limit_bytes=_VMEM_LIMIT),
    )(x_st.astype(F32), x_t.astype(F32), q.astype(F32),
      p["kv_w"].astype(MXU_DTYPE), p["proj_w"].astype(MXU_DTYPE), row(p["proj_b"], E),
      row(p["n1_g"], E), row(p["n1_b"], E), row(p["n2_g"], E), row(p["n2_b"], E),
      p["fc1_w"].astype(MXU_DTYPE), row(p["fc1_b"], hidden),
      p["fc2_w"].astype(MXU_DTYPE), row(p["fc2_b"], E))


def _expand_sum_kernel(t1_ref, t2_ref, w_ref, b_ref, o_ref):
    """FCUUp conv_project+bn+relu for both branches + branch sum, one tile."""
    w = w_ref[...]
    b = b_ref[...]
    y1 = jnp.dot(t1_ref[...].astype(MXU_DTYPE), w,
                 preferred_element_type=jnp.float32) + b
    y2 = jnp.dot(t2_ref[...].astype(MXU_DTYPE), w,
                 preferred_element_type=jnp.float32) + b
    o_ref[...] = jnp.maximum(y1, 0.0) + jnp.maximum(y2, 0.0)


def pl_expand_sum(t1, t2, w, b):
    M, K = t1.shape
    N = w.shape[1]
    tm, Mp = _tile_rows(M)
    grid = (Mp // tm,)
    out = pl.pallas_call(
        _expand_sum_kernel,
        grid=grid,
        in_specs=[pl.BlockSpec((tm, K), lambda i: (i, 0)),
                  pl.BlockSpec((tm, K), lambda i: (i, 0)),
                  pl.BlockSpec((K, N), lambda i: (0, 0)),
                  pl.BlockSpec((1, N), lambda i: (0, 0))],
        out_specs=pl.BlockSpec((tm, N), lambda i: (i, 0)),
        out_shape=jax.ShapeDtypeStruct((Mp, N), F32),
        compiler_params=MM_PARAMS,
    )(_pad_rows(t1.astype(F32), Mp), _pad_rows(t2.astype(F32), Mp),
      w.astype(MXU_DTYPE), b.reshape(1, N).astype(F32))
    return out if Mp == M else out[:M]


def _dw3x3_kernel(x_ref, w_ref, o_ref, pad_ref):
    """Depthwise 3x3 (stride 1, pad 1) for one image: the 1-px halo is built in
    a VMEM scratch (no HBM-level jnp.pad), then 9 shifted multiply-adds."""
    H, W, C = o_ref.shape[1], o_ref.shape[2], o_ref.shape[3]
    pad_ref[...] = jnp.zeros(pad_ref.shape, pad_ref.dtype)
    pad_ref[1:H + 1, 1:W + 1, :] = x_ref[0]
    xp = pad_ref[...]                       # (H+2, W+2, C)
    w = w_ref[...]                          # (3, 3, C)
    acc = jnp.zeros((H, W, C), jnp.float32)
    for dh in range(3):
        for dw in range(3):
            acc = acc + xp[dh:dh + H, dw:dw + W, :] * w[dh, dw, :]
    o_ref[0] = acc


def pl_depthwise3x3(x_nhwc, w33c):
    """Depthwise 3x3, stride 1, padding 1; grid over batch (parallel)."""
    # TODO(synk): lane-densify the small-C layout (W on lanes, C on sublanes)
    # and tile H with halo index_maps for very large images.
    B, H, W, C = x_nhwc.shape
    return pl.pallas_call(
        _dw3x3_kernel,
        grid=(B,),
        in_specs=[pl.BlockSpec((1, H, W, C), lambda b: (b, 0, 0, 0)),
                  pl.BlockSpec((3, 3, C), lambda b: (0, 0, 0))],
        out_specs=pl.BlockSpec((1, H, W, C), lambda b: (b, 0, 0, 0)),
        out_shape=jax.ShapeDtypeStruct((B, H, W, C), F32),
        scratch_shapes=[pltpu.VMEM((H + 2, W + 2, C), jnp.float32)],
        compiler_params=pltpu.CompilerParams(
            dimension_semantics=("parallel",), vmem_limit_bytes=_VMEM_LIMIT),
    )(x_nhwc.astype(F32), w33c.astype(F32))


# ------------------------------- glue helpers --------------------------------

def fold_bn(w, bn, b=None):
    """Fold inference BatchNorm (scale, shift) into a 1x1-conv weight/bias."""
    scale, shift = bn
    wf = w * scale[None, :]
    bf = shift if b is None else b * scale + shift
    return wf, bf


def avgpool_nhwc(x, s):
    B, H, W, C = x.shape
    return jnp.mean(x.reshape(B, H // s, s, W // s, s, C), axis=(2, 4))


def maxpool_nhwc(x, s):
    B, H, W, C = x.shape
    return jnp.max(x.reshape(B, H // s, s, W // s, s, C), axis=(2, 4))


def upsample_nearest(x, s):
    # TODO(synk): fold the nearest upsample into the fusion block's pw1
    # post_add via a (b, h // s) index_map so the full-res x_t never hits HBM.
    return jnp.repeat(jnp.repeat(x, s, axis=1), s, axis=2)


# ------------------------------ module forwards ------------------------------

def cnn_block_fwd(x, p, stride=1, x_t=None, hazy=None):
    """CNN_block: BN folded; residual / x_t add / ReLU (and optional hazy 1x1
    conv + add) fused into the matmul kernels."""
    B, H, W, Cin = x.shape
    # depth_conv1 depthwise, then pointwise + bn1 + relu1 (+ x_t add) fused
    h = pl_depthwise3x3(x, p["dw1"])
    w1, b1 = fold_bn(p["pw1"], p["bn1"])
    Cout = w1.shape[1]
    post = None if x_t is None else x_t.reshape(B * H * W, Cout)
    h = pl_matmul(h.reshape(B * H * W, Cin), w1, b1, act="relu", post_add=post)
    # depth_conv2 depthwise (stride handled by subsampling the s1 output)
    h = pl_depthwise3x3(h.reshape(B, H, W, Cout), p["dw2"])
    res = x
    if stride > 1:
        # TODO(synk): compute only the strided rows/cols inside the depthwise
        # kernel instead of subsampling the stride-1 result.
        h = h[:, ::stride, ::stride, :]
        res = res[:, ::stride, ::stride, :]
    Ho, Wo = h.shape[1], h.shape[2]
    # pw2 + bn2 + residual_conv + residual_bn + add + relu2 (+ hazy conv + add)
    w2, b2 = fold_bn(p["pw2"], p["bn2"])
    wr, br = fold_bn(p["res_w"], p["res_bn"])
    hz = None
    if hazy is not None:
        com_p, wh, bh = hazy
        hz = (com_p.reshape(B * Ho * Wo, com_p.shape[-1]), wh, bh)
    y = pl_cnn_tail(h.reshape(B * Ho * Wo, Cout), res.reshape(B * Ho * Wo, Cin),
                    w2, b2, wr, br, hazy=hz)
    return y.reshape(B, Ho, Wo, Cout)


def conv_trans_block_fwd(params, x_nchw, x_t1, x_t2, tex, color, com_nchw,
                         *, stride, dw_stride, hazy_stride, num_heads):
    x_in = jnp.transpose(x_nchw, (0, 2, 3, 1)).astype(F32)
    com = jnp.transpose(com_nchw, (0, 2, 3, 1)).astype(F32)

    # cnn_block with the (maxpool'd) hazy 1x1 conv + add fused into its tail.
    com_p = maxpool_nhwc(com, hazy_stride)
    x = cnn_block_fwd(x_in, params["cnn"], stride=stride,
                      hazy=(com_p, params["hazy_w"], params["hazy_b"]))
    B, H, W, C = x.shape

    # squeeze (FCUDown): computed ONCE and shared by both transformer branches.
    # AvgPool commutes with conv_project; LN+GELU fused into the matmul.
    pooled = avgpool_nhwc(x, dw_stride)
    hs, ws = pooled.shape[1], pooled.shape[2]
    sq = params["squeeze"]
    tok = pl_mm_ln_gelu(pooled.reshape(B * hs * ws, C), sq["conv_w"], sq["conv_b"],
                        sq["ln_g"], sq["ln_b"], eps=1e-6).reshape(B, hs * ws, -1)
    E = tok.shape[-1]

    # batch the two transformer branches (shared weights) along the batch axis
    x_st_cat = jnp.concatenate(
        [jnp.concatenate([x_t1[:, :1, :], tok], axis=1),
         jnp.concatenate([x_t2[:, :1, :], tok], axis=1)], axis=0)    # (2B,T,E)
    x_t_cat = jnp.concatenate([x_t1, x_t2], axis=0)
    q_cat = jnp.concatenate([tex, color], axis=0)
    x_out = pl_trans_block(x_st_cat, x_t_cat, q_cat, params["trans"], num_heads)
    x_t1n, x_t2n = x_out[:B], x_out[B:]

    # expand (FCUUp) on both branches; branch-sum fused; nearest upsample (which
    # commutes with the sum) done once afterwards.
    ex = params["expand"]
    we, be = fold_bn(ex["conv_w"], ex["bn"], ex["conv_b"])
    t1 = x_t1n[:, 1:, :].reshape(B * hs * ws, E)
    t2 = x_t2n[:, 1:, :].reshape(B * hs * ws, E)
    y_low = pl_expand_sum(t1, t2, we, be).reshape(B, hs, ws, C)
    x_t_r = upsample_nearest(y_low, dw_stride)                       # (B,H,W,C)

    x = cnn_block_fwd(x, params["fusion"], stride=1, x_t=x_t_r)
    return jnp.transpose(x, (0, 3, 1, 2)), x_t1n, x_t2n


# -------------------------------- param init ---------------------------------

def init_params(key, in_planes, out_planes, embed_dim, mlp_ratio):
    kit = iter(jax.random.split(key, 64))
    nk = lambda: next(kit)

    def w(shape):
        fan_in = int(np.prod(shape[:-1])) if len(shape) > 1 else shape[0]
        return (1.0 / np.sqrt(fan_in)) * jax.random.normal(nk(), shape, F32)

    def bn(c, eps):
        gamma = 1.0 + 0.1 * jax.random.normal(nk(), (c,), F32)
        beta = 0.1 * jax.random.normal(nk(), (c,), F32)
        mean = 0.1 * jax.random.normal(nk(), (c,), F32)
        var = 0.5 + jnp.abs(jax.random.normal(nk(), (c,), F32))
        scale = gamma / jnp.sqrt(var + eps)
        shift = beta - mean * scale
        return (scale, shift)

    def cnn(cin, cout):
        return dict(dw1=w((3, 3, cin)), pw1=w((cin, cout)), bn1=bn(cout, 1e-5),
                    dw2=w((3, 3, cout)), pw2=w((cout, cout)), bn2=bn(cout, 1e-5),
                    res_w=w((cin, cout)), res_bn=bn(cout, 1e-5))

    hidden = int(embed_dim * mlp_ratio)
    return dict(
        cnn=cnn(in_planes, out_planes),
        fusion=cnn(out_planes, out_planes),
        squeeze=dict(conv_w=w((out_planes, embed_dim)),
                     conv_b=0.1 * jax.random.normal(nk(), (embed_dim,), F32),
                     ln_g=1.0 + 0.1 * jax.random.normal(nk(), (embed_dim,), F32),
                     ln_b=0.1 * jax.random.normal(nk(), (embed_dim,), F32)),
        expand=dict(conv_w=w((embed_dim, out_planes)),
                    conv_b=0.1 * jax.random.normal(nk(), (out_planes,), F32),
                    bn=bn(out_planes, 1e-6)),                 # FCUUp BN eps=1e-6
        trans=dict(n1_g=jnp.ones((embed_dim,), F32), n1_b=jnp.zeros((embed_dim,), F32),
                   kv_w=w((embed_dim, 2 * embed_dim)),
                   proj_w=w((embed_dim, embed_dim)), proj_b=jnp.zeros((embed_dim,), F32),
                   n2_g=jnp.ones((embed_dim,), F32), n2_b=jnp.zeros((embed_dim,), F32),
                   fc1_w=w((embed_dim, hidden)), fc1_b=jnp.zeros((hidden,), F32),
                   fc2_w=w((hidden, embed_dim)), fc2_b=jnp.zeros((embed_dim,), F32)),
        hazy_w=w((64, out_planes)),
        hazy_b=0.1 * jax.random.normal(nk(), (out_planes,), F32),
    )


# ------------------------------------ main ------------------------------------

if __name__ == "__main__":
    B = 2
    in_planes, out_planes = 8, 16
    stride = 1
    dw_stride = 4
    hazy_stride = 2
    embed_dim = 32
    num_heads = 4
    mlp_ratio = 4.0
    Hx = Wx = 16
    H, W = Hx // stride, Wx // stride
    T = (H // dw_stride) * (W // dw_stride) + 1          # tokens incl. cls

    params = init_params(jax.random.PRNGKey(1), in_planes, out_planes,
                         embed_dim, mlp_ratio)

    ks = jax.random.split(jax.random.PRNGKey(0), 6)
    x = jax.random.normal(ks[0], (B, in_planes, Hx, Wx), F32)
    x_t1 = jax.random.normal(ks[1], (B, T, embed_dim), F32)
    x_t2 = jax.random.normal(ks[2], (B, T, embed_dim), F32)
    tex = jax.random.normal(ks[3], (B, T, embed_dim), F32)
    color = jax.random.normal(ks[4], (B, T, embed_dim), F32)
    com = jax.random.normal(ks[5], (B, 64, H * hazy_stride, W * hazy_stride), F32)

    fwd = jax.jit(partial(conv_trans_block_fwd, stride=stride, dw_stride=dw_stride,
                          hazy_stride=hazy_stride, num_heads=num_heads))
    out_x, out_t1, out_t2 = fwd(params, x, x_t1, x_t2, tex, color, com)
    jax.block_until_ready((out_x, out_t1, out_t2))

    assert out_x.shape == (B, out_planes, H, W)
    assert out_t1.shape == (B, T, embed_dim)
    assert out_t2.shape == (B, T, embed_dim)
    assert bool(jnp.isfinite(out_x).all())
    assert bool(jnp.isfinite(out_t1).all())
    assert bool(jnp.isfinite(out_t2).all())
    print("KERNEL_OK")
</pallas_src>

<mosaic_0001>
module attributes {stable_mosaic.version = 11 : i64} {
  func.func @_dw3x3_kernel(%arg0: i32, %arg1: memref<1x16x16x8xf32, #tpu.memory_space<vmem>>, %arg2: memref<3x3x8xf32, #tpu.memory_space<vmem>>, %arg3: memref<1x16x16x8xf32, #tpu.memory_space<vmem>>, %arg4: memref<18x18x8xf32, #tpu.memory_space<vmem>>) attributes {dimension_semantics = [#tpu.dimension_semantics<parallel>], iteration_bounds = array<i64: 2>, scalar_prefetch = 0 : i64, scratch_operands = 1 : i64, tpu.core_type = #tpu.core_type<tc>, window_params = [{transform_indices = @transform_0, window_bounds = array<i64: 1, 16, 16, 8>}, {pipeline_mode = #tpu.pipeline_mode<synchronous>, transform_indices = @transform_1, window_bounds = array<i64: 3, 3, 8>}, {transform_indices = @transform_2, window_bounds = array<i64: 1, 16, 16, 8>}]} {
    %cst = arith.constant 0.000000e+00 : f32
    %0 = vector.broadcast %cst : f32 to vector<18x18x8xf32>
    %c0 = arith.constant 0 : index
    %c0_0 = arith.constant 0 : index
    %c0_1 = arith.constant 0 : index
    %1 = vector.load %arg4[%c0, %c0_0, %c0_1] : memref<18x18x8xf32, #tpu.memory_space<vmem>>, vector<18x18x8xf32>
    tpu.vector_store %arg4[%c0, %c0_0, %c0_1], %0 {strides = array<i32>} : memref<18x18x8xf32, #tpu.memory_space<vmem>>, vector<18x18x8xf32>,
    %c0_2 = arith.constant 0 : index
    %c0_3 = arith.constant 0 : index
    %c0_4 = arith.constant 0 : index
    %c0_5 = arith.constant 0 : index
    %2 = vector.load %arg1[%c0_2, %c0_3, %c0_4, %c0_5] : memref<1x16x16x8xf32, #tpu.memory_space<vmem>>, vector<1x16x16x8xf32>
    %3 = vector.shape_cast %2 : vector<1x16x16x8xf32> to vector<16x16x8xf32>
    %c1 = arith.constant 1 : index
    %c1_6 = arith.constant 1 : index
    %c0_7 = arith.constant 0 : index
    %4 = vector.load %arg4[%c1, %c1_6, %c0_7] : memref<18x18x8xf32, #tpu.memory_space<vmem>>, vector<16x16x8xf32>
    tpu.vector_store %arg4[%c1, %c1_6, %c0_7], %3 {strides = array<i32>} : memref<18x18x8xf32, #tpu.memory_space<vmem>>, vector<16x16x8xf32>,
    %c0_8 = arith.constant 0 : index
    %c0_9 = arith.constant 0 : index
    %c0_10 = arith.constant 0 : index
    %5 = vector.load %arg4[%c0_8, %c0_9, %c0_10] : memref<18x18x8xf32, #tpu.memory_space<vmem>>, vector<18x18x8xf32>
    %c0_11 = arith.constant 0 : index
    %c0_12 = arith.constant 0 : index
    %c0_13 = arith.constant 0 : index
    %6 = vector.load %arg2[%c0_11, %c0_12, %c0_13] : memref<3x3x8xf32, #tpu.memory_space<vmem>>, vector<3x3x8xf32>
    %cst_14 = arith.constant 0.000000e+00 : f32
    %7 = vector.broadcast %cst_14 : f32 to vector<16x16x8xf32>
    %8 = vector.extract_strided_slice %5 {offsets = [0, 0, 0], sizes = [16, 16, 8], strides = [1, 1, 1]} : vector<18x18x8xf32> to vector<16x16x8xf32>
    %9 = vector.extract_strided_slice %6 {offsets = [0, 0, 0], sizes = [1, 1, 8], strides = [1, 1, 1]} : vector<3x3x8xf32> to vector<1x1x8xf32>
    %10 = vector.shape_cast %9 : vector<1x1x8xf32> to vector<8xf32>
    %11 = vector.shape_cast %10 : vector<8xf32> to vector<1x1x8xf32>
    %12 = vector.broadcast %11 : vector<1x1x8xf32> to vector<16x16x8xf32>
    %13 = arith.mulf %8, %12 : vector<16x16x8xf32>
    %14 = arith.addf %7, %13 : vector<16x16x8xf32>
    %15 = vector.extract_strided_slice %5 {offsets = [0, 1, 0], sizes = [16, 16, 8], strides = [1, 1, 1]} : vector<18x18x8xf32> to vector<16x16x8xf32>
    %16 = vector.extract_strided_slice %6 {offsets = [0, 1, 0], sizes = [1, 1, 8], strides = [1, 1, 1]} : vector<3x3x8xf32> to vector<1x1x8xf32>
    %17 = vector.shape_cast %16 : vector<1x1x8xf32> to vector<8xf32>
    %18 = vector.shape_cast %17 : vector<8xf32> to vector<1x1x8xf32>
    %19 = vector.broadcast %18 : vector<1x1x8xf32> to vector<16x16x8xf32>
    %20 = arith.mulf %15, %19 : vector<16x16x8xf32>
    %21 = arith.addf %14, %20 : vector<16x16x8xf32>
    %22 = vector.extract_strided_slice %5 {offsets = [0, 2, 0], sizes = [16, 16, 8], strides = [1, 1, 1]} : vector<18x18x8xf32> to vector<16x16x8xf32>
    %23 = vector.extract_strided_slice %6 {offsets = [0, 2, 0], sizes = [1, 1, 8], strides = [1, 1, 1]} : vector<3x3x8xf32> to vector<1x1x8xf32>
    %24 = vector.shape_cast %23 : vector<1x1x8xf32> to vector<8xf32>
    %25 = vector.shape_cast %24 : vector<8xf32> to vector<1x1x8xf32>
    %26 = vector.broadcast %25 : vector<1x1x8xf32> to vector<16x16x8xf32>
    %27 = arith.mulf %22, %26 : vector<16x16x8xf32>
    %28 = arith.addf %21, %27 : vector<16x16x8xf32>
    %29 = vector.extract_strided_slice %5 {offsets = [1, 0, 0], sizes = [16, 16, 8], strides = [1, 1, 1]} : vector<18x18x8xf32> to vector<16x16x8xf32>
    %30 = vector.extract_strided_slice %6 {offsets = [1, 0, 0], sizes = [1, 1, 8], strides = [1, 1, 1]} : vector<3x3x8xf32> to vector<1x1x8xf32>
    %31 = vector.shape_cast %30 : vector<1x1x8xf32> to vector<8xf32>
    %32 = vector.shape_cast %31 : vector<8xf32> to vector<1x1x8xf32>
    %33 = vector.broadcast %32 : vector<1x1x8xf32> to vector<16x16x8xf32>
    %34 = arith.mulf %29, %33 : vector<16x16x8xf32>
    %35 = arith.addf %28, %34 : vector<16x16x8xf32>
    %36 = vector.extract_strided_slice %5 {offsets = [1, 1, 0], sizes = [16, 16, 8], strides = [1, 1, 1]} : vector<18x18x8xf32> to vector<16x16x8xf32>
    %37 = vector.extract_strided_slice %6 {offsets = [1, 1, 0], sizes = [1, 1, 8], strides = [1, 1, 1]} : vector<3x3x8xf32> to vector<1x1x8xf32>
    %38 = vector.shape_cast %37 : vector<1x1x8xf32> to vector<8xf32>
    %39 = vector.shape_cast %38 : vector<8xf32> to vector<1x1x8xf32>
    %40 = vector.broadcast %39 : vector<1x1x8xf32> to vector<16x16x8xf32>
    %41 = arith.mulf %36, %40 : vector<16x16x8xf32>
    %42 = arith.addf %35, %41 : vector<16x16x8xf32>
    %43 = vector.extract_strided_slice %5 {offsets = [1, 2, 0], sizes = [16, 16, 8], strides = [1, 1, 1]} : vector<18x18x8xf32> to vector<16x16x8xf32>
    %44 = vector.extract_strided_slice %6 {offsets = [1, 2, 0], sizes = [1, 1, 8], strides = [1, 1, 1]} : vector<3x3x8xf32> to vector<1x1x8xf32>
    %45 = vector.shape_cast %44 : vector<1x1x8xf32> to vector<8xf32>
    %46 = vector.shape_cast %45 : vector<8xf32> to vector<1x1x8xf32>
    %47 = vector.broadcast %46 : vector<1x1x8xf32> to vector<16x16x8xf32>
    %48 = arith.mulf %43, %47 : vector<16x16x8xf32>
    %49 = arith.addf %42, %48 : vector<16x16x8xf32>
    %50 = vector.extract_strided_slice %5 {offsets = [2, 0, 0], sizes = [16, 16, 8], strides = [1, 1, 1]} : vector<18x18x8xf32> to vector<16x16x8xf32>
    %51 = vector.extract_strided_slice %6 {offsets = [2, 0, 0], sizes = [1, 1, 8], strides = [1, 1, 1]} : vector<3x3x8xf32> to vector<1x1x8xf32>
    %52 = vector.shape_cast %51 : vector<1x1x8xf32> to vector<8xf32>
    %53 = vector.shape_cast %52 : vector<8xf32> to vector<1x1x8xf32>
    %54 = vector.broadcast %53 : vector<1x1x8xf32> to vector<16x16x8xf32>
    %55 = arith.mulf %50, %54 : vector<16x16x8xf32>
    %56 = arith.addf %49, %55 : vector<16x16x8xf32>
    %57 = vector.extract_strided_slice %5 {offsets = [2, 1, 0], sizes = [16, 16, 8], strides = [1, 1, 1]} : vector<18x18x8xf32> to vector<16x16x8xf32>
    %58 = vector.extract_strided_slice %6 {offsets = [2, 1, 0], sizes = [1, 1, 8], strides = [1, 1, 1]} : vector<3x3x8xf32> to vector<1x1x8xf32>
    %59 = vector.shape_cast %58 : vector<1x1x8xf32> to vector<8xf32>
    %60 = vector.shape_cast %59 : vector<8xf32> to vector<1x1x8xf32>
    %61 = vector.broadcast %60 : vector<1x1x8xf32> to vector<16x16x8xf32>
    %62 = arith.mulf %57, %61 : vector<16x16x8xf32>
    %63 = arith.addf %56, %62 : vector<16x16x8xf32>
    %64 = vector.extract_strided_slice %5 {offsets = [2, 2, 0], sizes = [16, 16, 8], strides = [1, 1, 1]} : vector<18x18x8xf32> to vector<16x16x8xf32>
    %65 = vector.extract_strided_slice %6 {offsets = [2, 2, 0], sizes = [1, 1, 8], strides = [1, 1, 1]} : vector<3x3x8xf32> to vector<1x1x8xf32>
    %66 = vector.shape_cast %65 : vector<1x1x8xf32> to vector<8xf32>
    %67 = vector.shape_cast %66 : vector<8xf32> to vector<1x1x8xf32>
    %68 = vector.broadcast %67 : vector<1x1x8xf32> to vector<16x16x8xf32>
    %69 = arith.mulf %64, %68 : vector<16x16x8xf32>
    %70 = arith.addf %63, %69 : vector<16x16x8xf32>
    %c0_15 = arith.constant 0 : index
    %c0_16 = arith.constant 0 : index
    %c0_17 = arith.constant 0 : index
    %c0_18 = arith.constant 0 : index
    %71 = vector.load %arg3[%c0_15, %c0_16, %c0_17, %c0_18] : memref<1x16x16x8xf32, #tpu.memory_space<vmem>>, vector<1x16x16x8xf32>
    %72 = vector.shape_cast %71 : vector<1x16x16x8xf32> to vector<16x16x8xf32>
    %73 = vector.shape_cast %70 : vector<16x16x8xf32> to vector<1x16x16x8xf32>
    tpu.vector_store %arg3[%c0_15, %c0_16, %c0_17, %c0_18], %73 {strides = array<i32>} : memref<1x16x16x8xf32, #tpu.memory_space<vmem>>, vector<1x16x16x8xf32>,
    return
  }
  func.func @transform_0(%arg0: i32) -> (i32, i32, i32, i32) {
    %c0_i32 = arith.constant 0 : i32
    %c0_i32_0 = arith.constant 0 : i32
    %c0_i32_1 = arith.constant 0 : i32
    %c0_i32_2 = arith.constant 0 : i32
    return %arg0, %c0_i32, %c0_i32_0, %c0_i32_1 : i32, i32, i32, i32
  }
  func.func @transform_1(%arg0: i32) -> (i32, i32, i32) {
    %c0_i32 = arith.constant 0 : i32
    %c0_i32_0 = arith.constant 0 : i32
    %c0_i32_1 = arith.constant 0 : i32
    %c0_i32_2 = arith.constant 0 : i32
    return %c0_i32, %c0_i32_0, %c0_i32_1 : i32, i32, i32
  }
  func.func @transform_2(%arg0: i32) -> (i32, i32, i32, i32) {
    %c0_i32 = arith.constant 0 : i32
    %c0_i32_0 = arith.constant 0 : i32
    %c0_i32_1 = arith.constant 0 : i32
    %c0_i32_2 = arith.constant 0 : i32
    return %arg0, %c0_i32, %c0_i32_0, %c0_i32_1 : i32, i32, i32, i32
  }
}

module attributes {stable_mosaic.version = 11 : i64} {
  func.func @_mm_kernel(%arg0: i32, %arg1: memref<512x8xf32, #tpu.memory_space<vmem>>, %arg2: memref<8x16xbf16, #tpu.memory_space<vmem>>, %arg3: memref<1x16xf32, #tpu.memory_space<vmem>>, %arg4: memref<512x16xf32, #tpu.memory_space<vmem>>) attributes {dimension_semantics = [#tpu.dimension_semantics<parallel>], iteration_bounds = array<i64: 1>, scalar_prefetch = 0 : i64, scratch_operands = 0 : i64, tpu.core_type = #tpu.core_type<tc>, window_params = [{transform_indices = @transform_0, window_bounds = array<i64: 512, 8>}, {pipeline_mode = #tpu.pipeline_mode<synchronous>, transform_indices = @transform_1, window_bounds = array<i64: 8, 16>}, {pipeline_mode = #tpu.pipeline_mode<synchronous>, transform_indices = @transform_2, window_bounds = array<i64: 1, 16>}, {transform_indices = @transform_3, window_bounds = array<i64: 512, 16>}]} {
    %c0 = arith.constant 0 : index
    %c0_0 = arith.constant 0 : index
    %0 = vector.load %arg1[%c0, %c0_0] : memref<512x8xf32, #tpu.memory_space<vmem>>, vector<512x8xf32>
    %1 = arith.truncf %0 : vector<512x8xf32> to vector<512x8xbf16>
    %c0_1 = arith.constant 0 : index
    %c0_2 = arith.constant 0 : index
    %2 = vector.load %arg2[%c0_1, %c0_2] : memref<8x16xbf16, #tpu.memory_space<vmem>>, vector<8x16xbf16>
    %cst = arith.constant dense<0.000000e+00> : vector<512x16xf32>
    %3 = tpu.matmul %1, %2, %cst {dimension_numbers = #tpu.dot_dimension_numbers<[1], [0], [0], [1], [0, 0, 1, 1], [], []>} : vector<512x8xbf16>, vector<8x16xbf16>, vector<512x16xf32> -> vector<512x16xf32>
    %c0_3 = arith.constant 0 : index
    %c0_4 = arith.constant 0 : index
    %4 = vector.load %arg3[%c0_3, %c0_4] : memref<1x16xf32, #tpu.memory_space<vmem>>, vector<1x16xf32>
    %5 = vector.broadcast %4 : vector<1x16xf32> to vector<512x16xf32>
    %6 = arith.addf %3, %5 : vector<512x16xf32>
    %cst_5 = arith.constant 0.000000e+00 : f32
    %7 = vector.broadcast %cst_5 : f32 to vector<512x16xf32>
    %8 = arith.maximumf %6, %7 : vector<512x16xf32>
    %c0_6 = arith.constant 0 : index
    %c0_7 = arith.constant 0 : index
    %9 = vector.load %arg4[%c0_6, %c0_7] : memref<512x16xf32, #tpu.memory_space<vmem>>, vector<512x16xf32>
    tpu.vector_store %arg4[%c0_6, %c0_7], %8 {strides = array<i32>} : memref<512x16xf32, #tpu.memory_space<vmem>>, vector<512x16xf32>,
    return
  }
  func.func @transform_0(%arg0: i32) -> (i32, i32) {
    %c0_i32 = arith.constant 0 : i32
    %c0_i32_0 = arith.constant 0 : i32
    return %arg0, %c0_i32 : i32, i32
  }
  func.func @transform_1(%arg0: i32) -> (i32, i32) {
    %c0_i32 = arith.constant 0 : i32
    %c0_i32_0 = arith.constant 0 : i32
    %c0_i32_1 = arith.constant 0 : i32
    return %c0_i32, %c0_i32_0 : i32, i32
  }
  func.func @transform_2(%arg0: i32) -> (i32, i32) {
    %c0_i32 = arith.constant 0 : i32
    %c0_i32_0 = arith.constant 0 : i32
    %c0_i32_1 = arith.constant 0 : i32
    return %c0_i32, %c0_i32_0 : i32, i32
  }
  func.func @transform_3(%arg0: i32) -> (i32, i32) {
    %c0_i32 = arith.constant 0 : i32
    %c0_i32_0 = arith.constant 0 : i32
    return %arg0, %c0_i32 : i32, i32
  }
}

module attributes {stable_mosaic.version = 11 : i64} {
  func.func @_dw3x3_kernel(%arg0: i32, %arg1: memref<1x16x16x16xf32, #tpu.memory_space<vmem>>, %arg2: memref<3x3x16xf32, #tpu.memory_space<vmem>>, %arg3: memref<1x16x16x16xf32, #tpu.memory_space<vmem>>, %arg4: memref<18x18x16xf32, #tpu.memory_space<vmem>>) attributes {dimension_semantics = [#tpu.dimension_semantics<parallel>], iteration_bounds = array<i64: 2>, scalar_prefetch = 0 : i64, scratch_operands = 1 : i64, tpu.core_type = #tpu.core_type<tc>, window_params = [{transform_indices = @transform_0, window_bounds = array<i64: 1, 16, 16, 16>}, {pipeline_mode = #tpu.pipeline_mode<synchronous>, transform_indices = @transform_1, window_bounds = array<i64: 3, 3, 16>}, {transform_indices = @transform_2, window_bounds = array<i64: 1, 16, 16, 16>}]} {
    %cst = arith.constant 0.000000e+00 : f32
    %0 = vector.broadcast %cst : f32 to vector<18x18x16xf32>
    %c0 = arith.constant 0 : index
    %c0_0 = arith.constant 0 : index
    %c0_1 = arith.constant 0 : index
    %1 = vector.load %arg4[%c0, %c0_0, %c0_1] : memref<18x18x16xf32, #tpu.memory_space<vmem>>, vector<18x18x16xf32>
    tpu.vector_store %arg4[%c0, %c0_0, %c0_1], %0 {strides = array<i32>} : memref<18x18x16xf32, #tpu.memory_space<vmem>>, vector<18x18x16xf32>,
    %c0_2 = arith.constant 0 : index
    %c0_3 = arith.constant 0 : index
    %c0_4 = arith.constant 0 : index
    %c0_5 = arith.constant 0 : index
    %2 = vector.load %arg1[%c0_2, %c0_3, %c0_4, %c0_5] : memref<1x16x16x16xf32, #tpu.memory_space<vmem>>, vector<1x16x16x16xf32>
    %3 = vector.shape_cast %2 : vector<1x16x16x16xf32> to vector<16x16x16xf32>
    %c1 = arith.constant 1 : index
    %c1_6 = arith.constant 1 : index
    %c0_7 = arith.constant 0 : index
    %4 = vector.load %arg4[%c1, %c1_6, %c0_7] : memref<18x18x16xf32, #tpu.memory_space<vmem>>, vector<16x16x16xf32>
    tpu.vector_store %arg4[%c1, %c1_6, %c0_7], %3 {strides = array<i32>} : memref<18x18x16xf32, #tpu.memory_space<vmem>>, vector<16x16x16xf32>,
    %c0_8 = arith.constant 0 : index
    %c0_9 = arith.constant 0 : index
    %c0_10 = arith.constant 0 : index
    %5 = vector.load %arg4[%c0_8, %c0_9, %c0_10] : memref<18x18x16xf32, #tpu.memory_space<vmem>>, vector<18x18x16xf32>
    %c0_11 = arith.constant 0 : index
    %c0_12 = arith.constant 0 : index
    %c0_13 = arith.constant 0 : index
    %6 = vector.load %arg2[%c0_11, %c0_12, %c0_13] : memref<3x3x16xf32, #tpu.memory_space<vmem>>, vector<3x3x16xf32>
    %cst_14 = arith.constant 0.000000e+00 : f32
    %7 = vector.broadcast %cst_14 : f32 to vector<16x16x16xf32>
    %8 = vector.extract_strided_slice %5 {offsets = [0, 0, 0], sizes = [16, 16, 16], strides = [1, 1, 1]} : vector<18x18x16xf32> to vector<16x16x16xf32>
    %9 = vector.extract_strided_slice %6 {offsets = [0, 0, 0], sizes = [1, 1, 16], strides = [1, 1, 1]} : vector<3x3x16xf32> to vector<1x1x16xf32>
    %10 = vector.shape_cast %9 : vector<1x1x16xf32> to vector<16xf32>
    %11 = vector.shape_cast %10 : vector<16xf32> to vector<1x1x16xf32>
    %12 = vector.broadcast %11 : vector<1x1x16xf32> to vector<16x16x16xf32>
    %13 = arith.mulf %8, %12 : vector<16x16x16xf32>
    %14 = arith.addf %7, %13 : vector<16x16x16xf32>
    %15 = vector.extract_strided_slice %5 {offsets = [0, 1, 0], sizes = [16, 16, 16], strides = [1, 1, 1]} : vector<18x18x16xf32> to vector<16x16x16xf32>
    %16 = vector.extract_strided_slice %6 {offsets = [0, 1, 0], sizes = [1, 1, 16], strides = [1, 1, 1]} : vector<3x3x16xf32> to vector<1x1x16xf32>
    %17 = vector.shape_cast %16 : vector<1x1x16xf32> to vector<16xf32>
    %18 = vector.shape_cast %17 : vector<16xf32> to vector<1x1x16xf32>
    %19 = vector.broadcast %18 : vector<1x1x16xf32> to vector<16x16x16xf32>
    %20 = arith.mulf %15, %19 : vector<16x16x16xf32>
    %21 = arith.addf %14, %20 : vector<16x16x16xf32>
    %22 = vector.extract_strided_slice %5 {offsets = [0, 2, 0], sizes = [16, 16, 16], strides = [1, 1, 1]} : vector<18x18x16xf32> to vector<16x16x16xf32>
    %23 = vector.extract_strided_slice %6 {offsets = [0, 2, 0], sizes = [1, 1, 16], strides = [1, 1, 1]} : vector<3x3x16xf32> to vector<1x1x16xf32>
    %24 = vector.shape_cast %23 : vector<1x1x16xf32> to vector<16xf32>
    %25 = vector.shape_cast %24 : vector<16xf32> to vector<1x1x16xf32>
    %26 = vector.broadcast %25 : vector<1x1x16xf32> to vector<16x16x16xf32>
    %27 = arith.mulf %22, %26 : vector<16x16x16xf32>
    %28 = arith.addf %21, %27 : vector<16x16x16xf32>
    %29 = vector.extract_strided_slice %5 {offsets = [1, 0, 0], sizes = [16, 16, 16], strides = [1, 1, 1]} : vector<18x18x16xf32> to vector<16x16x16xf32>
    %30 = vector.extract_strided_slice %6 {offsets = [1, 0, 0], sizes = [1, 1, 16], strides = [1, 1, 1]} : vector<3x3x16xf32> to vector<1x1x16xf32>
    %31 = vector.shape_cast %30 : vector<1x1x16xf32> to vector<16xf32>
    %32 = vector.shape_cast %31 : vector<16xf32> to vector<1x1x16xf32>
    %33 = vector.broadcast %32 : vector<1x1x16xf32> to vector<16x16x16xf32>
    %34 = arith.mulf %29, %33 : vector<16x16x16xf32>
    %35 = arith.addf %28, %34 : vector<16x16x16xf32>
    %36 = vector.extract_strided_slice %5 {offsets = [1, 1, 0], sizes = [16, 16, 16], strides = [1, 1, 1]} : vector<18x18x16xf32> to vector<16x16x16xf32>
    %37 = vector.extract_strided_slice %6 {offsets = [1, 1, 0], sizes = [1, 1, 16], strides = [1, 1, 1]} : vector<3x3x16xf32> to vector<1x1x16xf32>
    %38 = vector.shape_cast %37 : vector<1x1x16xf32> to vector<16xf32>
    %39 = vector.shape_cast %38 : vector<16xf32> to vector<1x1x16xf32>
    %40 = vector.broadcast %39 : vector<1x1x16xf32> to vector<16x16x16xf32>
    %41 = arith.mulf %36, %40 : vector<16x16x16xf32>
    %42 = arith.addf %35, %41 : vector<16x16x16xf32>
    %43 = vector.extract_strided_slice %5 {offsets = [1, 2, 0], sizes = [16, 16, 16], strides = [1, 1, 1]} : vector<18x18x16xf32> to vector<16x16x16xf32>
    %44 = vector.extract_strided_slice %6 {offsets = [1, 2, 0], sizes = [1, 1, 16], strides = [1, 1, 1]} : vector<3x3x16xf32> to vector<1x1x16xf32>
    %45 = vector.shape_cast %44 : vector<1x1x16xf32> to vector<16xf32>
    %46 = vector.shape_cast %45 : vector<16xf32> to vector<1x1x16xf32>
    %47 = vector.broadcast %46 : vector<1x1x16xf32> to vector<16x16x16xf32>
    %48 = arith.mulf %43, %47 : vector<16x16x16xf32>
    %49 = arith.addf %42, %48 : vector<16x16x16xf32>
    %50 = vector.extract_strided_slice %5 {offsets = [2, 0, 0], sizes = [16, 16, 16], strides = [1, 1, 1]} : vector<18x18x16xf32> to vector<16x16x16xf32>
    %51 = vector.extract_strided_slice %6 {offsets = [2, 0, 0], sizes = [1, 1, 16], strides = [1, 1, 1]} : vector<3x3x16xf32> to vector<1x1x16xf32>
    %52 = vector.shape_cast %51 : vector<1x1x16xf32> to vector<16xf32>
    %53 = vector.shape_cast %52 : vector<16xf32> to vector<1x1x16xf32>
    %54 = vector.broadcast %53 : vector<1x1x16xf32> to vector<16x16x16xf32>
    %55 = arith.mulf %50, %54 : vector<16x16x16xf32>
    %56 = arith.addf %49, %55 : vector<16x16x16xf32>
    %57 = vector.extract_strided_slice %5 {offsets = [2, 1, 0], sizes = [16, 16, 16], strides = [1, 1, 1]} : vector<18x18x16xf32> to vector<16x16x16xf32>
    %58 = vector.extract_strided_slice %6 {offsets = [2, 1, 0], sizes = [1, 1, 16], strides = [1, 1, 1]} : vector<3x3x16xf32> to vector<1x1x16xf32>
    %59 = vector.shape_cast %58 : vector<1x1x16xf32> to vector<16xf32>
    %60 = vector.shape_cast %59 : vector<16xf32> to vector<1x1x16xf32>
    %61 = vector.broadcast %60 : vector<1x1x16xf32> to vector<16x16x16xf32>
    %62 = arith.mulf %57, %61 : vector<16x16x16xf32>
    %63 = arith.addf %56, %62 : vector<16x16x16xf32>
    %64 = vector.extract_strided_slice %5 {offsets = [2, 2, 0], sizes = [16, 16, 16], strides = [1, 1, 1]} : vector<18x18x16xf32> to vector<16x16x16xf32>
    %65 = vector.extract_strided_slice %6 {offsets = [2, 2, 0], sizes = [1, 1, 16], strides = [1, 1, 1]} : vector<3x3x16xf32> to vector<1x1x16xf32>
    %66 = vector.shape_cast %65 : vector<1x1x16xf32> to vector<16xf32>
    %67 = vector.shape_cast %66 : vector<16xf32> to vector<1x1x16xf32>
    %68 = vector.broadcast %67 : vector<1x1x16xf32> to vector<16x16x16xf32>
    %69 = arith.mulf %64, %68 : vector<16x16x16xf32>
    %70 = arith.addf %63, %69 : vector<16x16x16xf32>
    %c0_15 = arith.constant 0 : index
    %c0_16 = arith.constant 0 : index
    %c0_17 = arith.constant 0 : index
    %c0_18 = arith.constant 0 : index
    %71 = vector.load %arg3[%c0_15, %c0_16, %c0_17, %c0_18] : memref<1x16x16x16xf32, #tpu.memory_space<vmem>>, vector<1x16x16x16xf32>
    %72 = vector.shape_cast %71 : vector<1x16x16x16xf32> to vector<16x16x16xf32>
    %73 = vector.shape_cast %70 : vector<16x16x16xf32> to vector<1x16x16x16xf32>
    tpu.vector_store %arg3[%c0_15, %c0_16, %c0_17, %c0_18], %73 {strides = array<i32>} : memref<1x16x16x16xf32, #tpu.memory_space<vmem>>, vector<1x16x16x16xf32>,
    return
  }
  func.func @transform_0(%arg0: i32) -> (i32, i32, i32, i32) {
    %c0_i32 = arith.constant 0 : i32
    %c0_i32_0 = arith.constant 0 : i32
    %c0_i32_1 = arith.constant 0 : i32
    %c0_i32_2 = arith.constant 0 : i32
    return %arg0, %c0_i32, %c0_i32_0, %c0_i32_1 : i32, i32, i32, i32
  }
  func.func @transform_1(%arg0: i32) -> (i32, i32, i32) {
    %c0_i32 = arith.constant 0 : i32
    %c0_i32_0 = arith.constant 0 : i32
    %c0_i32_1 = arith.constant 0 : i32
    %c0_i32_2 = arith.constant 0 : i32
    return %c0_i32, %c0_i32_0, %c0_i32_1 : i32, i32, i32
  }
  func.func @transform_2(%arg0: i32) -> (i32, i32, i32, i32) {
    %c0_i32 = arith.constant 0 : i32
    %c0_i32_0 = arith.constant 0 : i32
    %c0_i32_1 = arith.constant 0 : i32
    %c0_i32_2 = arith.constant 0 : i32
    return %arg0, %c0_i32, %c0_i32_0, %c0_i32_1 : i32, i32, i32, i32
  }
}

module attributes {stable_mosaic.version = 11 : i64} {
  func.func @_cnn_tail_kernel(%arg0: i32, %arg1: memref<512x16xf32, #tpu.memory_space<vmem>>, %arg2: memref<512x8xf32, #tpu.memory_space<vmem>>, %arg3: memref<512x64xf32, #tpu.memory_space<vmem>>, %arg4: memref<16x16xbf16, #tpu.memory_space<vmem>>, %arg5: memref<1x16xf32, #tpu.memory_space<vmem>>, %arg6: memref<8x16xbf16, #tpu.memory_space<vmem>>, %arg7: memref<1x16xf32, #tpu.memory_space<vmem>>, %arg8: memref<64x16xbf16, #tpu.memory_space<vmem>>, %arg9: memref<1x16xf32, #tpu.memory_space<vmem>>, %arg10: memref<512x16xf32, #tpu.memory_space<vmem>>) attributes {dimension_semantics = [#tpu.dimension_semantics<parallel>], iteration_bounds = array<i64: 1>, scalar_prefetch = 0 : i64, scratch_operands = 0 : i64, tpu.core_type = #tpu.core_type<tc>, window_params = [{transform_indices = @transform_0, window_bounds = array<i64: 512, 16>}, {transform_indices = @transform_1, window_bounds = array<i64: 512, 8>}, {transform_indices = @transform_2, window_bounds = array<i64: 512, 64>}, {pipeline_mode = #tpu.pipeline_mode<synchronous>, transform_indices = @transform_3, window_bounds = array<i64: 16, 16>}, {pipeline_mode = #tpu.pipeline_mode<synchronous>, transform_indices = @transform_4, window_bounds = array<i64: 1, 16>}, {pipeline_mode = #tpu.pipeline_mode<synchronous>, transform_indices = @transform_5, window_bounds = array<i64: 8, 16>}, {pipeline_mode = #tpu.pipeline_mode<synchronous>, transform_indices = @transform_6, window_bounds = array<i64: 1, 16>}, {pipeline_mode = #tpu.pipeline_mode<synchronous>, transform_indices = @transform_7, window_bounds = array<i64: 64, 16>}, {pipeline_mode = #tpu.pipeline_mode<synchronous>, transform_indices = @transform_8, window_bounds = array<i64: 1, 16>}, {transform_indices = @transform_9, window_bounds = array<i64: 512, 16>}]} {
    %c0 = arith.constant 0 : index
    %c0_0 = arith.constant 0 : index
    %0 = vector.load %arg1[%c0, %c0_0] : memref<512x16xf32, #tpu.memory_space<vmem>>, vector<512x16xf32>
    %1 = arith.truncf %0 : vector<512x16xf32> to vector<512x16xbf16>
    %c0_1 = arith.constant 0 : index
    %c0_2 = arith.constant 0 : index
    %2 = vector.load %arg4[%c0_1, %c0_2] : memref<16x16xbf16, #tpu.memory_space<vmem>>, vector<16x16xbf16>
    %cst = arith.constant dense<0.000000e+00> : vector<512x16xf32>
    %3 = tpu.matmul %1, %2, %cst {dimension_numbers = #tpu.dot_dimension_numbers<[1], [0], [0], [1], [0, 0, 1, 1], [], []>} : vector<512x16xbf16>, vector<16x16xbf16>, vector<512x16xf32> -> vector<512x16xf32>
    %c0_3 = arith.constant 0 : index
    %c0_4 = arith.constant 0 : index
    %4 = vector.load %arg5[%c0_3, %c0_4] : memref<1x16xf32, #tpu.memory_space<vmem>>, vector<1x16xf32>
    %5 = vector.broadcast %4 : vector<1x16xf32> to vector<512x16xf32>
    %6 = arith.addf %3, %5 : vector<512x16xf32>
    %c0_5 = arith.constant 0 : index
    %c0_6 = arith.constant 0 : index
    %7 = vector.load %arg2[%c0_5, %c0_6] : memref<512x8xf32, #tpu.memory_space<vmem>>, vector<512x8xf32>
    %8 = arith.truncf %7 : vector<512x8xf32> to vector<512x8xbf16>
    %c0_7 = arith.constant 0 : index
    %c0_8 = arith.constant 0 : index
    %9 = vector.load %arg6[%c0_7, %c0_8] : memref<8x16xbf16, #tpu.memory_space<vmem>>, vector<8x16xbf16>
    %cst_9 = arith.constant dense<0.000000e+00> : vector<512x16xf32>
    %10 = tpu.matmul %8, %9, %cst_9 {dimension_numbers = #tpu.dot_dimension_numbers<[1], [0], [0], [1], [0, 0, 1, 1], [], []>} : vector<512x8xbf16>, vector<8x16xbf16>, vector<512x16xf32> -> vector<512x16xf32>
    %11 = arith.addf %6, %10 : vector<512x16xf32>
    %c0_10 = arith.constant 0 : index
    %c0_11 = arith.constant 0 : index
    %12 = vector.load %arg7[%c0_10, %c0_11] : memref<1x16xf32, #tpu.memory_space<vmem>>, vector<1x16xf32>
    %13 = vector.broadcast %12 : vector<1x16xf32> to vector<512x16xf32>
    %14 = arith.addf %11, %13 : vector<512x16xf32>
    %cst_12 = arith.constant 0.000000e+00 : f32
    %15 = vector.broadcast %cst_12 : f32 to vector<512x16xf32>
    %16 = arith.maximumf %14, %15 : vector<512x16xf32>
    %c0_13 = arith.constant 0 : index
    %c0_14 = arith.constant 0 : index
    %17 = vector.load %arg3[%c0_13, %c0_14] : memref<512x64xf32, #tpu.memory_space<vmem>>, vector<512x64xf32>
    %18 = arith.truncf %17 : vector<512x64xf32> to vector<512x64xbf16>
    %c0_15 = arith.constant 0 : index
    %c0_16 = arith.constant 0 : index
    %19 = vector.load %arg8[%c0_15, %c0_16] : memref<64x16xbf16, #tpu.memory_space<vmem>>, vector<64x16xbf16>
    %cst_17 = arith.constant dense<0.000000e+00> : vector<512x16xf32>
    %20 = tpu.matmul %18, %19, %cst_17 {dimension_numbers = #tpu.dot_dimension_numbers<[1], [0], [0], [1], [0, 0, 1, 1], [], []>} : vector<512x64xbf16>, vector<64x16xbf16>, vector<512x16xf32> -> vector<512x16xf32>
    %21 = arith.addf %16, %20 : vector<512x16xf32>
    %c0_18 = arith.constant 0 : index
    %c0_19 = arith.constant 0 : index
    %22 = vector.load %arg9[%c0_18, %c0_19] : memref<1x16xf32, #tpu.memory_space<vmem>>, vector<1x16xf32>
    %23 = vector.broadcast %22 : vector<1x16xf32> to vector<512x16xf32>
    %24 = arith.addf %21, %23 : vector<512x16xf32>
    %c0_20 = arith.constant 0 : index
    %c0_21 = arith.constant 0 : index
    %25 = vector.load %arg10[%c0_20, %c0_21] : memref<512x16xf32, #tpu.memory_space<vmem>>, vector<512x16xf32>
    tpu.vector_store %arg10[%c0_20, %c0_21], %24 {strides = array<i32>} : memref<512x16xf32, #tpu.memory_space<vmem>>, vector<512x16xf32>,
    return
  }
  func.func @transform_0(%arg0: i32) -> (i32, i32) {
    %c0_i32 = arith.constant 0 : i32
    %c0_i32_0 = arith.constant 0 : i32
    return %arg0, %c0_i32 : i32, i32
  }
  func.func @transform_1(%arg0: i32) -> (i32, i32) {
    %c0_i32 = arith.constant 0 : i32
    %c0_i32_0 = arith.constant 0 : i32
    return %arg0, %c0_i32 : i32, i32
  }
  func.func @transform_2(%arg0: i32) -> (i32, i32) {
    %c0_i32 = arith.constant 0 : i32
    %c0_i32_0 = arith.constant 0 : i32
    return %arg0, %c0_i32 : i32, i32
  }
  func.func @transform_3(%arg0: i32) -> (i32, i32) {
    %c0_i32 = arith.constant 0 : i32
    %c0_i32_0 = arith.constant 0 : i32
    %c0_i32_1 = arith.constant 0 : i32
    return %c0_i32, %c0_i32_0 : i32, i32
  }
  func.func @transform_4(%arg0: i32) -> (i32, i32) {
    %c0_i32 = arith.constant 0 : i32
    %c0_i32_0 = arith.constant 0 : i32
    %c0_i32_1 = arith.constant 0 : i32
    return %c0_i32, %c0_i32_0 : i32, i32
  }
  func.func @transform_5(%arg0: i32) -> (i32, i32) {
    %c0_i32 = arith.constant 0 : i32
    %c0_i32_0 = arith.constant 0 : i32
    %c0_i32_1 = arith.constant 0 : i32
    return %c0_i32, %c0_i32_0 : i32, i32
  }
  func.func @transform_6(%arg0: i32) -> (i32, i32) {
    %c0_i32 = arith.constant 0 : i32
    %c0_i32_0 = arith.constant 0 : i32
    %c0_i32_1 = arith.constant 0 : i32
    return %c0_i32, %c0_i32_0 : i32, i32
  }
  func.func @transform_7(%arg0: i32) -> (i32, i32) {
    %c0_i32 = arith.constant 0 : i32
    %c0_i32_0 = arith.constant 0 : i32
    %c0_i32_1 = arith.constant 0 : i32
    return %c0_i32, %c0_i32_0 : i32, i32
  }
  func.func @transform_8(%arg0: i32) -> (i32, i32) {
    %c0_i32 = arith.constant 0 : i32
    %c0_i32_0 = arith.constant 0 : i32
    %c0_i32_1 = arith.constant 0 : i32
    return %c0_i32, %c0_i32_0 : i32, i32
  }
  func.func @transform_9(%arg0: i32) -> (i32, i32) {
    %c0_i32 = arith.constant 0 : i32
    %c0_i32_0 = arith.constant 0 : i32
    return %arg0, %c0_i32 : i32, i32
  }
}

module attributes {stable_mosaic.version = 11 : i64} {
  func.func @_mm_ln_gelu_kernel(%arg0: i32, %arg1: memref<32x16xf32, #tpu.memory_space<vmem>>, %arg2: memref<16x32xbf16, #tpu.memory_space<vmem>>, %arg3: memref<1x32xf32, #tpu.memory_space<vmem>>, %arg4: memref<1x32xf32, #tpu.memory_space<vmem>>, %arg5: memref<1x32xf32, #tpu.memory_space<vmem>>, %arg6: memref<32x32xf32, #tpu.memory_space<vmem>>) attributes {dimension_semantics = [#tpu.dimension_semantics<parallel>], iteration_bounds = array<i64: 1>, scalar_prefetch = 0 : i64, scratch_operands = 0 : i64, tpu.core_type = #tpu.core_type<tc>, window_params = [{transform_indices = @transform_0, window_bounds = array<i64: 32, 16>}, {pipeline_mode = #tpu.pipeline_mode<synchronous>, transform_indices = @transform_1, window_bounds = array<i64: 16, 32>}, {pipeline_mode = #tpu.pipeline_mode<synchronous>, transform_indices = @transform_2, window_bounds = array<i64: 1, 32>}, {pipeline_mode = #tpu.pipeline_mode<synchronous>, transform_indices = @transform_3, window_bounds = array<i64: 1, 32>}, {pipeline_mode = #tpu.pipeline_mode<synchronous>, transform_indices = @transform_4, window_bounds = array<i64: 1, 32>}, {transform_indices = @transform_5, window_bounds = array<i64: 32, 32>}]} {
    %c0 = arith.constant 0 : index
    %c0_0 = arith.constant 0 : index
    %0 = vector.load %arg1[%c0, %c0_0] : memref<32x16xf32, #tpu.memory_space<vmem>>, vector<32x16xf32>
    %1 = arith.truncf %0 : vector<32x16xf32> to vector<32x16xbf16>
    %c0_1 = arith.constant 0 : index
    %c0_2 = arith.constant 0 : index
    %2 = vector.load %arg2[%c0_1, %c0_2] : memref<16x32xbf16, #tpu.memory_space<vmem>>, vector<16x32xbf16>
    %cst = arith.constant dense<0.000000e+00> : vector<32x32xf32>
    %3 = tpu.matmul %1, %2, %cst {dimension_numbers = #tpu.dot_dimension_numbers<[1], [0], [0], [1], [0, 0, 1, 1], [], []>} : vector<32x16xbf16>, vector<16x32xbf16>, vector<32x32xf32> -> vector<32x32xf32>
    %c0_3 = arith.constant 0 : index
    %c0_4 = arith.constant 0 : index
    %4 = vector.load %arg3[%c0_3, %c0_4] : memref<1x32xf32, #tpu.memory_space<vmem>>, vector<1x32xf32>
    %5 = vector.broadcast %4 : vector<1x32xf32> to vector<32x32xf32>
    %6 = arith.addf %3, %5 : vector<32x32xf32>
    %c0_5 = arith.constant 0 : index
    %c0_6 = arith.constant 0 : index
    %7 = vector.load %arg4[%c0_5, %c0_6] : memref<1x32xf32, #tpu.memory_space<vmem>>, vector<1x32xf32>
    %c0_7 = arith.constant 0 : index
    %c0_8 = arith.constant 0 : index
    %8 = vector.load %arg5[%c0_7, %c0_8] : memref<1x32xf32, #tpu.memory_space<vmem>>, vector<1x32xf32>
    %cst_9 = arith.constant dense<0.000000e+00> : vector<32xf32>
    %9 = vector.multi_reduction <add>, %6, %cst_9 [1] : vector<32x32xf32> to vector<32xf32>
    %10 = vector.shape_cast %9 : vector<32xf32> to vector<32x1xf32>
    %cst_10 = arith.constant 3.200000e+01 : f32
    %11 = vector.broadcast %cst_10 : f32 to vector<32x1xf32>
    %12 = arith.divf %10, %11 : vector<32x1xf32>
    %13 = vector.broadcast %12 : vector<32x1xf32> to vector<32x32xf32>
    %14 = arith.subf %6, %13 : vector<32x32xf32>
    %15 = arith.mulf %14, %14 : vector<32x32xf32>
    %cst_11 = arith.constant dense<0.000000e+00> : vector<32xf32>
    %16 = vector.multi_reduction <add>, %15, %cst_11 [1] : vector<32x32xf32> to vector<32xf32>
    %17 = vector.shape_cast %16 : vector<32xf32> to vector<32x1xf32>
    %cst_12 = arith.constant 3.200000e+01 : f32
    %18 = vector.broadcast %cst_12 : f32 to vector<32x1xf32>
    %19 = arith.divf %17, %18 : vector<32x1xf32>
    %cst_13 = arith.constant 9.99999997E-7 : f32
    %20 = vector.broadcast %cst_13 : f32 to vector<32x1xf32>
    %21 = arith.addf %19, %20 : vector<32x1xf32>
    %22 = math.rsqrt %21 : vector<32x1xf32>
    %23 = vector.broadcast %22 : vector<32x1xf32> to vector<32x32xf32>
    %24 = arith.mulf %14, %23 : vector<32x32xf32>
    %25 = vector.broadcast %7 : vector<1x32xf32> to vector<32x32xf32>
    %26 = arith.mulf %24, %25 : vector<32x32xf32>
    %27 = vector.broadcast %8 : vector<1x32xf32> to vector<32x32xf32>
    %28 = arith.addf %26, %27 : vector<32x32xf32>
    %cst_14 = arith.constant 5.000000e-01 : f32
    %29 = vector.broadcast %cst_14 : f32 to vector<32x32xf32>
    %30 = arith.mulf %29, %28 : vector<32x32xf32>
    %cst_15 = arith.constant 0.707106769 : f32
    %31 = vector.broadcast %cst_15 : f32 to vector<32x32xf32>
    %32 = arith.mulf %28, %31 : vector<32x32xf32>
    %33 = math.erf %32 : vector<32x32xf32>
    %cst_16 = arith.constant 1.000000e+00 : f32
    %34 = vector.broadcast %cst_16 : f32 to vector<32x32xf32>
    %35 = arith.addf %34, %33 : vector<32x32xf32>
    %36 = arith.mulf %30, %35 : vector<32x32xf32>
    %c0_17 = arith.constant 0 : index
    %c0_18 = arith.constant 0 : index
    %37 = vector.load %arg6[%c0_17, %c0_18] : memref<32x32xf32, #tpu.memory_space<vmem>>, vector<32x32xf32>
    tpu.vector_store %arg6[%c0_17, %c0_18], %36 {strides = array<i32>} : memref<32x32xf32, #tpu.memory_space<vmem>>, vector<32x32xf32>,
    return
  }
  func.func @transform_0(%arg0: i32) -> (i32, i32) {
    %c0_i32 = arith.constant 0 : i32
    %c0_i32_0 = arith.constant 0 : i32
    return %arg0, %c0_i32 : i32, i32
  }
  func.func @transform_1(%arg0: i32) -> (i32, i32) {
    %c0_i32 = arith.constant 0 : i32
    %c0_i32_0 = arith.constant 0 : i32
    %c0_i32_1 = arith.constant 0 : i32
    return %c0_i32, %c0_i32_0 : i32, i32
  }
  func.func @transform_2(%arg0: i32) -> (i32, i32) {
    %c0_i32 = arith.constant 0 : i32
    %c0_i32_0 = arith.constant 0 : i32
    %c0_i32_1 = arith.constant 0 : i32
    return %c0_i32, %c0_i32_0 : i32, i32
  }
  func.func @transform_3(%arg0: i32) -> (i32, i32) {
    %c0_i32 = arith.constant 0 : i32
    %c0_i32_0 = arith.constant 0 : i32
    %c0_i32_1 = arith.constant 0 : i32
    return %c0_i32, %c0_i32_0 : i32, i32
  }
  func.func @transform_4(%arg0: i32) -> (i32, i32) {
    %c0_i32 = arith.constant 0 : i32
    %c0_i32_0 = arith.constant 0 : i32
    %c0_i32_1 = arith.constant 0 : i32
    return %c0_i32, %c0_i32_0 : i32, i32
  }
  func.func @transform_5(%arg0: i32) -> (i32, i32) {
    %c0_i32 = arith.constant 0 : i32
    %c0_i32_0 = arith.constant 0 : i32
    return %arg0, %c0_i32 : i32, i32
  }
}

module attributes {stable_mosaic.version = 11 : i64} {
  func.func @_trans_kernel(%arg0: i32, %arg1: memref<1x17x32xf32, #tpu.memory_space<vmem>>, %arg2: memref<1x17x32xf32, #tpu.memory_space<vmem>>, %arg3: memref<1x17x32xf32, #tpu.memory_space<vmem>>, %arg4: memref<32x64xbf16, #tpu.memory_space<vmem>>, %arg5: memref<32x32xbf16, #tpu.memory_space<vmem>>, %arg6: memref<1x32xf32, #tpu.memory_space<vmem>>, %arg7: memref<1x32xf32, #tpu.memory_space<vmem>>, %arg8: memref<1x32xf32, #tpu.memory_space<vmem>>, %arg9: memref<1x32xf32, #tpu.memory_space<vmem>>, %arg10: memref<1x32xf32, #tpu.memory_space<vmem>>, %arg11: memref<32x128xbf16, #tpu.memory_space<vmem>>, %arg12: memref<1x128xf32, #tpu.memory_space<vmem>>, %arg13: memref<128x32xbf16, #tpu.memory_space<vmem>>, %arg14: memref<1x32xf32, #tpu.memory_space<vmem>>, %arg15: memref<1x17x32xf32, #tpu.memory_space<vmem>>) attributes {dimension_semantics = [#tpu.dimension_semantics<parallel>], iteration_bounds = array<i64: 4>, scalar_prefetch = 0 : i64, scratch_operands = 0 : i64, tpu.core_type = #tpu.core_type<tc>, window_params = [{transform_indices = @transform_0, window_bounds = array<i64: 1, 17, 32>}, {transform_indices = @transform_1, window_bounds = array<i64: 1, 17, 32>}, {transform_indices = @transform_2, window_bounds = array<i64: 1, 17, 32>}, {pipeline_mode = #tpu.pipeline_mode<synchronous>, transform_indices = @transform_3, window_bounds = array<i64: 32, 64>}, {pipeline_mode = #tpu.pipeline_mode<synchronous>, transform_indices = @transform_4, window_bounds = array<i64: 32, 32>}, {pipeline_mode = #tpu.pipeline_mode<synchronous>, transform_indices = @transform_5, window_bounds = array<i64: 1, 32>}, {pipeline_mode = #tpu.pipeline_mode<synchronous>, transform_indices = @transform_6, window_bounds = array<i64: 1, 32>}, {pipeline_mode = #tpu.pipeline_mode<synchronous>, transform_indices = @transform_7, window_bounds = array<i64: 1, 32>}, {pipeline_mode = #tpu.pipeline_mode<synchronous>, transform_indices = @transform_8, window_bounds = array<i64: 1, 32>}, {pipeline_mode = #tpu.pipeline_mode<synchronous>, transform_indices = @transform_9, window_bounds = array<i64: 1, 32>}, {pipeline_mode = #tpu.pipeline_mode<synchronous>, transform_indices = @transform_10, window_bounds = array<i64: 32, 128>}, {pipeline_mode = #tpu.pipeline_mode<synchronous>, transform_indices = @transform_11, window_bounds = array<i64: 1, 128>}, {pipeline_mode = #tpu.pipeline_mode<synchronous>, transform_indices = @transform_12, window_bounds = array<i64: 128, 32>}, {pipeline_mode = #tpu.pipeline_mode<synchronous>, transform_indices = @transform_13, window_bounds = array<i64: 1, 32>}, {transform_indices = @transform_14, window_bounds = array<i64: 1, 17, 32>}]} {
    %c0 = arith.constant 0 : index
    %c0_0 = arith.constant 0 : index
    %c0_1 = arith.constant 0 : index
    %0 = vector.load %arg1[%c0, %c0_0, %c0_1] : memref<1x17x32xf32, #tpu.memory_space<vmem>>, vector<1x17x32xf32>
    %1 = vector.shape_cast %0 : vector<1x17x32xf32> to vector<17x32xf32>
    %c0_2 = arith.constant 0 : index
    %c0_3 = arith.constant 0 : index
    %c0_4 = arith.constant 0 : index
    %2 = vector.load %arg2[%c0_2, %c0_3, %c0_4] : memref<1x17x32xf32, #tpu.memory_space<vmem>>, vector<1x17x32xf32>
    %3 = vector.shape_cast %2 : vector<1x17x32xf32> to vector<17x32xf32>
    %4 = arith.addf %1, %3 : vector<17x32xf32>
    %c0_5 = arith.constant 0 : index
    %c0_6 = arith.constant 0 : index
    %5 = vector.load %arg7[%c0_5, %c0_6] : memref<1x32xf32, #tpu.memory_space<vmem>>, vector<1x32xf32>
    %c0_7 = arith.constant 0 : index
    %c0_8 = arith.constant 0 : index
    %6 = vector.load %arg8[%c0_7, %c0_8] : memref<1x32xf32, #tpu.memory_space<vmem>>, vector<1x32xf32>
    %cst = arith.constant dense<0.000000e+00> : vector<17xf32>
    %7 = vector.multi_reduction <add>, %4, %cst [1] : vector<17x32xf32> to vector<17xf32>
    %8 = vector.shape_cast %7 : vector<17xf32> to vector<17x1xf32>
    %cst_9 = arith.constant 3.200000e+01 : f32
    %9 = vector.broadcast %cst_9 : f32 to vector<17x1xf32>
    %10 = arith.divf %8, %9 : vector<17x1xf32>
    %11 = vector.broadcast %10 : vector<17x1xf32> to vector<17x32xf32>
    %12 = arith.subf %4, %11 : vector<17x32xf32>
    %13 = arith.mulf %12, %12 : vector<17x32xf32>
    %cst_10 = arith.constant dense<0.000000e+00> : vector<17xf32>
    %14 = vector.multi_reduction <add>, %13, %cst_10 [1] : vector<17x32xf32> to vector<17xf32>
    %15 = vector.shape_cast %14 : vector<17xf32> to vector<17x1xf32>
    %cst_11 = arith.constant 3.200000e+01 : f32
    %16 = vector.broadcast %cst_11 : f32 to vector<17x1xf32>
    %17 = arith.divf %15, %16 : vector<17x1xf32>
    %cst_12 = arith.constant 9.99999974E-6 : f32
    %18 = vector.broadcast %cst_12 : f32 to vector<17x1xf32>
    %19 = arith.addf %17, %18 : vector<17x1xf32>
    %20 = math.rsqrt %19 : vector<17x1xf32>
    %21 = vector.broadcast %20 : vector<17x1xf32> to vector<17x32xf32>
    %22 = arith.mulf %12, %21 : vector<17x32xf32>
    %23 = vector.broadcast %5 : vector<1x32xf32> to vector<17x32xf32>
    %24 = arith.mulf %22, %23 : vector<17x32xf32>
    %25 = vector.broadcast %6 : vector<1x32xf32> to vector<17x32xf32>
    %26 = arith.addf %24, %25 : vector<17x32xf32>
    %27 = arith.truncf %26 : vector<17x32xf32> to vector<17x32xbf16>
    %c0_13 = arith.constant 0 : index
    %c0_14 = arith.constant 0 : index
    %28 = vector.load %arg4[%c0_13, %c0_14] : memref<32x64xbf16, #tpu.memory_space<vmem>>, vector<32x64xbf16>
    %cst_15 = arith.constant dense<0.000000e+00> : vector<17x64xf32>
    %29 = tpu.matmul %27, %28, %cst_15 {dimension_numbers = #tpu.dot_dimension_numbers<[1], [0], [0], [1], [0, 0, 1, 1], [], []>} : vector<17x32xbf16>, vector<32x64xbf16>, vector<17x64xf32> -> vector<17x64xf32>
    %c0_16 = arith.constant 0 : index
    %c0_17 = arith.constant 0 : index
    %c0_18 = arith.constant 0 : index
    %30 = vector.load %arg3[%c0_16, %c0_17, %c0_18] : memref<1x17x32xf32, #tpu.memory_space<vmem>>, vector<1x17x32xf32>
    %31 = vector.shape_cast %30 : vector<1x17x32xf32> to vector<17x32xf32>
    %c0_19 = arith.constant 0 : index
    %c0_20 = arith.constant 0 : index
    %32 = vector.load %arg6[%c0_19, %c0_20] : memref<1x32xf32, #tpu.memory_space<vmem>>, vector<1x32xf32>
    %33 = vector.broadcast %32 : vector<1x32xf32> to vector<17x32xf32>
    %34 = arith.addf %4, %33 : vector<17x32xf32>
    %35 = vector.extract_strided_slice %31 {offsets = [0, 0], sizes = [17, 8], strides = [1, 1]} : vector<17x32xf32> to vector<17x8xf32>
    %36 = arith.truncf %35 : vector<17x8xf32> to vector<17x8xbf16>
    %37 = vector.extract_strided_slice %29 {offsets = [0, 0], sizes = [17, 8], strides = [1, 1]} : vector<17x64xf32> to vector<17x8xf32>
    %38 = arith.truncf %37 : vector<17x8xf32> to vector<17x8xbf16>
    %39 = vector.extract_strided_slice %29 {offsets = [0, 32], sizes = [17, 8], strides = [1, 1]} : vector<17x64xf32> to vector<17x8xf32>
    %40 = arith.truncf %39 : vector<17x8xf32> to vector<17x8xbf16>
    %cst_21 = arith.constant dense<0.000000e+00> : vector<17x17xf32>
    %41 = tpu.matmul %36, %38, %cst_21 {dimension_numbers = #tpu.dot_dimension_numbers<[1], [1], [0], [0], [0, 0, 1, 0], [], []>} : vector<17x8xbf16>, vector<17x8xbf16>, vector<17x17xf32> -> vector<17x17xf32>
    %cst_22 = arith.constant 0.353553385 : f32
    %42 = vector.broadcast %cst_22 : f32 to vector<17x17xf32>
    %43 = arith.mulf %41, %42 : vector<17x17xf32>
    %cst_23 = arith.constant dense<0xFF800000> : vector<17xf32>
    %44 = vector.multi_reduction <maximumf>, %43, %cst_23 [1] : vector<17x17xf32> to vector<17xf32>
    %45 = vector.shape_cast %44 : vector<17xf32> to vector<17x1xf32>
    %46 = vector.broadcast %45 : vector<17x1xf32> to vector<17x17xf32>
    %47 = arith.subf %43, %46 : vector<17x17xf32>
    %48 = math.exp %47 : vector<17x17xf32>
    %cst_24 = arith.constant dense<0.000000e+00> : vector<17xf32>
    %49 = vector.multi_reduction <add>, %48, %cst_24 [1] : vector<17x17xf32> to vector<17xf32>
    %50 = vector.shape_cast %49 : vector<17xf32> to vector<17x1xf32>
    %51 = tpu.reciprocal %50 {approx = true} : vector<17x1xf32> -> vector<17x1xf32>
    %52 = vector.broadcast %51 : vector<17x1xf32> to vector<17x17xf32>
    %53 = arith.mulf %48, %52 : vector<17x17xf32>
    %54 = arith.truncf %53 : vector<17x17xf32> to vector<17x17xbf16>
    %cst_25 = arith.constant dense<0.000000e+00> : vector<17x8xf32>
    %55 = tpu.matmul %54, %40, %cst_25 {dimension_numbers = #tpu.dot_dimension_numbers<[1], [0], [0], [1], [0, 0, 1, 1], [], []>} : vector<17x17xbf16>, vector<17x8xbf16>, vector<17x8xf32> -> vector<17x8xf32>
    %56 = arith.truncf %55 : vector<17x8xf32> to vector<17x8xbf16>
    %c0_26 = arith.constant 0 : index
    %c0_27 = arith.constant 0 : index
    %57 = vector.load %arg5[%c0_26, %c0_27] : memref<32x32xbf16, #tpu.memory_space<vmem>>, vector<8x32xbf16>
    %cst_28 = arith.constant dense<0.000000e+00> : vector<17x32xf32>
    %58 = tpu.matmul %56, %57, %cst_28 {dimension_numbers = #tpu.dot_dimension_numbers<[1], [0], [0], [1], [0, 0, 1, 1], [], []>} : vector<17x8xbf16>, vector<8x32xbf16>, vector<17x32xf32> -> vector<17x32xf32>
    %59 = arith.addf %34, %58 : vector<17x32xf32>
    %60 = vector.extract_strided_slice %31 {offsets = [0, 8], sizes = [17, 8], strides = [1, 1]} : vector<17x32xf32> to vector<17x8xf32>
    %61 = arith.truncf %60 : vector<17x8xf32> to vector<17x8xbf16>
    %62 = vector.extract_strided_slice %29 {offsets = [0, 8], sizes = [17, 8], strides = [1, 1]} : vector<17x64xf32> to vector<17x8xf32>
    %63 = arith.truncf %62 : vector<17x8xf32> to vector<17x8xbf16>
    %64 = vector.extract_strided_slice %29 {offsets = [0, 40], sizes = [17, 8], strides = [1, 1]} : vector<17x64xf32> to vector<17x8xf32>
    %65 = arith.truncf %64 : vector<17x8xf32> to vector<17x8xbf16>
    %cst_29 = arith.constant dense<0.000000e+00> : vector<17x17xf32>
    %66 = tpu.matmul %61, %63, %cst_29 {dimension_numbers = #tpu.dot_dimension_numbers<[1], [1], [0], [0], [0, 0, 1, 0], [], []>} : vector<17x8xbf16>, vector<17x8xbf16>, vector<17x17xf32> -> vector<17x17xf32>
    %cst_30 = arith.constant 0.353553385 : f32
    %67 = vector.broadcast %cst_30 : f32 to vector<17x17xf32>
    %68 = arith.mulf %66, %67 : vector<17x17xf32>
    %cst_31 = arith.constant dense<0xFF800000> : vector<17xf32>
    %69 = vector.multi_reduction <maximumf>, %68, %cst_31 [1] : vector<17x17xf32> to vector<17xf32>
    %70 = vector.shape_cast %69 : vector<17xf32> to vector<17x1xf32>
    %71 = vector.broadcast %70 : vector<17x1xf32> to vector<17x17xf32>
    %72 = arith.subf %68, %71 : vector<17x17xf32>
    %73 = math.exp %72 : vector<17x17xf32>
    %cst_32 = arith.constant dense<0.000000e+00> : vector<17xf32>
    %74 = vector.multi_reduction <add>, %73, %cst_32 [1] : vector<17x17xf32> to vector<17xf32>
    %75 = vector.shape_cast %74 : vector<17xf32> to vector<17x1xf32>
    %76 = tpu.reciprocal %75 {approx = true} : vector<17x1xf32> -> vector<17x1xf32>
    %77 = vector.broadcast %76 : vector<17x1xf32> to vector<17x17xf32>
    %78 = arith.mulf %73, %77 : vector<17x17xf32>
    %79 = arith.truncf %78 : vector<17x17xf32> to vector<17x17xbf16>
    %cst_33 = arith.constant dense<0.000000e+00> : vector<17x8xf32>
    %80 = tpu.matmul %79, %65, %cst_33 {dimension_numbers = #tpu.dot_dimension_numbers<[1], [0], [0], [1], [0, 0, 1, 1], [], []>} : vector<17x17xbf16>, vector<17x8xbf16>, vector<17x8xf32> -> vector<17x8xf32>
    %81 = arith.truncf %80 : vector<17x8xf32> to vector<17x8xbf16>
    %c8 = arith.constant 8 : index
    %c0_34 = arith.constant 0 : index
    %82 = vector.load %arg5[%c8, %c0_34] : memref<32x32xbf16, #tpu.memory_space<vmem>>, vector<8x32xbf16>
    %cst_35 = arith.constant dense<0.000000e+00> : vector<17x32xf32>
    %83 = tpu.matmul %81, %82, %cst_35 {dimension_numbers = #tpu.dot_dimension_numbers<[1], [0], [0], [1], [0, 0, 1, 1], [], []>} : vector<17x8xbf16>, vector<8x32xbf16>, vector<17x32xf32> -> vector<17x32xf32>
    %84 = arith.addf %59, %83 : vector<17x32xf32>
    %85 = vector.extract_strided_slice %31 {offsets = [0, 16], sizes = [17, 8], strides = [1, 1]} : vector<17x32xf32> to vector<17x8xf32>
    %86 = arith.truncf %85 : vector<17x8xf32> to vector<17x8xbf16>
    %87 = vector.extract_strided_slice %29 {offsets = [0, 16], sizes = [17, 8], strides = [1, 1]} : vector<17x64xf32> to vector<17x8xf32>
    %88 = arith.truncf %87 : vector<17x8xf32> to vector<17x8xbf16>
    %89 = vector.extract_strided_slice %29 {offsets = [0, 48], sizes = [17, 8], strides = [1, 1]} : vector<17x64xf32> to vector<17x8xf32>
    %90 = arith.truncf %89 : vector<17x8xf32> to vector<17x8xbf16>
    %cst_36 = arith.constant dense<0.000000e+00> : vector<17x17xf32>
    %91 = tpu.matmul %86, %88, %cst_36 {dimension_numbers = #tpu.dot_dimension_numbers<[1], [1], [0], [0], [0, 0, 1, 0], [], []>} : vector<17x8xbf16>, vector<17x8xbf16>, vector<17x17xf32> -> vector<17x17xf32>
    %cst_37 = arith.constant 0.353553385 : f32
    %92 = vector.broadcast %cst_37 : f32 to vector<17x17xf32>
    %93 = arith.mulf %91, %92 : vector<17x17xf32>
    %cst_38 = arith.constant dense<0xFF800000> : vector<17xf32>
    %94 = vector.multi_reduction <maximumf>, %93, %cst_38 [1] : vector<17x17xf32> to vector<17xf32>
    %95 = vector.shape_cast %94 : vector<17xf32> to vector<17x1xf32>
    %96 = vector.broadcast %95 : vector<17x1xf32> to vector<17x17xf32>
    %97 = arith.subf %93, %96 : vector<17x17xf32>
    %98 = math.exp %97 : vector<17x17xf32>
    %cst_39 = arith.constant dense<0.000000e+00> : vector<17xf32>
    %99 = vector.multi_reduction <add>, %98, %cst_39 [1] : vector<17x17xf32> to vector<17xf32>
    %100 = vector.shape_cast %99 : vector<17xf32> to vector<17x1xf32>
    %101 = tpu.reciprocal %100 {approx = true} : vector<17x1xf32> -> vector<17x1xf32>
    %102 = vector.broadcast %101 : vector<17x1xf32> to vector<17x17xf32>
    %103 = arith.mulf %98, %102 : vector<17x17xf32>
    %104 = arith.truncf %103 : vector<17x17xf32> to vector<17x17xbf16>
    %cst_40 = arith.constant dense<0.000000e+00> : vector<17x8xf32>
    %105 = tpu.matmul %104, %90, %cst_40 {dimension_numbers = #tpu.dot_dimension_numbers<[1], [0], [0], [1], [0, 0, 1, 1], [], []>} : vector<17x17xbf16>, vector<17x8xbf16>, vector<17x8xf32> -> vector<17x8xf32>
    %106 = arith.truncf %105 : vector<17x8xf32> to vector<17x8xbf16>
    %c16 = arith.constant 16 : index
    %c0_41 = arith.constant 0 : index
    %107 = vector.load %arg5[%c16, %c0_41] : memref<32x32xbf16, #tpu.memory_space<vmem>>, vector<8x32xbf16>
    %cst_42 = arith.constant dense<0.000000e+00> : vector<17x32xf32>
    %108 = tpu.matmul %106, %107, %cst_42 {dimension_numbers = #tpu.dot_dimension_numbers<[1], [0], [0], [1], [0, 0, 1, 1], [], []>} : vector<17x8xbf16>, vector<8x32xbf16>, vector<17x32xf32> -> vector<17x32xf32>
    %109 = arith.addf %84, %108 : vector<17x32xf32>
    %110 = vector.extract_strided_slice %31 {offsets = [0, 24], sizes = [17, 8], strides = [1, 1]} : vector<17x32xf32> to vector<17x8xf32>
    %111 = arith.truncf %110 : vector<17x8xf32> to vector<17x8xbf16>
    %112 = vector.extract_strided_slice %29 {offsets = [0, 24], sizes = [17, 8], strides = [1, 1]} : vector<17x64xf32> to vector<17x8xf32>
    %113 = arith.truncf %112 : vector<17x8xf32> to vector<17x8xbf16>
    %114 = vector.extract_strided_slice %29 {offsets = [0, 56], sizes = [17, 8], strides = [1, 1]} : vector<17x64xf32> to vector<17x8xf32>
    %115 = arith.truncf %114 : vector<17x8xf32> to vector<17x8xbf16>
    %cst_43 = arith.constant dense<0.000000e+00> : vector<17x17xf32>
    %116 = tpu.matmul %111, %113, %cst_43 {dimension_numbers = #tpu.dot_dimension_numbers<[1], [1], [0], [0], [0, 0, 1, 0], [], []>} : vector<17x8xbf16>, vector<17x8xbf16>, vector<17x17xf32> -> vector<17x17xf32>
    %cst_44 = arith.constant 0.353553385 : f32
    %117 = vector.broadcast %cst_44 : f32 to vector<17x17xf32>
    %118 = arith.mulf %116, %117 : vector<17x17xf32>
    %cst_45 = arith.constant dense<0xFF800000> : vector<17xf32>
    %119 = vector.multi_reduction <maximumf>, %118, %cst_45 [1] : vector<17x17xf32> to vector<17xf32>
    %120 = vector.shape_cast %119 : vector<17xf32> to vector<17x1xf32>
    %121 = vector.broadcast %120 : vector<17x1xf32> to vector<17x17xf32>
    %122 = arith.subf %118, %121 : vector<17x17xf32>
    %123 = math.exp %122 : vector<17x17xf32>
    %cst_46 = arith.constant dense<0.000000e+00> : vector<17xf32>
    %124 = vector.multi_reduction <add>, %123, %cst_46 [1] : vector<17x17xf32> to vector<17xf32>
    %125 = vector.shape_cast %124 : vector<17xf32> to vector<17x1xf32>
    %126 = tpu.reciprocal %125 {approx = true} : vector<17x1xf32> -> vector<17x1xf32>
    %127 = vector.broadcast %126 : vector<17x1xf32> to vector<17x17xf32>
    %128 = arith.mulf %123, %127 : vector<17x17xf32>
    %129 = arith.truncf %128 : vector<17x17xf32> to vector<17x17xbf16>
    %cst_47 = arith.constant dense<0.000000e+00> : vector<17x8xf32>
    %130 = tpu.matmul %129, %115, %cst_47 {dimension_numbers = #tpu.dot_dimension_numbers<[1], [0], [0], [1], [0, 0, 1, 1], [], []>} : vector<17x17xbf16>, vector<17x8xbf16>, vector<17x8xf32> -> vector<17x8xf32>
    %131 = arith.truncf %130 : vector<17x8xf32> to vector<17x8xbf16>
    %c24 = arith.constant 24 : index
    %c0_48 = arith.constant 0 : index
    %132 = vector.load %arg5[%c24, %c0_48] : memref<32x32xbf16, #tpu.memory_space<vmem>>, vector<8x32xbf16>
    %cst_49 = arith.constant dense<0.000000e+00> : vector<17x32xf32>
    %133 = tpu.matmul %131, %132, %cst_49 {dimension_numbers = #tpu.dot_dimension_numbers<[1], [0], [0], [1], [0, 0, 1, 1], [], []>} : vector<17x8xbf16>, vector<8x32xbf16>, vector<17x32xf32> -> vector<17x32xf32>
    %134 = arith.addf %109, %133 : vector<17x32xf32>
    %c0_50 = arith.constant 0 : index
    %c0_51 = arith.constant 0 : index
    %135 = vector.load %arg9[%c0_50, %c0_51] : memref<1x32xf32, #tpu.memory_space<vmem>>, vector<1x32xf32>
    %c0_52 = arith.constant 0 : index
    %c0_53 = arith.constant 0 : index
    %136 = vector.load %arg10[%c0_52, %c0_53] : memref<1x32xf32, #tpu.memory_space<vmem>>, vector<1x32xf32>
    %cst_54 = arith.constant dense<0.000000e+00> : vector<17xf32>
    %137 = vector.multi_reduction <add>, %134, %cst_54 [1] : vector<17x32xf32> to vector<17xf32>
    %138 = vector.shape_cast %137 : vector<17xf32> to vector<17x1xf32>
    %cst_55 = arith.constant 3.200000e+01 : f32
    %139 = vector.broadcast %cst_55 : f32 to vector<17x1xf32>
    %140 = arith.divf %138, %139 : vector<17x1xf32>
    %141 = vector.broadcast %140 : vector<17x1xf32> to vector<17x32xf32>
    %142 = arith.subf %134, %141 : vector<17x32xf32>
    %143 = arith.mulf %142, %142 : vector<17x32xf32>
    %cst_56 = arith.constant dense<0.000000e+00> : vector<17xf32>
    %144 = vector.multi_reduction <add>, %143, %cst_56 [1] : vector<17x32xf32> to vector<17xf32>
    %145 = vector.shape_cast %144 : vector<17xf32> to vector<17x1xf32>
    %cst_57 = arith.constant 3.200000e+01 : f32
    %146 = vector.broadcast %cst_57 : f32 to vector<17x1xf32>
    %147 = arith.divf %145, %146 : vector<17x1xf32>
    %cst_58 = arith.constant 9.99999974E-6 : f32
    %148 = vector.broadcast %cst_58 : f32 to vector<17x1xf32>
    %149 = arith.addf %147, %148 : vector<17x1xf32>
    %150 = math.rsqrt %149 : vector<17x1xf32>
    %151 = vector.broadcast %150 : vector<17x1xf32> to vector<17x32xf32>
    %152 = arith.mulf %142, %151 : vector<17x32xf32>
    %153 = vector.broadcast %135 : vector<1x32xf32> to vector<17x32xf32>
    %154 = arith.mulf %152, %153 : vector<17x32xf32>
    %155 = vector.broadcast %136 : vector<1x32xf32> to vector<17x32xf32>
    %156 = arith.addf %154, %155 : vector<17x32xf32>
    %157 = arith.truncf %156 : vector<17x32xf32> to vector<17x32xbf16>
    %c0_59 = arith.constant 0 : index
    %c0_60 = arith.constant 0 : index
    %158 = vector.load %arg11[%c0_59, %c0_60] : memref<32x128xbf16, #tpu.memory_space<vmem>>, vector<32x128xbf16>
    %cst_61 = arith.constant dense<0.000000e+00> : vector<17x128xf32>
    %159 = tpu.matmul %157, %158, %cst_61 {dimension_numbers = #tpu.dot_dimension_numbers<[1], [0], [0], [1], [0, 0, 1, 1], [], []>} : vector<17x32xbf16>, vector<32x128xbf16>, vector<17x128xf32> -> vector<17x128xf32>
    %c0_62 = arith.constant 0 : index
    %c0_63 = arith.constant 0 : index
    %160 = vector.load %arg12[%c0_62, %c0_63] : memref<1x128xf32, #tpu.memory_space<vmem>>, vector<1x128xf32>
    %161 = vector.broadcast %160 : vector<1x128xf32> to vector<17x128xf32>
    %162 = arith.addf %159, %161 : vector<17x128xf32>
    %cst_64 = arith.constant 5.000000e-01 : f32
    %163 = vector.broadcast %cst_64 : f32 to vector<17x128xf32>
    %164 = arith.mulf %163, %162 : vector<17x128xf32>
    %cst_65 = arith.constant 0.707106769 : f32
    %165 = vector.broadcast %cst_65 : f32 to vector<17x128xf32>
    %166 = arith.mulf %162, %165 : vector<17x128xf32>
    %167 = math.erf %166 : vector<17x128xf32>
    %cst_66 = arith.constant 1.000000e+00 : f32
    %168 = vector.broadcast %cst_66 : f32 to vector<17x128xf32>
    %169 = arith.addf %168, %167 : vector<17x128xf32>
    %170 = arith.mulf %164, %169 : vector<17x128xf32>
    %171 = arith.truncf %170 : vector<17x128xf32> to vector<17x128xbf16>
    %c0_67 = arith.constant 0 : index
    %c0_68 = arith.constant 0 : index
    %172 = vector.load %arg13[%c0_67, %c0_68] : memref<128x32xbf16, #tpu.memory_space<vmem>>, vector<128x32xbf16>
    %cst_69 = arith.constant dense<0.000000e+00> : vector<17x32xf32>
    %173 = tpu.matmul %171, %172, %cst_69 {dimension_numbers = #tpu.dot_dimension_numbers<[1], [0], [0], [1], [0, 0, 1, 1], [], []>} : vector<17x128xbf16>, vector<128x32xbf16>, vector<17x32xf32> -> vector<17x32xf32>
    %174 = arith.addf %134, %173 : vector<17x32xf32>
    %c0_70 = arith.constant 0 : index
    %c0_71 = arith.constant 0 : index
    %175 = vector.load %arg14[%c0_70, %c0_71] : memref<1x32xf32, #tpu.memory_space<vmem>>, vector<1x32xf32>
    %176 = vector.broadcast %175 : vector<1x32xf32> to vector<17x32xf32>
    %177 = arith.addf %174, %176 : vector<17x32xf32>
    %c0_72 = arith.constant 0 : index
    %c0_73 = arith.constant 0 : index
    %c0_74 = arith.constant 0 : index
    %178 = vector.load %arg15[%c0_72, %c0_73, %c0_74] : memref<1x17x32xf32, #tpu.memory_space<vmem>>, vector<1x17x32xf32>
    %179 = vector.shape_cast %178 : vector<1x17x32xf32> to vector<17x32xf32>
    %180 = vector.shape_cast %177 : vector<17x32xf32> to vector<1x17x32xf32>
    tpu.vector_store %arg15[%c0_72, %c0_73, %c0_74], %180 {strides = array<i32>} : memref<1x17x32xf32, #tpu.memory_space<vmem>>, vector<1x17x32xf32>,
    return
  }
  func.func @transform_0(%arg0: i32) -> (i32, i32, i32) {
    %c0_i32 = arith.constant 0 : i32
    %c0_i32_0 = arith.constant 0 : i32
    %c0_i32_1 = arith.constant 0 : i32
    return %arg0, %c0_i32, %c0_i32_0 : i32, i32, i32
  }
  func.func @transform_1(%arg0: i32) -> (i32, i32, i32) {
    %c0_i32 = arith.constant 0 : i32
    %c0_i32_0 = arith.constant 0 : i32
    %c0_i32_1 = arith.constant 0 : i32
    return %arg0, %c0_i32, %c0_i32_0 : i32, i32, i32
  }
  func.func @transform_2(%arg0: i32) -> (i32, i32, i32) {
    %c0_i32 = arith.constant 0 : i32
    %c0_i32_0 = arith.constant 0 : i32
    %c0_i32_1 = arith.constant 0 : i32
    return %arg0, %c0_i32, %c0_i32_0 : i32, i32, i32
  }
  func.func @transform_3(%arg0: i32) -> (i32, i32) {
    %c0_i32 = arith.constant 0 : i32
    %c0_i32_0 = arith.constant 0 : i32
    %c0_i32_1 = arith.constant 0 : i32
    return %c0_i32, %c0_i32_0 : i32, i32
  }
  func.func @transform_4(%arg0: i32) -> (i32, i32) {
    %c0_i32 = arith.constant 0 : i32
    %c0_i32_0 = arith.constant 0 : i32
    %c0_i32_1 = arith.constant 0 : i32
    return %c0_i32, %c0_i32_0 : i32, i32
  }
  func.func @transform_5(%arg0: i32) -> (i32, i32) {
    %c0_i32 = arith.constant 0 : i32
    %c0_i32_0 = arith.constant 0 : i32
    %c0_i32_1 = arith.constant 0 : i32
    return %c0_i32, %c0_i32_0 : i32, i32
  }
  func.func @transform_6(%arg0: i32) -> (i32, i32) {
    %c0_i32 = arith.constant 0 : i32
    %c0_i32_0 = arith.constant 0 : i32
    %c0_i32_1 = arith.constant 0 : i32
    return %c0_i32, %c0_i32_0 : i32, i32
  }
  func.func @transform_7(%arg0: i32) -> (i32, i32) {
    %c0_i32 = arith.constant 0 : i32
    %c0_i32_0 = arith.constant 0 : i32
    %c0_i32_1 = arith.constant 0 : i32
    return %c0_i32, %c0_i32_0 : i32, i32
  }
  func.func @transform_8(%arg0: i32) -> (i32, i32) {
    %c0_i32 = arith.constant 0 : i32
    %c0_i32_0 = arith.constant 0 : i32
    %c0_i32_1 = arith.constant 0 : i32
    return %c0_i32, %c0_i32_0 : i32, i32
  }
  func.func @transform_9(%arg0: i32) -> (i32, i32) {
    %c0_i32 = arith.constant 0 : i32
    %c0_i32_0 = arith.constant 0 : i32
    %c0_i32_1 = arith.constant 0 : i32
    return %c0_i32, %c0_i32_0 : i32, i32
  }
  func.func @transform_10(%arg0: i32) -> (i32, i32) {
    %c0_i32 = arith.constant 0 : i32
    %c0_i32_0 = arith.constant 0 : i32
    %c0_i32_1 = arith.constant 0 : i32
    return %c0_i32, %c0_i32_0 : i32, i32
  }
  func.func @transform_11(%arg0: i32) -> (i32, i32) {
    %c0_i32 = arith.constant 0 : i32
    %c0_i32_0 = arith.constant 0 : i32
    %c0_i32_1 = arith.constant 0 : i32
    return %c0_i32, %c0_i32_0 : i32, i32
  }
  func.func @transform_12(%arg0: i32) -> (i32, i32) {
    %c0_i32 = arith.constant 0 : i32
    %c0_i32_0 = arith.constant 0 : i32
    %c0_i32_1 = arith.constant 0 : i32
    return %c0_i32, %c0_i32_0 : i32, i32
  }
  func.func @transform_13(%arg0: i32) -> (i32, i32) {
    %c0_i32 = arith.constant 0 : i32
    %c0_i32_0 = arith.constant 0 : i32
    %c0_i32_1 = arith.constant 0 : i32
    return %c0_i32, %c0_i32_0 : i32, i32
  }
  func.func @transform_14(%arg0: i32) -> (i32, i32, i32) {
    %c0_i32 = arith.constant 0 : i32
    %c0_i32_0 = arith.constant 0 : i32
    %c0_i32_1 = arith.constant 0 : i32
    return %arg0, %c0_i32, %c0_i32_0 : i32, i32, i32
  }
}

module attributes {stable_mosaic.version = 11 : i64} {
  func.func @_expand_sum_kernel(%arg0: i32, %arg1: memref<32x32xf32, #tpu.memory_space<vmem>>, %arg2: memref<32x32xf32, #tpu.memory_space<vmem>>, %arg3: memref<32x16xbf16, #tpu.memory_space<vmem>>, %arg4: memref<1x16xf32, #tpu.memory_space<vmem>>, %arg5: memref<32x16xf32, #tpu.memory_space<vmem>>) attributes {dimension_semantics = [#tpu.dimension_semantics<parallel>], iteration_bounds = array<i64: 1>, scalar_prefetch = 0 : i64, scratch_operands = 0 : i64, tpu.core_type = #tpu.core_type<tc>, window_params = [{transform_indices = @transform_0, window_bounds = array<i64: 32, 32>}, {transform_indices = @transform_1, window_bounds = array<i64: 32, 32>}, {pipeline_mode = #tpu.pipeline_mode<synchronous>, transform_indices = @transform_2, window_bounds = array<i64: 32, 16>}, {pipeline_mode = #tpu.pipeline_mode<synchronous>, transform_indices = @transform_3, window_bounds = array<i64: 1, 16>}, {transform_indices = @transform_4, window_bounds = array<i64: 32, 16>}]} {
    %c0 = arith.constant 0 : index
    %c0_0 = arith.constant 0 : index
    %0 = vector.load %arg3[%c0, %c0_0] : memref<32x16xbf16, #tpu.memory_space<vmem>>, vector<32x16xbf16>
    %c0_1 = arith.constant 0 : index
    %c0_2 = arith.constant 0 : index
    %1 = vector.load %arg4[%c0_1, %c0_2] : memref<1x16xf32, #tpu.memory_space<vmem>>, vector<1x16xf32>
    %c0_3 = arith.constant 0 : index
    %c0_4 = arith.constant 0 : index
    %2 = vector.load %arg1[%c0_3, %c0_4] : memref<32x32xf32, #tpu.memory_space<vmem>>, vector<32x32xf32>
    %3 = arith.truncf %2 : vector<32x32xf32> to vector<32x32xbf16>
    %cst = arith.constant dense<0.000000e+00> : vector<32x16xf32>
    %4 = tpu.matmul %3, %0, %cst {dimension_numbers = #tpu.dot_dimension_numbers<[1], [0], [0], [1], [0, 0, 1, 1], [], []>} : vector<32x32xbf16>, vector<32x16xbf16>, vector<32x16xf32> -> vector<32x16xf32>
    %5 = vector.broadcast %1 : vector<1x16xf32> to vector<32x16xf32>
    %6 = arith.addf %4, %5 : vector<32x16xf32>
    %c0_5 = arith.constant 0 : index
    %c0_6 = arith.constant 0 : index
    %7 = vector.load %arg2[%c0_5, %c0_6] : memref<32x32xf32, #tpu.memory_space<vmem>>, vector<32x32xf32>
    %8 = arith.truncf %7 : vector<32x32xf32> to vector<32x32xbf16>
    %cst_7 = arith.constant dense<0.000000e+00> : vector<32x16xf32>
    %9 = tpu.matmul %8, %0, %cst_7 {dimension_numbers = #tpu.dot_dimension_numbers<[1], [0], [0], [1], [0, 0, 1, 1], [], []>} : vector<32x32xbf16>, vector<32x16xbf16>, vector<32x16xf32> -> vector<32x16xf32>
    %10 = vector.broadcast %1 : vector<1x16xf32> to vector<32x16xf32>
    %11 = arith.addf %9, %10 : vector<32x16xf32>
    %cst_8 = arith.constant 0.000000e+00 : f32
    %12 = vector.broadcast %cst_8 : f32 to vector<32x16xf32>
    %13 = arith.maximumf %6, %12 : vector<32x16xf32>
    %cst_9 = arith.constant 0.000000e+00 : f32
    %14 = vector.broadcast %cst_9 : f32 to vector<32x16xf32>
    %15 = arith.maximumf %11, %14 : vector<32x16xf32>
    %16 = arith.addf %13, %15 : vector<32x16xf32>
    %c0_10 = arith.constant 0 : index
    %c0_11 = arith.constant 0 : index
    %17 = vector.load %arg5[%c0_10, %c0_11] : memref<32x16xf32, #tpu.memory_space<vmem>>, vector<32x16xf32>
    tpu.vector_store %arg5[%c0_10, %c0_11], %16 {strides = array<i32>} : memref<32x16xf32, #tpu.memory_space<vmem>>, vector<32x16xf32>,
    return
  }
  func.func @transform_0(%arg0: i32) -> (i32, i32) {
    %c0_i32 = arith.constant 0 : i32
    %c0_i32_0 = arith.constant 0 : i32
    return %arg0, %c0_i32 : i32, i32
  }
  func.func @transform_1(%arg0: i32) -> (i32, i32) {
    %c0_i32 = arith.constant 0 : i32
    %c0_i32_0 = arith.constant 0 : i32
    return %arg0, %c0_i32 : i32, i32
  }
  func.func @transform_2(%arg0: i32) -> (i32, i32) {
    %c0_i32 = arith.constant 0 : i32
    %c0_i32_0 = arith.constant 0 : i32
    %c0_i32_1 = arith.constant 0 : i32
    return %c0_i32, %c0_i32_0 : i32, i32
  }
  func.func @transform_3(%arg0: i32) -> (i32, i32) {
    %c0_i32 = arith.constant 0 : i32
    %c0_i32_0 = arith.constant 0 : i32
    %c0_i32_1 = arith.constant 0 : i32
    return %c0_i32, %c0_i32_0 : i32, i32
  }
  func.func @transform_4(%arg0: i32) -> (i32, i32) {
    %c0_i32 = arith.constant 0 : i32
    %c0_i32_0 = arith.constant 0 : i32
    return %arg0, %c0_i32 : i32, i32
  }
}

module attributes {stable_mosaic.version = 11 : i64} {
  func.func @_mm_kernel(%arg0: i32, %arg1: memref<512x16xf32, #tpu.memory_space<vmem>>, %arg2: memref<16x16xbf16, #tpu.memory_space<vmem>>, %arg3: memref<1x16xf32, #tpu.memory_space<vmem>>, %arg4: memref<512x16xf32, #tpu.memory_space<vmem>>, %arg5: memref<512x16xf32, #tpu.memory_space<vmem>>) attributes {dimension_semantics = [#tpu.dimension_semantics<parallel>], iteration_bounds = array<i64: 1>, scalar_prefetch = 0 : i64, scratch_operands = 0 : i64, tpu.core_type = #tpu.core_type<tc>, window_params = [{transform_indices = @transform_0, window_bounds = array<i64: 512, 16>}, {pipeline_mode = #tpu.pipeline_mode<synchronous>, transform_indices = @transform_1, window_bounds = array<i64: 16, 16>}, {pipeline_mode = #tpu.pipeline_mode<synchronous>, transform_indices = @transform_2, window_bounds = array<i64: 1, 16>}, {transform_indices = @transform_3, window_bounds = array<i64: 512, 16>}, {transform_indices = @transform_4, window_bounds = array<i64: 512, 16>}]} {
    %c0 = arith.constant 0 : index
    %c0_0 = arith.constant 0 : index
    %0 = vector.load %arg1[%c0, %c0_0] : memref<512x16xf32, #tpu.memory_space<vmem>>, vector<512x16xf32>
    %1 = arith.truncf %0 : vector<512x16xf32> to vector<512x16xbf16>
    %c0_1 = arith.constant 0 : index
    %c0_2 = arith.constant 0 : index
    %2 = vector.load %arg2[%c0_1, %c0_2] : memref<16x16xbf16, #tpu.memory_space<vmem>>, vector<16x16xbf16>
    %cst = arith.constant dense<0.000000e+00> : vector<512x16xf32>
    %3 = tpu.matmul %1, %2, %cst {dimension_numbers = #tpu.dot_dimension_numbers<[1], [0], [0], [1], [0, 0, 1, 1], [], []>} : vector<512x16xbf16>, vector<16x16xbf16>, vector<512x16xf32> -> vector<512x16xf32>
    %c0_3 = arith.constant 0 : index
    %c0_4 = arith.constant 0 : index
    %4 = vector.load %arg3[%c0_3, %c0_4] : memref<1x16xf32, #tpu.memory_space<vmem>>, vector<1x16xf32>
    %5 = vector.broadcast %4 : vector<1x16xf32> to vector<512x16xf32>
    %6 = arith.addf %3, %5 : vector<512x16xf32>
    %cst_5 = arith.constant 0.000000e+00 : f32
    %7 = vector.broadcast %cst_5 : f32 to vector<512x16xf32>
    %8 = arith.maximumf %6, %7 : vector<512x16xf32>
    %c0_6 = arith.constant 0 : index
    %c0_7 = arith.constant 0 : index
    %9 = vector.load %arg4[%c0_6, %c0_7] : memref<512x16xf32, #tpu.memory_space<vmem>>, vector<512x16xf32>
    %10 = arith.addf %8, %9 : vector<512x16xf32>
    %c0_8 = arith.constant 0 : index
    %c0_9 = arith.constant 0 : index
    %11 = vector.load %arg5[%c0_8, %c0_9] : memref<512x16xf32, #tpu.memory_space<vmem>>, vector<512x16xf32>
    tpu.vector_store %arg5[%c0_8, %c0_9], %10 {strides = array<i32>} : memref<512x16xf32, #tpu.memory_space<vmem>>, vector<512x16xf32>,
    return
  }
  func.func @transform_0(%arg0: i32) -> (i32, i32) {
    %c0_i32 = arith.constant 0 : i32
    %c0_i32_0 = arith.constant 0 : i32
    return %arg0, %c0_i32 : i32, i32
  }
  func.func @transform_1(%arg0: i32) -> (i32, i32) {
    %c0_i32 = arith.constant 0 : i32
    %c0_i32_0 = arith.constant 0 : i32
    %c0_i32_1 = arith.constant 0 : i32
    return %c0_i32, %c0_i32_0 : i32, i32
  }
  func.func @transform_2(%arg0: i32) -> (i32, i32) {
    %c0_i32 = arith.constant 0 : i32
    %c0_i32_0 = arith.constant 0 : i32
    %c0_i32_1 = arith.constant 0 : i32
    return %c0_i32, %c0_i32_0 : i32, i32
  }
  func.func @transform_3(%arg0: i32) -> (i32, i32) {
    %c0_i32 = arith.constant 0 : i32
    %c0_i32_0 = arith.constant 0 : i32
    return %arg0, %c0_i32 : i32, i32
  }
  func.func @transform_4(%arg0: i32) -> (i32, i32) {
    %c0_i32 = arith.constant 0 : i32
    %c0_i32_0 = arith.constant 0 : i32
    return %arg0, %c0_i32 : i32, i32
  }
}

module attributes {stable_mosaic.version = 11 : i64} {
  func.func @_cnn_tail_kernel(%arg0: i32, %arg1: memref<512x16xf32, #tpu.memory_space<vmem>>, %arg2: memref<512x16xf32, #tpu.memory_space<vmem>>, %arg3: memref<16x16xbf16, #tpu.memory_space<vmem>>, %arg4: memref<1x16xf32, #tpu.memory_space<vmem>>, %arg5: memref<16x16xbf16, #tpu.memory_space<vmem>>, %arg6: memref<1x16xf32, #tpu.memory_space<vmem>>, %arg7: memref<512x16xf32, #tpu.memory_space<vmem>>) attributes {dimension_semantics = [#tpu.dimension_semantics<parallel>], iteration_bounds = array<i64: 1>, scalar_prefetch = 0 : i64, scratch_operands = 0 : i64, tpu.core_type = #tpu.core_type<tc>, window_params = [{transform_indices = @transform_0, window_bounds = array<i64: 512, 16>}, {transform_indices = @transform_1, window_bounds = array<i64: 512, 16>}, {pipeline_mode = #tpu.pipeline_mode<synchronous>, transform_indices = @transform_2, window_bounds = array<i64: 16, 16>}, {pipeline_mode = #tpu.pipeline_mode<synchronous>, transform_indices = @transform_3, window_bounds = array<i64: 1, 16>}, {pipeline_mode = #tpu.pipeline_mode<synchronous>, transform_indices = @transform_4, window_bounds = array<i64: 16, 16>}, {pipeline_mode = #tpu.pipeline_mode<synchronous>, transform_indices = @transform_5, window_bounds = array<i64: 1, 16>}, {transform_indices = @transform_6, window_bounds = array<i64: 512, 16>}]} {
    %c0 = arith.constant 0 : index
    %c0_0 = arith.constant 0 : index
    %0 = vector.load %arg1[%c0, %c0_0] : memref<512x16xf32, #tpu.memory_space<vmem>>, vector<512x16xf32>
    %1 = arith.truncf %0 : vector<512x16xf32> to vector<512x16xbf16>
    %c0_1 = arith.constant 0 : index
    %c0_2 = arith.constant 0 : index
    %2 = vector.load %arg3[%c0_1, %c0_2] : memref<16x16xbf16, #tpu.memory_space<vmem>>, vector<16x16xbf16>
    %cst = arith.constant dense<0.000000e+00> : vector<512x16xf32>
    %3 = tpu.matmul %1, %2, %cst {dimension_numbers = #tpu.dot_dimension_numbers<[1], [0], [0], [1], [0, 0, 1, 1], [], []>} : vector<512x16xbf16>, vector<16x16xbf16>, vector<512x16xf32> -> vector<512x16xf32>
    %c0_3 = arith.constant 0 : index
    %c0_4 = arith.constant 0 : index
    %4 = vector.load %arg4[%c0_3, %c0_4] : memref<1x16xf32, #tpu.memory_space<vmem>>, vector<1x16xf32>
    %5 = vector.broadcast %4 : vector<1x16xf32> to vector<512x16xf32>
    %6 = arith.addf %3, %5 : vector<512x16xf32>
    %c0_5 = arith.constant 0 : index
    %c0_6 = arith.constant 0 : index
    %7 = vector.load %arg2[%c0_5, %c0_6] : memref<512x16xf32, #tpu.memory_space<vmem>>, vector<512x16xf32>
    %8 = arith.truncf %7 : vector<512x16xf32> to vector<512x16xbf16>
    %c0_7 = arith.constant 0 : index
    %c0_8 = arith.constant 0 : index
    %9 = vector.load %arg5[%c0_7, %c0_8] : memref<16x16xbf16, #tpu.memory_space<vmem>>, vector<16x16xbf16>
    %cst_9 = arith.constant dense<0.000000e+00> : vector<512x16xf32>
    %10 = tpu.matmul %8, %9, %cst_9 {dimension_numbers = #tpu.dot_dimension_numbers<[1], [0], [0], [1], [0, 0, 1, 1], [], []>} : vector<512x16xbf16>, vector<16x16xbf16>, vector<512x16xf32> -> vector<512x16xf32>
    %11 = arith.addf %6, %10 : vector<512x16xf32>
    %c0_10 = arith.constant 0 : index
    %c0_11 = arith.constant 0 : index
    %12 = vector.load %arg6[%c0_10, %c0_11] : memref<1x16xf32, #tpu.memory_space<vmem>>, vector<1x16xf32>
    %13 = vector.broadcast %12 : vector<1x16xf32> to vector<512x16xf32>
    %14 = arith.addf %11, %13 : vector<512x16xf32>
    %cst_12 = arith.constant 0.000000e+00 : f32
    %15 = vector.broadcast %cst_12 : f32 to vector<512x16xf32>
    %16 = arith.maximumf %14, %15 : vector<512x16xf32>
    %c0_13 = arith.constant 0 : index
    %c0_14 = arith.constant 0 : index
    %17 = vector.load %arg7[%c0_13, %c0_14] : memref<512x16xf32, #tpu.memory_space<vmem>>, vector<512x16xf32>
    tpu.vector_store %arg7[%c0_13, %c0_14], %16 {strides = array<i32>} : memref<512x16xf32, #tpu.memory_space<vmem>>, vector<512x16xf32>,
    return
  }
  func.func @transform_0(%arg0: i32) -> (i32, i32) {
    %c0_i32 = arith.constant 0 : i32
    %c0_i32_0 = arith.constant 0 : i32
    return %arg0, %c0_i32 : i32, i32
  }
  func.func @transform_1(%arg0: i32) -> (i32, i32) {
    %c0_i32 = arith.constant 0 : i32
    %c0_i32_0 = arith.constant 0 : i32
    return %arg0, %c0_i32 : i32, i32
  }
  func.func @transform_2(%arg0: i32) -> (i32, i32) {
    %c0_i32 = arith.constant 0 : i32
    %c0_i32_0 = arith.constant 0 : i32
    %c0_i32_1 = arith.constant 0 : i32
    return %c0_i32, %c0_i32_0 : i32, i32
  }
  func.func @transform_3(%arg0: i32) -> (i32, i32) {
    %c0_i32 = arith.constant 0 : i32
    %c0_i32_0 = arith.constant 0 : i32
    %c0_i32_1 = arith.constant 0 : i32
    return %c0_i32, %c0_i32_0 : i32, i32
  }
  func.func @transform_4(%arg0: i32) -> (i32, i32) {
    %c0_i32 = arith.constant 0 : i32
    %c0_i32_0 = arith.constant 0 : i32
    %c0_i32_1 = arith.constant 0 : i32
    return %c0_i32, %c0_i32_0 : i32, i32
  }
  func.func @transform_5(%arg0: i32) -> (i32, i32) {
    %c0_i32 = arith.constant 0 : i32
    %c0_i32_0 = arith.constant 0 : i32
    %c0_i32_1 = arith.constant 0 : i32
    return %c0_i32, %c0_i32_0 : i32, i32
  }
  func.func @transform_6(%arg0: i32) -> (i32, i32) {
    %c0_i32 = arith.constant 0 : i32
    %c0_i32_0 = arith.constant 0 : i32
    return %arg0, %c0_i32 : i32, i32
  }
}

</mosaic_0001>

<bundles_post_ra>
// kernel: conv_trans_block_fwd.12
= control target key start
LH: loop header
LB: loop body
LE: loop exit
PB: predicated region body
PF: predicated region fallthrough
CT: control target
= control target key end

     0   :  { %vm216_vm0 = vcmask 1043456   ;;  %vm119_vm1 = vcmask 64512   ;;  %vm573_vm2 = vcmask 130048   ;;  %s1350_s1 = inlined_call_operand.vmem [shape: bf16[8,16], index: 1, kind: input, shape index: {}]   ;;  %s1351_s0 = inlined_call_operand.vmem [shape: f32[512,8], index: 0, kind: input, shape index: {}]   ;;  %s1352_s2 = inlined_call_operand.vmem [shape: f32[1,16], index: 2, kind: input, shape index: {}]   ;;  %s1353_s3 = inlined_call_operand.vmem [shape: f32[512,16], index: 3, kind: output, shape index: {}]  }
   0x1   :  { %v111_v0 = vld [vmem:[%s1350_s1] sm:$0xf]  ;;  %v16_v2 = vld [vmem:[%s1351_s0 + $0x8] sm:$0xff]  ;;  %v17_v7 = vld [vmem:[%s1351_s0 + $0x10] sm:$0xff] }
   0x2   :  { %v15_v1 = vld [vmem:[%s1351_s0] sm:$0xff]  ;;  %776 = vmatprep.subr.msk.bf16.mxu0 %vm216_vm0, %v111_v0  ;;  %777 = vmatprep.subr.msk.bf16.mxu1 %vm216_vm0, %v111_v0  ;;  %v218_v3 = vsel %vm216_vm0, %v111_v0, 0  ;;  %v48_v6 = vld [vmem:[%s1351_s0 + $0x108] sm:$0xff]  ;;  %v18_v9 = vld [vmem:[%s1351_s0 + $0x18] sm:$0xff] }
   0x3   :  { %v79_v4 = vpack.c.bf16 %v16_v2, %v15_v1  ;;  %v47_v5 = vld [vmem:[%s1351_s0 + $0x100] sm:$0xff]  ;;  %709 = vmatpush3.bf16.msra.mxu0 %v218_v3  ;;  %775 = vmatpush3.bf16.msra.mxu1 %v218_v3  ;;  %v49_v10 = vld [vmem:[%s1351_s0 + $0x110] sm:$0xff]  ;;  %v50_v11 = vld [vmem:[%s1351_s0 + $0x118] sm:$0xff]  ;;  %v80_v12 = vpack.c.bf16 %v18_v9, %v17_v7 }
   0x4   :  { %v95_v8 = vpack.c.bf16 %v48_v6, %v47_v5  ;;  %v96_v13 = vpack.c.bf16 %v50_v11, %v49_v10  ;;  %v19_v14 = vld [vmem:[%s1351_s0 + $0x20] sm:$0xff]  ;;  %v20_v15 = vld [vmem:[%s1351_s0 + $0x28] sm:$0xff]  ;;  %v21_v20 = vld [vmem:[%s1351_s0 + $0x30] sm:$0xff] }
   0x5   :  { %710 = vmatprep.mubr.msk.bf16.mxu0 %vm119_vm1, %v79_v4  ;;  %v51_v16 = vld [vmem:[%s1351_s0 + $0x120] sm:$0xff]  ;;  %v81_v17 = vpack.c.bf16 %v20_v15, %v19_v14  ;;  %v52_v18 = vld [vmem:[%s1351_s0 + $0x128] sm:$0xff]  ;;  %v22_v21 = vld [vmem:[%s1351_s0 + $0x38] sm:$0xff] }
   0x6   :  { %742 = vmatprep.mubr.msk.bf16.mxu1 %vm119_vm1, %v95_v8  ;;  %711 = vmatmul.mubr.msk.bf16.vlgmr.msra.gmra.mxu0 %vm119_vm1, %v80_v12  ;;  %v97_v19 = vpack.c.bf16 %v52_v18, %v51_v16  ;;  %v53_v22 = vld [vmem:[%s1351_s0 + $0x130] sm:$0xff]  ;;  %v54_v23 = vld [vmem:[%s1351_s0 + $0x138] sm:$0xff]  ;;  %v23_v24 = vld [vmem:[%s1351_s0 + $0x40] sm:$0xff]  ;;  %v82_v28 = vpack.c.bf16 %v22_v21, %v21_v20 }
   0x7   :  { %743 = vmatmul.mubr.msk.bf16.vlgmr.msra.gmra.mxu1 %vm119_vm1, %v96_v13  ;;  %714 = vmatprep.mubr.msk.bf16.mxu0 %vm119_vm1, %v81_v17  ;;  %v24_v25 = vld [vmem:[%s1351_s0 + $0x48] sm:$0xff]  ;;  %v55_v26 = vld [vmem:[%s1351_s0 + $0x140] sm:$0xff]  ;;  %v98_v29 = vpack.c.bf16 %v54_v23, %v53_v22  ;;  %v25_v32 = vld [vmem:[%s1351_s0 + $0x50] sm:$0xff] }
   0x8   :  { %746 = vmatprep.mubr.msk.bf16.mxu1 %vm119_vm1, %v97_v19  ;;  %v56_v27 = vld [vmem:[%s1351_s0 + $0x148] sm:$0xff]  ;;  %v83_v30 = vpack.c.bf16 %v24_v25, %v23_v24  ;;  %v26_v33 = vld [vmem:[%s1351_s0 + $0x58] sm:$0xff]  ;;  %v57_v34 = vld [vmem:[%s1351_s0 + $0x150] sm:$0xff] }
   0x9   :  { %v99_v31 = vpack.c.bf16 %v56_v27, %v55_v26  ;;  %v58_v35 = vld [vmem:[%s1351_s0 + $0x158] sm:$0xff]  ;;  %v27_v36 = vld [vmem:[%s1351_s0 + $0x60] sm:$0xff]  ;;  %v28_v37 = vld [vmem:[%s1351_s0 + $0x68] sm:$0xff]  ;;  %v84_v40 = vpack.c.bf16 %v26_v33, %v25_v32 }
   0xa   :  { %v59_v38 = vld [vmem:[%s1351_s0 + $0x160] sm:$0xff]  ;;  %v60_v39 = vld [vmem:[%s1351_s0 + $0x168] sm:$0xff]  ;;  %v100_v41 = vpack.c.bf16 %v58_v35, %v57_v34  ;;  %v85_v42 = vpack.c.bf16 %v28_v37, %v27_v36  ;;  %v29_v44 = vld [vmem:[%s1351_s0 + $0x70] sm:$0xff] }
   0xb   :  { %v101_v43 = vpack.c.bf16 %v60_v39, %v59_v38  ;;  %v30_v45 = vld [vmem:[%s1351_s0 + $0x78] sm:$0xff]  ;;  %v61_v46 = vld [vmem:[%s1351_s0 + $0x170] sm:$0xff]  ;;  %v31_v48 = vld [vmem:[%s1351_s0 + $0x80] sm:$0xff] }
   0xc   :  { %v62_v47 = vld [vmem:[%s1351_s0 + $0x178] sm:$0xff]  ;;  %v32_v49 = vld [vmem:[%s1351_s0 + $0x88] sm:$0xff]  ;;  %v63_v50 = vld [vmem:[%s1351_s0 + $0x180] sm:$0xff]  ;;  %v86_v52 = vpack.c.bf16 %v30_v45, %v29_v44 }
   0xd   :  { %v64_v51 = vld [vmem:[%s1351_s0 + $0x188] sm:$0xff]  ;;  %v102_v53 = vpack.c.bf16 %v62_v47, %v61_v46  ;;  %v87_v54 = vpack.c.bf16 %v32_v49, %v31_v48  ;;  %v33_v56 = vld [vmem:[%s1351_s0 + $0x90] sm:$0xff]  ;;  %v34_v57 = vld [vmem:[%s1351_s0 + $0x98] sm:$0xff] }
   0xe   :  { %715 = vmatmul.mubr.msk.bf16.gmra.mxu0 %vm119_vm1, %v82_v28  ;;  %v103_v55 = vpack.c.bf16 %v64_v51, %v63_v50  ;;  %v65_v58 = vld [vmem:[%s1351_s0 + $0x190] sm:$0xff]  ;;  %v66_v59 = vld [vmem:[%s1351_s0 + $0x198] sm:$0xff]  ;;  %v35_v60 = vld [vmem:[%s1351_s0 + $0xa0] sm:$0xff]  ;;  %v88_v0 = vpack.c.bf16 %v34_v57, %v33_v56 }
   0xf   :  { %747 = vmatmul.mubr.msk.bf16.gmra.mxu1 %vm119_vm1, %v98_v29  ;;  %718 = vmatprep.mubr.msk.bf16.mxu0 %vm119_vm1, %v83_v30  ;;  %v36_v61 = vld [vmem:[%s1351_s0 + $0xa8] sm:$0xff]  ;;  %v67_v62 = vld [vmem:[%s1351_s0 + $0x1a0] sm:$0xff]  ;;  %v104_v1 = vpack.c.bf16 %v66_v59, %v65_v58  ;;  %v37_v4 = vld [vmem:[%s1351_s0 + $0xb0] sm:$0xff] }
  0x10   :  { %750 = vmatprep.mubr.msk.bf16.mxu1 %vm119_vm1, %v99_v31  ;;  %v68_v63 = vld [vmem:[%s1351_s0 + $0x1a8] sm:$0xff]  ;;  %v89_v2 = vpack.c.bf16 %v36_v61, %v35_v60  ;;  %v38_v5 = vld [vmem:[%s1351_s0 + $0xb8] sm:$0xff]  ;;  %v69_v6 = vld [vmem:[%s1351_s0 + $0x1b0] sm:$0xff] }
  0x11   :  { %v105_v3 = vpack.c.bf16 %v68_v63, %v67_v62  ;;  %v70_v7 = vld [vmem:[%s1351_s0 + $0x1b8] sm:$0xff]  ;;  %v39_v8 = vld [vmem:[%s1351_s0 + $0xc0] sm:$0xff]  ;;  %v40_v9 = vld [vmem:[%s1351_s0 + $0xc8] sm:$0xff]  ;;  %v90_v12 = vpack.c.bf16 %v38_v5, %v37_v4 }
  0x12   :  { %v71_v10 = vld [vmem:[%s1351_s0 + $0x1c0] sm:$0xff]  ;;  %v72_v11 = vld [vmem:[%s1351_s0 + $0x1c8] sm:$0xff]  ;;  %v106_v13 = vpack.c.bf16 %v70_v7, %v69_v6  ;;  %v91_v14 = vpack.c.bf16 %v40_v9, %v39_v8  ;;  %v41_v16 = vld [vmem:[%s1351_s0 + $0xd0] sm:$0xff] }
  0x13   :  { %v107_v15 = vpack.c.bf16 %v72_v11, %v71_v10  ;;  %v42_v17 = vld [vmem:[%s1351_s0 + $0xd8] sm:$0xff]  ;;  %v73_v18 = vld [vmem:[%s1351_s0 + $0x1d0] sm:$0xff]  ;;  %v43_v20 = vld [vmem:[%s1351_s0 + $0xe0] sm:$0xff] }
  0x14   :  { %v74_v19 = vld [vmem:[%s1351_s0 + $0x1d8] sm:$0xff]  ;;  %v44_v21 = vld [vmem:[%s1351_s0 + $0xe8] sm:$0xff]  ;;  %v75_v22 = vld [vmem:[%s1351_s0 + $0x1e0] sm:$0xff]  ;;  %v92_v24 = vpack.c.bf16 %v42_v17, %v41_v16 }
  0x15   :  { %v76_v23 = vld [vmem:[%s1351_s0 + $0x1e8] sm:$0xff]  ;;  %v108_v25 = vpack.c.bf16 %v74_v19, %v73_v18  ;;  %v93_v26 = vpack.c.bf16 %v44_v21, %v43_v20  ;;  %v45_v28 = vld [vmem:[%s1351_s0 + $0xf0] sm:$0xff]  ;;  %v46_v29 = vld [vmem:[%s1351_s0 + $0xf8] sm:$0xff] }
  0x16   :  { %719 = vmatmul.mubr.msk.bf16.gmra.mxu0 %vm119_vm1, %v84_v40  ;;  %v109_v27 = vpack.c.bf16 %v76_v23, %v75_v22  ;;  %v77_v30 = vld [vmem:[%s1351_s0 + $0x1f0] sm:$0xff]  ;;  %v78_v31 = vld [vmem:[%s1351_s0 + $0x1f8] sm:$0xff]  ;;  %v94_v32 = vpack.c.bf16 %v46_v29, %v45_v28  ;;  %v1028_v34 = vld [vmem:[%s1352_s2] ss:$0 sm:$0xff] }
  0x17   :  { %751 = vmatmul.mubr.msk.bf16.gmra.mxu1 %vm119_vm1, %v100_v41  ;;  %722 = vmatprep.mubr.msk.bf16.mxu0 %vm119_vm1, %v85_v42  ;;  %v110_v33 = vpack.c.bf16 %v78_v31, %v77_v30 }
  0x18   :  { %754 = vmatprep.mubr.msk.bf16.mxu1 %vm119_vm1, %v101_v43 }
  0x1e   :  { %723 = vmatmul.mubr.msk.bf16.gmra.mxu0 %vm119_vm1, %v86_v52 }
  0x1f   :  { %755 = vmatmul.mubr.msk.bf16.gmra.mxu1 %vm119_vm1, %v102_v53  ;;  %726 = vmatprep.mubr.msk.bf16.mxu0 %vm119_vm1, %v87_v54 }
  0x20   :  { %758 = vmatprep.mubr.msk.bf16.mxu1 %vm119_vm1, %v103_v55 }
  0x26   :  { %727 = vmatmul.mubr.msk.bf16.gmra.mxu0 %vm119_vm1, %v88_v0 }
  0x27   :  { %759 = vmatmul.mubr.msk.bf16.gmra.mxu1 %vm119_vm1, %v104_v1  ;;  %730 = vmatprep.mubr.msk.bf16.mxu0 %vm119_vm1, %v89_v2 }
  0x28   :  { %762 = vmatprep.mubr.msk.bf16.mxu1 %vm119_vm1, %v105_v3 }
  0x2e   :  { %731 = vmatmul.mubr.msk.bf16.gmra.mxu0 %vm119_vm1, %v90_v12 }
  0x2f   :  { %763 = vmatmul.mubr.msk.bf16.gmra.mxu1 %vm119_vm1, %v106_v13  ;;  %734 = vmatprep.mubr.msk.bf16.mxu0 %vm119_vm1, %v91_v14 }
  0x30   :  { %766 = vmatprep.mubr.msk.bf16.mxu1 %vm119_vm1, %v107_v15 }
  0x36   :  { %735 = vmatmul.mubr.msk.bf16.gmra.mxu0 %vm119_vm1, %v92_v24 }
  0x37   :  { %767 = vmatmul.mubr.msk.bf16.gmra.mxu1 %vm119_vm1, %v108_v25  ;;  %738 = vmatprep.mubr.msk.bf16.mxu0 %vm119_vm1, %v93_v26 }
  0x38   :  { %770 = vmatprep.mubr.msk.bf16.mxu1 %vm119_vm1, %v109_v27 }
  0x3e   :  { %739 = vmatmul.mubr.msk.bf16.gmra.mxu0 %vm119_vm1, %v94_v32 }
  0x3f   :  { %771 = vmatmul.mubr.msk.bf16.gmra.mxu1 %vm119_vm1, %v110_v33 }
  0xc6   :  { %v712_v35 = vpop.f32.mrf.mxu0 }
  0xc7   :  { %v744_v36 = vpop.f32.mrf.mxu1  ;;  %v263_v37 = vadd.f32 %v712_v35, %v1028_v34 }
  0xc8   :  { %v391_v38 = vadd.f32 %v744_v36, %v1028_v34  ;;  %v254_v39 = vpop.f32.mrf.mxu0 }
  0xc9   :  { %v382_v40 = vpop.f32.mrf.mxu1  ;;  %v511_v41 = vmax.f32 %v263_v37, 0.0  ;;  %v255_v43 = vadd.f32 %v1028_v34, %v254_v39 }
  0xca   :  { %v543_v42 = vmax.f32 %v391_v38, 0.0  ;;  %v383_v44 = vadd.f32 %v1028_v34, %v382_v40  ;;  %v713_v45 = vpop.f32.mrf.mxu0 }
  0xcb   :  { %v745_v46 = vpop.f32.mrf.mxu1  ;;  %576 = vst.msk [vmem:[%s1353_s3 + $0x10] sm:$0xff] %vm573_vm2, %v511_v41  ;;  %v509_v47 = vmax.f32 %v255_v43, 0.0  ;;  %v266_v49 = vadd.f32 %v713_v45, %v1028_v34 }
  0xcc   :  { %608 = vst.msk [vmem:[%s1353_s3 + $0x110] sm:$0xff] %vm573_vm2, %v543_v42  ;;  %v541_v48 = vmax.f32 %v383_v44, 0.0  ;;  %v394_v50 = vadd.f32 %v745_v46, %v1028_v34  ;;  %v257_v51 = vpop.f32.mrf.mxu0 }
  0xcd   :  { %v385_v52 = vpop.f32.mrf.mxu1  ;;  %574 = vst.msk [vmem:[%s1353_s3] sm:$0xff] %vm573_vm2, %v509_v47  ;;  %v512_v53 = vmax.f32 %v266_v49, 0.0  ;;  %v258_v55 = vadd.f32 %v1028_v34, %v257_v51 }
  0xce   :  { %606 = vst.msk [vmem:[%s1353_s3 + $0x100] sm:$0xff] %vm573_vm2, %v541_v48  ;;  %v544_v54 = vmax.f32 %v394_v50, 0.0  ;;  %v386_v56 = vadd.f32 %v1028_v34, %v385_v52  ;;  %v716_v57 = vpop.f32.mrf.mxu0 }
  0xcf   :  { %v748_v58 = vpop.f32.mrf.mxu1  ;;  %577 = vst.msk [vmem:[%s1353_s3 + $0x18] sm:$0xff] %vm573_vm2, %v512_v53  ;;  %v510_v59 = vmax.f32 %v258_v55, 0.0  ;;  %v279_v61 = vadd.f32 %v716_v57, %v1028_v34 }
  0xd0   :  { %609 = vst.msk [vmem:[%s1353_s3 + $0x118] sm:$0xff] %vm573_vm2, %v544_v54  ;;  %v542_v60 = vmax.f32 %v386_v56, 0.0  ;;  %v407_v62 = vadd.f32 %v748_v58, %v1028_v34  ;;  %v270_v63 = vpop.f32.mrf.mxu0 }
  0xd1   :  { %v398_v0 = vpop.f32.mrf.mxu1  ;;  %575 = vst.msk [vmem:[%s1353_s3 + $0x8] sm:$0xff] %vm573_vm2, %v510_v59  ;;  %v515_v1 = vmax.f32 %v279_v61, 0.0  ;;  %v271_v3 = vadd.f32 %v1028_v34, %v270_v63 }
  0xd2   :  { %607 = vst.msk [vmem:[%s1353_s3 + $0x108] sm:$0xff] %vm573_vm2, %v542_v60  ;;  %v547_v2 = vmax.f32 %v407_v62, 0.0  ;;  %v399_v4 = vadd.f32 %v1028_v34, %v398_v0  ;;  %v717_v5 = vpop.f32.mrf.mxu0 }
  0xd3   :  { %v749_v6 = vpop.f32.mrf.mxu1  ;;  %580 = vst.msk [vmem:[%s1353_s3 + $0x30] sm:$0xff] %vm573_vm2, %v515_v1  ;;  %v513_v7 = vmax.f32 %v271_v3, 0.0  ;;  %v282_v9 = vadd.f32 %v717_v5, %v1028_v34 }
  0xd4   :  { %612 = vst.msk [vmem:[%s1353_s3 + $0x130] sm:$0xff] %vm573_vm2, %v547_v2  ;;  %v545_v8 = vmax.f32 %v399_v4, 0.0  ;;  %v410_v10 = vadd.f32 %v749_v6, %v1028_v34  ;;  %v273_v11 = vpop.f32.mrf.mxu0 }
  0xd5   :  { %v401_v12 = vpop.f32.mrf.mxu1  ;;  %578 = vst.msk [vmem:[%s1353_s3 + $0x20] sm:$0xff] %vm573_vm2, %v513_v7  ;;  %v516_v13 = vmax.f32 %v282_v9, 0.0  ;;  %v274_v15 = vadd.f32 %v1028_v34, %v273_v11 }
  0xd6   :  { %610 = vst.msk [vmem:[%s1353_s3 + $0x120] sm:$0xff] %vm573_vm2, %v545_v8  ;;  %v548_v14 = vmax.f32 %v410_v10, 0.0  ;;  %v402_v16 = vadd.f32 %v1028_v34, %v401_v12  ;;  %v720_v17 = vpop.f32.mrf.mxu0 }
  0xd7   :  { %v752_v18 = vpop.f32.mrf.mxu1  ;;  %581 = vst.msk [vmem:[%s1353_s3 + $0x38] sm:$0xff] %vm573_vm2, %v516_v13  ;;  %v514_v19 = vmax.f32 %v274_v15, 0.0  ;;  %v295_v21 = vadd.f32 %v720_v17, %v1028_v34 }
  0xd8   :  { %613 = vst.msk [vmem:[%s1353_s3 + $0x138] sm:$0xff] %vm573_vm2, %v548_v14  ;;  %v546_v20 = vmax.f32 %v402_v16, 0.0  ;;  %v423_v22 = vadd.f32 %v752_v18, %v1028_v34  ;;  %v286_v23 = vpop.f32.mrf.mxu0 }
  0xd9   :  { %v414_v24 = vpop.f32.mrf.mxu1  ;;  %579 = vst.msk [vmem:[%s1353_s3 + $0x28] sm:$0xff] %vm573_vm2, %v514_v19  ;;  %v519_v25 = vmax.f32 %v295_v21, 0.0  ;;  %v287_v27 = vadd.f32 %v1028_v34, %v286_v23 }
  0xda   :  { %611 = vst.msk [vmem:[%s1353_s3 + $0x128] sm:$0xff] %vm573_vm2, %v546_v20  ;;  %v551_v26 = vmax.f32 %v423_v22, 0.0  ;;  %v415_v28 = vadd.f32 %v1028_v34, %v414_v24  ;;  %v721_v29 = vpop.f32.mrf.mxu0 }
  0xdb   :  { %v753_v30 = vpop.f32.mrf.mxu1  ;;  %584 = vst.msk [vmem:[%s1353_s3 + $0x50] sm:$0xff] %vm573_vm2, %v519_v25  ;;  %v517_v31 = vmax.f32 %v287_v27, 0.0  ;;  %v298_v33 = vadd.f32 %v721_v29, %v1028_v34 }
  0xdc   :  { %616 = vst.msk [vmem:[%s1353_s3 + $0x150] sm:$0xff] %vm573_vm2, %v551_v26  ;;  %v549_v32 = vmax.f32 %v415_v28, 0.0  ;;  %v426_v35 = vadd.f32 %v753_v30, %v1028_v34  ;;  %v289_v36 = vpop.f32.mrf.mxu0 }
  0xdd   :  { %v417_v37 = vpop.f32.mrf.mxu1  ;;  %582 = vst.msk [vmem:[%s1353_s3 + $0x40] sm:$0xff] %vm573_vm2, %v517_v31  ;;  %v520_v38 = vmax.f32 %v298_v33, 0.0  ;;  %v290_v40 = vadd.f32 %v1028_v34, %v289_v36 }
  0xde   :  { %614 = vst.msk [vmem:[%s1353_s3 + $0x140] sm:$0xff] %vm573_vm2, %v549_v32  ;;  %v552_v39 = vmax.f32 %v426_v35, 0.0  ;;  %v418_v41 = vadd.f32 %v1028_v34, %v417_v37  ;;  %v724_v42 = vpop.f32.mrf.mxu0 }
  0xdf   :  { %v756_v43 = vpop.f32.mrf.mxu1  ;;  %585 = vst.msk [vmem:[%s1353_s3 + $0x58] sm:$0xff] %vm573_vm2, %v520_v38  ;;  %v518_v44 = vmax.f32 %v290_v40, 0.0  ;;  %v311_v46 = vadd.f32 %v724_v42, %v1028_v34 }
  0xe0   :  { %617 = vst.msk [vmem:[%s1353_s3 + $0x158] sm:$0xff] %vm573_vm2, %v552_v39  ;;  %v550_v45 = vmax.f32 %v418_v41, 0.0  ;;  %v439_v47 = vadd.f32 %v756_v43, %v1028_v34  ;;  %v302_v48 = vpop.f32.mrf.mxu0 }
  0xe1   :  { %v430_v49 = vpop.f32.mrf.mxu1  ;;  %583 = vst.msk [vmem:[%s1353_s3 + $0x48] sm:$0xff] %vm573_vm2, %v518_v44  ;;  %v523_v50 = vmax.f32 %v311_v46, 0.0  ;;  %v303_v52 = vadd.f32 %v1028_v34, %v302_v48 }
  0xe2   :  { %615 = vst.msk [vmem:[%s1353_s3 + $0x148] sm:$0xff] %vm573_vm2, %v550_v45  ;;  %v555_v51 = vmax.f32 %v439_v47, 0.0  ;;  %v431_v53 = vadd.f32 %v1028_v34, %v430_v49  ;;  %v725_v54 = vpop.f32.mrf.mxu0 }
  0xe3   :  { %v757_v55 = vpop.f32.mrf.mxu1  ;;  %588 = vst.msk [vmem:[%s1353_s3 + $0x70] sm:$0xff] %vm573_vm2, %v523_v50  ;;  %v521_v56 = vmax.f32 %v303_v52, 0.0  ;;  %v314_v58 = vadd.f32 %v725_v54, %v1028_v34 }
  0xe4   :  { %620 = vst.msk [vmem:[%s1353_s3 + $0x170] sm:$0xff] %vm573_vm2, %v555_v51  ;;  %v553_v57 = vmax.f32 %v431_v53, 0.0  ;;  %v442_v59 = vadd.f32 %v757_v55, %v1028_v34  ;;  %v305_v60 = vpop.f32.mrf.mxu0 }
  0xe5   :  { %v433_v61 = vpop.f32.mrf.mxu1  ;;  %586 = vst.msk [vmem:[%s1353_s3 + $0x60] sm:$0xff] %vm573_vm2, %v521_v56  ;;  %v524_v62 = vmax.f32 %v314_v58, 0.0  ;;  %v306_v0 = vadd.f32 %v1028_v34, %v305_v60 }
  0xe6   :  { %618 = vst.msk [vmem:[%s1353_s3 + $0x160] sm:$0xff] %vm573_vm2, %v553_v57  ;;  %v556_v63 = vmax.f32 %v442_v59, 0.0  ;;  %v434_v1 = vadd.f32 %v1028_v34, %v433_v61  ;;  %v728_v2 = vpop.f32.mrf.mxu0 }
  0xe7   :  { %v760_v3 = vpop.f32.mrf.mxu1  ;;  %589 = vst.msk [vmem:[%s1353_s3 + $0x78] sm:$0xff] %vm573_vm2, %v524_v62  ;;  %v522_v4 = vmax.f32 %v306_v0, 0.0  ;;  %v327_v6 = vadd.f32 %v728_v2, %v1028_v34 }
  0xe8   :  { %621 = vst.msk [vmem:[%s1353_s3 + $0x178] sm:$0xff] %vm573_vm2, %v556_v63  ;;  %v554_v5 = vmax.f32 %v434_v1, 0.0  ;;  %v455_v7 = vadd.f32 %v760_v3, %v1028_v34  ;;  %v318_v8 = vpop.f32.mrf.mxu0 }
  0xe9   :  { %v446_v9 = vpop.f32.mrf.mxu1  ;;  %587 = vst.msk [vmem:[%s1353_s3 + $0x68] sm:$0xff] %vm573_vm2, %v522_v4  ;;  %v527_v10 = vmax.f32 %v327_v6, 0.0  ;;  %v319_v12 = vadd.f32 %v1028_v34, %v318_v8 }
  0xea   :  { %619 = vst.msk [vmem:[%s1353_s3 + $0x168] sm:$0xff] %vm573_vm2, %v554_v5  ;;  %v559_v11 = vmax.f32 %v455_v7, 0.0  ;;  %v447_v13 = vadd.f32 %v1028_v34, %v446_v9  ;;  %v729_v14 = vpop.f32.mrf.mxu0 }
  0xeb   :  { %v761_v15 = vpop.f32.mrf.mxu1  ;;  %592 = vst.msk [vmem:[%s1353_s3 + $0x90] sm:$0xff] %vm573_vm2, %v527_v10  ;;  %v525_v16 = vmax.f32 %v319_v12, 0.0  ;;  %v330_v18 = vadd.f32 %v729_v14, %v1028_v34 }
  0xec   :  { %624 = vst.msk [vmem:[%s1353_s3 + $0x190] sm:$0xff] %vm573_vm2, %v559_v11  ;;  %v557_v17 = vmax.f32 %v447_v13, 0.0  ;;  %v458_v19 = vadd.f32 %v761_v15, %v1028_v34  ;;  %v321_v20 = vpop.f32.mrf.mxu0 }
  0xed   :  { %v449_v21 = vpop.f32.mrf.mxu1  ;;  %590 = vst.msk [vmem:[%s1353_s3 + $0x80] sm:$0xff] %vm573_vm2, %v525_v16  ;;  %v528_v22 = vmax.f32 %v330_v18, 0.0  ;;  %v322_v24 = vadd.f32 %v1028_v34, %v321_v20 }
  0xee   :  { %622 = vst.msk [vmem:[%s1353_s3 + $0x180] sm:$0xff] %vm573_vm2, %v557_v17  ;;  %v560_v23 = vmax.f32 %v458_v19, 0.0  ;;  %v450_v25 = vadd.f32 %v1028_v34, %v449_v21  ;;  %v732_v26 = vpop.f32.mrf.mxu0 }
  0xef   :  { %v764_v27 = vpop.f32.mrf.mxu1  ;;  %593 = vst.msk [vmem:[%s1353_s3 + $0x98] sm:$0xff] %vm573_vm2, %v528_v22  ;;  %v526_v28 = vmax.f32 %v322_v24, 0.0  ;;  %v343_v30 = vadd.f32 %v732_v26, %v1028_v34 }
  0xf0   :  { %625 = vst.msk [vmem:[%s1353_s3 + $0x198] sm:$0xff] %vm573_vm2, %v560_v23  ;;  %v558_v29 = vmax.f32 %v450_v25, 0.0  ;;  %v471_v31 = vadd.f32 %v764_v27, %v1028_v34  ;;  %v334_v32 = vpop.f32.mrf.mxu0 }
  0xf1   :  { %v462_v33 = vpop.f32.mrf.mxu1  ;;  %591 = vst.msk [vmem:[%s1353_s3 + $0x88] sm:$0xff] %vm573_vm2, %v526_v28  ;;  %v531_v35 = vmax.f32 %v343_v30, 0.0  ;;  %v335_v37 = vadd.f32 %v1028_v34, %v334_v32 }
  0xf2   :  { %623 = vst.msk [vmem:[%s1353_s3 + $0x188] sm:$0xff] %vm573_vm2, %v558_v29  ;;  %v563_v36 = vmax.f32 %v471_v31, 0.0  ;;  %v463_v38 = vadd.f32 %v1028_v34, %v462_v33  ;;  %v733_v39 = vpop.f32.mrf.mxu0 }
  0xf3   :  { %v765_v40 = vpop.f32.mrf.mxu1  ;;  %596 = vst.msk [vmem:[%s1353_s3 + $0xb0] sm:$0xff] %vm573_vm2, %v531_v35  ;;  %v529_v41 = vmax.f32 %v335_v37, 0.0  ;;  %v346_v43 = vadd.f32 %v733_v39, %v1028_v34 }
  0xf4   :  { %628 = vst.msk [vmem:[%s1353_s3 + $0x1b0] sm:$0xff] %vm573_vm2, %v563_v36  ;;  %v561_v42 = vmax.f32 %v463_v38, 0.0  ;;  %v474_v44 = vadd.f32 %v765_v40, %v1028_v34  ;;  %v337_v45 = vpop.f32.mrf.mxu0 }
  0xf5   :  { %v465_v46 = vpop.f32.mrf.mxu1  ;;  %594 = vst.msk [vmem:[%s1353_s3 + $0xa0] sm:$0xff] %vm573_vm2, %v529_v41  ;;  %v532_v47 = vmax.f32 %v346_v43, 0.0  ;;  %v338_v49 = vadd.f32 %v1028_v34, %v337_v45 }
  0xf6   :  { %626 = vst.msk [vmem:[%s1353_s3 + $0x1a0] sm:$0xff] %vm573_vm2, %v561_v42  ;;  %v564_v48 = vmax.f32 %v474_v44, 0.0  ;;  %v466_v50 = vadd.f32 %v1028_v34, %v465_v46  ;;  %v736_v51 = vpop.f32.mrf.mxu0 }
  0xf7   :  { %v768_v52 = vpop.f32.mrf.mxu1  ;;  %597 = vst.msk [vmem:[%s1353_s3 + $0xb8] sm:$0xff] %vm573_vm2, %v532_v47  ;;  %v530_v53 = vmax.f32 %v338_v49, 0.0  ;;  %v359_v55 = vadd.f32 %v736_v51, %v1028_v34 }
  0xf8   :  { %629 = vst.msk [vmem:[%s1353_s3 + $0x1b8] sm:$0xff] %vm573_vm2, %v564_v48  ;;  %v562_v54 = vmax.f32 %v466_v50, 0.0  ;;  %v487_v56 = vadd.f32 %v768_v52, %v1028_v34  ;;  %v350_v57 = vpop.f32.mrf.mxu0 }
  0xf9   :  { %v478_v58 = vpop.f32.mrf.mxu1  ;;  %595 = vst.msk [vmem:[%s1353_s3 + $0xa8] sm:$0xff] %vm573_vm2, %v530_v53  ;;  %v535_v59 = vmax.f32 %v359_v55, 0.0  ;;  %v351_v61 = vadd.f32 %v1028_v34, %v350_v57 }
  0xfa   :  { %627 = vst.msk [vmem:[%s1353_s3 + $0x1a8] sm:$0xff] %vm573_vm2, %v562_v54  ;;  %v567_v60 = vmax.f32 %v487_v56, 0.0  ;;  %v479_v62 = vadd.f32 %v1028_v34, %v478_v58  ;;  %v737_v63 = vpop.f32.mrf.mxu0 }
  0xfb   :  { %v769_v0 = vpop.f32.mrf.mxu1  ;;  %600 = vst.msk [vmem:[%s1353_s3 + $0xd0] sm:$0xff] %vm573_vm2, %v535_v59  ;;  %v533_v1 = vmax.f32 %v351_v61, 0.0  ;;  %v362_v3 = vadd.f32 %v737_v63, %v1028_v34 }
  0xfc   :  { %632 = vst.msk [vmem:[%s1353_s3 + $0x1d0] sm:$0xff] %vm573_vm2, %v567_v60  ;;  %v565_v2 = vmax.f32 %v479_v62, 0.0  ;;  %v490_v4 = vadd.f32 %v769_v0, %v1028_v34  ;;  %v353_v5 = vpop.f32.mrf.mxu0 }
  0xfd   :  { %v481_v6 = vpop.f32.mrf.mxu1  ;;  %598 = vst.msk [vmem:[%s1353_s3 + $0xc0] sm:$0xff] %vm573_vm2, %v533_v1  ;;  %v536_v7 = vmax.f32 %v362_v3, 0.0  ;;  %v354_v9 = vadd.f32 %v1028_v34, %v353_v5 }
  0xfe   :  { %630 = vst.msk [vmem:[%s1353_s3 + $0x1c0] sm:$0xff] %vm573_vm2, %v565_v2  ;;  %v568_v8 = vmax.f32 %v490_v4, 0.0  ;;  %v482_v10 = vadd.f32 %v1028_v34, %v481_v6  ;;  %v740_v11 = vpop.f32.mrf.mxu0 }
  0xff   :  { %v772_v12 = vpop.f32.mrf.mxu1  ;;  %601 = vst.msk [vmem:[%s1353_s3 + $0xd8] sm:$0xff] %vm573_vm2, %v536_v7  ;;  %v534_v13 = vmax.f32 %v354_v9, 0.0  ;;  %v375_v15 = vadd.f32 %v740_v11, %v1028_v34 }
 0x100   :  { %633 = vst.msk [vmem:[%s1353_s3 + $0x1d8] sm:$0xff] %vm573_vm2, %v568_v8  ;;  %v566_v14 = vmax.f32 %v482_v10, 0.0  ;;  %v503_v16 = vadd.f32 %v772_v12, %v1028_v34  ;;  %v366_v17 = vpop.f32.mrf.mxu0 }
 0x101   :  { %v494_v18 = vpop.f32.mrf.mxu1  ;;  %599 = vst.msk [vmem:[%s1353_s3 + $0xc8] sm:$0xff] %vm573_vm2, %v534_v13  ;;  %v539_v19 = vmax.f32 %v375_v15, 0.0  ;;  %v367_v21 = vadd.f32 %v1028_v34, %v366_v17 }
 0x102   :  { %631 = vst.msk [vmem:[%s1353_s3 + $0x1c8] sm:$0xff] %vm573_vm2, %v566_v14  ;;  %v571_v20 = vmax.f32 %v503_v16, 0.0  ;;  %v495_v22 = vadd.f32 %v1028_v34, %v494_v18  ;;  %v741_v23 = vpop.f32.mrf.mxu0 }
 0x103   :  { %v773_v24 = vpop.f32.mrf.mxu1  ;;  %604 = vst.msk [vmem:[%s1353_s3 + $0xf0] sm:$0xff] %vm573_vm2, %v539_v19  ;;  %v537_v25 = vmax.f32 %v367_v21, 0.0  ;;  %v378_v27 = vadd.f32 %v741_v23, %v1028_v34 }
 0x104   :  { %636 = vst.msk [vmem:[%s1353_s3 + $0x1f0] sm:$0xff] %vm573_vm2, %v571_v20  ;;  %v569_v26 = vmax.f32 %v495_v22, 0.0  ;;  %v506_v28 = vadd.f32 %v773_v24, %v1028_v34  ;;  %v369_v29 = vpop.f32.mrf.mxu0 }
 0x105   :  { %v497_v30 = vpop.f32.mrf.mxu1  ;;  %602 = vst.msk [vmem:[%s1353_s3 + $0xe0] sm:$0xff] %vm573_vm2, %v537_v25  ;;  %v540_v31 = vmax.f32 %v378_v27, 0.0  ;;  %v370_v33 = vadd.f32 %v1028_v34, %v369_v29 }
 0x106   :  { %634 = vst.msk [vmem:[%s1353_s3 + $0x1e0] sm:$0xff] %vm573_vm2, %v569_v26  ;;  %v572_v32 = vmax.f32 %v506_v28, 0.0  ;;  %v498_v35 = vadd.f32 %v1028_v34, %v497_v30 }
 0x107   :  { %605 = vst.msk [vmem:[%s1353_s3 + $0xf8] sm:$0xff] %vm573_vm2, %v540_v31  ;;  %v538_v36 = vmax.f32 %v370_v33, 0.0 }
 0x108   :  { %637 = vst.msk [vmem:[%s1353_s3 + $0x1f8] sm:$0xff] %vm573_vm2, %v572_v32  ;;  %v570_v37 = vmax.f32 %v498_v35, 0.0 }
 0x109   :  { %603 = vst.msk [vmem:[%s1353_s3 + $0xe8] sm:$0xff] %vm573_vm2, %v538_v36 }
 0x10a   :  { %635 = vst.msk [vmem:[%s1353_s3 + $0x1e8] sm:$0xff] %vm573_vm2, %v570_v37 }

// kernel: conv_trans_block_fwd.11
= control target key start
LH: loop header
LB: loop body
LE: loop exit
PB: predicated region body
PF: predicated region fallthrough
CT: control target
= control target key end

     0   :  { %s2125_s9 = smov 0   ;;  %s3641_s0 = inlined_call_operand.vmem [shape: f32[2,16,16,8], index: 0, kind: input, shape index: {}]   ;;  %s3642_s1 = inlined_call_operand.vmem [shape: f32[3,3,8], index: 1, kind: input, shape index: {}]   ;;  %s3643_s2 = inlined_call_operand.vmem [shape: f32[2,16,16,8], index: 2, kind: output, shape index: {}]  }
   0x1 LB: > { %s2079_s10 = sadd.s32 4294967295, %s2107_s9   ;;  %p2083_p0 = scmp.ge.s32.totalorder %s2107_s9, 1  ;;  %s2107_s9 = sphi %s2125_s9, %s12_s9  }
   0x2   : > { %p112_p1 = scmp.lt.s32.totalorder %s2107_s9, 3 }
   0x4   : > { %p113_p2 = pnand %p2083_p0, %p112_p1 }
   0x5   : > { %p2135_p3 = scmp.lt.s32.totalorder (!%p113_p2), %s2079_s10, 1 }
   0x6   : > { %116 = sbr.rel (%p113_p2) target bundleno = 335 (0x14f), region = 28 }
   0xb   : > { %vm144_vm0 = vcmask 64512   ;;  %vm147_vm1 = vcmask 58368   ;;  %v2109_v0 = vmov 0.0   ;;  %v322_v1 = vlaneseq  ;;  %s3646_s10 = smov (!%p2135_p3, %s2079_s10), 1  ;;  %v319_v12 = vld [vmem:[%s3642_s1] sm:$0x7] }
   0xc   : > { %145 = vst.msk [vmem:[#allocation2] sm:$0xff] %vm144_vm0, %v2109_v0  ;;  %146 = vst.msk [vmem:[#allocation2 + $0x8] sm:$0xff] %vm144_vm0, %v2109_v0  ;;  %s2090_s12 = sshll.u32 %s3646_s10, 8  ;;  %v320_v16 = vld [vmem:[%s3642_s1 + $0x4] sm:$0x7]  ;;  %vm490_vm2 = vcmask 1046528  }
   0xd   : > { %149 = vst.msk [vmem:[#allocation2 + $0x18] sm:$0xff] %vm144_vm0, %v2109_v0  ;;  %150 = vst.msk [vmem:[#allocation2 + $0x20] sm:$0xff] %vm144_vm0, %v2109_v0  ;;  %s2205_s15 = scalar_lea.vmem %s3641_s0, %s2090_s12  ;;  %v323_v2 = vshrl.u32 %v322_v1, 7  ;;  %v321_v26 = vld [vmem:[%s3642_s1 + $0x8] sm:$0x7]  ;;  %vm735_vm3 = vcmask 1045504   ;;  %s2393_s24 = scalar_lea.vmem %s3643_s2, %s2090_s12 }
   0xe   : > { %152 = vst.msk [vmem:[#allocation2 + $0x30] sm:$0xff] %vm144_vm0, %v2109_v0  ;;  %153 = vst.msk [vmem:[#allocation2 + $0x38] sm:$0xff] %vm144_vm0, %v2109_v0  ;;  %v200_v3 = vld [vmem:[%s2205_s15] sm:$0xff]  ;;  %v201_v4 = vld [vmem:[%s2205_s15 + $0x8] sm:$0xff] }
   0xf   : > { %155 = vst.msk [vmem:[#allocation2 + $0x48] sm:$0xff] %vm144_vm0, %v2109_v0  ;;  %156 = vst.msk [vmem:[#allocation2 + $0x50] sm:$0xff] %vm144_vm0, %v2109_v0  ;;  %v202_v5 = vld [vmem:[%s2205_s15 + $0x10] sm:$0xff]  ;;  %v203_v6 = vld [vmem:[%s2205_s15 + $0x18] sm:$0xff]  ;;  %v392_v17 = vsub.s32 1, %v323_v2  ;;  %v637_v18 = vsub.s32 2, %v323_v2 }
  0x10   : > { %158 = vst.msk [vmem:[#allocation2 + $0x60] sm:$0xff] %vm144_vm0, %v2109_v0  ;;  %159 = vst.msk [vmem:[#allocation2 + $0x68] sm:$0xff] %vm144_vm0, %v2109_v0  ;;  %v204_v7 = vld [vmem:[%s2205_s15 + $0x20] sm:$0xff]  ;;  %v205_v8 = vld [vmem:[%s2205_s15 + $0x28] sm:$0xff]  ;;  %v324_v22 = vsub.s32 0, %v323_v2 }
  0x11   : > { %161 = vst.msk [vmem:[#allocation2 + $0x78] sm:$0xff] %vm144_vm0, %v2109_v0  ;;  %162 = vst.msk [vmem:[#allocation2 + $0x80] sm:$0xff] %vm144_vm0, %v2109_v0  ;;  %v206_v9 = vld [vmem:[%s2205_s15 + $0x30] sm:$0xff]  ;;  %v207_v10 = vld [vmem:[%s2205_s15 + $0x38] sm:$0xff]  ;;  %v2261_v33 = vrot.slane %v319_v12, %v392_v17  ;;  %v2263_v34 = vrot.slane %v319_v12, %v637_v18  ;;  %v2273_v39 = vrot.slane %v320_v16, %v392_v17 }
  0x12   : > { %164 = vst.msk [vmem:[#allocation2 + $0x90] sm:$0xff] %vm144_vm0, %v2109_v0  ;;  %165 = vst.msk [vmem:[#allocation2 + $0x98] sm:$0xff] %vm144_vm0, %v2109_v0  ;;  %v208_v11 = vld [vmem:[%s2205_s15 + $0x40] sm:$0xff]  ;;  %v209_v13 = vld [vmem:[%s2205_s15 + $0x48] sm:$0xff]  ;;  %v2271_v38 = vrot.slane %v319_v12, %v324_v22  ;;  %v2281_v43 = vrot.slane %v320_v16, %v637_v18  ;;  %v2288_v47 = vrot.slane %v320_v16, %v324_v22 }
  0x13   : > { %167 = vst.msk [vmem:[#allocation2 + $0xa8] sm:$0xff] %vm144_vm0, %v2109_v0  ;;  %168 = vst.msk [vmem:[#allocation2 + $0xb0] sm:$0xff] %vm144_vm0, %v2109_v0  ;;  %v210_v14 = vld [vmem:[%s2205_s15 + $0x50] sm:$0xff]  ;;  %v211_v15 = vld [vmem:[%s2205_s15 + $0x58] sm:$0xff]  ;;  %v2290_v48 = vrot.slane %v321_v26, %v324_v22  ;;  %v2300_v54 = vrot.slane %v321_v26, %v392_v17  ;;  %v2302_v55 = vrot.slane %v321_v26, %v637_v18 }
  0x14   : > { %170 = vst.msk [vmem:[#allocation2 + $0xc0] sm:$0xff] %vm144_vm0, %v2109_v0  ;;  %171 = vst.msk [vmem:[#allocation2 + $0xc8] sm:$0xff] %vm144_vm0, %v2109_v0  ;;  %v212_v19 = vld [vmem:[%s2205_s15 + $0x60] sm:$0xff]  ;;  %v213_v20 = vld [vmem:[%s2205_s15 + $0x68] sm:$0xff] }
  0x15   : > { %173 = vst.msk [vmem:[#allocation2 + $0xd8] sm:$0xff] %vm144_vm0, %v2109_v0  ;;  %174 = vst.msk [vmem:[#allocation2 + $0xe0] sm:$0xff] %vm144_vm0, %v2109_v0  ;;  %v214_v21 = vld [vmem:[%s2205_s15 + $0x70] sm:$0xff]  ;;  %v215_v23 = vld [vmem:[%s2205_s15 + $0x78] sm:$0xff] }
  0x16   : > { %176 = vst.msk [vmem:[#allocation2 + $0xf0] sm:$0xff] %vm144_vm0, %v2109_v0  ;;  %177 = vst.msk [vmem:[#allocation2 + $0xf8] sm:$0xff] %vm144_vm0, %v2109_v0  ;;  %v216_v24 = vld [vmem:[%s2205_s15 + $0x80] sm:$0xff]  ;;  %v217_v25 = vld [vmem:[%s2205_s15 + $0x88] sm:$0xff] }
  0x17   : > { %179 = vst.msk [vmem:[#allocation2 + $0x108] sm:$0xff] %vm144_vm0, %v2109_v0  ;;  %180 = vst.msk [vmem:[#allocation2 + $0x110] sm:$0xff] %vm144_vm0, %v2109_v0  ;;  %v218_v27 = vld [vmem:[%s2205_s15 + $0x90] sm:$0xff]  ;;  %v219_v28 = vld [vmem:[%s2205_s15 + $0x98] sm:$0xff] }
  0x18   : > { %182 = vst.msk [vmem:[#allocation2 + $0x120] sm:$0xff] %vm144_vm0, %v2109_v0  ;;  %183 = vst.msk [vmem:[#allocation2 + $0x128] sm:$0xff] %vm144_vm0, %v2109_v0  ;;  %v220_v29 = vld [vmem:[%s2205_s15 + $0xa0] sm:$0xff]  ;;  %v221_v30 = vld [vmem:[%s2205_s15 + $0xa8] sm:$0xff] }
  0x19   : > { %185 = vst.msk [vmem:[#allocation2 + $0x138] sm:$0xff] %vm144_vm0, %v2109_v0  ;;  %186 = vst.msk [vmem:[#allocation2 + $0x140] sm:$0xff] %vm144_vm0, %v2109_v0  ;;  %v222_v31 = vld [vmem:[%s2205_s15 + $0xb0] sm:$0xff]  ;;  %v223_v32 = vld [vmem:[%s2205_s15 + $0xb8] sm:$0xff] }
  0x1a   : > { %188 = vst.msk [vmem:[#allocation2 + $0x150] sm:$0xff] %vm144_vm0, %v2109_v0  ;;  %189 = vst.msk [vmem:[#allocation2 + $0x158] sm:$0xff] %vm144_vm0, %v2109_v0  ;;  %v224_v35 = vld [vmem:[%s2205_s15 + $0xc0] sm:$0xff]  ;;  %v225_v36 = vld [vmem:[%s2205_s15 + $0xc8] sm:$0xff] }
  0x1b   : > { %191 = vst.msk [vmem:[#allocation2 + $0x168] sm:$0xff] %vm144_vm0, %v2109_v0  ;;  %192 = vst.msk [vmem:[#allocation2 + $0x170] sm:$0xff] %vm144_vm0, %v2109_v0  ;;  %v226_v37 = vld [vmem:[%s2205_s15 + $0xd0] sm:$0xff]  ;;  %v227_v40 = vld [vmem:[%s2205_s15 + $0xd8] sm:$0xff] }
  0x1c   : > { %194 = vst.msk [vmem:[#allocation2 + $0x180] sm:$0xff] %vm144_vm0, %v2109_v0  ;;  %195 = vst.msk [vmem:[#allocation2 + $0x188] sm:$0xff] %vm144_vm0, %v2109_v0  ;;  %v228_v41 = vld [vmem:[%s2205_s15 + $0xe0] sm:$0xff]  ;;  %v229_v42 = vld [vmem:[%s2205_s15 + $0xe8] sm:$0xff] }
  0x1d   : > { %197 = vst.msk [vmem:[#allocation2 + $0x198] sm:$0xff] %vm144_vm0, %v2109_v0  ;;  %198 = vst.msk [vmem:[#allocation2 + $0x1a0] sm:$0xff] %vm144_vm0, %v2109_v0  ;;  %v230_v44 = vld [vmem:[%s2205_s15 + $0xf0] sm:$0xff]  ;;  %v231_v45 = vld [vmem:[%s2205_s15 + $0xf8] sm:$0xff] }
  0x1e   : > { %148 = vst.msk [vmem:[#allocation2 + $0x10] sm:$0x3] %vm147_vm1, %v2109_v0  ;;  %151 = vst.msk [vmem:[#allocation2 + $0x28] sm:$0x3] %vm147_vm1, %v2109_v0  ;;  %v265_v46 = vld [vmem:[#allocation2] sm:$0xff]  ;;  %v266_v49 = vld [vmem:[#allocation2 + $0x8] sm:$0xff] }
  0x1f   : > { %154 = vst.msk [vmem:[#allocation2 + $0x40] sm:$0x3] %vm147_vm1, %v2109_v0  ;;  %157 = vst.msk [vmem:[#allocation2 + $0x58] sm:$0x3] %vm147_vm1, %v2109_v0  ;;  %v394_v52 = vmul.f32 %v2261_v33, %v265_v46  ;;  %v639_v53 = vmul.f32 %v2263_v34, %v265_v46  ;;  %v326_v57 = vmul.f32 %v2271_v38, %v265_v46 }
  0x20   : > { %160 = vst.msk [vmem:[#allocation2 + $0x70] sm:$0x3] %vm147_vm1, %v2109_v0  ;;  %163 = vst.msk [vmem:[#allocation2 + $0x88] sm:$0x3] %vm147_vm1, %v2109_v0  ;;  %v395_v58 = vmul.f32 %v2261_v33, %v266_v49  ;;  %v640_v59 = vmul.f32 %v2263_v34, %v266_v49 }
  0x21   : > { %166 = vst.msk [vmem:[#allocation2 + $0xa0] sm:$0x3] %vm147_vm1, %v2109_v0  ;;  %169 = vst.msk [vmem:[#allocation2 + $0xb8] sm:$0x3] %vm147_vm1, %v2109_v0  ;;  %v491_v62 = vrot.slane %v394_v52, 1  ;;  %v736_v63 = vrot.slane %v639_v53, 2 }
  0x22   : > { %172 = vst.msk [vmem:[#allocation2 + $0xd0] sm:$0x3] %vm147_vm1, %v2109_v0  ;;  %175 = vst.msk [vmem:[#allocation2 + $0xe8] sm:$0x3] %vm147_vm1, %v2109_v0  ;;  %v492_v2 = vrot.slane %v395_v58, 1 }
  0x23   : > { %178 = vst.msk [vmem:[#allocation2 + $0x100] sm:$0x3] %vm147_vm1, %v2109_v0  ;;  %181 = vst.msk [vmem:[#allocation2 + $0x118] sm:$0x3] %vm147_vm1, %v2109_v0 }
  0x24   : > { %184 = vst.msk [vmem:[#allocation2 + $0x130] sm:$0x3] %vm147_vm1, %v2109_v0  ;;  %187 = vst.msk [vmem:[#allocation2 + $0x148] sm:$0x3] %vm147_vm1, %v2109_v0 }
  0x25   : > { %190 = vst.msk [vmem:[#allocation2 + $0x160] sm:$0x3] %vm147_vm1, %v2109_v0  ;;  %193 = vst.msk [vmem:[#allocation2 + $0x178] sm:$0x3] %vm147_vm1, %v2109_v0  ;;  %v267_v12 = vld [vmem:[#allocation2 + $0x10] sm:$0x3] }
  0x26   : > { %196 = vst.msk [vmem:[#allocation2 + $0x190] sm:$0x3] %vm147_vm1, %v2109_v0  ;;  %199 = vst.msk [vmem:[#allocation2 + $0x1a8] sm:$0x3] %vm147_vm1, %v2109_v0  ;;  %v641_v26 = vmul.f32 %v2263_v34, %v267_v12 }
  0x27   : > { %233 = vst.msk [vmem:[#allocation2 + $0x19] sm:$0xff] %vm144_vm0, %v200_v3  ;;  %234 = vst.msk [vmem:[#allocation2 + $0x21] sm:$0xff] %vm144_vm0, %v201_v4  ;;  %v737_v3 = vrot.slane %v640_v59, 2 }
  0x28   : > { %235 = vst.msk [vmem:[#allocation2 + $0x31] sm:$0xff] %vm144_vm0, %v202_v5  ;;  %236 = vst.msk [vmem:[#allocation2 + $0x39] sm:$0xff] %vm144_vm0, %v203_v6 }
  0x29   : > { %237 = vst.msk [vmem:[#allocation2 + $0x49] sm:$0xff] %vm144_vm0, %v204_v7  ;;  %238 = vst.msk [vmem:[#allocation2 + $0x51] sm:$0xff] %vm144_vm0, %v205_v8  ;;  %v493_v8 = vsel %vm490_vm2, %v491_v62, %v492_v2 }
  0x2a   : > { %239 = vst.msk [vmem:[#allocation2 + $0x61] sm:$0xff] %vm144_vm0, %v206_v9  ;;  %240 = vst.msk [vmem:[#allocation2 + $0x69] sm:$0xff] %vm144_vm0, %v207_v10  ;;  %v738_v9 = vsel %vm735_vm3, %v736_v63, %v737_v3 }
  0x2b   : > { %241 = vst.msk [vmem:[#allocation2 + $0x79] sm:$0xff] %vm144_vm0, %v208_v11  ;;  %242 = vst.msk [vmem:[#allocation2 + $0x81] sm:$0xff] %vm144_vm0, %v209_v13  ;;  %v603_v13 = vadd.f32 %v493_v8, %v326_v57 }
  0x2c   : > { %243 = vst.msk [vmem:[#allocation2 + $0x91] sm:$0xff] %vm144_vm0, %v210_v14  ;;  %244 = vst.msk [vmem:[#allocation2 + $0x99] sm:$0xff] %vm144_vm0, %v211_v15 }
  0x2d   : > { %245 = vst.msk [vmem:[#allocation2 + $0xa9] sm:$0xff] %vm144_vm0, %v212_v19  ;;  %246 = vst.msk [vmem:[#allocation2 + $0xb1] sm:$0xff] %vm144_vm0, %v213_v20  ;;  %v848_v22 = vadd.f32 %v738_v9, %v603_v13 }
  0x2e   : > { %247 = vst.msk [vmem:[#allocation2 + $0xc1] sm:$0xff] %vm144_vm0, %v214_v21  ;;  %248 = vst.msk [vmem:[#allocation2 + $0xc9] sm:$0xff] %vm144_vm0, %v215_v23  ;;  %v2294_v50 = vld [vmem:[#allocation2 + $0x18] sm:$0xff]  ;;  %v2296_v51 = vld [vmem:[#allocation2 + $0x20] sm:$0xff] }
  0x2f   : > { %249 = vst.msk [vmem:[#allocation2 + $0xd9] sm:$0xff] %vm144_vm0, %v216_v24  ;;  %250 = vst.msk [vmem:[#allocation2 + $0xe1] sm:$0xff] %vm144_vm0, %v217_v25  ;;  %v2304_v56 = vld [vmem:[#allocation2 + $0x30] sm:$0xff]  ;;  %v952_v60 = vmul.f32 %v2273_v39, %v2294_v50  ;;  %v2311_v61 = vld [vmem:[#allocation2 + $0x38] sm:$0xff]  ;;  %v953_v0 = vmul.f32 %v2273_v39, %v2296_v51  ;;  %v1196_v1 = vmul.f32 %v2281_v43, %v2294_v50 }
  0x30   : > { %251 = vst.msk [vmem:[#allocation2 + $0xf1] sm:$0xff] %vm144_vm0, %v218_v27  ;;  %252 = vst.msk [vmem:[#allocation2 + $0xf9] sm:$0xff] %vm144_vm0, %v219_v28  ;;  %v1197_v4 = vmul.f32 %v2281_v43, %v2296_v51  ;;  %v1508_v7 = vmul.f32 %v2300_v54, %v2304_v56  ;;  %v884_v10 = vmul.f32 %v2288_v47, %v2294_v50  ;;  %v2333_v17 = vld [vmem:[#allocation2 + $0x28] sm:$0x3]  ;;  %v2341_v24 = vld [vmem:[#allocation2 + $0x40] sm:$0x3] }
  0x31   : > { %253 = vst.msk [vmem:[#allocation2 + $0x109] sm:$0xff] %vm144_vm0, %v220_v29  ;;  %254 = vst.msk [vmem:[#allocation2 + $0x111] sm:$0xff] %vm144_vm0, %v221_v30  ;;  %v1048_v5 = vrot.slane %v952_v60, 1  ;;  %v1049_v6 = vrot.slane %v953_v0, 1  ;;  %v2327_v11 = vmul.f32 %v2300_v54, %v2311_v61  ;;  %v1292_v14 = vrot.slane %v1196_v1, 2 }
  0x32   : > { %255 = vst.msk [vmem:[#allocation2 + $0x121] sm:$0xff] %vm144_vm0, %v222_v31  ;;  %256 = vst.msk [vmem:[#allocation2 + $0x129] sm:$0xff] %vm144_vm0, %v223_v32  ;;  %v1440_v15 = vmul.f32 %v2290_v48, %v2304_v56  ;;  %v1752_v16 = vmul.f32 %v2302_v55, %v2304_v56  ;;  %v1293_v18 = vrot.slane %v1197_v4, 2  ;;  %v1604_v19 = vrot.slane %v1508_v7, 1 }
  0x33   : > { %257 = vst.msk [vmem:[#allocation2 + $0x139] sm:$0xff] %vm144_vm0, %v224_v35  ;;  %258 = vst.msk [vmem:[#allocation2 + $0x141] sm:$0xff] %vm144_vm0, %v225_v36  ;;  %v1605_v20 = vrot.slane %v2327_v11, 1  ;;  %v2338_v21 = vmul.f32 %v2302_v55, %v2311_v61  ;;  %v1050_v23 = vsel %vm490_vm2, %v1048_v5, %v1049_v6  ;;  %v396_v25 = vmul.f32 %v2261_v33, %v267_v12 }
  0x34   : > { %259 = vst.msk [vmem:[#allocation2 + $0x151] sm:$0xff] %vm144_vm0, %v226_v37  ;;  %260 = vst.msk [vmem:[#allocation2 + $0x159] sm:$0xff] %vm144_vm0, %v227_v40  ;;  %v1848_v27 = vrot.slane %v1752_v16, 2  ;;  %v327_v29 = vmul.f32 %v2271_v38, %v266_v49  ;;  %v954_v30 = vmul.f32 %v2273_v39, %v2333_v17  ;;  %v916_v31 = vadd.f32 %v884_v10, %v848_v22 }
  0x35   : > { %261 = vst.msk [vmem:[#allocation2 + $0x169] sm:$0xff] %vm144_vm0, %v228_v41  ;;  %262 = vst.msk [vmem:[#allocation2 + $0x171] sm:$0xff] %vm144_vm0, %v229_v42  ;;  %v1849_v28 = vrot.slane %v2338_v21, 2  ;;  %v494_v32 = vrot.slane %v396_v25, 1  ;;  %v739_v35 = vrot.slane %v641_v26, 2  ;;  %v1198_v36 = vmul.f32 %v2281_v43, %v2333_v17 }
  0x36   : > { %263 = vst.msk [vmem:[#allocation2 + $0x181] sm:$0xff] %vm144_vm0, %v230_v44  ;;  %264 = vst.msk [vmem:[#allocation2 + $0x189] sm:$0xff] %vm144_vm0, %v231_v45  ;;  %v1294_v37 = vsel %vm735_vm3, %v1292_v14, %v1293_v18  ;;  %v1606_v40 = vsel %vm490_vm2, %v1604_v19, %v1605_v20  ;;  %v1051_v41 = vrot.slane %v954_v30, 1  ;;  %v1510_v42 = vmul.f32 %v2300_v54, %v2341_v24  ;;  %v2395_v19 = vld [vmem:[#allocation2 + $0x48] sm:$0xff] }
  0x37   : > { %v1160_v44 = vadd.f32 %v1050_v23, %v916_v31  ;;  %v495_v45 = vsel %vm490_vm2, %v492_v2, %v494_v32  ;;  %v740_v46 = vsel %vm735_vm3, %v737_v3, %v739_v35  ;;  %v1295_v49 = vrot.slane %v1198_v36, 2 }
  0x38   : > { %v1850_v52 = vsel %vm735_vm3, %v1848_v27, %v1849_v28  ;;  %v604_v53 = vadd.f32 %v495_v45, %v327_v29  ;;  %v885_v57 = vmul.f32 %v2288_v47, %v2296_v51  ;;  %v1754_v58 = vmul.f32 %v2302_v55, %v2341_v24 }
  0x39   : > { %v1404_v59 = vadd.f32 %v1294_v37, %v1160_v44  ;;  %v1052_v60 = vsel %vm490_vm2, %v1049_v6, %v1051_v41  ;;  %v1441_v62 = vmul.f32 %v2290_v48, %v2311_v61  ;;  %v397_v63 = vmul.f32 %v2261_v33, %v2294_v50 }
  0x3a   : > { %v849_v0 = vadd.f32 %v740_v46, %v604_v53  ;;  %v1296_v1 = vsel %vm735_vm3, %v1293_v18, %v1295_v49  ;;  %v1607_v2 = vrot.slane %v1510_v42, 1  ;;  %v2374_v3 = vmul.f32 %v2261_v33, %v2296_v51 }
  0x3b   : > { %v1472_v4 = vadd.f32 %v1440_v15, %v1404_v59  ;;  %v496_v5 = vrot.slane %v397_v63, 1  ;;  %v642_v6 = vmul.f32 %v2263_v34, %v2294_v50  ;;  %v2380_v7 = vmul.f32 %v2263_v34, %v2296_v51 }
  0x3c   : > { %v917_v8 = vadd.f32 %v885_v57, %v849_v0  ;;  %v1851_v9 = vrot.slane %v1754_v58, 2  ;;  %v328_v10 = vmul.f32 %v2271_v38, %v2294_v50  ;;  %v497_v12 = vrot.slane %v2374_v3, 1  ;;  %v2397_v50 = vld [vmem:[#allocation2 + $0x50] sm:$0xff]  ;;  %v2432_v0 = vld [vmem:[#allocation2 + $0x58] sm:$0x3] }
  0x3d   : > { %v1716_v13 = vadd.f32 %v1606_v40, %v1472_v4  ;;  %v741_v14 = vrot.slane %v642_v6, 2  ;;  %v742_v16 = vrot.slane %v2380_v7, 2  ;;  %v955_v15 = vmul.f32 %v2273_v39, %v2304_v56 }
  0x3e   : > { %v1161_v18 = vadd.f32 %v1052_v60, %v917_v8  ;;  %v498_v22 = vsel %vm490_vm2, %v496_v5, %v497_v12  ;;  %v956_v23 = vmul.f32 %v2273_v39, %v2311_v61  ;;  %v1199_v25 = vmul.f32 %v2281_v43, %v2304_v56 }
  0x3f   : > { %v1960_v26 = vadd.f32 %v1850_v52, %v1716_v13  ;;  %v605_v27 = vadd.f32 %v498_v22, %v328_v10  ;;  %v743_v29 = vsel %vm735_vm3, %v741_v14, %v742_v16  ;;  %v886_v30 = vmul.f32 %v2288_v47, %v2304_v56 }
  0x40   : > { %v1405_v31 = vadd.f32 %v1296_v1, %v1161_v18  ;;  %v1053_v32 = vrot.slane %v955_v15, 1  ;;  %v1054_v35 = vrot.slane %v956_v23, 1  ;;  %v1200_v36 = vmul.f32 %v2281_v43, %v2311_v61 }
  0x41   : > { %1992 = vst.msk [vmem:[%s2393_s24] sm:$0xff] %vm144_vm0, %v1960_v26  ;;  %v850_v37 = vadd.f32 %v743_v29, %v605_v27  ;;  %v1297_v40 = vrot.slane %v1199_v25, 2  ;;  %v1511_v41 = vmul.f32 %v2300_v54, %v2395_v19  ;;  %v2415_v42 = vmul.f32 %v2300_v54, %v2397_v50 }
  0x42   : > { %v1473_v44 = vadd.f32 %v1441_v62, %v1405_v31  ;;  %v1298_v45 = vrot.slane %v1200_v36, 2  ;;  %v1755_v46 = vmul.f32 %v2302_v55, %v2395_v19  ;;  %v1608_v49 = vsel %vm490_vm2, %v1605_v20, %v1607_v2 }
  0x43   : > { %v1852_v52 = vsel %vm735_vm3, %v1849_v28, %v1851_v9  ;;  %v918_v53 = vadd.f32 %v886_v30, %v850_v37  ;;  %v2427_v57 = vmul.f32 %v2302_v55, %v2397_v50  ;;  %v1055_v59 = vsel %vm490_vm2, %v1053_v32, %v1054_v35 }
  0x44   : > { %v1717_v58 = vadd.f32 %v1608_v49, %v1473_v44  ;;  %v1609_v60 = vrot.slane %v1511_v41, 1  ;;  %v1610_v62 = vrot.slane %v2415_v42, 1  ;;  %v1299_v11 = vsel %vm735_vm3, %v1297_v40, %v1298_v45 }
  0x45   : > { %v1162_v63 = vadd.f32 %v1055_v59, %v918_v53  ;;  %v1853_v20 = vrot.slane %v1755_v46, 2  ;;  %v399_v21 = vmul.f32 %v2261_v33, %v2333_v17  ;;  %v1854_v1 = vrot.slane %v2427_v57, 2 }
  0x46   : > { %v1961_v28 = vadd.f32 %v1852_v52, %v1717_v58  ;;  %v644_v2 = vmul.f32 %v2263_v34, %v2333_v17  ;;  %v957_v3 = vmul.f32 %v2273_v39, %v2341_v24  ;;  %v1442_v5 = vmul.f32 %v2290_v48, %v2395_v19 }
  0x47   : > { %v1406_v4 = vadd.f32 %v1299_v11, %v1162_v63  ;;  %v499_v6 = vrot.slane %v399_v21, 1  ;;  %v1201_v7 = vmul.f32 %v2281_v43, %v2341_v24  ;;  %v329_v8 = vmul.f32 %v2271_v38, %v2296_v51  ;;  %v2488_v63 = vld [vmem:[#allocation2 + $0x68] sm:$0xff] }
  0x48   : > { %1993 = vst.msk [vmem:[%s2393_s24 + $0x8] sm:$0xff] %vm144_vm0, %v1961_v28  ;;  %v744_v9 = vrot.slane %v644_v2, 2  ;;  %v1056_v10 = vrot.slane %v957_v3, 1  ;;  %v1513_v17 = vmul.f32 %v2300_v54, %v2432_v0  ;;  %v1611_v14 = vsel %vm490_vm2, %v1609_v60, %v1610_v62  ;;  %v2486_v60 = vld [vmem:[#allocation2 + $0x60] sm:$0xff] }
  0x49   : > { %v1474_v13 = vadd.f32 %v1442_v5, %v1406_v4  ;;  %v500_v15 = vsel %vm490_vm2, %v497_v12, %v499_v6  ;;  %v1300_v18 = vrot.slane %v1201_v7, 2  ;;  %v1855_v22 = vsel %vm735_vm3, %v1853_v20, %v1854_v1 }
  0x4a   : > { %v606_v23 = vadd.f32 %v500_v15, %v329_v8  ;;  %v887_v51 = vmul.f32 %v2288_v47, %v2311_v61  ;;  %v1443_v25 = vmul.f32 %v2290_v48, %v2397_v50  ;;  %v745_v27 = vsel %vm735_vm3, %v742_v16, %v744_v9 }
  0x4b   : > { %v1718_v26 = vadd.f32 %v1611_v14, %v1474_v13  ;;  %v1057_v29 = vsel %vm490_vm2, %v1054_v35, %v1056_v10  ;;  %v1757_v12 = vmul.f32 %v2302_v55, %v2432_v0  ;;  %v1612_v31 = vrot.slane %v1513_v17, 1 }
  0x4c   : > { %v851_v30 = vadd.f32 %v745_v27, %v606_v23  ;;  %v400_v32 = vmul.f32 %v2261_v33, %v2304_v56  ;;  %v401_v36 = vmul.f32 %v2261_v33, %v2311_v61  ;;  %v1301_v40 = vsel %vm735_vm3, %v1298_v45, %v1300_v18 }
  0x4d   : > { %v1962_v37 = vadd.f32 %v1855_v22, %v1718_v26  ;;  %v645_v41 = vmul.f32 %v2263_v34, %v2304_v56  ;;  %v2475_v16 = vmul.f32 %v2263_v34, %v2311_v61  ;;  %v330_v44 = vmul.f32 %v2271_v38, %v2304_v56 }
  0x4e   : > { %v919_v35 = vadd.f32 %v887_v51, %v851_v30  ;;  %v501_v46 = vrot.slane %v400_v32, 1  ;;  %v502_v49 = vrot.slane %v401_v36, 1  ;;  %v958_v45 = vmul.f32 %v2273_v39, %v2395_v19  ;;  %v2526_v30 = vld [vmem:[#allocation2 + $0x70] sm:$0x3] }
  0x4f   : > { %1994 = vst.msk [vmem:[%s2393_s24 + $0x10] sm:$0xff] %vm144_vm0, %v1962_v37  ;;  %v746_v52 = vrot.slane %v645_v41, 2  ;;  %v747_v53 = vrot.slane %v2475_v16, 2  ;;  %v959_v58 = vmul.f32 %v2273_v39, %v2397_v50  ;;  %v1202_v11 = vmul.f32 %v2281_v43, %v2395_v19 }
  0x50   : > { %v1163_v59 = vadd.f32 %v1057_v29, %v919_v35  ;;  %v503_v56 = vsel %vm490_vm2, %v501_v46, %v502_v49  ;;  %v2495_v20 = vmul.f32 %v2281_v43, %v2397_v50  ;;  %v1856_v21 = vrot.slane %v1757_v12, 2 }
  0x51   : > { %v607_v28 = vadd.f32 %v503_v56, %v330_v44  ;;  %v1058_v2 = vrot.slane %v958_v45, 1  ;;  %v1059_v3 = vrot.slane %v959_v58, 1  ;;  %v748_v5 = vsel %vm735_vm3, %v746_v52, %v747_v53 }
  0x52   : > { %v1407_v4 = vadd.f32 %v1301_v40, %v1163_v59  ;;  %v1302_v6 = vrot.slane %v1202_v11, 2  ;;  %v1303_v7 = vrot.slane %v2495_v20, 2  ;;  %v888_v9 = vmul.f32 %v2288_v47, %v2395_v19 }
  0x53   : > { %v852_v8 = vadd.f32 %v748_v5, %v607_v28  ;;  %v1514_v10 = vmul.f32 %v2300_v54, %v2486_v60  ;;  %v2505_v17 = vmul.f32 %v2300_v54, %v2488_v63  ;;  %v1613_v14 = vsel %vm490_vm2, %v1610_v62, %v1612_v31 }
  0x54   : > { %v1475_v13 = vadd.f32 %v1443_v25, %v1407_v4  ;;  %v1758_v15 = vmul.f32 %v2302_v55, %v2486_v60  ;;  %v2514_v18 = vmul.f32 %v2302_v55, %v2488_v63  ;;  %v1857_v22 = vsel %vm735_vm3, %v1854_v1, %v1856_v21 }
  0x55   : > { %v920_v23 = vadd.f32 %v888_v9, %v852_v8  ;;  %v1060_v51 = vsel %vm490_vm2, %v1058_v2, %v1059_v3  ;;  %v1444_v25 = vmul.f32 %v2290_v48, %v2486_v60  ;;  %v1304_v62 = vsel %vm735_vm3, %v1302_v6, %v1303_v7 }
  0x56   : > { %v1719_v42 = vadd.f32 %v1613_v14, %v1475_v13  ;;  %v1614_v26 = vrot.slane %v1514_v10, 1  ;;  %v402_v27 = vmul.f32 %v2261_v33, %v2341_v24  ;;  %v1615_v12 = vrot.slane %v2505_v17, 1 }
  0x57   : > { %v1164_v29 = vadd.f32 %v1060_v51, %v920_v23  ;;  %v1858_v57 = vrot.slane %v1758_v15, 2  ;;  %v647_v1 = vmul.f32 %v2263_v34, %v2341_v24  ;;  %v1859_v32 = vrot.slane %v2514_v18, 2  ;;  %v2569_v51 = vld [vmem:[#allocation2 + $0x78] sm:$0xff] }
  0x58   : > { %v1963_v31 = vadd.f32 %v1857_v22, %v1719_v42  ;;  %v504_v36 = vrot.slane %v402_v27, 1  ;;  %v960_v37 = vmul.f32 %v2273_v39, %v2432_v0  ;;  %v331_v41 = vmul.f32 %v2271_v38, %v2311_v61 }
  0x59   : > { %v1408_v40 = vadd.f32 %v1304_v62, %v1164_v29  ;;  %v749_v16 = vrot.slane %v647_v1, 2  ;;  %v1204_v35 = vmul.f32 %v2281_v43, %v2432_v0  ;;  %v1516_v46 = vmul.f32 %v2300_v54, %v2526_v30 }
  0x5a   : > { %1995 = vst.msk [vmem:[%s2393_s24 + $0x18] sm:$0xff] %vm144_vm0, %v1963_v31  ;;  %v505_v44 = vsel %vm490_vm2, %v502_v49, %v504_v36  ;;  %v1061_v24 = vrot.slane %v960_v37, 1  ;;  %v1760_v52 = vmul.f32 %v2302_v55, %v2526_v30  ;;  %v1616_v58 = vsel %vm490_vm2, %v1614_v26, %v1615_v12 }
  0x5b   : > { %v1476_v45 = vadd.f32 %v1444_v25, %v1408_v40  ;;  %v608_v59 = vadd.f32 %v505_v44, %v331_v41  ;;  %v889_v61 = vmul.f32 %v2288_v47, %v2397_v50  ;;  %v1860_v56 = vsel %vm735_vm3, %v1858_v57, %v1859_v32  ;;  %v2571_v25 = vld [vmem:[#allocation2 + $0x80] sm:$0xff] }
  0x5c   : > { %v750_v11 = vsel %vm735_vm3, %v747_v53, %v749_v16  ;;  %v1305_v20 = vrot.slane %v1204_v35, 2  ;;  %v1445_v49 = vmul.f32 %v2290_v48, %v2488_v63  ;;  %v1062_v2 = vsel %vm490_vm2, %v1059_v3, %v1061_v24 }
  0x5d   : > { %v1720_v21 = vadd.f32 %v1616_v58, %v1476_v45  ;;  %v853_v28 = vadd.f32 %v750_v11, %v608_v59  ;;  %v403_v4 = vmul.f32 %v2261_v33, %v2395_v19  ;;  %v1617_v5 = vrot.slane %v1516_v46, 1 }
  0x5e   : > { %v1861_v6 = vrot.slane %v1760_v52, 2  ;;  %v404_v8 = vmul.f32 %v2261_v33, %v2397_v50  ;;  %v648_v53 = vmul.f32 %v2263_v34, %v2395_v19  ;;  %v2560_v13 = vmul.f32 %v2263_v34, %v2397_v50 }
  0x5f   : > { %v1964_v9 = vadd.f32 %v1860_v56, %v1720_v21  ;;  %v921_v10 = vadd.f32 %v889_v61, %v853_v28  ;;  %v506_v17 = vrot.slane %v403_v4, 1  ;;  %v332_v3 = vmul.f32 %v2271_v38, %v2395_v19 }
  0x60   : > { %v507_v14 = vrot.slane %v404_v8, 1  ;;  %v751_v15 = vrot.slane %v648_v53, 2  ;;  %v961_v18 = vmul.f32 %v2273_v39, %v2486_v60  ;;  %v1306_v23 = vsel %vm735_vm3, %v1303_v7, %v1305_v20  ;;  %v2602_v20 = vld [vmem:[#allocation2 + $0x88] sm:$0x3] }
  0x61   : > { %1996 = vst.msk [vmem:[%s2393_s24 + $0x20] sm:$0xff] %vm144_vm0, %v1964_v9  ;;  %v1165_v22 = vadd.f32 %v1062_v2, %v921_v10  ;;  %v752_v42 = vrot.slane %v2560_v13, 2  ;;  %v962_v62 = vmul.f32 %v2273_v39, %v2488_v63  ;;  %v1618_v19 = vsel %vm490_vm2, %v1615_v12, %v1617_v5 }
  0x62   : > { %v508_v26 = vsel %vm490_vm2, %v506_v17, %v507_v14  ;;  %v1205_v27 = vmul.f32 %v2281_v43, %v2486_v60  ;;  %v1206_v29 = vmul.f32 %v2281_v43, %v2488_v63  ;;  %v1063_v1 = vrot.slane %v961_v18, 1 }
  0x63   : > { %v1409_v7 = vadd.f32 %v1306_v23, %v1165_v22  ;;  %v609_v57 = vadd.f32 %v508_v26, %v332_v3  ;;  %v1064_v31 = vrot.slane %v962_v62, 1  ;;  %v1862_v36 = vsel %vm735_vm3, %v1859_v32, %v1861_v6 }
  0x64   : > { %v753_v37 = vsel %vm735_vm3, %v751_v15, %v752_v42  ;;  %v1517_v40 = vmul.f32 %v2300_v54, %v2569_v51  ;;  %v2588_v12 = vmul.f32 %v2300_v54, %v2571_v25  ;;  %v890_v35 = vmul.f32 %v2288_v47, %v2486_v60 }
  0x65   : > { %v1477_v41 = vadd.f32 %v1445_v49, %v1409_v7  ;;  %v854_v16 = vadd.f32 %v753_v37, %v609_v57  ;;  %v1761_v44 = vmul.f32 %v2302_v55, %v2569_v51  ;;  %v1307_v24 = vrot.slane %v1205_v27, 2 }
  0x66   : > { %v1308_v46 = vrot.slane %v1206_v29, 2  ;;  %v1446_v32 = vmul.f32 %v2290_v48, %v2569_v51  ;;  %v2598_v52 = vmul.f32 %v2302_v55, %v2571_v25  ;;  %v1065_v59 = vsel %vm490_vm2, %v1063_v1, %v1064_v31 }
  0x67   : > { %v1721_v45 = vadd.f32 %v1618_v19, %v1477_v41  ;;  %v922_v58 = vadd.f32 %v890_v35, %v854_v16  ;;  %v1619_v61 = vrot.slane %v1517_v40, 1  ;;  %v1620_v56 = vrot.slane %v2588_v12, 1 }
  0x68   : > { %v1863_v11 = vrot.slane %v1761_v44, 2  ;;  %v405_v49 = vmul.f32 %v2261_v33, %v2432_v0  ;;  %v650_v21 = vmul.f32 %v2263_v34, %v2432_v0  ;;  %v1864_v4 = vrot.slane %v2598_v52, 2 }
  0x69   : > { %v1965_v28 = vadd.f32 %v1862_v36, %v1721_v45  ;;  %v1166_v2 = vadd.f32 %v1065_v59, %v922_v58  ;;  %v963_v5 = vmul.f32 %v2273_v39, %v2526_v30  ;;  %v1309_v6 = vsel %vm735_vm3, %v1307_v24, %v1308_v46  ;;  %v2655_v59 = vld [vmem:[#allocation2 + $0x90] sm:$0xff] }
  0x6a   : > { %v509_v8 = vrot.slane %v405_v49, 1  ;;  %v754_v53 = vrot.slane %v650_v21, 2  ;;  %v1207_v9 = vmul.f32 %v2281_v43, %v2526_v30  ;;  %v333_v0 = vmul.f32 %v2271_v38, %v2397_v50 }
  0x6b   : > { %1997 = vst.msk [vmem:[%s2393_s24 + $0x28] sm:$0xff] %vm144_vm0, %v1965_v28  ;;  %v1410_v10 = vadd.f32 %v1309_v6, %v1166_v2  ;;  %v1066_v17 = vrot.slane %v963_v5, 1  ;;  %v1519_v13 = vmul.f32 %v2300_v54, %v2602_v20  ;;  %v1621_v3 = vsel %vm490_vm2, %v1619_v61, %v1620_v56  ;;  %v2657_v61 = vld [vmem:[#allocation2 + $0x98] sm:$0xff] }
  0x6c   : > { %v510_v15 = vsel %vm490_vm2, %v507_v14, %v509_v8  ;;  %v891_v18 = vmul.f32 %v2288_v47, %v2488_v63  ;;  %v1310_v22 = vrot.slane %v1207_v9, 2  ;;  %v1865_v62 = vsel %vm735_vm3, %v1863_v11, %v1864_v4 }
  0x6d   : > { %v1478_v23 = vadd.f32 %v1446_v32, %v1410_v10  ;;  %v610_v50 = vadd.f32 %v510_v15, %v333_v0  ;;  %v1447_v19 = vmul.f32 %v2290_v48, %v2571_v25  ;;  %v755_v26 = vsel %vm735_vm3, %v752_v42, %v754_v53 }
  0x6e   : > { %v1067_v27 = vsel %vm490_vm2, %v1064_v31, %v1066_v17  ;;  %v1763_v14 = vmul.f32 %v2302_v55, %v2602_v20  ;;  %v406_v29 = vmul.f32 %v2261_v33, %v2486_v60  ;;  %v1622_v1 = vrot.slane %v1519_v13, 1 }
  0x6f   : > { %v1722_v7 = vadd.f32 %v1621_v3, %v1478_v23  ;;  %v855_v57 = vadd.f32 %v755_v26, %v610_v50  ;;  %v407_v36 = vmul.f32 %v2261_v33, %v2488_v63  ;;  %v1311_v37 = vsel %vm735_vm3, %v1308_v46, %v1310_v22 }
  0x70   : > { %v511_v40 = vrot.slane %v406_v29, 1  ;;  %v651_v42 = vmul.f32 %v2263_v34, %v2486_v60  ;;  %v2644_v31 = vmul.f32 %v2263_v34, %v2488_v63  ;;  %v334_v35 = vmul.f32 %v2271_v38, %v2486_v60 }
  0x71   : > { %v1966_v41 = vadd.f32 %v1865_v62, %v1722_v7  ;;  %v923_v16 = vadd.f32 %v891_v18, %v855_v57  ;;  %v512_v44 = vrot.slane %v407_v36, 1  ;;  %v964_v46 = vmul.f32 %v2273_v39, %v2569_v51  ;;  %v2695_v7 = vld [vmem:[#allocation2 + $0xa0] sm:$0x3] }
  0x72   : > { %v756_v24 = vrot.slane %v651_v42, 2  ;;  %v757_v32 = vrot.slane %v2644_v31, 2  ;;  %v965_v45 = vmul.f32 %v2273_v39, %v2571_v25  ;;  %v1208_v60 = vmul.f32 %v2281_v43, %v2569_v51 }
  0x73   : > { %1998 = vst.msk [vmem:[%s2393_s24 + $0x30] sm:$0xff] %vm144_vm0, %v1966_v41  ;;  %v1167_v58 = vadd.f32 %v1067_v27, %v923_v16  ;;  %v513_v11 = vsel %vm490_vm2, %v511_v40, %v512_v44  ;;  %v2664_v49 = vmul.f32 %v2281_v43, %v2571_v25  ;;  %v1866_v21 = vrot.slane %v1763_v14, 2 }
  0x74   : > { %v611_v28 = vadd.f32 %v513_v11, %v334_v35  ;;  %v1068_v2 = vrot.slane %v964_v46, 1  ;;  %v1069_v5 = vrot.slane %v965_v45, 1  ;;  %v758_v8 = vsel %vm735_vm3, %v756_v24, %v757_v32 }
  0x75   : > { %v1411_v6 = vadd.f32 %v1311_v37, %v1167_v58  ;;  %v1312_v53 = vrot.slane %v1208_v60, 2  ;;  %v1313_v9 = vrot.slane %v2664_v49, 2  ;;  %v892_v0 = vmul.f32 %v2288_v47, %v2569_v51 }
  0x76   : > { %v856_v10 = vadd.f32 %v758_v8, %v611_v28  ;;  %v1520_v17 = vmul.f32 %v2300_v54, %v2655_v59  ;;  %v2674_v13 = vmul.f32 %v2300_v54, %v2657_v61  ;;  %v1623_v15 = vsel %vm490_vm2, %v1620_v56, %v1622_v1 }
  0x77   : > { %v1479_v3 = vadd.f32 %v1447_v19, %v1411_v6  ;;  %v1764_v18 = vmul.f32 %v2302_v55, %v2655_v59  ;;  %v2683_v22 = vmul.f32 %v2302_v55, %v2657_v61  ;;  %v1867_v23 = vsel %vm735_vm3, %v1864_v4, %v1866_v21 }
  0x78   : > { %v924_v62 = vadd.f32 %v892_v0, %v856_v10  ;;  %v1070_v50 = vsel %vm490_vm2, %v1068_v2, %v1069_v5  ;;  %v1448_v19 = vmul.f32 %v2290_v48, %v2655_v59  ;;  %v1314_v56 = vsel %vm735_vm3, %v1312_v53, %v1313_v9 }
  0x79   : > { %v1723_v12 = vadd.f32 %v1623_v15, %v1479_v3  ;;  %v1624_v26 = vrot.slane %v1520_v17, 1  ;;  %v408_v27 = vmul.f32 %v2261_v33, %v2526_v30  ;;  %v1625_v29 = vrot.slane %v2674_v13, 1 }
  0x7a   : > { %v1168_v14 = vadd.f32 %v1070_v50, %v924_v62  ;;  %v1868_v52 = vrot.slane %v1764_v18, 2  ;;  %v653_v4 = vmul.f32 %v2263_v34, %v2526_v30  ;;  %v1869_v1 = vrot.slane %v2683_v22, 2  ;;  %v2738_v50 = vld [vmem:[#allocation2 + $0xa8] sm:$0xff] }
  0x7b   : > { %v1967_v57 = vadd.f32 %v1867_v23, %v1723_v12  ;;  %v514_v36 = vrot.slane %v408_v27, 1  ;;  %v966_v37 = vmul.f32 %v2273_v39, %v2602_v20  ;;  %v335_v42 = vmul.f32 %v2271_v38, %v2488_v63 }
  0x7c   : > { %v1412_v40 = vadd.f32 %v1314_v56, %v1168_v14  ;;  %v759_v31 = vrot.slane %v653_v4, 2  ;;  %v1210_v41 = vmul.f32 %v2281_v43, %v2602_v20  ;;  %v1522_v35 = vmul.f32 %v2300_v54, %v2695_v7 }
  0x7d   : > { %1999 = vst.msk [vmem:[%s2393_s24 + $0x38] sm:$0xff] %vm144_vm0, %v1967_v57  ;;  %v515_v16 = vsel %vm490_vm2, %v512_v44, %v514_v36  ;;  %v1071_v30 = vrot.slane %v966_v37, 1  ;;  %v1766_v24 = vmul.f32 %v2302_v55, %v2695_v7  ;;  %v1626_v45 = vsel %vm490_vm2, %v1624_v26, %v1625_v29 }
  0x7e   : > { %v1480_v46 = vadd.f32 %v1448_v19, %v1412_v40  ;;  %v612_v58 = vadd.f32 %v515_v16, %v335_v42  ;;  %v893_v63 = vmul.f32 %v2288_v47, %v2571_v25  ;;  %v1870_v11 = vsel %vm735_vm3, %v1868_v52, %v1869_v1  ;;  %v2740_v19 = vld [vmem:[#allocation2 + $0xb0] sm:$0xff] }
  0x7f   : > { %v760_v60 = vsel %vm735_vm3, %v757_v32, %v759_v31  ;;  %v1315_v49 = vrot.slane %v1210_v41, 2  ;;  %v1449_v44 = vmul.f32 %v2290_v48, %v2657_v61  ;;  %v1072_v2 = vsel %vm490_vm2, %v1069_v5, %v1071_v30 }
  0x80   : > { %v1724_v21 = vadd.f32 %v1626_v45, %v1480_v46  ;;  %v857_v28 = vadd.f32 %v760_v60, %v612_v58  ;;  %v409_v6 = vmul.f32 %v2261_v33, %v2569_v51  ;;  %v1627_v8 = vrot.slane %v1522_v35, 1 }
  0x81   : > { %v1871_v53 = vrot.slane %v1766_v24, 2  ;;  %v410_v10 = vmul.f32 %v2261_v33, %v2571_v25  ;;  %v654_v32 = vmul.f32 %v2263_v34, %v2569_v51  ;;  %v2729_v3 = vmul.f32 %v2263_v34, %v2571_v25 }
  0x82   : > { %v1968_v0 = vadd.f32 %v1870_v11, %v1724_v21  ;;  %v925_v17 = vadd.f32 %v893_v63, %v857_v28  ;;  %v516_v13 = vrot.slane %v409_v6, 1  ;;  %v336_v5 = vmul.f32 %v2271_v38, %v2569_v51 }
  0x83   : > { %v517_v15 = vrot.slane %v410_v10, 1  ;;  %v761_v18 = vrot.slane %v654_v32, 2  ;;  %v967_v22 = vmul.f32 %v2273_v39, %v2655_v59  ;;  %v1316_v62 = vsel %vm735_vm3, %v1313_v9, %v1315_v49  ;;  %v2771_v49 = vld [vmem:[#allocation2 + $0xb8] sm:$0x3] }
  0x84   : > { %2000 = vst.msk [vmem:[%s2393_s24 + $0x40] sm:$0xff] %vm144_vm0, %v1968_v0  ;;  %v1169_v23 = vadd.f32 %v1072_v2, %v925_v17  ;;  %v762_v12 = vrot.slane %v2729_v3, 2  ;;  %v968_v56 = vmul.f32 %v2273_v39, %v2657_v61  ;;  %v1628_v51 = vsel %vm490_vm2, %v1625_v29, %v1627_v8 }
  0x85   : > { %v518_v26 = vsel %vm490_vm2, %v516_v13, %v517_v15  ;;  %v1211_v27 = vmul.f32 %v2281_v43, %v2655_v59  ;;  %v1212_v14 = vmul.f32 %v2281_v43, %v2657_v61  ;;  %v1073_v4 = vrot.slane %v967_v22, 1 }
  0x86   : > { %v1413_v9 = vadd.f32 %v1316_v62, %v1169_v23  ;;  %v613_v52 = vadd.f32 %v518_v26, %v336_v5  ;;  %v1074_v57 = vrot.slane %v968_v56, 1  ;;  %v1872_v36 = vsel %vm735_vm3, %v1869_v1, %v1871_v53 }
  0x87   : > { %v763_v37 = vsel %vm735_vm3, %v761_v18, %v762_v12  ;;  %v1523_v40 = vmul.f32 %v2300_v54, %v2738_v50  ;;  %v2757_v29 = vmul.f32 %v2300_v54, %v2740_v19  ;;  %v894_v41 = vmul.f32 %v2288_v47, %v2655_v59 }
  0x88   : > { %v1481_v42 = vadd.f32 %v1449_v44, %v1413_v9  ;;  %v858_v31 = vadd.f32 %v763_v37, %v613_v52  ;;  %v1767_v16 = vmul.f32 %v2302_v55, %v2738_v50  ;;  %v1317_v30 = vrot.slane %v1211_v27, 2 }
  0x89   : > { %v1318_v35 = vrot.slane %v1212_v14, 2  ;;  %v1450_v1 = vmul.f32 %v2290_v48, %v2738_v50  ;;  %v2767_v24 = vmul.f32 %v2302_v55, %v2740_v19  ;;  %v1075_v58 = vsel %vm490_vm2, %v1073_v4, %v1074_v57 }
  0x8a   : > { %v1725_v46 = vadd.f32 %v1628_v51, %v1481_v42  ;;  %v926_v45 = vadd.f32 %v894_v41, %v858_v31  ;;  %v1629_v63 = vrot.slane %v1523_v40, 1  ;;  %v1630_v11 = vrot.slane %v2757_v29, 1 }
  0x8b   : > { %v1873_v60 = vrot.slane %v1767_v16, 2  ;;  %v411_v44 = vmul.f32 %v2261_v33, %v2602_v20  ;;  %v656_v21 = vmul.f32 %v2263_v34, %v2602_v20  ;;  %v1874_v6 = vrot.slane %v2767_v24, 2 }
  0x8c   : > { %v1969_v28 = vadd.f32 %v1872_v36, %v1725_v46  ;;  %v1170_v2 = vadd.f32 %v1075_v58, %v926_v45  ;;  %v969_v8 = vmul.f32 %v2273_v39, %v2695_v7  ;;  %v1319_v53 = vsel %vm735_vm3, %v1317_v30, %v1318_v35  ;;  %v2824_v58 = vld [vmem:[#allocation2 + $0xc0] sm:$0xff] }
  0x8d   : > { %v519_v10 = vrot.slane %v411_v44, 1  ;;  %v764_v32 = vrot.slane %v656_v21, 2  ;;  %v1213_v0 = vmul.f32 %v2281_v43, %v2695_v7  ;;  %v337_v20 = vmul.f32 %v2271_v38, %v2571_v25 }
  0x8e   : > { %2001 = vst.msk [vmem:[%s2393_s24 + $0x48] sm:$0xff] %vm144_vm0, %v1969_v28  ;;  %v1414_v17 = vadd.f32 %v1319_v53, %v1170_v2  ;;  %v1076_v13 = vrot.slane %v969_v8, 1  ;;  %v1525_v3 = vmul.f32 %v2300_v54, %v2771_v49  ;;  %v1631_v5 = vsel %vm490_vm2, %v1629_v63, %v1630_v11  ;;  %v2826_v63 = vld [vmem:[#allocation2 + $0xc8] sm:$0xff] }
  0x8f   : > { %v520_v18 = vsel %vm490_vm2, %v517_v15, %v519_v10  ;;  %v895_v22 = vmul.f32 %v2288_v47, %v2657_v61  ;;  %v1320_v23 = vrot.slane %v1213_v0, 2  ;;  %v1875_v56 = vsel %vm735_vm3, %v1873_v60, %v1874_v6 }
  0x90   : > { %v1482_v62 = vadd.f32 %v1450_v1, %v1414_v17  ;;  %v614_v25 = vadd.f32 %v520_v18, %v337_v20  ;;  %v1451_v51 = vmul.f32 %v2290_v48, %v2740_v19  ;;  %v765_v26 = vsel %vm735_vm3, %v762_v12, %v764_v32 }
  0x91   : > { %v1077_v27 = vsel %vm490_vm2, %v1074_v57, %v1076_v13  ;;  %v1769_v15 = vmul.f32 %v2302_v55, %v2771_v49  ;;  %v412_v14 = vmul.f32 %v2261_v33, %v2655_v59  ;;  %v1632_v4 = vrot.slane %v1525_v3, 1 }
  0x92   : > { %v1726_v9 = vadd.f32 %v1631_v5, %v1482_v62  ;;  %v859_v52 = vadd.f32 %v765_v26, %v614_v25  ;;  %v413_v36 = vmul.f32 %v2261_v33, %v2657_v61  ;;  %v1321_v37 = vsel %vm735_vm3, %v1318_v35, %v1320_v23 }
  0x93   : > { %v521_v40 = vrot.slane %v412_v14, 1  ;;  %v657_v12 = vmul.f32 %v2263_v34, %v2655_v59  ;;  %v2813_v57 = vmul.f32 %v2263_v34, %v2657_v61  ;;  %v338_v41 = vmul.f32 %v2271_v38, %v2655_v59 }
  0x94   : > { %v1970_v42 = vadd.f32 %v1875_v56, %v1726_v9  ;;  %v927_v31 = vadd.f32 %v895_v22, %v859_v52  ;;  %v522_v16 = vrot.slane %v413_v36, 1  ;;  %v970_v35 = vmul.f32 %v2273_v39, %v2738_v50  ;;  %v2864_v9 = vld [vmem:[#allocation2 + $0xd0] sm:$0x3] }
  0x95   : > { %v766_v30 = vrot.slane %v657_v12, 2  ;;  %v767_v1 = vrot.slane %v2813_v57, 2  ;;  %v971_v46 = vmul.f32 %v2273_v39, %v2740_v19  ;;  %v1214_v59 = vmul.f32 %v2281_v43, %v2738_v50 }
  0x96   : > { %2002 = vst.msk [vmem:[%s2393_s24 + $0x50] sm:$0xff] %vm144_vm0, %v1970_v42  ;;  %v1171_v45 = vadd.f32 %v1077_v27, %v927_v31  ;;  %v523_v60 = vsel %vm490_vm2, %v521_v40, %v522_v16  ;;  %v2833_v44 = vmul.f32 %v2281_v43, %v2740_v19  ;;  %v1876_v21 = vrot.slane %v1769_v15, 2 }
  0x97   : > { %v615_v28 = vadd.f32 %v523_v60, %v338_v41  ;;  %v1078_v2 = vrot.slane %v970_v35, 1  ;;  %v1079_v8 = vrot.slane %v971_v46, 1  ;;  %v768_v10 = vsel %vm735_vm3, %v766_v30, %v767_v1 }
  0x98   : > { %v1415_v53 = vadd.f32 %v1321_v37, %v1171_v45  ;;  %v1322_v32 = vrot.slane %v1214_v59, 2  ;;  %v1323_v0 = vrot.slane %v2833_v44, 2  ;;  %v896_v20 = vmul.f32 %v2288_v47, %v2738_v50 }
  0x99   : > { %v860_v17 = vadd.f32 %v768_v10, %v615_v28  ;;  %v1526_v13 = vmul.f32 %v2300_v54, %v2824_v58  ;;  %v2843_v3 = vmul.f32 %v2300_v54, %v2826_v63  ;;  %v1633_v18 = vsel %vm490_vm2, %v1630_v11, %v1632_v4 }
  0x9a   : > { %v1483_v5 = vadd.f32 %v1451_v51, %v1415_v53  ;;  %v1770_v22 = vmul.f32 %v2302_v55, %v2824_v58  ;;  %v2852_v23 = vmul.f32 %v2302_v55, %v2826_v63  ;;  %v1877_v62 = vsel %vm735_vm3, %v1874_v6, %v1876_v21 }
  0x9b   : > { %v928_v56 = vadd.f32 %v896_v20, %v860_v17  ;;  %v1080_v25 = vsel %vm490_vm2, %v1078_v2, %v1079_v8  ;;  %v1452_v51 = vmul.f32 %v2290_v48, %v2824_v58  ;;  %v1324_v11 = vsel %vm735_vm3, %v1322_v32, %v1323_v0 }
  0x9c   : > { %v1727_v29 = vadd.f32 %v1633_v18, %v1483_v5  ;;  %v1634_v26 = vrot.slane %v1526_v13, 1  ;;  %v414_v27 = vmul.f32 %v2261_v33, %v2695_v7  ;;  %v1635_v14 = vrot.slane %v2843_v3, 1 }
  0x9d   : > { %v1172_v15 = vadd.f32 %v1080_v25, %v928_v56  ;;  %v1878_v24 = vrot.slane %v1770_v22, 2  ;;  %v659_v6 = vmul.f32 %v2263_v34, %v2695_v7  ;;  %v1879_v4 = vrot.slane %v2852_v23, 2  ;;  %v2907_v25 = vld [vmem:[#allocation2 + $0xd8] sm:$0xff] }
  0x9e   : > { %v1971_v52 = vadd.f32 %v1877_v62, %v1727_v29  ;;  %v524_v36 = vrot.slane %v414_v27, 1  ;;  %v972_v37 = vmul.f32 %v2273_v39, %v2771_v49  ;;  %v339_v12 = vmul.f32 %v2271_v38, %v2657_v61 }
  0x9f   : > { %v1416_v40 = vadd.f32 %v1324_v11, %v1172_v15  ;;  %v769_v57 = vrot.slane %v659_v6, 2  ;;  %v1216_v42 = vmul.f32 %v2281_v43, %v2771_v49  ;;  %v1528_v41 = vmul.f32 %v2300_v54, %v2864_v9 }
  0xa0   : > { %2003 = vst.msk [vmem:[%s2393_s24 + $0x58] sm:$0xff] %vm144_vm0, %v1971_v52  ;;  %v525_v31 = vsel %vm490_vm2, %v522_v16, %v524_v36  ;;  %v1081_v7 = vrot.slane %v972_v37, 1  ;;  %v1772_v30 = vmul.f32 %v2302_v55, %v2864_v9  ;;  %v1636_v46 = vsel %vm490_vm2, %v1634_v26, %v1635_v14 }
  0xa1   : > { %v1484_v35 = vadd.f32 %v1452_v51, %v1416_v40  ;;  %v616_v45 = vadd.f32 %v525_v31, %v339_v12  ;;  %v897_v61 = vmul.f32 %v2288_v47, %v2740_v19  ;;  %v1880_v60 = vsel %vm735_vm3, %v1878_v24, %v1879_v4  ;;  %v2909_v51 = vld [vmem:[#allocation2 + $0xe0] sm:$0xff] }
  0xa2   : > { %v770_v59 = vsel %vm735_vm3, %v767_v1, %v769_v57  ;;  %v1325_v44 = vrot.slane %v1216_v42, 2  ;;  %v1453_v16 = vmul.f32 %v2290_v48, %v2826_v63  ;;  %v1082_v2 = vsel %vm490_vm2, %v1079_v8, %v1081_v7 }
  0xa3   : > { %v1728_v21 = vadd.f32 %v1636_v46, %v1484_v35  ;;  %v861_v28 = vadd.f32 %v770_v59, %v616_v45  ;;  %v415_v53 = vmul.f32 %v2261_v33, %v2738_v50  ;;  %v1637_v10 = vrot.slane %v1528_v41, 1 }
  0xa4   : > { %v1881_v32 = vrot.slane %v1772_v30, 2  ;;  %v416_v17 = vmul.f32 %v2261_v33, %v2740_v19  ;;  %v660_v1 = vmul.f32 %v2263_v34, %v2738_v50  ;;  %v2898_v5 = vmul.f32 %v2263_v34, %v2740_v19 }
  0xa5   : > { %v1972_v20 = vadd.f32 %v1880_v60, %v1728_v21  ;;  %v929_v13 = vadd.f32 %v897_v61, %v861_v28  ;;  %v526_v3 = vrot.slane %v415_v53, 1  ;;  %v340_v8 = vmul.f32 %v2271_v38, %v2738_v50 }
  0xa6   : > { %v527_v18 = vrot.slane %v416_v17, 1  ;;  %v771_v22 = vrot.slane %v660_v1, 2  ;;  %v973_v23 = vmul.f32 %v2273_v39, %v2824_v58  ;;  %v1326_v56 = vsel %vm735_vm3, %v1323_v0, %v1325_v44  ;;  %v2940_v44 = vld [vmem:[#allocation2 + $0xe8] sm:$0x3] }
  0xa7   : > { %2004 = vst.msk [vmem:[%s2393_s24 + $0x60] sm:$0xff] %vm144_vm0, %v1972_v20  ;;  %v1173_v62 = vadd.f32 %v1082_v2, %v929_v13  ;;  %v772_v29 = vrot.slane %v2898_v5, 2  ;;  %v974_v11 = vmul.f32 %v2273_v39, %v2826_v63  ;;  %v1638_v50 = vsel %vm490_vm2, %v1635_v14, %v1637_v10 }
  0xa8   : > { %v528_v26 = vsel %vm490_vm2, %v526_v3, %v527_v18  ;;  %v1217_v27 = vmul.f32 %v2281_v43, %v2824_v58  ;;  %v1218_v15 = vmul.f32 %v2281_v43, %v2826_v63  ;;  %v1083_v6 = vrot.slane %v973_v23, 1 }
  0xa9   : > { %v1417_v0 = vadd.f32 %v1326_v56, %v1173_v62  ;;  %v617_v24 = vadd.f32 %v528_v26, %v340_v8  ;;  %v1084_v52 = vrot.slane %v974_v11, 1  ;;  %v1882_v36 = vsel %vm735_vm3, %v1879_v4, %v1881_v32 }
  0xaa   : > { %v773_v37 = vsel %vm735_vm3, %v771_v22, %v772_v29  ;;  %v1529_v40 = vmul.f32 %v2300_v54, %v2907_v25  ;;  %v2926_v14 = vmul.f32 %v2300_v54, %v2909_v51  ;;  %v898_v42 = vmul.f32 %v2288_v47, %v2824_v58 }
  0xab   : > { %v1485_v12 = vadd.f32 %v1453_v16, %v1417_v0  ;;  %v862_v57 = vadd.f32 %v773_v37, %v617_v24  ;;  %v1773_v31 = vmul.f32 %v2302_v55, %v2907_v25  ;;  %v1327_v7 = vrot.slane %v1217_v27, 2 }
  0xac   : > { %v1328_v41 = vrot.slane %v1218_v15, 2  ;;  %v1454_v4 = vmul.f32 %v2290_v48, %v2907_v25  ;;  %v2936_v30 = vmul.f32 %v2302_v55, %v2909_v51  ;;  %v1085_v45 = vsel %vm490_vm2, %v1083_v6, %v1084_v52 }
  0xad   : > { %v1729_v35 = vadd.f32 %v1638_v50, %v1485_v12  ;;  %v930_v46 = vadd.f32 %v898_v42, %v862_v57  ;;  %v1639_v61 = vrot.slane %v1529_v40, 1  ;;  %v1640_v60 = vrot.slane %v2926_v14, 1 }
  0xae   : > { %v1883_v59 = vrot.slane %v1773_v31, 2  ;;  %v417_v16 = vmul.f32 %v2261_v33, %v2771_v49  ;;  %v662_v21 = vmul.f32 %v2263_v34, %v2771_v49  ;;  %v1884_v53 = vrot.slane %v2936_v30, 2 }
  0xaf   : > { %v1973_v28 = vadd.f32 %v1882_v36, %v1729_v35  ;;  %v1174_v2 = vadd.f32 %v1085_v45, %v930_v46  ;;  %v975_v10 = vmul.f32 %v2273_v39, %v2864_v9  ;;  %v1329_v32 = vsel %vm735_vm3, %v1327_v7, %v1328_v41  ;;  %v2993_v45 = vld [vmem:[#allocation2 + $0xf0] sm:$0xff] }
  0xb0   : > { %v529_v17 = vrot.slane %v417_v16, 1  ;;  %v774_v1 = vrot.slane %v662_v21, 2  ;;  %v1219_v20 = vmul.f32 %v2281_v43, %v2864_v9  ;;  %v341_v49 = vmul.f32 %v2271_v38, %v2740_v19 }
  0xb1   : > { %2005 = vst.msk [vmem:[%s2393_s24 + $0x68] sm:$0xff] %vm144_vm0, %v1973_v28  ;;  %v1418_v13 = vadd.f32 %v1329_v32, %v1174_v2  ;;  %v1086_v3 = vrot.slane %v975_v10, 1  ;;  %v1531_v5 = vmul.f32 %v2300_v54, %v2940_v44  ;;  %v1641_v8 = vsel %vm490_vm2, %v1639_v61, %v1640_v60  ;;  %v2995_v61 = vld [vmem:[#allocation2 + $0xf8] sm:$0xff] }
  0xb2   : > { %v530_v22 = vsel %vm490_vm2, %v527_v18, %v529_v17  ;;  %v899_v23 = vmul.f32 %v2288_v47, %v2826_v63  ;;  %v1330_v62 = vrot.slane %v1219_v20, 2  ;;  %v1885_v11 = vsel %vm735_vm3, %v1883_v59, %v1884_v53 }
  0xb3   : > { %v1486_v56 = vadd.f32 %v1454_v4, %v1418_v13  ;;  %v618_v19 = vadd.f32 %v530_v22, %v341_v49  ;;  %v1455_v50 = vmul.f32 %v2290_v48, %v2909_v51  ;;  %v775_v26 = vsel %vm735_vm3, %v772_v29, %v774_v1 }
  0xb4   : > { %v1087_v27 = vsel %vm490_vm2, %v1084_v52, %v1086_v3  ;;  %v1775_v18 = vmul.f32 %v2302_v55, %v2940_v44  ;;  %v418_v15 = vmul.f32 %v2261_v33, %v2824_v58  ;;  %v1642_v6 = vrot.slane %v1531_v5, 1 }
  0xb5   : > { %v1730_v0 = vadd.f32 %v1641_v8, %v1486_v56  ;;  %v863_v24 = vadd.f32 %v775_v26, %v618_v19  ;;  %v419_v36 = vmul.f32 %v2261_v33, %v2826_v63  ;;  %v1331_v37 = vsel %vm735_vm3, %v1328_v41, %v1330_v62 }
  0xb6   : > { %v531_v40 = vrot.slane %v418_v15, 1  ;;  %v663_v29 = vmul.f32 %v2263_v34, %v2824_v58  ;;  %v2982_v52 = vmul.f32 %v2263_v34, %v2826_v63  ;;  %v342_v42 = vmul.f32 %v2271_v38, %v2824_v58 }
  0xb7   : > { %v1974_v12 = vadd.f32 %v1885_v11, %v1730_v0  ;;  %v931_v57 = vadd.f32 %v899_v23, %v863_v24  ;;  %v532_v31 = vrot.slane %v419_v36, 1  ;;  %v976_v41 = vmul.f32 %v2273_v39, %v2907_v25  ;;  %v3033_v0 = vld [vmem:[#allocation2 + $0x100] sm:$0x3] }
  0xb8   : > { %v776_v7 = vrot.slane %v663_v29, 2  ;;  %v777_v4 = vrot.slane %v2982_v52, 2  ;;  %v977_v35 = vmul.f32 %v2273_v39, %v2909_v51  ;;  %v1220_v58 = vmul.f32 %v2281_v43, %v2907_v25 }
  0xb9   : > { %2006 = vst.msk [vmem:[%s2393_s24 + $0x70] sm:$0xff] %vm144_vm0, %v1974_v12  ;;  %v1175_v46 = vadd.f32 %v1087_v27, %v931_v57  ;;  %v533_v59 = vsel %vm490_vm2, %v531_v40, %v532_v31  ;;  %v3002_v16 = vmul.f32 %v2281_v43, %v2909_v51  ;;  %v1886_v21 = vrot.slane %v1775_v18, 2 }
  0xba   : > { %v619_v28 = vadd.f32 %v533_v59, %v342_v42  ;;  %v1088_v2 = vrot.slane %v976_v41, 1  ;;  %v1089_v10 = vrot.slane %v977_v35, 1  ;;  %v778_v17 = vsel %vm735_vm3, %v776_v7, %v777_v4 }
  0xbb   : > { %v1419_v32 = vadd.f32 %v1331_v37, %v1175_v46  ;;  %v1332_v1 = vrot.slane %v1220_v58, 2  ;;  %v1333_v20 = vrot.slane %v3002_v16, 2  ;;  %v900_v49 = vmul.f32 %v2288_v47, %v2907_v25 }
  0xbc   : > { %v864_v13 = vadd.f32 %v778_v17, %v619_v28  ;;  %v1532_v3 = vmul.f32 %v2300_v54, %v2993_v45  ;;  %v3012_v5 = vmul.f32 %v2300_v54, %v2995_v61  ;;  %v1643_v22 = vsel %vm490_vm2, %v1640_v60, %v1642_v6 }
  0xbd   : > { %v1487_v8 = vadd.f32 %v1455_v50, %v1419_v32  ;;  %v1776_v23 = vmul.f32 %v2302_v55, %v2993_v45  ;;  %v3021_v62 = vmul.f32 %v2302_v55, %v2995_v61  ;;  %v1887_v56 = vsel %vm735_vm3, %v1884_v53, %v1886_v21 }
  0xbe   : > { %v932_v11 = vadd.f32 %v900_v49, %v864_v13  ;;  %v1090_v19 = vsel %vm490_vm2, %v1088_v2, %v1089_v10  ;;  %v1456_v50 = vmul.f32 %v2290_v48, %v2993_v45  ;;  %v1334_v60 = vsel %vm735_vm3, %v1332_v1, %v1333_v20 }
  0xbf   : > { %v1731_v14 = vadd.f32 %v1643_v22, %v1487_v8  ;;  %v1644_v26 = vrot.slane %v1532_v3, 1  ;;  %v420_v27 = vmul.f32 %v2261_v33, %v2864_v9  ;;  %v1645_v15 = vrot.slane %v3012_v5, 1 }
  0xc0   : > { %v1176_v18 = vadd.f32 %v1090_v19, %v932_v11  ;;  %v1888_v30 = vrot.slane %v1776_v23, 2  ;;  %v665_v53 = vmul.f32 %v2263_v34, %v2864_v9  ;;  %v1889_v6 = vrot.slane %v3021_v62, 2  ;;  %v3076_v19 = vld [vmem:[#allocation2 + $0x108] sm:$0xff] }
  0xc1   : > { %v1975_v24 = vadd.f32 %v1887_v56, %v1731_v14  ;;  %v534_v36 = vrot.slane %v420_v27, 1  ;;  %v978_v37 = vmul.f32 %v2273_v39, %v2940_v44  ;;  %v343_v29 = vmul.f32 %v2271_v38, %v2826_v63 }
  0xc2   : > { %v1420_v40 = vadd.f32 %v1334_v60, %v1176_v18  ;;  %v779_v52 = vrot.slane %v665_v53, 2  ;;  %v1222_v12 = vmul.f32 %v2281_v43, %v2940_v44  ;;  %v1534_v42 = vmul.f32 %v2300_v54, %v3033_v0 }
  0xc3   : > { %2007 = vst.msk [vmem:[%s2393_s24 + $0x78] sm:$0xff] %vm144_vm0, %v1975_v24  ;;  %v535_v57 = vsel %vm490_vm2, %v532_v31, %v534_v36  ;;  %v1091_v9 = vrot.slane %v978_v37, 1  ;;  %v1778_v7 = vmul.f32 %v2302_v55, %v3033_v0  ;;  %v1646_v35 = vsel %vm490_vm2, %v1644_v26, %v1645_v15 }
  0xc4   : > { %v1488_v41 = vadd.f32 %v1456_v50, %v1420_v40  ;;  %v620_v46 = vadd.f32 %v535_v57, %v343_v29  ;;  %v901_v63 = vmul.f32 %v2288_v47, %v2909_v51  ;;  %v1890_v59 = vsel %vm735_vm3, %v1888_v30, %v1889_v6  ;;  %v3078_v50 = vld [vmem:[#allocation2 + $0x110] sm:$0xff] }
  0xc5   : > { %v780_v58 = vsel %vm735_vm3, %v777_v4, %v779_v52  ;;  %v1335_v16 = vrot.slane %v1222_v12, 2  ;;  %v1457_v31 = vmul.f32 %v2290_v48, %v2995_v61  ;;  %v1092_v2 = vsel %vm490_vm2, %v1089_v10, %v1091_v9 }
  0xc6   : > { %v1732_v21 = vadd.f32 %v1646_v35, %v1488_v41  ;;  %v865_v28 = vadd.f32 %v780_v58, %v620_v46  ;;  %v421_v32 = vmul.f32 %v2261_v33, %v2907_v25  ;;  %v1647_v17 = vrot.slane %v1534_v42, 1 }
  0xc7   : > { %v1891_v1 = vrot.slane %v1778_v7, 2  ;;  %v422_v13 = vmul.f32 %v2261_v33, %v2909_v51  ;;  %v666_v4 = vmul.f32 %v2263_v34, %v2907_v25  ;;  %v3067_v8 = vmul.f32 %v2263_v34, %v2909_v51 }
  0xc8   : > { %v1976_v49 = vadd.f32 %v1890_v59, %v1732_v21  ;;  %v933_v3 = vadd.f32 %v901_v63, %v865_v28  ;;  %v536_v5 = vrot.slane %v421_v32, 1  ;;  %v344_v10 = vmul.f32 %v2271_v38, %v2907_v25 }
  0xc9   : > { %v537_v22 = vrot.slane %v422_v13, 1  ;;  %v781_v23 = vrot.slane %v666_v4, 2  ;;  %v979_v62 = vmul.f32 %v2273_v39, %v2993_v45  ;;  %v1336_v11 = vsel %vm735_vm3, %v1333_v20, %v1335_v16  ;;  %v3109_v16 = vld [vmem:[#allocation2 + $0x118] sm:$0x3] }
  0xca   : > { %2008 = vst.msk [vmem:[%s2393_s24 + $0x80] sm:$0xff] %vm144_vm0, %v1976_v49  ;;  %v1177_v56 = vadd.f32 %v1092_v2, %v933_v3  ;;  %v782_v14 = vrot.slane %v3067_v8, 2  ;;  %v980_v60 = vmul.f32 %v2273_v39, %v2995_v61  ;;  %v1648_v25 = vsel %vm490_vm2, %v1645_v15, %v1647_v17 }
  0xcb   : > { %v538_v26 = vsel %vm490_vm2, %v536_v5, %v537_v22  ;;  %v1223_v27 = vmul.f32 %v2281_v43, %v2993_v45  ;;  %v1224_v18 = vmul.f32 %v2281_v43, %v2995_v61  ;;  %v1093_v53 = vrot.slane %v979_v62, 1 }
  0xcc   : > { %v1421_v20 = vadd.f32 %v1336_v11, %v1177_v56  ;;  %v621_v30 = vadd.f32 %v538_v26, %v344_v10  ;;  %v1094_v24 = vrot.slane %v980_v60, 1  ;;  %v1892_v36 = vsel %vm735_vm3, %v1889_v6, %v1891_v1 }
  0xcd   : > { %v783_v37 = vsel %vm735_vm3, %v781_v23, %v782_v14  ;;  %v1535_v40 = vmul.f32 %v2300_v54, %v3076_v19  ;;  %v3095_v15 = vmul.f32 %v2300_v54, %v3078_v50  ;;  %v902_v12 = vmul.f32 %v2288_v47, %v2993_v45 }
  0xce   : > { %v1489_v29 = vadd.f32 %v1457_v31, %v1421_v20  ;;  %v866_v52 = vadd.f32 %v783_v37, %v621_v30  ;;  %v1779_v57 = vmul.f32 %v2302_v55, %v3076_v19  ;;  %v1337_v9 = vrot.slane %v1223_v27, 2 }
  0xcf   : > { %v1338_v42 = vrot.slane %v1224_v18, 2  ;;  %v1458_v6 = vmul.f32 %v2290_v48, %v3076_v19  ;;  %v3105_v7 = vmul.f32 %v2302_v55, %v3078_v50  ;;  %v1095_v46 = vsel %vm490_vm2, %v1093_v53, %v1094_v24 }
  0xd0   : > { %v1733_v41 = vadd.f32 %v1648_v25, %v1489_v29  ;;  %v934_v35 = vadd.f32 %v902_v12, %v866_v52  ;;  %v1649_v63 = vrot.slane %v1535_v40, 1  ;;  %v1650_v59 = vrot.slane %v3095_v15, 1 }
  0xd1   : > { %v1893_v58 = vrot.slane %v1779_v57, 2  ;;  %v423_v31 = vmul.f32 %v2261_v33, %v2940_v44  ;;  %v668_v21 = vmul.f32 %v2263_v34, %v2940_v44  ;;  %v1894_v32 = vrot.slane %v3105_v7, 2 }
  0xd2   : > { %v1977_v28 = vadd.f32 %v1892_v36, %v1733_v41  ;;  %v1178_v2 = vadd.f32 %v1095_v46, %v934_v35  ;;  %v981_v17 = vmul.f32 %v2273_v39, %v3033_v0  ;;  %v1339_v1 = vsel %vm735_vm3, %v1337_v9, %v1338_v42  ;;  %v3162_v46 = vld [vmem:[#allocation2 + $0x120] sm:$0xff] }
  0xd3   : > { %v539_v13 = vrot.slane %v423_v31, 1  ;;  %v784_v4 = vrot.slane %v668_v21, 2  ;;  %v1225_v49 = vmul.f32 %v2281_v43, %v3033_v0  ;;  %v345_v44 = vmul.f32 %v2271_v38, %v2909_v51 }
  0xd4   : > { %2009 = vst.msk [vmem:[%s2393_s24 + $0x88] sm:$0xff] %vm144_vm0, %v1977_v28  ;;  %v1422_v3 = vadd.f32 %v1339_v1, %v1178_v2  ;;  %v1096_v5 = vrot.slane %v981_v17, 1  ;;  %v1537_v8 = vmul.f32 %v2300_v54, %v3109_v16  ;;  %v1651_v10 = vsel %vm490_vm2, %v1649_v63, %v1650_v59  ;;  %v3164_v63 = vld [vmem:[#allocation2 + $0x128] sm:$0xff] }
  0xd5   : > { %v540_v23 = vsel %vm490_vm2, %v537_v22, %v539_v13  ;;  %v903_v62 = vmul.f32 %v2288_v47, %v2995_v61  ;;  %v1340_v56 = vrot.slane %v1225_v49, 2  ;;  %v1895_v60 = vsel %vm735_vm3, %v1893_v58, %v1894_v32 }
  0xd6   : > { %v1490_v11 = vadd.f32 %v1458_v6, %v1422_v3  ;;  %v622_v51 = vadd.f32 %v540_v23, %v345_v44  ;;  %v1459_v25 = vmul.f32 %v2290_v48, %v3078_v50  ;;  %v785_v26 = vsel %vm735_vm3, %v782_v14, %v784_v4 }
  0xd7   : > { %v1097_v27 = vsel %vm490_vm2, %v1094_v24, %v1096_v5  ;;  %v1781_v22 = vmul.f32 %v2302_v55, %v3109_v16  ;;  %v424_v18 = vmul.f32 %v2261_v33, %v2993_v45  ;;  %v1652_v53 = vrot.slane %v1537_v8, 1 }
  0xd8   : > { %v1734_v20 = vadd.f32 %v1651_v10, %v1490_v11  ;;  %v867_v30 = vadd.f32 %v785_v26, %v622_v51  ;;  %v425_v36 = vmul.f32 %v2261_v33, %v2995_v61  ;;  %v1341_v37 = vsel %vm735_vm3, %v1338_v42, %v1340_v56 }
  0xd9   : > { %v541_v40 = vrot.slane %v424_v18, 1  ;;  %v669_v14 = vmul.f32 %v2263_v34, %v2993_v45  ;;  %v3151_v24 = vmul.f32 %v2263_v34, %v2995_v61  ;;  %v346_v12 = vmul.f32 %v2271_v38, %v2993_v45 }
  0xda   : > { %v1978_v29 = vadd.f32 %v1895_v60, %v1734_v20  ;;  %v935_v52 = vadd.f32 %v903_v62, %v867_v30  ;;  %v542_v57 = vrot.slane %v425_v36, 1  ;;  %v982_v42 = vmul.f32 %v2273_v39, %v3076_v19  ;;  %v3202_v20 = vld [vmem:[#allocation2 + $0x130] sm:$0x3] }
  0xdb   : > { %v786_v9 = vrot.slane %v669_v14, 2  ;;  %v787_v6 = vrot.slane %v3151_v24, 2  ;;  %v983_v41 = vmul.f32 %v2273_v39, %v3078_v50  ;;  %v1226_v45 = vmul.f32 %v2281_v43, %v3076_v19 }
  0xdc   : > { %2010 = vst.msk [vmem:[%s2393_s24 + $0x90] sm:$0xff] %vm144_vm0, %v1978_v29  ;;  %v1179_v35 = vadd.f32 %v1097_v27, %v935_v52  ;;  %v543_v58 = vsel %vm490_vm2, %v541_v40, %v542_v57  ;;  %v3171_v31 = vmul.f32 %v2281_v43, %v3078_v50  ;;  %v1896_v21 = vrot.slane %v1781_v22, 2 }
  0xdd   : > { %v623_v28 = vadd.f32 %v543_v58, %v346_v12  ;;  %v1098_v2 = vrot.slane %v982_v42, 1  ;;  %v1099_v17 = vrot.slane %v983_v41, 1  ;;  %v788_v13 = vsel %vm735_vm3, %v786_v9, %v787_v6 }
  0xde   : > { %v1423_v1 = vadd.f32 %v1341_v37, %v1179_v35  ;;  %v1342_v4 = vrot.slane %v1226_v45, 2  ;;  %v1343_v49 = vrot.slane %v3171_v31, 2  ;;  %v904_v44 = vmul.f32 %v2288_v47, %v3076_v19 }
  0xdf   : > { %v868_v3 = vadd.f32 %v788_v13, %v623_v28  ;;  %v1538_v5 = vmul.f32 %v2300_v54, %v3162_v46  ;;  %v3181_v8 = vmul.f32 %v2300_v54, %v3164_v63  ;;  %v1653_v23 = vsel %vm490_vm2, %v1650_v59, %v1652_v53 }
  0xe0   : > { %v1491_v10 = vadd.f32 %v1459_v25, %v1423_v1  ;;  %v1782_v62 = vmul.f32 %v2302_v55, %v3162_v46  ;;  %v3190_v56 = vmul.f32 %v2302_v55, %v3164_v63  ;;  %v1897_v11 = vsel %vm735_vm3, %v1894_v32, %v1896_v21 }
  0xe1   : > { %v936_v60 = vadd.f32 %v904_v44, %v868_v3  ;;  %v1100_v51 = vsel %vm490_vm2, %v1098_v2, %v1099_v17  ;;  %v1460_v25 = vmul.f32 %v2290_v48, %v3162_v46  ;;  %v1344_v59 = vsel %vm735_vm3, %v1342_v4, %v1343_v49 }
  0xe2   : > { %v1735_v15 = vadd.f32 %v1653_v23, %v1491_v10  ;;  %v1654_v26 = vrot.slane %v1538_v5, 1  ;;  %v426_v27 = vmul.f32 %v2261_v33, %v3033_v0  ;;  %v1655_v18 = vrot.slane %v3181_v8, 1 }
  0xe3   : > { %v1180_v22 = vadd.f32 %v1100_v51, %v936_v60  ;;  %v1898_v7 = vrot.slane %v1782_v62, 2  ;;  %v671_v32 = vmul.f32 %v2263_v34, %v3033_v0  ;;  %v1899_v53 = vrot.slane %v3190_v56, 2  ;;  %v3245_v51 = vld [vmem:[#allocation2 + $0x138] sm:$0xff] }
  0xe4   : > { %v1979_v30 = vadd.f32 %v1897_v11, %v1735_v15  ;;  %v544_v36 = vrot.slane %v426_v27, 1  ;;  %v984_v37 = vmul.f32 %v2273_v39, %v3109_v16  ;;  %v347_v14 = vmul.f32 %v2271_v38, %v2995_v61 }
  0xe5   : > { %v1424_v40 = vadd.f32 %v1344_v59, %v1180_v22  ;;  %v789_v24 = vrot.slane %v671_v32, 2  ;;  %v1228_v29 = vmul.f32 %v2281_v43, %v3109_v16  ;;  %v1540_v12 = vmul.f32 %v2300_v54, %v3202_v20 }
  0xe6   : > { %2011 = vst.msk [vmem:[%s2393_s24 + $0x98] sm:$0xff] %vm144_vm0, %v1979_v30  ;;  %v545_v52 = vsel %vm490_vm2, %v542_v57, %v544_v36  ;;  %v1101_v0 = vrot.slane %v984_v37, 1  ;;  %v1784_v9 = vmul.f32 %v2302_v55, %v3202_v20  ;;  %v1656_v41 = vsel %vm490_vm2, %v1654_v26, %v1655_v18 }
  0xe7   : > { %v1492_v42 = vadd.f32 %v1460_v25, %v1424_v40  ;;  %v624_v35 = vadd.f32 %v545_v52, %v347_v14  ;;  %v905_v61 = vmul.f32 %v2288_v47, %v3078_v50  ;;  %v1900_v58 = vsel %vm735_vm3, %v1898_v7, %v1899_v53  ;;  %v3247_v25 = vld [vmem:[#allocation2 + $0x140] sm:$0xff] }
  0xe8   : > { %v790_v45 = vsel %vm735_vm3, %v787_v6, %v789_v24  ;;  %v1345_v31 = vrot.slane %v1228_v29, 2  ;;  %v1461_v57 = vmul.f32 %v2290_v48, %v3164_v63  ;;  %v1102_v2 = vsel %vm490_vm2, %v1099_v17, %v1101_v0 }
  0xe9   : > { %v1736_v21 = vadd.f32 %v1656_v41, %v1492_v42  ;;  %v869_v28 = vadd.f32 %v790_v45, %v624_v35  ;;  %v427_v1 = vmul.f32 %v2261_v33, %v3076_v19  ;;  %v1657_v13 = vrot.slane %v1540_v12, 1 }
  0xea   : > { %v1901_v4 = vrot.slane %v1784_v9, 2  ;;  %v428_v3 = vmul.f32 %v2261_v33, %v3078_v50  ;;  %v672_v6 = vmul.f32 %v2263_v34, %v3076_v19  ;;  %v3236_v10 = vmul.f32 %v2263_v34, %v3078_v50 }
  0xeb   : > { %v1980_v44 = vadd.f32 %v1900_v58, %v1736_v21  ;;  %v937_v5 = vadd.f32 %v905_v61, %v869_v28  ;;  %v546_v8 = vrot.slane %v427_v1, 1  ;;  %v348_v17 = vmul.f32 %v2271_v38, %v3076_v19 }
  0xec   : > { %v547_v23 = vrot.slane %v428_v3, 1  ;;  %v791_v62 = vrot.slane %v672_v6, 2  ;;  %v985_v56 = vmul.f32 %v2273_v39, %v3162_v46  ;;  %v1346_v60 = vsel %vm735_vm3, %v1343_v49, %v1345_v31  ;;  %v3278_v31 = vld [vmem:[#allocation2 + $0x148] sm:$0x3] }
  0xed   : > { %2012 = vst.msk [vmem:[%s2393_s24 + $0xa0] sm:$0xff] %vm144_vm0, %v1980_v44  ;;  %v1181_v11 = vadd.f32 %v1102_v2, %v937_v5  ;;  %v792_v15 = vrot.slane %v3236_v10, 2  ;;  %v986_v59 = vmul.f32 %v2273_v39, %v3164_v63  ;;  %v1658_v19 = vsel %vm490_vm2, %v1655_v18, %v1657_v13 }
  0xee   : > { %v548_v26 = vsel %vm490_vm2, %v546_v8, %v547_v23  ;;  %v1229_v27 = vmul.f32 %v2281_v43, %v3162_v46  ;;  %v1230_v22 = vmul.f32 %v2281_v43, %v3164_v63  ;;  %v1103_v32 = vrot.slane %v985_v56, 1 }
  0xef   : > { %v1425_v49 = vadd.f32 %v1346_v60, %v1181_v11  ;;  %v625_v7 = vadd.f32 %v548_v26, %v348_v17  ;;  %v1104_v30 = vrot.slane %v986_v59, 1  ;;  %v1902_v36 = vsel %vm735_vm3, %v1899_v53, %v1901_v4 }
  0xf0   : > { %v793_v37 = vsel %vm735_vm3, %v791_v62, %v792_v15  ;;  %v1541_v40 = vmul.f32 %v2300_v54, %v3245_v51  ;;  %v3264_v18 = vmul.f32 %v2300_v54, %v3247_v25  ;;  %v906_v29 = vmul.f32 %v2288_v47, %v3162_v46 }
  0xf1   : > { %v1493_v14 = vadd.f32 %v1461_v57, %v1425_v49  ;;  %v870_v24 = vadd.f32 %v793_v37, %v625_v7  ;;  %v1785_v52 = vmul.f32 %v2302_v55, %v3245_v51  ;;  %v1347_v0 = vrot.slane %v1229_v27, 2 }
  0xf2   : > { %v1348_v12 = vrot.slane %v1230_v22, 2  ;;  %v1462_v53 = vmul.f32 %v2290_v48, %v3245_v51  ;;  %v3274_v9 = vmul.f32 %v2302_v55, %v3247_v25  ;;  %v1105_v35 = vsel %vm490_vm2, %v1103_v32, %v1104_v30 }
  0xf3   : > { %v1737_v42 = vadd.f32 %v1658_v19, %v1493_v14  ;;  %v938_v41 = vadd.f32 %v906_v29, %v870_v24  ;;  %v1659_v61 = vrot.slane %v1541_v40, 1  ;;  %v1660_v58 = vrot.slane %v3264_v18, 1 }
  0xf4   : > { %v1903_v45 = vrot.slane %v1785_v52, 2  ;;  %v429_v57 = vmul.f32 %v2261_v33, %v3109_v16  ;;  %v674_v21 = vmul.f32 %v2263_v34, %v3109_v16  ;;  %v1904_v1 = vrot.slane %v3274_v9, 2 }
  0xf5   : > { %v1981_v28 = vadd.f32 %v1902_v36, %v1737_v42  ;;  %v1182_v2 = vadd.f32 %v1105_v35, %v938_v41  ;;  %v987_v13 = vmul.f32 %v2273_v39, %v3202_v20  ;;  %v1349_v4 = vsel %vm735_vm3, %v1347_v0, %v1348_v12  ;;  %v3331_v35 = vld [vmem:[#allocation2 + $0x150] sm:$0xff] }
  0xf6   : > { %v549_v3 = vrot.slane %v429_v57, 1  ;;  %v794_v6 = vrot.slane %v674_v21, 2  ;;  %v1231_v44 = vmul.f32 %v2281_v43, %v3202_v20  ;;  %v349_v16 = vmul.f32 %v2271_v38, %v3078_v50 }
  0xf7   : > { %2013 = vst.msk [vmem:[%s2393_s24 + $0xa8] sm:$0xff] %vm144_vm0, %v1981_v28  ;;  %v1426_v5 = vadd.f32 %v1349_v4, %v1182_v2  ;;  %v1106_v8 = vrot.slane %v987_v13, 1  ;;  %v1543_v10 = vmul.f32 %v2300_v54, %v3278_v31  ;;  %v1661_v17 = vsel %vm490_vm2, %v1659_v61, %v1660_v58  ;;  %v3333_v61 = vld [vmem:[#allocation2 + $0x158] sm:$0xff] }
  0xf8   : > { %v550_v62 = vsel %vm490_vm2, %v547_v23, %v549_v3  ;;  %v907_v56 = vmul.f32 %v2288_v47, %v3164_v63  ;;  %v1350_v11 = vrot.slane %v1231_v44, 2  ;;  %v1905_v59 = vsel %vm735_vm3, %v1903_v45, %v1904_v1 }
  0xf9   : > { %v1494_v60 = vadd.f32 %v1462_v53, %v1426_v5  ;;  %v626_v50 = vadd.f32 %v550_v62, %v349_v16  ;;  %v1463_v19 = vmul.f32 %v2290_v48, %v3247_v25  ;;  %v795_v26 = vsel %vm735_vm3, %v792_v15, %v794_v6 }
  0xfa   : > { %v1107_v27 = vsel %vm490_vm2, %v1104_v30, %v1106_v8  ;;  %v1787_v23 = vmul.f32 %v2302_v55, %v3278_v31  ;;  %v430_v22 = vmul.f32 %v2261_v33, %v3162_v46  ;;  %v1662_v32 = vrot.slane %v1543_v10, 1 }
  0xfb   : > { %v1738_v49 = vadd.f32 %v1661_v17, %v1494_v60  ;;  %v871_v7 = vadd.f32 %v795_v26, %v626_v50  ;;  %v431_v36 = vmul.f32 %v2261_v33, %v3164_v63  ;;  %v1351_v37 = vsel %vm735_vm3, %v1348_v12, %v1350_v11 }
  0xfc   : > { %v551_v40 = vrot.slane %v430_v22, 1  ;;  %v675_v15 = vmul.f32 %v2263_v34, %v3162_v46  ;;  %v3320_v30 = vmul.f32 %v2263_v34, %v3164_v63  ;;  %v350_v29 = vmul.f32 %v2271_v38, %v3162_v46 }
  0xfd   : > { %v1982_v14 = vadd.f32 %v1905_v59, %v1738_v49  ;;  %v939_v24 = vadd.f32 %v907_v56, %v871_v7  ;;  %v552_v52 = vrot.slane %v431_v36, 1  ;;  %v988_v12 = vmul.f32 %v2273_v39, %v3245_v51  ;;  %v3371_v49 = vld [vmem:[#allocation2 + $0x160] sm:$0x3] }
  0xfe   : > { %v796_v0 = vrot.slane %v675_v15, 2  ;;  %v797_v53 = vrot.slane %v3320_v30, 2  ;;  %v989_v42 = vmul.f32 %v2273_v39, %v3247_v25  ;;  %v1232_v46 = vmul.f32 %v2281_v43, %v3245_v51 }
  0xff   : > { %2014 = vst.msk [vmem:[%s2393_s24 + $0xb0] sm:$0xff] %vm144_vm0, %v1982_v14  ;;  %v1183_v41 = vadd.f32 %v1107_v27, %v939_v24  ;;  %v553_v45 = vsel %vm490_vm2, %v551_v40, %v552_v52  ;;  %v3340_v57 = vmul.f32 %v2281_v43, %v3247_v25  ;;  %v1906_v21 = vrot.slane %v1787_v23, 2 }
 0x100   : > { %v627_v28 = vadd.f32 %v553_v45, %v350_v29  ;;  %v1108_v2 = vrot.slane %v988_v12, 1  ;;  %v1109_v13 = vrot.slane %v989_v42, 1  ;;  %v798_v3 = vsel %vm735_vm3, %v796_v0, %v797_v53 }
 0x101   : > { %v1427_v4 = vadd.f32 %v1351_v37, %v1183_v41  ;;  %v1352_v6 = vrot.slane %v1232_v46, 2  ;;  %v1353_v44 = vrot.slane %v3340_v57, 2  ;;  %v908_v16 = vmul.f32 %v2288_v47, %v3245_v51 }
 0x102   : > { %v872_v5 = vadd.f32 %v798_v3, %v627_v28  ;;  %v1544_v8 = vmul.f32 %v2300_v54, %v3331_v35  ;;  %v3350_v10 = vmul.f32 %v2300_v54, %v3333_v61  ;;  %v1663_v62 = vsel %vm490_vm2, %v1660_v58, %v1662_v32 }
 0x103   : > { %v1495_v17 = vadd.f32 %v1463_v19, %v1427_v4  ;;  %v1788_v56 = vmul.f32 %v2302_v55, %v3331_v35  ;;  %v3359_v11 = vmul.f32 %v2302_v55, %v3333_v61  ;;  %v1907_v60 = vsel %vm735_vm3, %v1904_v1, %v1906_v21 }
 0x104   : > { %v940_v59 = vadd.f32 %v908_v16, %v872_v5  ;;  %v1110_v50 = vsel %vm490_vm2, %v1108_v2, %v1109_v13  ;;  %v1464_v19 = vmul.f32 %v2290_v48, %v3331_v35  ;;  %v1354_v58 = vsel %vm735_vm3, %v1352_v6, %v1353_v44 }
 0x105   : > { %v1739_v18 = vadd.f32 %v1663_v62, %v1495_v17  ;;  %v1664_v26 = vrot.slane %v1544_v8, 1  ;;  %v432_v27 = vmul.f32 %v2261_v33, %v3202_v20  ;;  %v1665_v22 = vrot.slane %v3350_v10, 1 }
 0x106   : > { %v1184_v23 = vadd.f32 %v1110_v50, %v940_v59  ;;  %v1908_v9 = vrot.slane %v1788_v56, 2  ;;  %v677_v1 = vmul.f32 %v2263_v34, %v3202_v20  ;;  %v1909_v32 = vrot.slane %v3359_v11, 2  ;;  %v3414_v50 = vld [vmem:[#allocation2 + $0x168] sm:$0xff] }
 0x107   : > { %v1983_v7 = vadd.f32 %v1907_v60, %v1739_v18  ;;  %v554_v36 = vrot.slane %v432_v27, 1  ;;  %v990_v37 = vmul.f32 %v2273_v39, %v3278_v31  ;;  %v351_v15 = vmul.f32 %v2271_v38, %v3164_v63 }
 0x108   : > { %v1428_v40 = vadd.f32 %v1354_v58, %v1184_v23  ;;  %v799_v30 = vrot.slane %v677_v1, 2  ;;  %v1234_v14 = vmul.f32 %v2281_v43, %v3278_v31  ;;  %v1546_v29 = vmul.f32 %v2300_v54, %v3371_v49 }
 0x109   : > { %2015 = vst.msk [vmem:[%s2393_s24 + $0xb8] sm:$0xff] %vm144_vm0, %v1983_v7  ;;  %v555_v24 = vsel %vm490_vm2, %v552_v52, %v554_v36  ;;  %v1111_v20 = vrot.slane %v990_v37, 1  ;;  %v1790_v0 = vmul.f32 %v2302_v55, %v3371_v49  ;;  %v1666_v42 = vsel %vm490_vm2, %v1664_v26, %v1665_v22 }
 0x10a   : > { %v1496_v12 = vadd.f32 %v1464_v19, %v1428_v40  ;;  %v628_v41 = vadd.f32 %v555_v24, %v351_v15  ;;  %v909_v63 = vmul.f32 %v2288_v47, %v3247_v25  ;;  %v1910_v45 = vsel %vm735_vm3, %v1908_v9, %v1909_v32  ;;  %v3416_v19 = vld [vmem:[#allocation2 + $0x170] sm:$0xff] }
 0x10b   : > { %v800_v46 = vsel %vm735_vm3, %v797_v53, %v799_v30  ;;  %v1355_v57 = vrot.slane %v1234_v14, 2  ;;  %v1465_v52 = vmul.f32 %v2290_v48, %v3333_v61  ;;  %v1112_v2 = vsel %vm490_vm2, %v1109_v13, %v1111_v20 }
 0x10c   : > { %v1740_v21 = vadd.f32 %v1666_v42, %v1496_v12  ;;  %v873_v28 = vadd.f32 %v800_v46, %v628_v41  ;;  %v433_v4 = vmul.f32 %v2261_v33, %v3245_v51  ;;  %v1667_v3 = vrot.slane %v1546_v29, 1 }
 0x10d   : > { %v1911_v6 = vrot.slane %v1790_v0, 2  ;;  %v434_v5 = vmul.f32 %v2261_v33, %v3247_v25  ;;  %v678_v53 = vmul.f32 %v2263_v34, %v3245_v51  ;;  %v3405_v17 = vmul.f32 %v2263_v34, %v3247_v25 }
 0x10e   : > { %v1984_v16 = vadd.f32 %v1910_v45, %v1740_v21  ;;  %v941_v8 = vadd.f32 %v909_v63, %v873_v28  ;;  %v556_v10 = vrot.slane %v433_v4, 1  ;;  %v352_v13 = vmul.f32 %v2271_v38, %v3245_v51 }
 0x10f   : > { %v557_v62 = vrot.slane %v434_v5, 1  ;;  %v801_v56 = vrot.slane %v678_v53, 2  ;;  %v991_v11 = vmul.f32 %v2273_v39, %v3331_v35  ;;  %v1356_v59 = vsel %vm735_vm3, %v1353_v44, %v1355_v57  ;;  %v3447_v57 = vld [vmem:[#allocation2 + $0x178] sm:$0x3] }
 0x110   : > { %2016 = vst.msk [vmem:[%s2393_s24 + $0xc0] sm:$0xff] %vm144_vm0, %v1984_v16  ;;  %v1185_v60 = vadd.f32 %v1112_v2, %v941_v8  ;;  %v802_v18 = vrot.slane %v3405_v17, 2  ;;  %v992_v58 = vmul.f32 %v2273_v39, %v3333_v61  ;;  %v1668_v51 = vsel %vm490_vm2, %v1665_v22, %v1667_v3 }
 0x111   : > { %v558_v26 = vsel %vm490_vm2, %v556_v10, %v557_v62  ;;  %v1235_v27 = vmul.f32 %v2281_v43, %v3331_v35  ;;  %v1236_v23 = vmul.f32 %v2281_v43, %v3333_v61  ;;  %v1113_v1 = vrot.slane %v991_v11, 1 }
 0x112   : > { %v1429_v44 = vadd.f32 %v1356_v59, %v1185_v60  ;;  %v629_v9 = vadd.f32 %v558_v26, %v352_v13  ;;  %v1114_v7 = vrot.slane %v992_v58, 1  ;;  %v1912_v36 = vsel %vm735_vm3, %v1909_v32, %v1911_v6 }
 0x113   : > { %v803_v37 = vsel %vm735_vm3, %v801_v56, %v802_v18  ;;  %v1547_v40 = vmul.f32 %v2300_v54, %v3414_v50  ;;  %v3433_v22 = vmul.f32 %v2300_v54, %v3416_v19  ;;  %v910_v14 = vmul.f32 %v2288_v47, %v3331_v35 }
 0x114   : > { %v1497_v15 = vadd.f32 %v1465_v52, %v1429_v44  ;;  %v874_v30 = vadd.f32 %v803_v37, %v629_v9  ;;  %v1791_v24 = vmul.f32 %v2302_v55, %v3414_v50  ;;  %v1357_v20 = vrot.slane %v1235_v27, 2 }
 0x115   : > { %v1358_v29 = vrot.slane %v1236_v23, 2  ;;  %v1466_v32 = vmul.f32 %v2290_v48, %v3414_v50  ;;  %v3443_v0 = vmul.f32 %v2302_v55, %v3416_v19  ;;  %v1115_v41 = vsel %vm490_vm2, %v1113_v1, %v1114_v7 }
 0x116   : > { %v1741_v12 = vadd.f32 %v1668_v51, %v1497_v15  ;;  %v942_v42 = vadd.f32 %v910_v14, %v874_v30  ;;  %v1669_v63 = vrot.slane %v1547_v40, 1  ;;  %v1670_v45 = vrot.slane %v3433_v22, 1 }
 0x117   : > { %v1913_v46 = vrot.slane %v1791_v24, 2  ;;  %v435_v52 = vmul.f32 %v2261_v33, %v3278_v31  ;;  %v680_v21 = vmul.f32 %v2263_v34, %v3278_v31  ;;  %v1914_v4 = vrot.slane %v3443_v0, 2 }
 0x118   : > { %v1985_v28 = vadd.f32 %v1912_v36, %v1741_v12  ;;  %v1186_v2 = vadd.f32 %v1115_v41, %v942_v42  ;;  %v993_v3 = vmul.f32 %v2273_v39, %v3371_v49  ;;  %v1359_v6 = vsel %vm735_vm3, %v1357_v20, %v1358_v29  ;;  %v3500_v41 = vld [vmem:[#allocation2 + $0x180] sm:$0xff] }
 0x119   : > { %v559_v5 = vrot.slane %v435_v52, 1  ;;  %v804_v53 = vrot.slane %v680_v21, 2  ;;  %v1237_v16 = vmul.f32 %v2281_v43, %v3371_v49  ;;  %v353_v31 = vmul.f32 %v2271_v38, %v3247_v25 }
 0x11a   : > { %2017 = vst.msk [vmem:[%s2393_s24 + $0xc8] sm:$0xff] %vm144_vm0, %v1985_v28  ;;  %v1430_v8 = vadd.f32 %v1359_v6, %v1186_v2  ;;  %v1116_v10 = vrot.slane %v993_v3, 1  ;;  %v1549_v17 = vmul.f32 %v2300_v54, %v3447_v57  ;;  %v1671_v13 = vsel %vm490_vm2, %v1669_v63, %v1670_v45  ;;  %v3502_v63 = vld [vmem:[#allocation2 + $0x188] sm:$0xff] }
 0x11b   : > { %v560_v56 = vsel %vm490_vm2, %v557_v62, %v559_v5  ;;  %v911_v11 = vmul.f32 %v2288_v47, %v3333_v61  ;;  %v1360_v60 = vrot.slane %v1237_v16, 2  ;;  %v1915_v58 = vsel %vm735_vm3, %v1913_v46, %v1914_v4 }
 0x11c   : > { %v1498_v59 = vadd.f32 %v1466_v32, %v1430_v8  ;;  %v630_v25 = vadd.f32 %v560_v56, %v353_v31  ;;  %v1467_v51 = vmul.f32 %v2290_v48, %v3416_v19  ;;  %v805_v26 = vsel %vm735_vm3, %v802_v18, %v804_v53 }
 0x11d   : > { %v1117_v27 = vsel %vm490_vm2, %v1114_v7, %v1116_v10  ;;  %v1793_v62 = vmul.f32 %v2302_v55, %v3447_v57  ;;  %v436_v23 = vmul.f32 %v2261_v33, %v3331_v35  ;;  %v1672_v1 = vrot.slane %v1549_v17, 1 }
 0x11e   : > { %v1742_v44 = vadd.f32 %v1671_v13, %v1498_v59  ;;  %v875_v9 = vadd.f32 %v805_v26, %v630_v25  ;;  %v437_v36 = vmul.f32 %v2261_v33, %v3333_v61  ;;  %v1361_v37 = vsel %vm735_vm3, %v1358_v29, %v1360_v60 }
 0x11f   : > { %v561_v40 = vrot.slane %v436_v23, 1  ;;  %v681_v18 = vmul.f32 %v2263_v34, %v3331_v35  ;;  %v3489_v7 = vmul.f32 %v2263_v34, %v3333_v61  ;;  %v354_v14 = vmul.f32 %v2271_v38, %v3331_v35 }
 0x120   : > { %v1986_v15 = vadd.f32 %v1915_v58, %v1742_v44  ;;  %v943_v30 = vadd.f32 %v911_v11, %v875_v9  ;;  %v562_v24 = vrot.slane %v437_v36, 1  ;;  %v994_v29 = vmul.f32 %v2273_v39, %v3414_v50  ;;  %v3540_v44 = vld [vmem:[#allocation2 + $0x190] sm:$0x3] }
 0x121   : > { %v806_v20 = vrot.slane %v681_v18, 2  ;;  %v807_v32 = vrot.slane %v3489_v7, 2  ;;  %v995_v12 = vmul.f32 %v2273_v39, %v3416_v19  ;;  %v1238_v35 = vmul.f32 %v2281_v43, %v3414_v50 }
 0x122   : > { %2018 = vst.msk [vmem:[%s2393_s24 + $0xd0] sm:$0xff] %vm144_vm0, %v1986_v15  ;;  %v1187_v42 = vadd.f32 %v1117_v27, %v943_v30  ;;  %v563_v46 = vsel %vm490_vm2, %v561_v40, %v562_v24  ;;  %v3509_v52 = vmul.f32 %v2281_v43, %v3416_v19  ;;  %v1916_v21 = vrot.slane %v1793_v62, 2 }
 0x123   : > { %v631_v28 = vadd.f32 %v563_v46, %v354_v14  ;;  %v1118_v2 = vrot.slane %v994_v29, 1  ;;  %v1119_v3 = vrot.slane %v995_v12, 1  ;;  %v808_v5 = vsel %vm735_vm3, %v806_v20, %v807_v32 }
 0x124   : > { %v1431_v6 = vadd.f32 %v1361_v37, %v1187_v42  ;;  %v1362_v53 = vrot.slane %v1238_v35, 2  ;;  %v1363_v16 = vrot.slane %v3509_v52, 2  ;;  %v912_v31 = vmul.f32 %v2288_v47, %v3414_v50 }
 0x125   : > { %v876_v8 = vadd.f32 %v808_v5, %v631_v28  ;;  %v1550_v10 = vmul.f32 %v2300_v54, %v3500_v41  ;;  %v3519_v17 = vmul.f32 %v2300_v54, %v3502_v63  ;;  %v1673_v56 = vsel %vm490_vm2, %v1670_v45, %v1672_v1 }
 0x126   : > { %v1499_v13 = vadd.f32 %v1467_v51, %v1431_v6  ;;  %v1794_v11 = vmul.f32 %v2302_v55, %v3500_v41  ;;  %v3528_v60 = vmul.f32 %v2302_v55, %v3502_v63  ;;  %v1917_v59 = vsel %vm735_vm3, %v1914_v4, %v1916_v21 }
 0x127   : > { %v944_v58 = vadd.f32 %v912_v31, %v876_v8  ;;  %v1120_v25 = vsel %vm490_vm2, %v1118_v2, %v1119_v3  ;;  %v1468_v51 = vmul.f32 %v2290_v48, %v3500_v41  ;;  %v1364_v45 = vsel %vm735_vm3, %v1362_v53, %v1363_v16 }
 0x128   : > { %v1743_v22 = vadd.f32 %v1673_v56, %v1499_v13  ;;  %v1674_v26 = vrot.slane %v1550_v10, 1  ;;  %v438_v27 = vmul.f32 %v2261_v33, %v3371_v49  ;;  %v1675_v23 = vrot.slane %v3519_v17, 1 }
 0x129   : > { %v1188_v62 = vadd.f32 %v1120_v25, %v944_v58  ;;  %v1918_v0 = vrot.slane %v1794_v11, 2  ;;  %v683_v4 = vmul.f32 %v2263_v34, %v3371_v49  ;;  %v1919_v1 = vrot.slane %v3528_v60, 2  ;;  %v316_v58 = vld [vmem:[#allocation2 + $0x198] sm:$0xff]  ;;  %v3581_v25 = vld [vmem:[#allocation2 + $0x1a0] sm:$0xff] }
 0x12a   : > { %v1987_v9 = vadd.f32 %v1917_v59, %v1743_v22  ;;  %v564_v36 = vrot.slane %v438_v27, 1  ;;  %v996_v37 = vmul.f32 %v2273_v39, %v3447_v57  ;;  %v355_v18 = vmul.f32 %v2271_v38, %v3333_v61 }
 0x12b   : > { %v1432_v40 = vadd.f32 %v1364_v45, %v1188_v62  ;;  %v809_v7 = vrot.slane %v683_v4, 2  ;;  %v1240_v15 = vmul.f32 %v2281_v43, %v3447_v57  ;;  %v1552_v14 = vmul.f32 %v2300_v54, %v3540_v44 }
 0x12c   : > { %2019 = vst.msk [vmem:[%s2393_s24 + $0xd8] sm:$0xff] %vm144_vm0, %v1987_v9  ;;  %v565_v30 = vsel %vm490_vm2, %v562_v24, %v564_v36  ;;  %v1121_v49 = vrot.slane %v996_v37, 1  ;;  %v1676_v29 = vsel %vm490_vm2, %v1674_v26, %v1675_v23  ;;  %v1920_v61 = vsel %vm735_vm3, %v1918_v0, %v1919_v1 }
 0x12d   : > { %v1500_v20 = vadd.f32 %v1468_v51, %v1432_v40  ;;  %v632_v12 = vadd.f32 %v565_v30, %v355_v18  ;;  %v810_v42 = vsel %vm735_vm3, %v807_v32, %v809_v7  ;;  %v913_v46 = vmul.f32 %v2288_v47, %v3416_v19 }
 0x12e   : > { %v1796_v24 = vmul.f32 %v2302_v55, %v3540_v44  ;;  %v1365_v21 = vrot.slane %v1240_v15, 2  ;;  %v439_v28 = vmul.f32 %v2261_v33, %v3414_v50  ;;  %v1122_v2 = vsel %vm490_vm2, %v1119_v3, %v1121_v49 }
 0x12f   : > { %v1744_v35 = vadd.f32 %v1676_v29, %v1500_v20  ;;  %v877_v52 = vadd.f32 %v810_v42, %v632_v12  ;;  %v1677_v6 = vrot.slane %v1552_v14, 1  ;;  %v440_v5 = vmul.f32 %v2261_v33, %v3416_v19 }
 0x130   : > { %v684_v32 = vmul.f32 %v2263_v34, %v3414_v50  ;;  %v566_v31 = vrot.slane %v439_v28, 1  ;;  %v685_v10 = vmul.f32 %v2263_v34, %v3416_v19  ;;  %v356_v17 = vmul.f32 %v2271_v38, %v3414_v50 }
 0x131   : > { %v1988_v53 = vadd.f32 %v1920_v61, %v1744_v35  ;;  %v945_v8 = vadd.f32 %v913_v46, %v877_v52  ;;  %v567_v13 = vrot.slane %v440_v5, 1  ;;  %v997_v3 = vmul.f32 %v2273_v39, %v3500_v41 }
 0x132   : > { %v811_v56 = vrot.slane %v684_v32, 2  ;;  %v1366_v59 = vsel %vm735_vm3, %v1363_v16, %v1365_v21  ;;  %v812_v51 = vrot.slane %v685_v10, 2  ;;  %v998_v22 = vmul.f32 %v2273_v39, %v3502_v63 }
 0x133   : > { %2020 = vst.msk [vmem:[%s2393_s24 + $0xe0] sm:$0xff] %vm144_vm0, %v1988_v53  ;;  %v1189_v11 = vadd.f32 %v1122_v2, %v945_v8  ;;  %v568_v45 = vsel %vm490_vm2, %v566_v31, %v567_v13  ;;  %v1123_v50 = vrot.slane %v997_v3, 1  ;;  %v1241_v26 = vmul.f32 %v2281_v43, %v3500_v41  ;;  %v318_v53 = vld [vmem:[#allocation2 + $0x1a8] sm:$0x3] }
 0x134   : > { %v1242_v27 = vmul.f32 %v2281_v43, %v3502_v63  ;;  %v1469_v16 = vmul.f32 %v2290_v48, %v3502_v63  ;;  %v633_v0 = vadd.f32 %v568_v45, %v356_v17  ;;  %v1124_v4 = vrot.slane %v998_v22, 1 }
 0x135   : > { %v1433_v62 = vadd.f32 %v1366_v59, %v1189_v11  ;;  %v1921_v9 = vrot.slane %v1796_v24, 2  ;;  %v813_v36 = vsel %vm735_vm3, %v811_v56, %v812_v51  ;;  %v1553_v37 = vmul.f32 %v2300_v54, %v316_v58 }
 0x136   : > { %v1554_v40 = vmul.f32 %v2300_v54, %v3581_v25  ;;  %v1678_v7 = vsel %vm490_vm2, %v1675_v23, %v1677_v6  ;;  %v878_v15 = vadd.f32 %v813_v36, %v633_v0  ;;  %v914_v30 = vmul.f32 %v2288_v47, %v3500_v41 }
 0x137   : > { %v1501_v18 = vadd.f32 %v1469_v16, %v1433_v62  ;;  %v1125_v49 = vsel %vm490_vm2, %v1123_v50, %v1124_v4  ;;  %v1367_v14 = vrot.slane %v1241_v26, 2  ;;  %v1368_v20 = vrot.slane %v1242_v27, 2 }
 0x138   : > { %v1797_v29 = vmul.f32 %v2302_v55, %v316_v58  ;;  %v946_v61 = vadd.f32 %v914_v30, %v878_v15  ;;  %v1679_v42 = vrot.slane %v1553_v37, 1  ;;  %v1680_v46 = vrot.slane %v1554_v40, 1 }
 0x139   : > { %v1745_v12 = vadd.f32 %v1678_v7, %v1501_v18  ;;  %v1922_v24 = vsel %vm735_vm3, %v1919_v1, %v1921_v9  ;;  %v1798_v23 = vmul.f32 %v2302_v55, %v3581_v25  ;;  %v441_v41 = vmul.f32 %v2261_v33, %v3447_v57 }
 0x13a   : > { %v686_v35 = vmul.f32 %v2263_v34, %v3447_v57  ;;  %v1190_v21 = vadd.f32 %v1125_v49, %v946_v61  ;;  %v1470_v28 = vmul.f32 %v2290_v48, %v316_v58  ;;  %v999_v2 = vmul.f32 %v2273_v39, %v3540_v44 }
 0x13b   : > { %v1989_v52 = vadd.f32 %v1922_v24, %v1745_v12  ;;  %v1369_v60 = vsel %vm735_vm3, %v1367_v14, %v1368_v20  ;;  %v569_v6 = vrot.slane %v441_v41, 1  ;;  %v1681_v32 = vsel %vm490_vm2, %v1679_v42, %v1680_v46 }
 0x13c   : > { %v814_v1 = vrot.slane %v686_v35, 2  ;;  %v1434_v5 = vadd.f32 %v1369_v60, %v1190_v21  ;;  %v1923_v33 = vrot.slane %v1797_v29, 2  ;;  %v357_v34 = vmul.f32 %v2271_v38, %v3416_v19 }
 0x13d   : > { %2021 = vst.msk [vmem:[%s2393_s24 + $0xe8] sm:$0xff] %vm144_vm0, %v1989_v52  ;;  %v1924_v57 = vrot.slane %v1798_v23, 2  ;;  %v570_v8 = vsel %vm490_vm2, %v567_v13, %v569_v6  ;;  %v1126_v31 = vrot.slane %v999_v2, 1  ;;  %v1243_v39 = vmul.f32 %v2281_v43, %v3540_v44 }
 0x13e   : > { %v1502_v10 = vadd.f32 %v1470_v28, %v1434_v5  ;;  %v634_v17 = vadd.f32 %v570_v8, %v357_v34  ;;  %v915_v56 = vmul.f32 %v2288_v47, %v3502_v63  ;;  %v815_v3 = vsel %vm735_vm3, %v812_v51, %v814_v1 }
 0x13f   : > { %v1555_v11 = vmul.f32 %v2300_v54, %v318_v53  ;;  %v1925_v38 = vsel %vm735_vm3, %v1923_v33, %v1924_v57  ;;  %v1127_v19 = vsel %vm490_vm2, %v1124_v4, %v1126_v31  ;;  %v1370_v13 = vrot.slane %v1243_v39, 2 }
 0x140   : > { %v1746_v59 = vadd.f32 %v1681_v32, %v1502_v10  ;;  %v879_v58 = vadd.f32 %v815_v3, %v634_v17  ;;  %v1799_v44 = vmul.f32 %v2302_v55, %v318_v53  ;;  %v1471_v63 = vmul.f32 %v2290_v48, %v3581_v25 }
 0x141   : > { %v1682_v43 = vrot.slane %v1555_v11, 1  ;;  %v1371_v54 = vsel %vm735_vm3, %v1368_v20, %v1370_v13 }
 0x142   : > { %v1990_v22 = vadd.f32 %v1925_v38, %v1746_v59  ;;  %v947_v45 = vadd.f32 %v915_v56, %v879_v58  ;;  %v1926_v26 = vrot.slane %v1799_v44, 2 }
 0x143   : > { %v1683_v50 = vsel %vm490_vm2, %v1680_v46, %v1682_v43 }
 0x144   : > { %2022 = vst.msk [vmem:[%s2393_s24 + $0xf0] sm:$0xff] %vm144_vm0, %v1990_v22  ;;  %v1191_v47 = vadd.f32 %v1127_v19, %v947_v45  ;;  %v1927_v16 = vsel %vm735_vm3, %v1924_v57, %v1926_v26 }
 0x146   : > { %v1435_v51 = vadd.f32 %v1371_v54, %v1191_v47 }
 0x148   : > { %v1503_v27 = vadd.f32 %v1471_v63, %v1435_v51 }
 0x14a   : > { %v1747_v62 = vadd.f32 %v1683_v50, %v1503_v27 }
 0x14c   : > { %v1991_v0 = vadd.f32 %v1927_v16, %v1747_v62 }
 0x14e   : > { %2023 = vst.msk [vmem:[%s2393_s24 + $0xf8] sm:$0xff] %vm144_vm0, %v1991_v0 }
 0x14f PF: > { %s12_s9 = sadd.s32 1, %s2107_s9  }
 0x150   : > { %p9_p4 = scmp.ge.s32.totalorder %s12_s9, 4  }
 0x152   :  { %11 = sbr.rel (!%p9_p4) target bundleno = 1 (0x1), region = 59 }

// kernel: conv_trans_block_fwd.13
= control target key start
LH: loop header
LB: loop body
LE: loop exit
PB: predicated region body
PF: predicated region fallthrough
CT: control target
= control target key end

     0   :  { %s2125_s9 = smov 0   ;;  %s3641_s0 = inlined_call_operand.vmem [shape: f32[2,16,16,16], index: 0, kind: input, shape index: {}]   ;;  %s3642_s1 = inlined_call_operand.vmem [shape: f32[3,3,16], index: 1, kind: input, shape index: {}]   ;;  %s3643_s2 = inlined_call_operand.vmem [shape: f32[2,16,16,16], index: 2, kind: output, shape index: {}]  }
   0x1 LB: > { %s2079_s10 = sadd.s32 4294967295, %s2107_s9   ;;  %p2083_p0 = scmp.ge.s32.totalorder %s2107_s9, 1  ;;  %s2107_s9 = sphi %s2125_s9, %s12_s9  }
   0x2   : > { %p112_p1 = scmp.lt.s32.totalorder %s2107_s9, 3 }
   0x4   : > { %p113_p2 = pnand %p2083_p0, %p112_p1 }
   0x5   : > { %p2135_p3 = scmp.lt.s32.totalorder (!%p113_p2), %s2079_s10, 1 }
   0x6   : > { %116 = sbr.rel (%p113_p2) target bundleno = 335 (0x14f), region = 28 }
   0xb   : > { %vm144_vm0 = vcmask 130048   ;;  %vm147_vm1 = vcmask 123904   ;;  %v2109_v0 = vmov 0.0   ;;  %v322_v1 = vlaneseq  ;;  %s3646_s10 = smov (!%p2135_p3, %s2079_s10), 1  ;;  %v319_v12 = vld [vmem:[%s3642_s1] sm:$0x7] }
   0xc   : > { %145 = vst.msk [vmem:[#allocation2] sm:$0xff] %vm144_vm0, %v2109_v0  ;;  %146 = vst.msk [vmem:[#allocation2 + $0x8] sm:$0xff] %vm144_vm0, %v2109_v0  ;;  %s2090_s12 = sshll.u32 %s3646_s10, 8  ;;  %v320_v16 = vld [vmem:[%s3642_s1 + $0x4] sm:$0x7]  ;;  %vm490_vm2 = vcmask 1046528  }
   0xd   : > { %149 = vst.msk [vmem:[#allocation2 + $0x18] sm:$0xff] %vm144_vm0, %v2109_v0  ;;  %150 = vst.msk [vmem:[#allocation2 + $0x20] sm:$0xff] %vm144_vm0, %v2109_v0  ;;  %s2205_s15 = scalar_lea.vmem %s3641_s0, %s2090_s12  ;;  %v323_v2 = vshrl.u32 %v322_v1, 7  ;;  %v321_v26 = vld [vmem:[%s3642_s1 + $0x8] sm:$0x7]  ;;  %vm735_vm3 = vcmask 1045504   ;;  %s2393_s24 = scalar_lea.vmem %s3643_s2, %s2090_s12 }
   0xe   : > { %152 = vst.msk [vmem:[#allocation2 + $0x30] sm:$0xff] %vm144_vm0, %v2109_v0  ;;  %153 = vst.msk [vmem:[#allocation2 + $0x38] sm:$0xff] %vm144_vm0, %v2109_v0  ;;  %v200_v3 = vld [vmem:[%s2205_s15] sm:$0xff]  ;;  %v201_v4 = vld [vmem:[%s2205_s15 + $0x8] sm:$0xff] }
   0xf   : > { %155 = vst.msk [vmem:[#allocation2 + $0x48] sm:$0xff] %vm144_vm0, %v2109_v0  ;;  %156 = vst.msk [vmem:[#allocation2 + $0x50] sm:$0xff] %vm144_vm0, %v2109_v0  ;;  %v202_v5 = vld [vmem:[%s2205_s15 + $0x10] sm:$0xff]  ;;  %v203_v6 = vld [vmem:[%s2205_s15 + $0x18] sm:$0xff]  ;;  %v392_v17 = vsub.s32 1, %v323_v2  ;;  %v637_v18 = vsub.s32 2, %v323_v2 }
  0x10   : > { %158 = vst.msk [vmem:[#allocation2 + $0x60] sm:$0xff] %vm144_vm0, %v2109_v0  ;;  %159 = vst.msk [vmem:[#allocation2 + $0x68] sm:$0xff] %vm144_vm0, %v2109_v0  ;;  %v204_v7 = vld [vmem:[%s2205_s15 + $0x20] sm:$0xff]  ;;  %v205_v8 = vld [vmem:[%s2205_s15 + $0x28] sm:$0xff]  ;;  %v324_v22 = vsub.s32 0, %v323_v2 }
  0x11   : > { %161 = vst.msk [vmem:[#allocation2 + $0x78] sm:$0xff] %vm144_vm0, %v2109_v0  ;;  %162 = vst.msk [vmem:[#allocation2 + $0x80] sm:$0xff] %vm144_vm0, %v2109_v0  ;;  %v206_v9 = vld [vmem:[%s2205_s15 + $0x30] sm:$0xff]  ;;  %v207_v10 = vld [vmem:[%s2205_s15 + $0x38] sm:$0xff]  ;;  %v2261_v33 = vrot.slane %v319_v12, %v392_v17  ;;  %v2263_v34 = vrot.slane %v319_v12, %v637_v18  ;;  %v2273_v39 = vrot.slane %v320_v16, %v392_v17 }
  0x12   : > { %164 = vst.msk [vmem:[#allocation2 + $0x90] sm:$0xff] %vm144_vm0, %v2109_v0  ;;  %165 = vst.msk [vmem:[#allocation2 + $0x98] sm:$0xff] %vm144_vm0, %v2109_v0  ;;  %v208_v11 = vld [vmem:[%s2205_s15 + $0x40] sm:$0xff]  ;;  %v209_v13 = vld [vmem:[%s2205_s15 + $0x48] sm:$0xff]  ;;  %v2271_v38 = vrot.slane %v319_v12, %v324_v22  ;;  %v2281_v43 = vrot.slane %v320_v16, %v637_v18  ;;  %v2288_v47 = vrot.slane %v320_v16, %v324_v22 }
  0x13   : > { %167 = vst.msk [vmem:[#allocation2 + $0xa8] sm:$0xff] %vm144_vm0, %v2109_v0  ;;  %168 = vst.msk [vmem:[#allocation2 + $0xb0] sm:$0xff] %vm144_vm0, %v2109_v0  ;;  %v210_v14 = vld [vmem:[%s2205_s15 + $0x50] sm:$0xff]  ;;  %v211_v15 = vld [vmem:[%s2205_s15 + $0x58] sm:$0xff]  ;;  %v2290_v48 = vrot.slane %v321_v26, %v324_v22  ;;  %v2300_v54 = vrot.slane %v321_v26, %v392_v17  ;;  %v2302_v55 = vrot.slane %v321_v26, %v637_v18 }
  0x14   : > { %170 = vst.msk [vmem:[#allocation2 + $0xc0] sm:$0xff] %vm144_vm0, %v2109_v0  ;;  %171 = vst.msk [vmem:[#allocation2 + $0xc8] sm:$0xff] %vm144_vm0, %v2109_v0  ;;  %v212_v19 = vld [vmem:[%s2205_s15 + $0x60] sm:$0xff]  ;;  %v213_v20 = vld [vmem:[%s2205_s15 + $0x68] sm:$0xff] }
  0x15   : > { %173 = vst.msk [vmem:[#allocation2 + $0xd8] sm:$0xff] %vm144_vm0, %v2109_v0  ;;  %174 = vst.msk [vmem:[#allocation2 + $0xe0] sm:$0xff] %vm144_vm0, %v2109_v0  ;;  %v214_v21 = vld [vmem:[%s2205_s15 + $0x70] sm:$0xff]  ;;  %v215_v23 = vld [vmem:[%s2205_s15 + $0x78] sm:$0xff] }
  0x16   : > { %176 = vst.msk [vmem:[#allocation2 + $0xf0] sm:$0xff] %vm144_vm0, %v2109_v0  ;;  %177 = vst.msk [vmem:[#allocation2 + $0xf8] sm:$0xff] %vm144_vm0, %v2109_v0  ;;  %v216_v24 = vld [vmem:[%s2205_s15 + $0x80] sm:$0xff]  ;;  %v217_v25 = vld [vmem:[%s2205_s15 + $0x88] sm:$0xff] }
  0x17   : > { %179 = vst.msk [vmem:[#allocation2 + $0x108] sm:$0xff] %vm144_vm0, %v2109_v0  ;;  %180 = vst.msk [vmem:[#allocation2 + $0x110] sm:$0xff] %vm144_vm0, %v2109_v0  ;;  %v218_v27 = vld [vmem:[%s2205_s15 + $0x90] sm:$0xff]  ;;  %v219_v28 = vld [vmem:[%s2205_s15 + $0x98] sm:$0xff] }
  0x18   : > { %182 = vst.msk [vmem:[#allocation2 + $0x120] sm:$0xff] %vm144_vm0, %v2109_v0  ;;  %183 = vst.msk [vmem:[#allocation2 + $0x128] sm:$0xff] %vm144_vm0, %v2109_v0  ;;  %v220_v29 = vld [vmem:[%s2205_s15 + $0xa0] sm:$0xff]  ;;  %v221_v30 = vld [vmem:[%s2205_s15 + $0xa8] sm:$0xff] }
  0x19   : > { %185 = vst.msk [vmem:[#allocation2 + $0x138] sm:$0xff] %vm144_vm0, %v2109_v0  ;;  %186 = vst.msk [vmem:[#allocation2 + $0x140] sm:$0xff] %vm144_vm0, %v2109_v0  ;;  %v222_v31 = vld [vmem:[%s2205_s15 + $0xb0] sm:$0xff]  ;;  %v223_v32 = vld [vmem:[%s2205_s15 + $0xb8] sm:$0xff] }
  0x1a   : > { %188 = vst.msk [vmem:[#allocation2 + $0x150] sm:$0xff] %vm144_vm0, %v2109_v0  ;;  %189 = vst.msk [vmem:[#allocation2 + $0x158] sm:$0xff] %vm144_vm0, %v2109_v0  ;;  %v224_v35 = vld [vmem:[%s2205_s15 + $0xc0] sm:$0xff]  ;;  %v225_v36 = vld [vmem:[%s2205_s15 + $0xc8] sm:$0xff] }
  0x1b   : > { %191 = vst.msk [vmem:[#allocation2 + $0x168] sm:$0xff] %vm144_vm0, %v2109_v0  ;;  %192 = vst.msk [vmem:[#allocation2 + $0x170] sm:$0xff] %vm144_vm0, %v2109_v0  ;;  %v226_v37 = vld [vmem:[%s2205_s15 + $0xd0] sm:$0xff]  ;;  %v227_v40 = vld [vmem:[%s2205_s15 + $0xd8] sm:$0xff] }
  0x1c   : > { %194 = vst.msk [vmem:[#allocation2 + $0x180] sm:$0xff] %vm144_vm0, %v2109_v0  ;;  %195 = vst.msk [vmem:[#allocation2 + $0x188] sm:$0xff] %vm144_vm0, %v2109_v0  ;;  %v228_v41 = vld [vmem:[%s2205_s15 + $0xe0] sm:$0xff]  ;;  %v229_v42 = vld [vmem:[%s2205_s15 + $0xe8] sm:$0xff] }
  0x1d   : > { %197 = vst.msk [vmem:[#allocation2 + $0x198] sm:$0xff] %vm144_vm0, %v2109_v0  ;;  %198 = vst.msk [vmem:[#allocation2 + $0x1a0] sm:$0xff] %vm144_vm0, %v2109_v0  ;;  %v230_v44 = vld [vmem:[%s2205_s15 + $0xf0] sm:$0xff]  ;;  %v231_v45 = vld [vmem:[%s2205_s15 + $0xf8] sm:$0xff] }
  0x1e   : > { %148 = vst.msk [vmem:[#allocation2 + $0x10] sm:$0x3] %vm147_vm1, %v2109_v0  ;;  %151 = vst.msk [vmem:[#allocation2 + $0x28] sm:$0x3] %vm147_vm1, %v2109_v0  ;;  %v265_v46 = vld [vmem:[#allocation2] sm:$0xff]  ;;  %v266_v49 = vld [vmem:[#allocation2 + $0x8] sm:$0xff] }
  0x1f   : > { %154 = vst.msk [vmem:[#allocation2 + $0x40] sm:$0x3] %vm147_vm1, %v2109_v0  ;;  %157 = vst.msk [vmem:[#allocation2 + $0x58] sm:$0x3] %vm147_vm1, %v2109_v0  ;;  %v394_v52 = vmul.f32 %v2261_v33, %v265_v46  ;;  %v639_v53 = vmul.f32 %v2263_v34, %v265_v46  ;;  %v326_v57 = vmul.f32 %v2271_v38, %v265_v46 }
  0x20   : > { %160 = vst.msk [vmem:[#allocation2 + $0x70] sm:$0x3] %vm147_vm1, %v2109_v0  ;;  %163 = vst.msk [vmem:[#allocation2 + $0x88] sm:$0x3] %vm147_vm1, %v2109_v0  ;;  %v395_v58 = vmul.f32 %v2261_v33, %v266_v49  ;;  %v640_v59 = vmul.f32 %v2263_v34, %v266_v49 }
  0x21   : > { %166 = vst.msk [vmem:[#allocation2 + $0xa0] sm:$0x3] %vm147_vm1, %v2109_v0  ;;  %169 = vst.msk [vmem:[#allocation2 + $0xb8] sm:$0x3] %vm147_vm1, %v2109_v0  ;;  %v491_v62 = vrot.slane %v394_v52, 1  ;;  %v736_v63 = vrot.slane %v639_v53, 2 }
  0x22   : > { %172 = vst.msk [vmem:[#allocation2 + $0xd0] sm:$0x3] %vm147_vm1, %v2109_v0  ;;  %175 = vst.msk [vmem:[#allocation2 + $0xe8] sm:$0x3] %vm147_vm1, %v2109_v0  ;;  %v492_v2 = vrot.slane %v395_v58, 1 }
  0x23   : > { %178 = vst.msk [vmem:[#allocation2 + $0x100] sm:$0x3] %vm147_vm1, %v2109_v0  ;;  %181 = vst.msk [vmem:[#allocation2 + $0x118] sm:$0x3] %vm147_vm1, %v2109_v0 }
  0x24   : > { %184 = vst.msk [vmem:[#allocation2 + $0x130] sm:$0x3] %vm147_vm1, %v2109_v0  ;;  %187 = vst.msk [vmem:[#allocation2 + $0x148] sm:$0x3] %vm147_vm1, %v2109_v0 }
  0x25   : > { %190 = vst.msk [vmem:[#allocation2 + $0x160] sm:$0x3] %vm147_vm1, %v2109_v0  ;;  %193 = vst.msk [vmem:[#allocation2 + $0x178] sm:$0x3] %vm147_vm1, %v2109_v0  ;;  %v267_v12 = vld [vmem:[#allocation2 + $0x10] sm:$0x3] }
  0x26   : > { %196 = vst.msk [vmem:[#allocation2 + $0x190] sm:$0x3] %vm147_vm1, %v2109_v0  ;;  %199 = vst.msk [vmem:[#allocation2 + $0x1a8] sm:$0x3] %vm147_vm1, %v2109_v0  ;;  %v641_v26 = vmul.f32 %v2263_v34, %v267_v12 }
  0x27   : > { %233 = vst.msk [vmem:[#allocation2 + $0x19] sm:$0xff] %vm144_vm0, %v200_v3  ;;  %234 = vst.msk [vmem:[#allocation2 + $0x21] sm:$0xff] %vm144_vm0, %v201_v4  ;;  %v737_v3 = vrot.slane %v640_v59, 2 }
  0x28   : > { %235 = vst.msk [vmem:[#allocation2 + $0x31] sm:$0xff] %vm144_vm0, %v202_v5  ;;  %236 = vst.msk [vmem:[#allocation2 + $0x39] sm:$0xff] %vm144_vm0, %v203_v6 }
  0x29   : > { %237 = vst.msk [vmem:[#allocation2 + $0x49] sm:$0xff] %vm144_vm0, %v204_v7  ;;  %238 = vst.msk [vmem:[#allocation2 + $0x51] sm:$0xff] %vm144_vm0, %v205_v8  ;;  %v493_v8 = vsel %vm490_vm2, %v491_v62, %v492_v2 }
  0x2a   : > { %239 = vst.msk [vmem:[#allocation2 + $0x61] sm:$0xff] %vm144_vm0, %v206_v9  ;;  %240 = vst.msk [vmem:[#allocation2 + $0x69] sm:$0xff] %vm144_vm0, %v207_v10  ;;  %v738_v9 = vsel %vm735_vm3, %v736_v63, %v737_v3 }
  0x2b   : > { %241 = vst.msk [vmem:[#allocation2 + $0x79] sm:$0xff] %vm144_vm0, %v208_v11  ;;  %242 = vst.msk [vmem:[#allocation2 + $0x81] sm:$0xff] %vm144_vm0, %v209_v13  ;;  %v603_v13 = vadd.f32 %v493_v8, %v326_v57 }
  0x2c   : > { %243 = vst.msk [vmem:[#allocation2 + $0x91] sm:$0xff] %vm144_vm0, %v210_v14  ;;  %244 = vst.msk [vmem:[#allocation2 + $0x99] sm:$0xff] %vm144_vm0, %v211_v15 }
  0x2d   : > { %245 = vst.msk [vmem:[#allocation2 + $0xa9] sm:$0xff] %vm144_vm0, %v212_v19  ;;  %246 = vst.msk [vmem:[#allocation2 + $0xb1] sm:$0xff] %vm144_vm0, %v213_v20  ;;  %v848_v22 = vadd.f32 %v738_v9, %v603_v13 }
  0x2e   : > { %247 = vst.msk [vmem:[#allocation2 + $0xc1] sm:$0xff] %vm144_vm0, %v214_v21  ;;  %248 = vst.msk [vmem:[#allocation2 + $0xc9] sm:$0xff] %vm144_vm0, %v215_v23  ;;  %v2294_v50 = vld [vmem:[#allocation2 + $0x18] sm:$0xff]  ;;  %v2296_v51 = vld [vmem:[#allocation2 + $0x20] sm:$0xff] }
  0x2f   : > { %249 = vst.msk [vmem:[#allocation2 + $0xd9] sm:$0xff] %vm144_vm0, %v216_v24  ;;  %250 = vst.msk [vmem:[#allocation2 + $0xe1] sm:$0xff] %vm144_vm0, %v217_v25  ;;  %v2304_v56 = vld [vmem:[#allocation2 + $0x30] sm:$0xff]  ;;  %v952_v60 = vmul.f32 %v2273_v39, %v2294_v50  ;;  %v2311_v61 = vld [vmem:[#allocation2 + $0x38] sm:$0xff]  ;;  %v953_v0 = vmul.f32 %v2273_v39, %v2296_v51  ;;  %v1196_v1 = vmul.f32 %v2281_v43, %v2294_v50 }
  0x30   : > { %251 = vst.msk [vmem:[#allocation2 + $0xf1] sm:$0xff] %vm144_vm0, %v218_v27  ;;  %252 = vst.msk [vmem:[#allocation2 + $0xf9] sm:$0xff] %vm144_vm0, %v219_v28  ;;  %v1197_v4 = vmul.f32 %v2281_v43, %v2296_v51  ;;  %v1508_v7 = vmul.f32 %v2300_v54, %v2304_v56  ;;  %v884_v10 = vmul.f32 %v2288_v47, %v2294_v50  ;;  %v2333_v17 = vld [vmem:[#allocation2 + $0x28] sm:$0x3]  ;;  %v2341_v24 = vld [vmem:[#allocation2 + $0x40] sm:$0x3] }
  0x31   : > { %253 = vst.msk [vmem:[#allocation2 + $0x109] sm:$0xff] %vm144_vm0, %v220_v29  ;;  %254 = vst.msk [vmem:[#allocation2 + $0x111] sm:$0xff] %vm144_vm0, %v221_v30  ;;  %v1048_v5 = vrot.slane %v952_v60, 1  ;;  %v1049_v6 = vrot.slane %v953_v0, 1  ;;  %v2327_v11 = vmul.f32 %v2300_v54, %v2311_v61  ;;  %v1292_v14 = vrot.slane %v1196_v1, 2 }
  0x32   : > { %255 = vst.msk [vmem:[#allocation2 + $0x121] sm:$0xff] %vm144_vm0, %v222_v31  ;;  %256 = vst.msk [vmem:[#allocation2 + $0x129] sm:$0xff] %vm144_vm0, %v223_v32  ;;  %v1440_v15 = vmul.f32 %v2290_v48, %v2304_v56  ;;  %v1752_v16 = vmul.f32 %v2302_v55, %v2304_v56  ;;  %v1293_v18 = vrot.slane %v1197_v4, 2  ;;  %v1604_v19 = vrot.slane %v1508_v7, 1 }
  0x33   : > { %257 = vst.msk [vmem:[#allocation2 + $0x139] sm:$0xff] %vm144_vm0, %v224_v35  ;;  %258 = vst.msk [vmem:[#allocation2 + $0x141] sm:$0xff] %vm144_vm0, %v225_v36  ;;  %v1605_v20 = vrot.slane %v2327_v11, 1  ;;  %v2338_v21 = vmul.f32 %v2302_v55, %v2311_v61  ;;  %v1050_v23 = vsel %vm490_vm2, %v1048_v5, %v1049_v6  ;;  %v396_v25 = vmul.f32 %v2261_v33, %v267_v12 }
  0x34   : > { %259 = vst.msk [vmem:[#allocation2 + $0x151] sm:$0xff] %vm144_vm0, %v226_v37  ;;  %260 = vst.msk [vmem:[#allocation2 + $0x159] sm:$0xff] %vm144_vm0, %v227_v40  ;;  %v1848_v27 = vrot.slane %v1752_v16, 2  ;;  %v327_v29 = vmul.f32 %v2271_v38, %v266_v49  ;;  %v954_v30 = vmul.f32 %v2273_v39, %v2333_v17  ;;  %v916_v31 = vadd.f32 %v884_v10, %v848_v22 }
  0x35   : > { %261 = vst.msk [vmem:[#allocation2 + $0x169] sm:$0xff] %vm144_vm0, %v228_v41  ;;  %262 = vst.msk [vmem:[#allocation2 + $0x171] sm:$0xff] %vm144_vm0, %v229_v42  ;;  %v1849_v28 = vrot.slane %v2338_v21, 2  ;;  %v494_v32 = vrot.slane %v396_v25, 1  ;;  %v739_v35 = vrot.slane %v641_v26, 2  ;;  %v1198_v36 = vmul.f32 %v2281_v43, %v2333_v17 }
  0x36   : > { %263 = vst.msk [vmem:[#allocation2 + $0x181] sm:$0xff] %vm144_vm0, %v230_v44  ;;  %264 = vst.msk [vmem:[#allocation2 + $0x189] sm:$0xff] %vm144_vm0, %v231_v45  ;;  %v1294_v37 = vsel %vm735_vm3, %v1292_v14, %v1293_v18  ;;  %v1606_v40 = vsel %vm490_vm2, %v1604_v19, %v1605_v20  ;;  %v1051_v41 = vrot.slane %v954_v30, 1  ;;  %v1510_v42 = vmul.f32 %v2300_v54, %v2341_v24  ;;  %v2395_v19 = vld [vmem:[#allocation2 + $0x48] sm:$0xff] }
  0x37   : > { %v1160_v44 = vadd.f32 %v1050_v23, %v916_v31  ;;  %v495_v45 = vsel %vm490_vm2, %v492_v2, %v494_v32  ;;  %v740_v46 = vsel %vm735_vm3, %v737_v3, %v739_v35  ;;  %v1295_v49 = vrot.slane %v1198_v36, 2 }
  0x38   : > { %v1850_v52 = vsel %vm735_vm3, %v1848_v27, %v1849_v28  ;;  %v604_v53 = vadd.f32 %v495_v45, %v327_v29  ;;  %v885_v57 = vmul.f32 %v2288_v47, %v2296_v51  ;;  %v1754_v58 = vmul.f32 %v2302_v55, %v2341_v24 }
  0x39   : > { %v1404_v59 = vadd.f32 %v1294_v37, %v1160_v44  ;;  %v1052_v60 = vsel %vm490_vm2, %v1049_v6, %v1051_v41  ;;  %v1441_v62 = vmul.f32 %v2290_v48, %v2311_v61  ;;  %v397_v63 = vmul.f32 %v2261_v33, %v2294_v50 }
  0x3a   : > { %v849_v0 = vadd.f32 %v740_v46, %v604_v53  ;;  %v1296_v1 = vsel %vm735_vm3, %v1293_v18, %v1295_v49  ;;  %v1607_v2 = vrot.slane %v1510_v42, 1  ;;  %v2374_v3 = vmul.f32 %v2261_v33, %v2296_v51 }
  0x3b   : > { %v1472_v4 = vadd.f32 %v1440_v15, %v1404_v59  ;;  %v496_v5 = vrot.slane %v397_v63, 1  ;;  %v642_v6 = vmul.f32 %v2263_v34, %v2294_v50  ;;  %v2380_v7 = vmul.f32 %v2263_v34, %v2296_v51 }
  0x3c   : > { %v917_v8 = vadd.f32 %v885_v57, %v849_v0  ;;  %v1851_v9 = vrot.slane %v1754_v58, 2  ;;  %v328_v10 = vmul.f32 %v2271_v38, %v2294_v50  ;;  %v497_v12 = vrot.slane %v2374_v3, 1  ;;  %v2397_v50 = vld [vmem:[#allocation2 + $0x50] sm:$0xff]  ;;  %v2432_v0 = vld [vmem:[#allocation2 + $0x58] sm:$0x3] }
  0x3d   : > { %v1716_v13 = vadd.f32 %v1606_v40, %v1472_v4  ;;  %v741_v14 = vrot.slane %v642_v6, 2  ;;  %v742_v16 = vrot.slane %v2380_v7, 2  ;;  %v955_v15 = vmul.f32 %v2273_v39, %v2304_v56 }
  0x3e   : > { %v1161_v18 = vadd.f32 %v1052_v60, %v917_v8  ;;  %v498_v22 = vsel %vm490_vm2, %v496_v5, %v497_v12  ;;  %v956_v23 = vmul.f32 %v2273_v39, %v2311_v61  ;;  %v1199_v25 = vmul.f32 %v2281_v43, %v2304_v56 }
  0x3f   : > { %v1960_v26 = vadd.f32 %v1850_v52, %v1716_v13  ;;  %v605_v27 = vadd.f32 %v498_v22, %v328_v10  ;;  %v743_v29 = vsel %vm735_vm3, %v741_v14, %v742_v16  ;;  %v886_v30 = vmul.f32 %v2288_v47, %v2304_v56 }
  0x40   : > { %v1405_v31 = vadd.f32 %v1296_v1, %v1161_v18  ;;  %v1053_v32 = vrot.slane %v955_v15, 1  ;;  %v1054_v35 = vrot.slane %v956_v23, 1  ;;  %v1200_v36 = vmul.f32 %v2281_v43, %v2311_v61 }
  0x41   : > { %1992 = vst.msk [vmem:[%s2393_s24] sm:$0xff] %vm144_vm0, %v1960_v26  ;;  %v850_v37 = vadd.f32 %v743_v29, %v605_v27  ;;  %v1297_v40 = vrot.slane %v1199_v25, 2  ;;  %v1511_v41 = vmul.f32 %v2300_v54, %v2395_v19  ;;  %v2415_v42 = vmul.f32 %v2300_v54, %v2397_v50 }
  0x42   : > { %v1473_v44 = vadd.f32 %v1441_v62, %v1405_v31  ;;  %v1298_v45 = vrot.slane %v1200_v36, 2  ;;  %v1755_v46 = vmul.f32 %v2302_v55, %v2395_v19  ;;  %v1608_v49 = vsel %vm490_vm2, %v1605_v20, %v1607_v2 }
  0x43   : > { %v1852_v52 = vsel %vm735_vm3, %v1849_v28, %v1851_v9  ;;  %v918_v53 = vadd.f32 %v886_v30, %v850_v37  ;;  %v2427_v57 = vmul.f32 %v2302_v55, %v2397_v50  ;;  %v1055_v59 = vsel %vm490_vm2, %v1053_v32, %v1054_v35 }
  0x44   : > { %v1717_v58 = vadd.f32 %v1608_v49, %v1473_v44  ;;  %v1609_v60 = vrot.slane %v1511_v41, 1  ;;  %v1610_v62 = vrot.slane %v2415_v42, 1  ;;  %v1299_v11 = vsel %vm735_vm3, %v1297_v40, %v1298_v45 }
  0x45   : > { %v1162_v63 = vadd.f32 %v1055_v59, %v918_v53  ;;  %v1853_v20 = vrot.slane %v1755_v46, 2  ;;  %v399_v21 = vmul.f32 %v2261_v33, %v2333_v17  ;;  %v1854_v1 = vrot.slane %v2427_v57, 2 }
  0x46   : > { %v1961_v28 = vadd.f32 %v1852_v52, %v1717_v58  ;;  %v644_v2 = vmul.f32 %v2263_v34, %v2333_v17  ;;  %v957_v3 = vmul.f32 %v2273_v39, %v2341_v24  ;;  %v1442_v5 = vmul.f32 %v2290_v48, %v2395_v19 }
  0x47   : > { %v1406_v4 = vadd.f32 %v1299_v11, %v1162_v63  ;;  %v499_v6 = vrot.slane %v399_v21, 1  ;;  %v1201_v7 = vmul.f32 %v2281_v43, %v2341_v24  ;;  %v329_v8 = vmul.f32 %v2271_v38, %v2296_v51  ;;  %v2488_v63 = vld [vmem:[#allocation2 + $0x68] sm:$0xff] }
  0x48   : > { %1993 = vst.msk [vmem:[%s2393_s24 + $0x8] sm:$0xff] %vm144_vm0, %v1961_v28  ;;  %v744_v9 = vrot.slane %v644_v2, 2  ;;  %v1056_v10 = vrot.slane %v957_v3, 1  ;;  %v1513_v17 = vmul.f32 %v2300_v54, %v2432_v0  ;;  %v1611_v14 = vsel %vm490_vm2, %v1609_v60, %v1610_v62  ;;  %v2486_v60 = vld [vmem:[#allocation2 + $0x60] sm:$0xff] }
  0x49   : > { %v1474_v13 = vadd.f32 %v1442_v5, %v1406_v4  ;;  %v500_v15 = vsel %vm490_vm2, %v497_v12, %v499_v6  ;;  %v1300_v18 = vrot.slane %v1201_v7, 2  ;;  %v1855_v22 = vsel %vm735_vm3, %v1853_v20, %v1854_v1 }
  0x4a   : > { %v606_v23 = vadd.f32 %v500_v15, %v329_v8  ;;  %v887_v51 = vmul.f32 %v2288_v47, %v2311_v61  ;;  %v1443_v25 = vmul.f32 %v2290_v48, %v2397_v50  ;;  %v745_v27 = vsel %vm735_vm3, %v742_v16, %v744_v9 }
  0x4b   : > { %v1718_v26 = vadd.f32 %v1611_v14, %v1474_v13  ;;  %v1057_v29 = vsel %vm490_vm2, %v1054_v35, %v1056_v10  ;;  %v1757_v12 = vmul.f32 %v2302_v55, %v2432_v0  ;;  %v1612_v31 = vrot.slane %v1513_v17, 1 }
  0x4c   : > { %v851_v30 = vadd.f32 %v745_v27, %v606_v23  ;;  %v400_v32 = vmul.f32 %v2261_v33, %v2304_v56  ;;  %v401_v36 = vmul.f32 %v2261_v33, %v2311_v61  ;;  %v1301_v40 = vsel %vm735_vm3, %v1298_v45, %v1300_v18 }
  0x4d   : > { %v1962_v37 = vadd.f32 %v1855_v22, %v1718_v26  ;;  %v645_v41 = vmul.f32 %v2263_v34, %v2304_v56  ;;  %v2475_v16 = vmul.f32 %v2263_v34, %v2311_v61  ;;  %v330_v44 = vmul.f32 %v2271_v38, %v2304_v56 }
  0x4e   : > { %v919_v35 = vadd.f32 %v887_v51, %v851_v30  ;;  %v501_v46 = vrot.slane %v400_v32, 1  ;;  %v502_v49 = vrot.slane %v401_v36, 1  ;;  %v958_v45 = vmul.f32 %v2273_v39, %v2395_v19  ;;  %v2526_v30 = vld [vmem:[#allocation2 + $0x70] sm:$0x3] }
  0x4f   : > { %1994 = vst.msk [vmem:[%s2393_s24 + $0x10] sm:$0xff] %vm144_vm0, %v1962_v37  ;;  %v746_v52 = vrot.slane %v645_v41, 2  ;;  %v747_v53 = vrot.slane %v2475_v16, 2  ;;  %v959_v58 = vmul.f32 %v2273_v39, %v2397_v50  ;;  %v1202_v11 = vmul.f32 %v2281_v43, %v2395_v19 }
  0x50   : > { %v1163_v59 = vadd.f32 %v1057_v29, %v919_v35  ;;  %v503_v56 = vsel %vm490_vm2, %v501_v46, %v502_v49  ;;  %v2495_v20 = vmul.f32 %v2281_v43, %v2397_v50  ;;  %v1856_v21 = vrot.slane %v1757_v12, 2 }
  0x51   : > { %v607_v28 = vadd.f32 %v503_v56, %v330_v44  ;;  %v1058_v2 = vrot.slane %v958_v45, 1  ;;  %v1059_v3 = vrot.slane %v959_v58, 1  ;;  %v748_v5 = vsel %vm735_vm3, %v746_v52, %v747_v53 }
  0x52   : > { %v1407_v4 = vadd.f32 %v1301_v40, %v1163_v59  ;;  %v1302_v6 = vrot.slane %v1202_v11, 2  ;;  %v1303_v7 = vrot.slane %v2495_v20, 2  ;;  %v888_v9 = vmul.f32 %v2288_v47, %v2395_v19 }
  0x53   : > { %v852_v8 = vadd.f32 %v748_v5, %v607_v28  ;;  %v1514_v10 = vmul.f32 %v2300_v54, %v2486_v60  ;;  %v2505_v17 = vmul.f32 %v2300_v54, %v2488_v63  ;;  %v1613_v14 = vsel %vm490_vm2, %v1610_v62, %v1612_v31 }
  0x54   : > { %v1475_v13 = vadd.f32 %v1443_v25, %v1407_v4  ;;  %v1758_v15 = vmul.f32 %v2302_v55, %v2486_v60  ;;  %v2514_v18 = vmul.f32 %v2302_v55, %v2488_v63  ;;  %v1857_v22 = vsel %vm735_vm3, %v1854_v1, %v1856_v21 }
  0x55   : > { %v920_v23 = vadd.f32 %v888_v9, %v852_v8  ;;  %v1060_v51 = vsel %vm490_vm2, %v1058_v2, %v1059_v3  ;;  %v1444_v25 = vmul.f32 %v2290_v48, %v2486_v60  ;;  %v1304_v62 = vsel %vm735_vm3, %v1302_v6, %v1303_v7 }
  0x56   : > { %v1719_v42 = vadd.f32 %v1613_v14, %v1475_v13  ;;  %v1614_v26 = vrot.slane %v1514_v10, 1  ;;  %v402_v27 = vmul.f32 %v2261_v33, %v2341_v24  ;;  %v1615_v12 = vrot.slane %v2505_v17, 1 }
  0x57   : > { %v1164_v29 = vadd.f32 %v1060_v51, %v920_v23  ;;  %v1858_v57 = vrot.slane %v1758_v15, 2  ;;  %v647_v1 = vmul.f32 %v2263_v34, %v2341_v24  ;;  %v1859_v32 = vrot.slane %v2514_v18, 2  ;;  %v2569_v51 = vld [vmem:[#allocation2 + $0x78] sm:$0xff] }
  0x58   : > { %v1963_v31 = vadd.f32 %v1857_v22, %v1719_v42  ;;  %v504_v36 = vrot.slane %v402_v27, 1  ;;  %v960_v37 = vmul.f32 %v2273_v39, %v2432_v0  ;;  %v331_v41 = vmul.f32 %v2271_v38, %v2311_v61 }
  0x59   : > { %v1408_v40 = vadd.f32 %v1304_v62, %v1164_v29  ;;  %v749_v16 = vrot.slane %v647_v1, 2  ;;  %v1204_v35 = vmul.f32 %v2281_v43, %v2432_v0  ;;  %v1516_v46 = vmul.f32 %v2300_v54, %v2526_v30 }
  0x5a   : > { %1995 = vst.msk [vmem:[%s2393_s24 + $0x18] sm:$0xff] %vm144_vm0, %v1963_v31  ;;  %v505_v44 = vsel %vm490_vm2, %v502_v49, %v504_v36  ;;  %v1061_v24 = vrot.slane %v960_v37, 1  ;;  %v1760_v52 = vmul.f32 %v2302_v55, %v2526_v30  ;;  %v1616_v58 = vsel %vm490_vm2, %v1614_v26, %v1615_v12 }
  0x5b   : > { %v1476_v45 = vadd.f32 %v1444_v25, %v1408_v40  ;;  %v608_v59 = vadd.f32 %v505_v44, %v331_v41  ;;  %v889_v61 = vmul.f32 %v2288_v47, %v2397_v50  ;;  %v1860_v56 = vsel %vm735_vm3, %v1858_v57, %v1859_v32  ;;  %v2571_v25 = vld [vmem:[#allocation2 + $0x80] sm:$0xff] }
  0x5c   : > { %v750_v11 = vsel %vm735_vm3, %v747_v53, %v749_v16  ;;  %v1305_v20 = vrot.slane %v1204_v35, 2  ;;  %v1445_v49 = vmul.f32 %v2290_v48, %v2488_v63  ;;  %v1062_v2 = vsel %vm490_vm2, %v1059_v3, %v1061_v24 }
  0x5d   : > { %v1720_v21 = vadd.f32 %v1616_v58, %v1476_v45  ;;  %v853_v28 = vadd.f32 %v750_v11, %v608_v59  ;;  %v403_v4 = vmul.f32 %v2261_v33, %v2395_v19  ;;  %v1617_v5 = vrot.slane %v1516_v46, 1 }
  0x5e   : > { %v1861_v6 = vrot.slane %v1760_v52, 2  ;;  %v404_v8 = vmul.f32 %v2261_v33, %v2397_v50  ;;  %v648_v53 = vmul.f32 %v2263_v34, %v2395_v19  ;;  %v2560_v13 = vmul.f32 %v2263_v34, %v2397_v50 }
  0x5f   : > { %v1964_v9 = vadd.f32 %v1860_v56, %v1720_v21  ;;  %v921_v10 = vadd.f32 %v889_v61, %v853_v28  ;;  %v506_v17 = vrot.slane %v403_v4, 1  ;;  %v332_v3 = vmul.f32 %v2271_v38, %v2395_v19 }
  0x60   : > { %v507_v14 = vrot.slane %v404_v8, 1  ;;  %v751_v15 = vrot.slane %v648_v53, 2  ;;  %v961_v18 = vmul.f32 %v2273_v39, %v2486_v60  ;;  %v1306_v23 = vsel %vm735_vm3, %v1303_v7, %v1305_v20  ;;  %v2602_v20 = vld [vmem:[#allocation2 + $0x88] sm:$0x3] }
  0x61   : > { %1996 = vst.msk [vmem:[%s2393_s24 + $0x20] sm:$0xff] %vm144_vm0, %v1964_v9  ;;  %v1165_v22 = vadd.f32 %v1062_v2, %v921_v10  ;;  %v752_v42 = vrot.slane %v2560_v13, 2  ;;  %v962_v62 = vmul.f32 %v2273_v39, %v2488_v63  ;;  %v1618_v19 = vsel %vm490_vm2, %v1615_v12, %v1617_v5 }
  0x62   : > { %v508_v26 = vsel %vm490_vm2, %v506_v17, %v507_v14  ;;  %v1205_v27 = vmul.f32 %v2281_v43, %v2486_v60  ;;  %v1206_v29 = vmul.f32 %v2281_v43, %v2488_v63  ;;  %v1063_v1 = vrot.slane %v961_v18, 1 }
  0x63   : > { %v1409_v7 = vadd.f32 %v1306_v23, %v1165_v22  ;;  %v609_v57 = vadd.f32 %v508_v26, %v332_v3  ;;  %v1064_v31 = vrot.slane %v962_v62, 1  ;;  %v1862_v36 = vsel %vm735_vm3, %v1859_v32, %v1861_v6 }
  0x64   : > { %v753_v37 = vsel %vm735_vm3, %v751_v15, %v752_v42  ;;  %v1517_v40 = vmul.f32 %v2300_v54, %v2569_v51  ;;  %v2588_v12 = vmul.f32 %v2300_v54, %v2571_v25  ;;  %v890_v35 = vmul.f32 %v2288_v47, %v2486_v60 }
  0x65   : > { %v1477_v41 = vadd.f32 %v1445_v49, %v1409_v7  ;;  %v854_v16 = vadd.f32 %v753_v37, %v609_v57  ;;  %v1761_v44 = vmul.f32 %v2302_v55, %v2569_v51  ;;  %v1307_v24 = vrot.slane %v1205_v27, 2 }
  0x66   : > { %v1308_v46 = vrot.slane %v1206_v29, 2  ;;  %v1446_v32 = vmul.f32 %v2290_v48, %v2569_v51  ;;  %v2598_v52 = vmul.f32 %v2302_v55, %v2571_v25  ;;  %v1065_v59 = vsel %vm490_vm2, %v1063_v1, %v1064_v31 }
  0x67   : > { %v1721_v45 = vadd.f32 %v1618_v19, %v1477_v41  ;;  %v922_v58 = vadd.f32 %v890_v35, %v854_v16  ;;  %v1619_v61 = vrot.slane %v1517_v40, 1  ;;  %v1620_v56 = vrot.slane %v2588_v12, 1 }
  0x68   : > { %v1863_v11 = vrot.slane %v1761_v44, 2  ;;  %v405_v49 = vmul.f32 %v2261_v33, %v2432_v0  ;;  %v650_v21 = vmul.f32 %v2263_v34, %v2432_v0  ;;  %v1864_v4 = vrot.slane %v2598_v52, 2 }
  0x69   : > { %v1965_v28 = vadd.f32 %v1862_v36, %v1721_v45  ;;  %v1166_v2 = vadd.f32 %v1065_v59, %v922_v58  ;;  %v963_v5 = vmul.f32 %v2273_v39, %v2526_v30  ;;  %v1309_v6 = vsel %vm735_vm3, %v1307_v24, %v1308_v46  ;;  %v2655_v59 = vld [vmem:[#allocation2 + $0x90] sm:$0xff] }
  0x6a   : > { %v509_v8 = vrot.slane %v405_v49, 1  ;;  %v754_v53 = vrot.slane %v650_v21, 2  ;;  %v1207_v9 = vmul.f32 %v2281_v43, %v2526_v30  ;;  %v333_v0 = vmul.f32 %v2271_v38, %v2397_v50 }
  0x6b   : > { %1997 = vst.msk [vmem:[%s2393_s24 + $0x28] sm:$0xff] %vm144_vm0, %v1965_v28  ;;  %v1410_v10 = vadd.f32 %v1309_v6, %v1166_v2  ;;  %v1066_v17 = vrot.slane %v963_v5, 1  ;;  %v1519_v13 = vmul.f32 %v2300_v54, %v2602_v20  ;;  %v1621_v3 = vsel %vm490_vm2, %v1619_v61, %v1620_v56  ;;  %v2657_v61 = vld [vmem:[#allocation2 + $0x98] sm:$0xff] }
  0x6c   : > { %v510_v15 = vsel %vm490_vm2, %v507_v14, %v509_v8  ;;  %v891_v18 = vmul.f32 %v2288_v47, %v2488_v63  ;;  %v1310_v22 = vrot.slane %v1207_v9, 2  ;;  %v1865_v62 = vsel %vm735_vm3, %v1863_v11, %v1864_v4 }
  0x6d   : > { %v1478_v23 = vadd.f32 %v1446_v32, %v1410_v10  ;;  %v610_v50 = vadd.f32 %v510_v15, %v333_v0  ;;  %v1447_v19 = vmul.f32 %v2290_v48, %v2571_v25  ;;  %v755_v26 = vsel %vm735_vm3, %v752_v42, %v754_v53 }
  0x6e   : > { %v1067_v27 = vsel %vm490_vm2, %v1064_v31, %v1066_v17  ;;  %v1763_v14 = vmul.f32 %v2302_v55, %v2602_v20  ;;  %v406_v29 = vmul.f32 %v2261_v33, %v2486_v60  ;;  %v1622_v1 = vrot.slane %v1519_v13, 1 }
  0x6f   : > { %v1722_v7 = vadd.f32 %v1621_v3, %v1478_v23  ;;  %v855_v57 = vadd.f32 %v755_v26, %v610_v50  ;;  %v407_v36 = vmul.f32 %v2261_v33, %v2488_v63  ;;  %v1311_v37 = vsel %vm735_vm3, %v1308_v46, %v1310_v22 }
  0x70   : > { %v511_v40 = vrot.slane %v406_v29, 1  ;;  %v651_v42 = vmul.f32 %v2263_v34, %v2486_v60  ;;  %v2644_v31 = vmul.f32 %v2263_v34, %v2488_v63  ;;  %v334_v35 = vmul.f32 %v2271_v38, %v2486_v60 }
  0x71   : > { %v1966_v41 = vadd.f32 %v1865_v62, %v1722_v7  ;;  %v923_v16 = vadd.f32 %v891_v18, %v855_v57  ;;  %v512_v44 = vrot.slane %v407_v36, 1  ;;  %v964_v46 = vmul.f32 %v2273_v39, %v2569_v51  ;;  %v2695_v7 = vld [vmem:[#allocation2 + $0xa0] sm:$0x3] }
  0x72   : > { %v756_v24 = vrot.slane %v651_v42, 2  ;;  %v757_v32 = vrot.slane %v2644_v31, 2  ;;  %v965_v45 = vmul.f32 %v2273_v39, %v2571_v25  ;;  %v1208_v60 = vmul.f32 %v2281_v43, %v2569_v51 }
  0x73   : > { %1998 = vst.msk [vmem:[%s2393_s24 + $0x30] sm:$0xff] %vm144_vm0, %v1966_v41  ;;  %v1167_v58 = vadd.f32 %v1067_v27, %v923_v16  ;;  %v513_v11 = vsel %vm490_vm2, %v511_v40, %v512_v44  ;;  %v2664_v49 = vmul.f32 %v2281_v43, %v2571_v25  ;;  %v1866_v21 = vrot.slane %v1763_v14, 2 }
  0x74   : > { %v611_v28 = vadd.f32 %v513_v11, %v334_v35  ;;  %v1068_v2 = vrot.slane %v964_v46, 1  ;;  %v1069_v5 = vrot.slane %v965_v45, 1  ;;  %v758_v8 = vsel %vm735_vm3, %v756_v24, %v757_v32 }
  0x75   : > { %v1411_v6 = vadd.f32 %v1311_v37, %v1167_v58  ;;  %v1312_v53 = vrot.slane %v1208_v60, 2  ;;  %v1313_v9 = vrot.slane %v2664_v49, 2  ;;  %v892_v0 = vmul.f32 %v2288_v47, %v2569_v51 }
  0x76   : > { %v856_v10 = vadd.f32 %v758_v8, %v611_v28  ;;  %v1520_v17 = vmul.f32 %v2300_v54, %v2655_v59  ;;  %v2674_v13 = vmul.f32 %v2300_v54, %v2657_v61  ;;  %v1623_v15 = vsel %vm490_vm2, %v1620_v56, %v1622_v1 }
  0x77   : > { %v1479_v3 = vadd.f32 %v1447_v19, %v1411_v6  ;;  %v1764_v18 = vmul.f32 %v2302_v55, %v2655_v59  ;;  %v2683_v22 = vmul.f32 %v2302_v55, %v2657_v61  ;;  %v1867_v23 = vsel %vm735_vm3, %v1864_v4, %v1866_v21 }
  0x78   : > { %v924_v62 = vadd.f32 %v892_v0, %v856_v10  ;;  %v1070_v50 = vsel %vm490_vm2, %v1068_v2, %v1069_v5  ;;  %v1448_v19 = vmul.f32 %v2290_v48, %v2655_v59  ;;  %v1314_v56 = vsel %vm735_vm3, %v1312_v53, %v1313_v9 }
  0x79   : > { %v1723_v12 = vadd.f32 %v1623_v15, %v1479_v3  ;;  %v1624_v26 = vrot.slane %v1520_v17, 1  ;;  %v408_v27 = vmul.f32 %v2261_v33, %v2526_v30  ;;  %v1625_v29 = vrot.slane %v2674_v13, 1 }
  0x7a   : > { %v1168_v14 = vadd.f32 %v1070_v50, %v924_v62  ;;  %v1868_v52 = vrot.slane %v1764_v18, 2  ;;  %v653_v4 = vmul.f32 %v2263_v34, %v2526_v30  ;;  %v1869_v1 = vrot.slane %v2683_v22, 2  ;;  %v2738_v50 = vld [vmem:[#allocation2 + $0xa8] sm:$0xff] }
  0x7b   : > { %v1967_v57 = vadd.f32 %v1867_v23, %v1723_v12  ;;  %v514_v36 = vrot.slane %v408_v27, 1  ;;  %v966_v37 = vmul.f32 %v2273_v39, %v2602_v20  ;;  %v335_v42 = vmul.f32 %v2271_v38, %v2488_v63 }
  0x7c   : > { %v1412_v40 = vadd.f32 %v1314_v56, %v1168_v14  ;;  %v759_v31 = vrot.slane %v653_v4, 2  ;;  %v1210_v41 = vmul.f32 %v2281_v43, %v2602_v20  ;;  %v1522_v35 = vmul.f32 %v2300_v54, %v2695_v7 }
  0x7d   : > { %1999 = vst.msk [vmem:[%s2393_s24 + $0x38] sm:$0xff] %vm144_vm0, %v1967_v57  ;;  %v515_v16 = vsel %vm490_vm2, %v512_v44, %v514_v36  ;;  %v1071_v30 = vrot.slane %v966_v37, 1  ;;  %v1766_v24 = vmul.f32 %v2302_v55, %v2695_v7  ;;  %v1626_v45 = vsel %vm490_vm2, %v1624_v26, %v1625_v29 }
  0x7e   : > { %v1480_v46 = vadd.f32 %v1448_v19, %v1412_v40  ;;  %v612_v58 = vadd.f32 %v515_v16, %v335_v42  ;;  %v893_v63 = vmul.f32 %v2288_v47, %v2571_v25  ;;  %v1870_v11 = vsel %vm735_vm3, %v1868_v52, %v1869_v1  ;;  %v2740_v19 = vld [vmem:[#allocation2 + $0xb0] sm:$0xff] }
  0x7f   : > { %v760_v60 = vsel %vm735_vm3, %v757_v32, %v759_v31  ;;  %v1315_v49 = vrot.slane %v1210_v41, 2  ;;  %v1449_v44 = vmul.f32 %v2290_v48, %v2657_v61  ;;  %v1072_v2 = vsel %vm490_vm2, %v1069_v5, %v1071_v30 }
  0x80   : > { %v1724_v21 = vadd.f32 %v1626_v45, %v1480_v46  ;;  %v857_v28 = vadd.f32 %v760_v60, %v612_v58  ;;  %v409_v6 = vmul.f32 %v2261_v33, %v2569_v51  ;;  %v1627_v8 = vrot.slane %v1522_v35, 1 }
  0x81   : > { %v1871_v53 = vrot.slane %v1766_v24, 2  ;;  %v410_v10 = vmul.f32 %v2261_v33, %v2571_v25  ;;  %v654_v32 = vmul.f32 %v2263_v34, %v2569_v51  ;;  %v2729_v3 = vmul.f32 %v2263_v34, %v2571_v25 }
  0x82   : > { %v1968_v0 = vadd.f32 %v1870_v11, %v1724_v21  ;;  %v925_v17 = vadd.f32 %v893_v63, %v857_v28  ;;  %v516_v13 = vrot.slane %v409_v6, 1  ;;  %v336_v5 = vmul.f32 %v2271_v38, %v2569_v51 }
  0x83   : > { %v517_v15 = vrot.slane %v410_v10, 1  ;;  %v761_v18 = vrot.slane %v654_v32, 2  ;;  %v967_v22 = vmul.f32 %v2273_v39, %v2655_v59  ;;  %v1316_v62 = vsel %vm735_vm3, %v1313_v9, %v1315_v49  ;;  %v2771_v49 = vld [vmem:[#allocation2 + $0xb8] sm:$0x3] }
  0x84   : > { %2000 = vst.msk [vmem:[%s2393_s24 + $0x40] sm:$0xff] %vm144_vm0, %v1968_v0  ;;  %v1169_v23 = vadd.f32 %v1072_v2, %v925_v17  ;;  %v762_v12 = vrot.slane %v2729_v3, 2  ;;  %v968_v56 = vmul.f32 %v2273_v39, %v2657_v61  ;;  %v1628_v51 = vsel %vm490_vm2, %v1625_v29, %v1627_v8 }
  0x85   : > { %v518_v26 = vsel %vm490_vm2, %v516_v13, %v517_v15  ;;  %v1211_v27 = vmul.f32 %v2281_v43, %v2655_v59  ;;  %v1212_v14 = vmul.f32 %v2281_v43, %v2657_v61  ;;  %v1073_v4 = vrot.slane %v967_v22, 1 }
  0x86   : > { %v1413_v9 = vadd.f32 %v1316_v62, %v1169_v23  ;;  %v613_v52 = vadd.f32 %v518_v26, %v336_v5  ;;  %v1074_v57 = vrot.slane %v968_v56, 1  ;;  %v1872_v36 = vsel %vm735_vm3, %v1869_v1, %v1871_v53 }
  0x87   : > { %v763_v37 = vsel %vm735_vm3, %v761_v18, %v762_v12  ;;  %v1523_v40 = vmul.f32 %v2300_v54, %v2738_v50  ;;  %v2757_v29 = vmul.f32 %v2300_v54, %v2740_v19  ;;  %v894_v41 = vmul.f32 %v2288_v47, %v2655_v59 }
  0x88   : > { %v1481_v42 = vadd.f32 %v1449_v44, %v1413_v9  ;;  %v858_v31 = vadd.f32 %v763_v37, %v613_v52  ;;  %v1767_v16 = vmul.f32 %v2302_v55, %v2738_v50  ;;  %v1317_v30 = vrot.slane %v1211_v27, 2 }
  0x89   : > { %v1318_v35 = vrot.slane %v1212_v14, 2  ;;  %v1450_v1 = vmul.f32 %v2290_v48, %v2738_v50  ;;  %v2767_v24 = vmul.f32 %v2302_v55, %v2740_v19  ;;  %v1075_v58 = vsel %vm490_vm2, %v1073_v4, %v1074_v57 }
  0x8a   : > { %v1725_v46 = vadd.f32 %v1628_v51, %v1481_v42  ;;  %v926_v45 = vadd.f32 %v894_v41, %v858_v31  ;;  %v1629_v63 = vrot.slane %v1523_v40, 1  ;;  %v1630_v11 = vrot.slane %v2757_v29, 1 }
  0x8b   : > { %v1873_v60 = vrot.slane %v1767_v16, 2  ;;  %v411_v44 = vmul.f32 %v2261_v33, %v2602_v20  ;;  %v656_v21 = vmul.f32 %v2263_v34, %v2602_v20  ;;  %v1874_v6 = vrot.slane %v2767_v24, 2 }
  0x8c   : > { %v1969_v28 = vadd.f32 %v1872_v36, %v1725_v46  ;;  %v1170_v2 = vadd.f32 %v1075_v58, %v926_v45  ;;  %v969_v8 = vmul.f32 %v2273_v39, %v2695_v7  ;;  %v1319_v53 = vsel %vm735_vm3, %v1317_v30, %v1318_v35  ;;  %v2824_v58 = vld [vmem:[#allocation2 + $0xc0] sm:$0xff] }
  0x8d   : > { %v519_v10 = vrot.slane %v411_v44, 1  ;;  %v764_v32 = vrot.slane %v656_v21, 2  ;;  %v1213_v0 = vmul.f32 %v2281_v43, %v2695_v7  ;;  %v337_v20 = vmul.f32 %v2271_v38, %v2571_v25 }
  0x8e   : > { %2001 = vst.msk [vmem:[%s2393_s24 + $0x48] sm:$0xff] %vm144_vm0, %v1969_v28  ;;  %v1414_v17 = vadd.f32 %v1319_v53, %v1170_v2  ;;  %v1076_v13 = vrot.slane %v969_v8, 1  ;;  %v1525_v3 = vmul.f32 %v2300_v54, %v2771_v49  ;;  %v1631_v5 = vsel %vm490_vm2, %v1629_v63, %v1630_v11  ;;  %v2826_v63 = vld [vmem:[#allocation2 + $0xc8] sm:$0xff] }
  0x8f   : > { %v520_v18 = vsel %vm490_vm2, %v517_v15, %v519_v10  ;;  %v895_v22 = vmul.f32 %v2288_v47, %v2657_v61  ;;  %v1320_v23 = vrot.slane %v1213_v0, 2  ;;  %v1875_v56 = vsel %vm735_vm3, %v1873_v60, %v1874_v6 }
  0x90   : > { %v1482_v62 = vadd.f32 %v1450_v1, %v1414_v17  ;;  %v614_v25 = vadd.f32 %v520_v18, %v337_v20  ;;  %v1451_v51 = vmul.f32 %v2290_v48, %v2740_v19  ;;  %v765_v26 = vsel %vm735_vm3, %v762_v12, %v764_v32 }
  0x91   : > { %v1077_v27 = vsel %vm490_vm2, %v1074_v57, %v1076_v13  ;;  %v1769_v15 = vmul.f32 %v2302_v55, %v2771_v49  ;;  %v412_v14 = vmul.f32 %v2261_v33, %v2655_v59  ;;  %v1632_v4 = vrot.slane %v1525_v3, 1 }
  0x92   : > { %v1726_v9 = vadd.f32 %v1631_v5, %v1482_v62  ;;  %v859_v52 = vadd.f32 %v765_v26, %v614_v25  ;;  %v413_v36 = vmul.f32 %v2261_v33, %v2657_v61  ;;  %v1321_v37 = vsel %vm735_vm3, %v1318_v35, %v1320_v23 }
  0x93   : > { %v521_v40 = vrot.slane %v412_v14, 1  ;;  %v657_v12 = vmul.f32 %v2263_v34, %v2655_v59  ;;  %v2813_v57 = vmul.f32 %v2263_v34, %v2657_v61  ;;  %v338_v41 = vmul.f32 %v2271_v38, %v2655_v59 }
  0x94   : > { %v1970_v42 = vadd.f32 %v1875_v56, %v1726_v9  ;;  %v927_v31 = vadd.f32 %v895_v22, %v859_v52  ;;  %v522_v16 = vrot.slane %v413_v36, 1  ;;  %v970_v35 = vmul.f32 %v2273_v39, %v2738_v50  ;;  %v2864_v9 = vld [vmem:[#allocation2 + $0xd0] sm:$0x3] }
  0x95   : > { %v766_v30 = vrot.slane %v657_v12, 2  ;;  %v767_v1 = vrot.slane %v2813_v57, 2  ;;  %v971_v46 = vmul.f32 %v2273_v39, %v2740_v19  ;;  %v1214_v59 = vmul.f32 %v2281_v43, %v2738_v50 }
  0x96   : > { %2002 = vst.msk [vmem:[%s2393_s24 + $0x50] sm:$0xff] %vm144_vm0, %v1970_v42  ;;  %v1171_v45 = vadd.f32 %v1077_v27, %v927_v31  ;;  %v523_v60 = vsel %vm490_vm2, %v521_v40, %v522_v16  ;;  %v2833_v44 = vmul.f32 %v2281_v43, %v2740_v19  ;;  %v1876_v21 = vrot.slane %v1769_v15, 2 }
  0x97   : > { %v615_v28 = vadd.f32 %v523_v60, %v338_v41  ;;  %v1078_v2 = vrot.slane %v970_v35, 1  ;;  %v1079_v8 = vrot.slane %v971_v46, 1  ;;  %v768_v10 = vsel %vm735_vm3, %v766_v30, %v767_v1 }
  0x98   : > { %v1415_v53 = vadd.f32 %v1321_v37, %v1171_v45  ;;  %v1322_v32 = vrot.slane %v1214_v59, 2  ;;  %v1323_v0 = vrot.slane %v2833_v44, 2  ;;  %v896_v20 = vmul.f32 %v2288_v47, %v2738_v50 }
  0x99   : > { %v860_v17 = vadd.f32 %v768_v10, %v615_v28  ;;  %v1526_v13 = vmul.f32 %v2300_v54, %v2824_v58  ;;  %v2843_v3 = vmul.f32 %v2300_v54, %v2826_v63  ;;  %v1633_v18 = vsel %vm490_vm2, %v1630_v11, %v1632_v4 }
  0x9a   : > { %v1483_v5 = vadd.f32 %v1451_v51, %v1415_v53  ;;  %v1770_v22 = vmul.f32 %v2302_v55, %v2824_v58  ;;  %v2852_v23 = vmul.f32 %v2302_v55, %v2826_v63  ;;  %v1877_v62 = vsel %vm735_vm3, %v1874_v6, %v1876_v21 }
  0x9b   : > { %v928_v56 = vadd.f32 %v896_v20, %v860_v17  ;;  %v1080_v25 = vsel %vm490_vm2, %v1078_v2, %v1079_v8  ;;  %v1452_v51 = vmul.f32 %v2290_v48, %v2824_v58  ;;  %v1324_v11 = vsel %vm735_vm3, %v1322_v32, %v1323_v0 }
  0x9c   : > { %v1727_v29 = vadd.f32 %v1633_v18, %v1483_v5  ;;  %v1634_v26 = vrot.slane %v1526_v13, 1  ;;  %v414_v27 = vmul.f32 %v2261_v33, %v2695_v7  ;;  %v1635_v14 = vrot.slane %v2843_v3, 1 }
  0x9d   : > { %v1172_v15 = vadd.f32 %v1080_v25, %v928_v56  ;;  %v1878_v24 = vrot.slane %v1770_v22, 2  ;;  %v659_v6 = vmul.f32 %v2263_v34, %v2695_v7  ;;  %v1879_v4 = vrot.slane %v2852_v23, 2  ;;  %v2907_v25 = vld [vmem:[#allocation2 + $0xd8] sm:$0xff] }
  0x9e   : > { %v1971_v52 = vadd.f32 %v1877_v62, %v1727_v29  ;;  %v524_v36 = vrot.slane %v414_v27, 1  ;;  %v972_v37 = vmul.f32 %v2273_v39, %v2771_v49  ;;  %v339_v12 = vmul.f32 %v2271_v38, %v2657_v61 }
  0x9f   : > { %v1416_v40 = vadd.f32 %v1324_v11, %v1172_v15  ;;  %v769_v57 = vrot.slane %v659_v6, 2  ;;  %v1216_v42 = vmul.f32 %v2281_v43, %v2771_v49  ;;  %v1528_v41 = vmul.f32 %v2300_v54, %v2864_v9 }
  0xa0   : > { %2003 = vst.msk [vmem:[%s2393_s24 + $0x58] sm:$0xff] %vm144_vm0, %v1971_v52  ;;  %v525_v31 = vsel %vm490_vm2, %v522_v16, %v524_v36  ;;  %v1081_v7 = vrot.slane %v972_v37, 1  ;;  %v1772_v30 = vmul.f32 %v2302_v55, %v2864_v9  ;;  %v1636_v46 = vsel %vm490_vm2, %v1634_v26, %v1635_v14 }
  0xa1   : > { %v1484_v35 = vadd.f32 %v1452_v51, %v1416_v40  ;;  %v616_v45 = vadd.f32 %v525_v31, %v339_v12  ;;  %v897_v61 = vmul.f32 %v2288_v47, %v2740_v19  ;;  %v1880_v60 = vsel %vm735_vm3, %v1878_v24, %v1879_v4  ;;  %v2909_v51 = vld [vmem:[#allocation2 + $0xe0] sm:$0xff] }
  0xa2   : > { %v770_v59 = vsel %vm735_vm3, %v767_v1, %v769_v57  ;;  %v1325_v44 = vrot.slane %v1216_v42, 2  ;;  %v1453_v16 = vmul.f32 %v2290_v48, %v2826_v63  ;;  %v1082_v2 = vsel %vm490_vm2, %v1079_v8, %v1081_v7 }
  0xa3   : > { %v1728_v21 = vadd.f32 %v1636_v46, %v1484_v35  ;;  %v861_v28 = vadd.f32 %v770_v59, %v616_v45  ;;  %v415_v53 = vmul.f32 %v2261_v33, %v2738_v50  ;;  %v1637_v10 = vrot.slane %v1528_v41, 1 }
  0xa4   : > { %v1881_v32 = vrot.slane %v1772_v30, 2  ;;  %v416_v17 = vmul.f32 %v2261_v33, %v2740_v19  ;;  %v660_v1 = vmul.f32 %v2263_v34, %v2738_v50  ;;  %v2898_v5 = vmul.f32 %v2263_v34, %v2740_v19 }
  0xa5   : > { %v1972_v20 = vadd.f32 %v1880_v60, %v1728_v21  ;;  %v929_v13 = vadd.f32 %v897_v61, %v861_v28  ;;  %v526_v3 = vrot.slane %v415_v53, 1  ;;  %v340_v8 = vmul.f32 %v2271_v38, %v2738_v50 }
  0xa6   : > { %v527_v18 = vrot.slane %v416_v17, 1  ;;  %v771_v22 = vrot.slane %v660_v1, 2  ;;  %v973_v23 = vmul.f32 %v2273_v39, %v2824_v58  ;;  %v1326_v56 = vsel %vm735_vm3, %v1323_v0, %v1325_v44  ;;  %v2940_v44 = vld [vmem:[#allocation2 + $0xe8] sm:$0x3] }
  0xa7   : > { %2004 = vst.msk [vmem:[%s2393_s24 + $0x60] sm:$0xff] %vm144_vm0, %v1972_v20  ;;  %v1173_v62 = vadd.f32 %v1082_v2, %v929_v13  ;;  %v772_v29 = vrot.slane %v2898_v5, 2  ;;  %v974_v11 = vmul.f32 %v2273_v39, %v2826_v63  ;;  %v1638_v50 = vsel %vm490_vm2, %v1635_v14, %v1637_v10 }
  0xa8   : > { %v528_v26 = vsel %vm490_vm2, %v526_v3, %v527_v18  ;;  %v1217_v27 = vmul.f32 %v2281_v43, %v2824_v58  ;;  %v1218_v15 = vmul.f32 %v2281_v43, %v2826_v63  ;;  %v1083_v6 = vrot.slane %v973_v23, 1 }
  0xa9   : > { %v1417_v0 = vadd.f32 %v1326_v56, %v1173_v62  ;;  %v617_v24 = vadd.f32 %v528_v26, %v340_v8  ;;  %v1084_v52 = vrot.slane %v974_v11, 1  ;;  %v1882_v36 = vsel %vm735_vm3, %v1879_v4, %v1881_v32 }
  0xaa   : > { %v773_v37 = vsel %vm735_vm3, %v771_v22, %v772_v29  ;;  %v1529_v40 = vmul.f32 %v2300_v54, %v2907_v25  ;;  %v2926_v14 = vmul.f32 %v2300_v54, %v2909_v51  ;;  %v898_v42 = vmul.f32 %v2288_v47, %v2824_v58 }
  0xab   : > { %v1485_v12 = vadd.f32 %v1453_v16, %v1417_v0  ;;  %v862_v57 = vadd.f32 %v773_v37, %v617_v24  ;;  %v1773_v31 = vmul.f32 %v2302_v55, %v2907_v25  ;;  %v1327_v7 = vrot.slane %v1217_v27, 2 }
  0xac   : > { %v1328_v41 = vrot.slane %v1218_v15, 2  ;;  %v1454_v4 = vmul.f32 %v2290_v48, %v2907_v25  ;;  %v2936_v30 = vmul.f32 %v2302_v55, %v2909_v51  ;;  %v1085_v45 = vsel %vm490_vm2, %v1083_v6, %v1084_v52 }
  0xad   : > { %v1729_v35 = vadd.f32 %v1638_v50, %v1485_v12  ;;  %v930_v46 = vadd.f32 %v898_v42, %v862_v57  ;;  %v1639_v61 = vrot.slane %v1529_v40, 1  ;;  %v1640_v60 = vrot.slane %v2926_v14, 1 }
  0xae   : > { %v1883_v59 = vrot.slane %v1773_v31, 2  ;;  %v417_v16 = vmul.f32 %v2261_v33, %v2771_v49  ;;  %v662_v21 = vmul.f32 %v2263_v34, %v2771_v49  ;;  %v1884_v53 = vrot.slane %v2936_v30, 2 }
  0xaf   : > { %v1973_v28 = vadd.f32 %v1882_v36, %v1729_v35  ;;  %v1174_v2 = vadd.f32 %v1085_v45, %v930_v46  ;;  %v975_v10 = vmul.f32 %v2273_v39, %v2864_v9  ;;  %v1329_v32 = vsel %vm735_vm3, %v1327_v7, %v1328_v41  ;;  %v2993_v45 = vld [vmem:[#allocation2 + $0xf0] sm:$0xff] }
  0xb0   : > { %v529_v17 = vrot.slane %v417_v16, 1  ;;  %v774_v1 = vrot.slane %v662_v21, 2  ;;  %v1219_v20 = vmul.f32 %v2281_v43, %v2864_v9  ;;  %v341_v49 = vmul.f32 %v2271_v38, %v2740_v19 }
  0xb1   : > { %2005 = vst.msk [vmem:[%s2393_s24 + $0x68] sm:$0xff] %vm144_vm0, %v1973_v28  ;;  %v1418_v13 = vadd.f32 %v1329_v32, %v1174_v2  ;;  %v1086_v3 = vrot.slane %v975_v10, 1  ;;  %v1531_v5 = vmul.f32 %v2300_v54, %v2940_v44  ;;  %v1641_v8 = vsel %vm490_vm2, %v1639_v61, %v1640_v60  ;;  %v2995_v61 = vld [vmem:[#allocation2 + $0xf8] sm:$0xff] }
  0xb2   : > { %v530_v22 = vsel %vm490_vm2, %v527_v18, %v529_v17  ;;  %v899_v23 = vmul.f32 %v2288_v47, %v2826_v63  ;;  %v1330_v62 = vrot.slane %v1219_v20, 2  ;;  %v1885_v11 = vsel %vm735_vm3, %v1883_v59, %v1884_v53 }
  0xb3   : > { %v1486_v56 = vadd.f32 %v1454_v4, %v1418_v13  ;;  %v618_v19 = vadd.f32 %v530_v22, %v341_v49  ;;  %v1455_v50 = vmul.f32 %v2290_v48, %v2909_v51  ;;  %v775_v26 = vsel %vm735_vm3, %v772_v29, %v774_v1 }
  0xb4   : > { %v1087_v27 = vsel %vm490_vm2, %v1084_v52, %v1086_v3  ;;  %v1775_v18 = vmul.f32 %v2302_v55, %v2940_v44  ;;  %v418_v15 = vmul.f32 %v2261_v33, %v2824_v58  ;;  %v1642_v6 = vrot.slane %v1531_v5, 1 }
  0xb5   : > { %v1730_v0 = vadd.f32 %v1641_v8, %v1486_v56  ;;  %v863_v24 = vadd.f32 %v775_v26, %v618_v19  ;;  %v419_v36 = vmul.f32 %v2261_v33, %v2826_v63  ;;  %v1331_v37 = vsel %vm735_vm3, %v1328_v41, %v1330_v62 }
  0xb6   : > { %v531_v40 = vrot.slane %v418_v15, 1  ;;  %v663_v29 = vmul.f32 %v2263_v34, %v2824_v58  ;;  %v2982_v52 = vmul.f32 %v2263_v34, %v2826_v63  ;;  %v342_v42 = vmul.f32 %v2271_v38, %v2824_v58 }
  0xb7   : > { %v1974_v12 = vadd.f32 %v1885_v11, %v1730_v0  ;;  %v931_v57 = vadd.f32 %v899_v23, %v863_v24  ;;  %v532_v31 = vrot.slane %v419_v36, 1  ;;  %v976_v41 = vmul.f32 %v2273_v39, %v2907_v25  ;;  %v3033_v0 = vld [vmem:[#allocation2 + $0x100] sm:$0x3] }
  0xb8   : > { %v776_v7 = vrot.slane %v663_v29, 2  ;;  %v777_v4 = vrot.slane %v2982_v52, 2  ;;  %v977_v35 = vmul.f32 %v2273_v39, %v2909_v51  ;;  %v1220_v58 = vmul.f32 %v2281_v43, %v2907_v25 }
  0xb9   : > { %2006 = vst.msk [vmem:[%s2393_s24 + $0x70] sm:$0xff] %vm144_vm0, %v1974_v12  ;;  %v1175_v46 = vadd.f32 %v1087_v27, %v931_v57  ;;  %v533_v59 = vsel %vm490_vm2, %v531_v40, %v532_v31  ;;  %v3002_v16 = vmul.f32 %v2281_v43, %v2909_v51  ;;  %v1886_v21 = vrot.slane %v1775_v18, 2 }
  0xba   : > { %v619_v28 = vadd.f32 %v533_v59, %v342_v42  ;;  %v1088_v2 = vrot.slane %v976_v41, 1  ;;  %v1089_v10 = vrot.slane %v977_v35, 1  ;;  %v778_v17 = vsel %vm735_vm3, %v776_v7, %v777_v4 }
  0xbb   : > { %v1419_v32 = vadd.f32 %v1331_v37, %v1175_v46  ;;  %v1332_v1 = vrot.slane %v1220_v58, 2  ;;  %v1333_v20 = vrot.slane %v3002_v16, 2  ;;  %v900_v49 = vmul.f32 %v2288_v47, %v2907_v25 }
  0xbc   : > { %v864_v13 = vadd.f32 %v778_v17, %v619_v28  ;;  %v1532_v3 = vmul.f32 %v2300_v54, %v2993_v45  ;;  %v3012_v5 = vmul.f32 %v2300_v54, %v2995_v61  ;;  %v1643_v22 = vsel %vm490_vm2, %v1640_v60, %v1642_v6 }
  0xbd   : > { %v1487_v8 = vadd.f32 %v1455_v50, %v1419_v32  ;;  %v1776_v23 = vmul.f32 %v2302_v55, %v2993_v45  ;;  %v3021_v62 = vmul.f32 %v2302_v55, %v2995_v61  ;;  %v1887_v56 = vsel %vm735_vm3, %v1884_v53, %v1886_v21 }
  0xbe   : > { %v932_v11 = vadd.f32 %v900_v49, %v864_v13  ;;  %v1090_v19 = vsel %vm490_vm2, %v1088_v2, %v1089_v10  ;;  %v1456_v50 = vmul.f32 %v2290_v48, %v2993_v45  ;;  %v1334_v60 = vsel %vm735_vm3, %v1332_v1, %v1333_v20 }
  0xbf   : > { %v1731_v14 = vadd.f32 %v1643_v22, %v1487_v8  ;;  %v1644_v26 = vrot.slane %v1532_v3, 1  ;;  %v420_v27 = vmul.f32 %v2261_v33, %v2864_v9  ;;  %v1645_v15 = vrot.slane %v3012_v5, 1 }
  0xc0   : > { %v1176_v18 = vadd.f32 %v1090_v19, %v932_v11  ;;  %v1888_v30 = vrot.slane %v1776_v23, 2  ;;  %v665_v53 = vmul.f32 %v2263_v34, %v2864_v9  ;;  %v1889_v6 = vrot.slane %v3021_v62, 2  ;;  %v3076_v19 = vld [vmem:[#allocation2 + $0x108] sm:$0xff] }
  0xc1   : > { %v1975_v24 = vadd.f32 %v1887_v56, %v1731_v14  ;;  %v534_v36 = vrot.slane %v420_v27, 1  ;;  %v978_v37 = vmul.f32 %v2273_v39, %v2940_v44  ;;  %v343_v29 = vmul.f32 %v2271_v38, %v2826_v63 }
  0xc2   : > { %v1420_v40 = vadd.f32 %v1334_v60, %v1176_v18  ;;  %v779_v52 = vrot.slane %v665_v53, 2  ;;  %v1222_v12 = vmul.f32 %v2281_v43, %v2940_v44  ;;  %v1534_v42 = vmul.f32 %v2300_v54, %v3033_v0 }
  0xc3   : > { %2007 = vst.msk [vmem:[%s2393_s24 + $0x78] sm:$0xff] %vm144_vm0, %v1975_v24  ;;  %v535_v57 = vsel %vm490_vm2, %v532_v31, %v534_v36  ;;  %v1091_v9 = vrot.slane %v978_v37, 1  ;;  %v1778_v7 = vmul.f32 %v2302_v55, %v3033_v0  ;;  %v1646_v35 = vsel %vm490_vm2, %v1644_v26, %v1645_v15 }
  0xc4   : > { %v1488_v41 = vadd.f32 %v1456_v50, %v1420_v40  ;;  %v620_v46 = vadd.f32 %v535_v57, %v343_v29  ;;  %v901_v63 = vmul.f32 %v2288_v47, %v2909_v51  ;;  %v1890_v59 = vsel %vm735_vm3, %v1888_v30, %v1889_v6  ;;  %v3078_v50 = vld [vmem:[#allocation2 + $0x110] sm:$0xff] }
  0xc5   : > { %v780_v58 = vsel %vm735_vm3, %v777_v4, %v779_v52  ;;  %v1335_v16 = vrot.slane %v1222_v12, 2  ;;  %v1457_v31 = vmul.f32 %v2290_v48, %v2995_v61  ;;  %v1092_v2 = vsel %vm490_vm2, %v1089_v10, %v1091_v9 }
  0xc6   : > { %v1732_v21 = vadd.f32 %v1646_v35, %v1488_v41  ;;  %v865_v28 = vadd.f32 %v780_v58, %v620_v46  ;;  %v421_v32 = vmul.f32 %v2261_v33, %v2907_v25  ;;  %v1647_v17 = vrot.slane %v1534_v42, 1 }
  0xc7   : > { %v1891_v1 = vrot.slane %v1778_v7, 2  ;;  %v422_v13 = vmul.f32 %v2261_v33, %v2909_v51  ;;  %v666_v4 = vmul.f32 %v2263_v34, %v2907_v25  ;;  %v3067_v8 = vmul.f32 %v2263_v34, %v2909_v51 }
  0xc8   : > { %v1976_v49 = vadd.f32 %v1890_v59, %v1732_v21  ;;  %v933_v3 = vadd.f32 %v901_v63, %v865_v28  ;;  %v536_v5 = vrot.slane %v421_v32, 1  ;;  %v344_v10 = vmul.f32 %v2271_v38, %v2907_v25 }
  0xc9   : > { %v537_v22 = vrot.slane %v422_v13, 1  ;;  %v781_v23 = vrot.slane %v666_v4, 2  ;;  %v979_v62 = vmul.f32 %v2273_v39, %v2993_v45  ;;  %v1336_v11 = vsel %vm735_vm3, %v1333_v20, %v1335_v16  ;;  %v3109_v16 = vld [vmem:[#allocation2 + $0x118] sm:$0x3] }
  0xca   : > { %2008 = vst.msk [vmem:[%s2393_s24 + $0x80] sm:$0xff] %vm144_vm0, %v1976_v49  ;;  %v1177_v56 = vadd.f32 %v1092_v2, %v933_v3  ;;  %v782_v14 = vrot.slane %v3067_v8, 2  ;;  %v980_v60 = vmul.f32 %v2273_v39, %v2995_v61  ;;  %v1648_v25 = vsel %vm490_vm2, %v1645_v15, %v1647_v17 }
  0xcb   : > { %v538_v26 = vsel %vm490_vm2, %v536_v5, %v537_v22  ;;  %v1223_v27 = vmul.f32 %v2281_v43, %v2993_v45  ;;  %v1224_v18 = vmul.f32 %v2281_v43, %v2995_v61  ;;  %v1093_v53 = vrot.slane %v979_v62, 1 }
  0xcc   : > { %v1421_v20 = vadd.f32 %v1336_v11, %v1177_v56  ;;  %v621_v30 = vadd.f32 %v538_v26, %v344_v10  ;;  %v1094_v24 = vrot.slane %v980_v60, 1  ;;  %v1892_v36 = vsel %vm735_vm3, %v1889_v6, %v1891_v1 }
  0xcd   : > { %v783_v37 = vsel %vm735_vm3, %v781_v23, %v782_v14  ;;  %v1535_v40 = vmul.f32 %v2300_v54, %v3076_v19  ;;  %v3095_v15 = vmul.f32 %v2300_v54, %v3078_v50  ;;  %v902_v12 = vmul.f32 %v2288_v47, %v2993_v45 }
  0xce   : > { %v1489_v29 = vadd.f32 %v1457_v31, %v1421_v20  ;;  %v866_v52 = vadd.f32 %v783_v37, %v621_v30  ;;  %v1779_v57 = vmul.f32 %v2302_v55, %v3076_v19  ;;  %v1337_v9 = vrot.slane %v1223_v27, 2 }
  0xcf   : > { %v1338_v42 = vrot.slane %v1224_v18, 2  ;;  %v1458_v6 = vmul.f32 %v2290_v48, %v3076_v19  ;;  %v3105_v7 = vmul.f32 %v2302_v55, %v3078_v50  ;;  %v1095_v46 = vsel %vm490_vm2, %v1093_v53, %v1094_v24 }
  0xd0   : > { %v1733_v41 = vadd.f32 %v1648_v25, %v1489_v29  ;;  %v934_v35 = vadd.f32 %v902_v12, %v866_v52  ;;  %v1649_v63 = vrot.slane %v1535_v40, 1  ;;  %v1650_v59 = vrot.slane %v3095_v15, 1 }
  0xd1   : > { %v1893_v58 = vrot.slane %v1779_v57, 2  ;;  %v423_v31 = vmul.f32 %v2261_v33, %v2940_v44  ;;  %v668_v21 = vmul.f32 %v2263_v34, %v2940_v44  ;;  %v1894_v32 = vrot.slane %v3105_v7, 2 }
  0xd2   : > { %v1977_v28 = vadd.f32 %v1892_v36, %v1733_v41  ;;  %v1178_v2 = vadd.f32 %v1095_v46, %v934_v35  ;;  %v981_v17 = vmul.f32 %v2273_v39, %v3033_v0  ;;  %v1339_v1 = vsel %vm735_vm3, %v1337_v9, %v1338_v42  ;;  %v3162_v46 = vld [vmem:[#allocation2 + $0x120] sm:$0xff] }
  0xd3   : > { %v539_v13 = vrot.slane %v423_v31, 1  ;;  %v784_v4 = vrot.slane %v668_v21, 2  ;;  %v1225_v49 = vmul.f32 %v2281_v43, %v3033_v0  ;;  %v345_v44 = vmul.f32 %v2271_v38, %v2909_v51 }
  0xd4   : > { %2009 = vst.msk [vmem:[%s2393_s24 + $0x88] sm:$0xff] %vm144_vm0, %v1977_v28  ;;  %v1422_v3 = vadd.f32 %v1339_v1, %v1178_v2  ;;  %v1096_v5 = vrot.slane %v981_v17, 1  ;;  %v1537_v8 = vmul.f32 %v2300_v54, %v3109_v16  ;;  %v1651_v10 = vsel %vm490_vm2, %v1649_v63, %v1650_v59  ;;  %v3164_v63 = vld [vmem:[#allocation2 + $0x128] sm:$0xff] }
  0xd5   : > { %v540_v23 = vsel %vm490_vm2, %v537_v22, %v539_v13  ;;  %v903_v62 = vmul.f32 %v2288_v47, %v2995_v61  ;;  %v1340_v56 = vrot.slane %v1225_v49, 2  ;;  %v1895_v60 = vsel %vm735_vm3, %v1893_v58, %v1894_v32 }
  0xd6   : > { %v1490_v11 = vadd.f32 %v1458_v6, %v1422_v3  ;;  %v622_v51 = vadd.f32 %v540_v23, %v345_v44  ;;  %v1459_v25 = vmul.f32 %v2290_v48, %v3078_v50  ;;  %v785_v26 = vsel %vm735_vm3, %v782_v14, %v784_v4 }
  0xd7   : > { %v1097_v27 = vsel %vm490_vm2, %v1094_v24, %v1096_v5  ;;  %v1781_v22 = vmul.f32 %v2302_v55, %v3109_v16  ;;  %v424_v18 = vmul.f32 %v2261_v33, %v2993_v45  ;;  %v1652_v53 = vrot.slane %v1537_v8, 1 }
  0xd8   : > { %v1734_v20 = vadd.f32 %v1651_v10, %v1490_v11  ;;  %v867_v30 = vadd.f32 %v785_v26, %v622_v51  ;;  %v425_v36 = vmul.f32 %v2261_v33, %v2995_v61  ;;  %v1341_v37 = vsel %vm735_vm3, %v1338_v42, %v1340_v56 }
  0xd9   : > { %v541_v40 = vrot.slane %v424_v18, 1  ;;  %v669_v14 = vmul.f32 %v2263_v34, %v2993_v45  ;;  %v3151_v24 = vmul.f32 %v2263_v34, %v2995_v61  ;;  %v346_v12 = vmul.f32 %v2271_v38, %v2993_v45 }
  0xda   : > { %v1978_v29 = vadd.f32 %v1895_v60, %v1734_v20  ;;  %v935_v52 = vadd.f32 %v903_v62, %v867_v30  ;;  %v542_v57 = vrot.slane %v425_v36, 1  ;;  %v982_v42 = vmul.f32 %v2273_v39, %v3076_v19  ;;  %v3202_v20 = vld [vmem:[#allocation2 + $0x130] sm:$0x3] }
  0xdb   : > { %v786_v9 = vrot.slane %v669_v14, 2  ;;  %v787_v6 = vrot.slane %v3151_v24, 2  ;;  %v983_v41 = vmul.f32 %v2273_v39, %v3078_v50  ;;  %v1226_v45 = vmul.f32 %v2281_v43, %v3076_v19 }
  0xdc   : > { %2010 = vst.msk [vmem:[%s2393_s24 + $0x90] sm:$0xff] %vm144_vm0, %v1978_v29  ;;  %v1179_v35 = vadd.f32 %v1097_v27, %v935_v52  ;;  %v543_v58 = vsel %vm490_vm2, %v541_v40, %v542_v57  ;;  %v3171_v31 = vmul.f32 %v2281_v43, %v3078_v50  ;;  %v1896_v21 = vrot.slane %v1781_v22, 2 }
  0xdd   : > { %v623_v28 = vadd.f32 %v543_v58, %v346_v12  ;;  %v1098_v2 = vrot.slane %v982_v42, 1  ;;  %v1099_v17 = vrot.slane %v983_v41, 1  ;;  %v788_v13 = vsel %vm735_vm3, %v786_v9, %v787_v6 }
  0xde   : > { %v1423_v1 = vadd.f32 %v1341_v37, %v1179_v35  ;;  %v1342_v4 = vrot.slane %v1226_v45, 2  ;;  %v1343_v49 = vrot.slane %v3171_v31, 2  ;;  %v904_v44 = vmul.f32 %v2288_v47, %v3076_v19 }
  0xdf   : > { %v868_v3 = vadd.f32 %v788_v13, %v623_v28  ;;  %v1538_v5 = vmul.f32 %v2300_v54, %v3162_v46  ;;  %v3181_v8 = vmul.f32 %v2300_v54, %v3164_v63  ;;  %v1653_v23 = vsel %vm490_vm2, %v1650_v59, %v1652_v53 }
  0xe0   : > { %v1491_v10 = vadd.f32 %v1459_v25, %v1423_v1  ;;  %v1782_v62 = vmul.f32 %v2302_v55, %v3162_v46  ;;  %v3190_v56 = vmul.f32 %v2302_v55, %v3164_v63  ;;  %v1897_v11 = vsel %vm735_vm3, %v1894_v32, %v1896_v21 }
  0xe1   : > { %v936_v60 = vadd.f32 %v904_v44, %v868_v3  ;;  %v1100_v51 = vsel %vm490_vm2, %v1098_v2, %v1099_v17  ;;  %v1460_v25 = vmul.f32 %v2290_v48, %v3162_v46  ;;  %v1344_v59 = vsel %vm735_vm3, %v1342_v4, %v1343_v49 }
  0xe2   : > { %v1735_v15 = vadd.f32 %v1653_v23, %v1491_v10  ;;  %v1654_v26 = vrot.slane %v1538_v5, 1  ;;  %v426_v27 = vmul.f32 %v2261_v33, %v3033_v0  ;;  %v1655_v18 = vrot.slane %v3181_v8, 1 }
  0xe3   : > { %v1180_v22 = vadd.f32 %v1100_v51, %v936_v60  ;;  %v1898_v7 = vrot.slane %v1782_v62, 2  ;;  %v671_v32 = vmul.f32 %v2263_v34, %v3033_v0  ;;  %v1899_v53 = vrot.slane %v3190_v56, 2  ;;  %v3245_v51 = vld [vmem:[#allocation2 + $0x138] sm:$0xff] }
  0xe4   : > { %v1979_v30 = vadd.f32 %v1897_v11, %v1735_v15  ;;  %v544_v36 = vrot.slane %v426_v27, 1  ;;  %v984_v37 = vmul.f32 %v2273_v39, %v3109_v16  ;;  %v347_v14 = vmul.f32 %v2271_v38, %v2995_v61 }
  0xe5   : > { %v1424_v40 = vadd.f32 %v1344_v59, %v1180_v22  ;;  %v789_v24 = vrot.slane %v671_v32, 2  ;;  %v1228_v29 = vmul.f32 %v2281_v43, %v3109_v16  ;;  %v1540_v12 = vmul.f32 %v2300_v54, %v3202_v20 }
  0xe6   : > { %2011 = vst.msk [vmem:[%s2393_s24 + $0x98] sm:$0xff] %vm144_vm0, %v1979_v30  ;;  %v545_v52 = vsel %vm490_vm2, %v542_v57, %v544_v36  ;;  %v1101_v0 = vrot.slane %v984_v37, 1  ;;  %v1784_v9 = vmul.f32 %v2302_v55, %v3202_v20  ;;  %v1656_v41 = vsel %vm490_vm2, %v1654_v26, %v1655_v18 }
  0xe7   : > { %v1492_v42 = vadd.f32 %v1460_v25, %v1424_v40  ;;  %v624_v35 = vadd.f32 %v545_v52, %v347_v14  ;;  %v905_v61 = vmul.f32 %v2288_v47, %v3078_v50  ;;  %v1900_v58 = vsel %vm735_vm3, %v1898_v7, %v1899_v53  ;;  %v3247_v25 = vld [vmem:[#allocation2 + $0x140] sm:$0xff] }
  0xe8   : > { %v790_v45 = vsel %vm735_vm3, %v787_v6, %v789_v24  ;;  %v1345_v31 = vrot.slane %v1228_v29, 2  ;;  %v1461_v57 = vmul.f32 %v2290_v48, %v3164_v63  ;;  %v1102_v2 = vsel %vm490_vm2, %v1099_v17, %v1101_v0 }
  0xe9   : > { %v1736_v21 = vadd.f32 %v1656_v41, %v1492_v42  ;;  %v869_v28 = vadd.f32 %v790_v45, %v624_v35  ;;  %v427_v1 = vmul.f32 %v2261_v33, %v3076_v19  ;;  %v1657_v13 = vrot.slane %v1540_v12, 1 }
  0xea   : > { %v1901_v4 = vrot.slane %v1784_v9, 2  ;;  %v428_v3 = vmul.f32 %v2261_v33, %v3078_v50  ;;  %v672_v6 = vmul.f32 %v2263_v34, %v3076_v19  ;;  %v3236_v10 = vmul.f32 %v2263_v34, %v3078_v50 }
  0xeb   : > { %v1980_v44 = vadd.f32 %v1900_v58, %v1736_v21  ;;  %v937_v5 = vadd.f32 %v905_v61, %v869_v28  ;;  %v546_v8 = vrot.slane %v427_v1, 1  ;;  %v348_v17 = vmul.f32 %v2271_v38, %v3076_v19 }
  0xec   : > { %v547_v23 = vrot.slane %v428_v3, 1  ;;  %v791_v62 = vrot.slane %v672_v6, 2  ;;  %v985_v56 = vmul.f32 %v2273_v39, %v3162_v46  ;;  %v1346_v60 = vsel %vm735_vm3, %v1343_v49, %v1345_v31  ;;  %v3278_v31 = vld [vmem:[#allocation2 + $0x148] sm:$0x3] }
  0xed   : > { %2012 = vst.msk [vmem:[%s2393_s24 + $0xa0] sm:$0xff] %vm144_vm0, %v1980_v44  ;;  %v1181_v11 = vadd.f32 %v1102_v2, %v937_v5  ;;  %v792_v15 = vrot.slane %v3236_v10, 2  ;;  %v986_v59 = vmul.f32 %v2273_v39, %v3164_v63  ;;  %v1658_v19 = vsel %vm490_vm2, %v1655_v18, %v1657_v13 }
  0xee   : > { %v548_v26 = vsel %vm490_vm2, %v546_v8, %v547_v23  ;;  %v1229_v27 = vmul.f32 %v2281_v43, %v3162_v46  ;;  %v1230_v22 = vmul.f32 %v2281_v43, %v3164_v63  ;;  %v1103_v32 = vrot.slane %v985_v56, 1 }
  0xef   : > { %v1425_v49 = vadd.f32 %v1346_v60, %v1181_v11  ;;  %v625_v7 = vadd.f32 %v548_v26, %v348_v17  ;;  %v1104_v30 = vrot.slane %v986_v59, 1  ;;  %v1902_v36 = vsel %vm735_vm3, %v1899_v53, %v1901_v4 }
  0xf0   : > { %v793_v37 = vsel %vm735_vm3, %v791_v62, %v792_v15  ;;  %v1541_v40 = vmul.f32 %v2300_v54, %v3245_v51  ;;  %v3264_v18 = vmul.f32 %v2300_v54, %v3247_v25  ;;  %v906_v29 = vmul.f32 %v2288_v47, %v3162_v46 }
  0xf1   : > { %v1493_v14 = vadd.f32 %v1461_v57, %v1425_v49  ;;  %v870_v24 = vadd.f32 %v793_v37, %v625_v7  ;;  %v1785_v52 = vmul.f32 %v2302_v55, %v3245_v51  ;;  %v1347_v0 = vrot.slane %v1229_v27, 2 }
  0xf2   : > { %v1348_v12 = vrot.slane %v1230_v22, 2  ;;  %v1462_v53 = vmul.f32 %v2290_v48, %v3245_v51  ;;  %v3274_v9 = vmul.f32 %v2302_v55, %v3247_v25  ;;  %v1105_v35 = vsel %vm490_vm2, %v1103_v32, %v1104_v30 }
  0xf3   : > { %v1737_v42 = vadd.f32 %v1658_v19, %v1493_v14  ;;  %v938_v41 = vadd.f32 %v906_v29, %v870_v24  ;;  %v1659_v61 = vrot.slane %v1541_v40, 1  ;;  %v1660_v58 = vrot.slane %v3264_v18, 1 }
  0xf4   : > { %v1903_v45 = vrot.slane %v1785_v52, 2  ;;  %v429_v57 = vmul.f32 %v2261_v33, %v3109_v16  ;;  %v674_v21 = vmul.f32 %v2263_v34, %v3109_v16  ;;  %v1904_v1 = vrot.slane %v3274_v9, 2 }
  0xf5   : > { %v1981_v28 = vadd.f32 %v1902_v36, %v1737_v42  ;;  %v1182_v2 = vadd.f32 %v1105_v35, %v938_v41  ;;  %v987_v13 = vmul.f32 %v2273_v39, %v3202_v20  ;;  %v1349_v4 = vsel %vm735_vm3, %v1347_v0, %v1348_v12  ;;  %v3331_v35 = vld [vmem:[#allocation2 + $0x150] sm:$0xff] }
  0xf6   : > { %v549_v3 = vrot.slane %v429_v57, 1  ;;  %v794_v6 = vrot.slane %v674_v21, 2  ;;  %v1231_v44 = vmul.f32 %v2281_v43, %v3202_v20  ;;  %v349_v16 = vmul.f32 %v2271_v38, %v3078_v50 }
  0xf7   : > { %2013 = vst.msk [vmem:[%s2393_s24 + $0xa8] sm:$0xff] %vm144_vm0, %v1981_v28  ;;  %v1426_v5 = vadd.f32 %v1349_v4, %v1182_v2  ;;  %v1106_v8 = vrot.slane %v987_v13, 1  ;;  %v1543_v10 = vmul.f32 %v2300_v54, %v3278_v31  ;;  %v1661_v17 = vsel %vm490_vm2, %v1659_v61, %v1660_v58  ;;  %v3333_v61 = vld [vmem:[#allocation2 + $0x158] sm:$0xff] }
  0xf8   : > { %v550_v62 = vsel %vm490_vm2, %v547_v23, %v549_v3  ;;  %v907_v56 = vmul.f32 %v2288_v47, %v3164_v63  ;;  %v1350_v11 = vrot.slane %v1231_v44, 2  ;;  %v1905_v59 = vsel %vm735_vm3, %v1903_v45, %v1904_v1 }
  0xf9   : > { %v1494_v60 = vadd.f32 %v1462_v53, %v1426_v5  ;;  %v626_v50 = vadd.f32 %v550_v62, %v349_v16  ;;  %v1463_v19 = vmul.f32 %v2290_v48, %v3247_v25  ;;  %v795_v26 = vsel %vm735_vm3, %v792_v15, %v794_v6 }
  0xfa   : > { %v1107_v27 = vsel %vm490_vm2, %v1104_v30, %v1106_v8  ;;  %v1787_v23 = vmul.f32 %v2302_v55, %v3278_v31  ;;  %v430_v22 = vmul.f32 %v2261_v33, %v3162_v46  ;;  %v1662_v32 = vrot.slane %v1543_v10, 1 }
  0xfb   : > { %v1738_v49 = vadd.f32 %v1661_v17, %v1494_v60  ;;  %v871_v7 = vadd.f32 %v795_v26, %v626_v50  ;;  %v431_v36 = vmul.f32 %v2261_v33, %v3164_v63  ;;  %v1351_v37 = vsel %vm735_vm3, %v1348_v12, %v1350_v11 }
  0xfc   : > { %v551_v40 = vrot.slane %v430_v22, 1  ;;  %v675_v15 = vmul.f32 %v2263_v34, %v3162_v46  ;;  %v3320_v30 = vmul.f32 %v2263_v34, %v3164_v63  ;;  %v350_v29 = vmul.f32 %v2271_v38, %v3162_v46 }
  0xfd   : > { %v1982_v14 = vadd.f32 %v1905_v59, %v1738_v49  ;;  %v939_v24 = vadd.f32 %v907_v56, %v871_v7  ;;  %v552_v52 = vrot.slane %v431_v36, 1  ;;  %v988_v12 = vmul.f32 %v2273_v39, %v3245_v51  ;;  %v3371_v49 = vld [vmem:[#allocation2 + $0x160] sm:$0x3] }
  0xfe   : > { %v796_v0 = vrot.slane %v675_v15, 2  ;;  %v797_v53 = vrot.slane %v3320_v30, 2  ;;  %v989_v42 = vmul.f32 %v2273_v39, %v3247_v25  ;;  %v1232_v46 = vmul.f32 %v2281_v43, %v3245_v51 }
  0xff   : > { %2014 = vst.msk [vmem:[%s2393_s24 + $0xb0] sm:$0xff] %vm144_vm0, %v1982_v14  ;;  %v1183_v41 = vadd.f32 %v1107_v27, %v939_v24  ;;  %v553_v45 = vsel %vm490_vm2, %v551_v40, %v552_v52  ;;  %v3340_v57 = vmul.f32 %v2281_v43, %v3247_v25  ;;  %v1906_v21 = vrot.slane %v1787_v23, 2 }
 0x100   : > { %v627_v28 = vadd.f32 %v553_v45, %v350_v29  ;;  %v1108_v2 = vrot.slane %v988_v12, 1  ;;  %v1109_v13 = vrot.slane %v989_v42, 1  ;;  %v798_v3 = vsel %vm735_vm3, %v796_v0, %v797_v53 }
 0x101   : > { %v1427_v4 = vadd.f32 %v1351_v37, %v1183_v41  ;;  %v1352_v6 = vrot.slane %v1232_v46, 2  ;;  %v1353_v44 = vrot.slane %v3340_v57, 2  ;;  %v908_v16 = vmul.f32 %v2288_v47, %v3245_v51 }
 0x102   : > { %v872_v5 = vadd.f32 %v798_v3, %v627_v28  ;;  %v1544_v8 = vmul.f32 %v2300_v54, %v3331_v35  ;;  %v3350_v10 = vmul.f32 %v2300_v54, %v3333_v61  ;;  %v1663_v62 = vsel %vm490_vm2, %v1660_v58, %v1662_v32 }
 0x103   : > { %v1495_v17 = vadd.f32 %v1463_v19, %v1427_v4  ;;  %v1788_v56 = vmul.f32 %v2302_v55, %v3331_v35  ;;  %v3359_v11 = vmul.f32 %v2302_v55, %v3333_v61  ;;  %v1907_v60 = vsel %vm735_vm3, %v1904_v1, %v1906_v21 }
 0x104   : > { %v940_v59 = vadd.f32 %v908_v16, %v872_v5  ;;  %v1110_v50 = vsel %vm490_vm2, %v1108_v2, %v1109_v13  ;;  %v1464_v19 = vmul.f32 %v2290_v48, %v3331_v35  ;;  %v1354_v58 = vsel %vm735_vm3, %v1352_v6, %v1353_v44 }
 0x105   : > { %v1739_v18 = vadd.f32 %v1663_v62, %v1495_v17  ;;  %v1664_v26 = vrot.slane %v1544_v8, 1  ;;  %v432_v27 = vmul.f32 %v2261_v33, %v3202_v20  ;;  %v1665_v22 = vrot.slane %v3350_v10, 1 }
 0x106   : > { %v1184_v23 = vadd.f32 %v1110_v50, %v940_v59  ;;  %v1908_v9 = vrot.slane %v1788_v56, 2  ;;  %v677_v1 = vmul.f32 %v2263_v34, %v3202_v20  ;;  %v1909_v32 = vrot.slane %v3359_v11, 2  ;;  %v3414_v50 = vld [vmem:[#allocation2 + $0x168] sm:$0xff] }
 0x107   : > { %v1983_v7 = vadd.f32 %v1907_v60, %v1739_v18  ;;  %v554_v36 = vrot.slane %v432_v27, 1  ;;  %v990_v37 = vmul.f32 %v2273_v39, %v3278_v31  ;;  %v351_v15 = vmul.f32 %v2271_v38, %v3164_v63 }
 0x108   : > { %v1428_v40 = vadd.f32 %v1354_v58, %v1184_v23  ;;  %v799_v30 = vrot.slane %v677_v1, 2  ;;  %v1234_v14 = vmul.f32 %v2281_v43, %v3278_v31  ;;  %v1546_v29 = vmul.f32 %v2300_v54, %v3371_v49 }
 0x109   : > { %2015 = vst.msk [vmem:[%s2393_s24 + $0xb8] sm:$0xff] %vm144_vm0, %v1983_v7  ;;  %v555_v24 = vsel %vm490_vm2, %v552_v52, %v554_v36  ;;  %v1111_v20 = vrot.slane %v990_v37, 1  ;;  %v1790_v0 = vmul.f32 %v2302_v55, %v3371_v49  ;;  %v1666_v42 = vsel %vm490_vm2, %v1664_v26, %v1665_v22 }
 0x10a   : > { %v1496_v12 = vadd.f32 %v1464_v19, %v1428_v40  ;;  %v628_v41 = vadd.f32 %v555_v24, %v351_v15  ;;  %v909_v63 = vmul.f32 %v2288_v47, %v3247_v25  ;;  %v1910_v45 = vsel %vm735_vm3, %v1908_v9, %v1909_v32  ;;  %v3416_v19 = vld [vmem:[#allocation2 + $0x170] sm:$0xff] }
 0x10b   : > { %v800_v46 = vsel %vm735_vm3, %v797_v53, %v799_v30  ;;  %v1355_v57 = vrot.slane %v1234_v14, 2  ;;  %v1465_v52 = vmul.f32 %v2290_v48, %v3333_v61  ;;  %v1112_v2 = vsel %vm490_vm2, %v1109_v13, %v1111_v20 }
 0x10c   : > { %v1740_v21 = vadd.f32 %v1666_v42, %v1496_v12  ;;  %v873_v28 = vadd.f32 %v800_v46, %v628_v41  ;;  %v433_v4 = vmul.f32 %v2261_v33, %v3245_v51  ;;  %v1667_v3 = vrot.slane %v1546_v29, 1 }
 0x10d   : > { %v1911_v6 = vrot.slane %v1790_v0, 2  ;;  %v434_v5 = vmul.f32 %v2261_v33, %v3247_v25  ;;  %v678_v53 = vmul.f32 %v2263_v34, %v3245_v51  ;;  %v3405_v17 = vmul.f32 %v2263_v34, %v3247_v25 }
 0x10e   : > { %v1984_v16 = vadd.f32 %v1910_v45, %v1740_v21  ;;  %v941_v8 = vadd.f32 %v909_v63, %v873_v28  ;;  %v556_v10 = vrot.slane %v433_v4, 1  ;;  %v352_v13 = vmul.f32 %v2271_v38, %v3245_v51 }
 0x10f   : > { %v557_v62 = vrot.slane %v434_v5, 1  ;;  %v801_v56 = vrot.slane %v678_v53, 2  ;;  %v991_v11 = vmul.f32 %v2273_v39, %v3331_v35  ;;  %v1356_v59 = vsel %vm735_vm3, %v1353_v44, %v1355_v57  ;;  %v3447_v57 = vld [vmem:[#allocation2 + $0x178] sm:$0x3] }
 0x110   : > { %2016 = vst.msk [vmem:[%s2393_s24 + $0xc0] sm:$0xff] %vm144_vm0, %v1984_v16  ;;  %v1185_v60 = vadd.f32 %v1112_v2, %v941_v8  ;;  %v802_v18 = vrot.slane %v3405_v17, 2  ;;  %v992_v58 = vmul.f32 %v2273_v39, %v3333_v61  ;;  %v1668_v51 = vsel %vm490_vm2, %v1665_v22, %v1667_v3 }
 0x111   : > { %v558_v26 = vsel %vm490_vm2, %v556_v10, %v557_v62  ;;  %v1235_v27 = vmul.f32 %v2281_v43, %v3331_v35  ;;  %v1236_v23 = vmul.f32 %v2281_v43, %v3333_v61  ;;  %v1113_v1 = vrot.slane %v991_v11, 1 }
 0x112   : > { %v1429_v44 = vadd.f32 %v1356_v59, %v1185_v60  ;;  %v629_v9 = vadd.f32 %v558_v26, %v352_v13  ;;  %v1114_v7 = vrot.slane %v992_v58, 1  ;;  %v1912_v36 = vsel %vm735_vm3, %v1909_v32, %v1911_v6 }
 0x113   : > { %v803_v37 = vsel %vm735_vm3, %v801_v56, %v802_v18  ;;  %v1547_v40 = vmul.f32 %v2300_v54, %v3414_v50  ;;  %v3433_v22 = vmul.f32 %v2300_v54, %v3416_v19  ;;  %v910_v14 = vmul.f32 %v2288_v47, %v3331_v35 }
 0x114   : > { %v1497_v15 = vadd.f32 %v1465_v52, %v1429_v44  ;;  %v874_v30 = vadd.f32 %v803_v37, %v629_v9  ;;  %v1791_v24 = vmul.f32 %v2302_v55, %v3414_v50  ;;  %v1357_v20 = vrot.slane %v1235_v27, 2 }
 0x115   : > { %v1358_v29 = vrot.slane %v1236_v23, 2  ;;  %v1466_v32 = vmul.f32 %v2290_v48, %v3414_v50  ;;  %v3443_v0 = vmul.f32 %v2302_v55, %v3416_v19  ;;  %v1115_v41 = vsel %vm490_vm2, %v1113_v1, %v1114_v7 }
 0x116   : > { %v1741_v12 = vadd.f32 %v1668_v51, %v1497_v15  ;;  %v942_v42 = vadd.f32 %v910_v14, %v874_v30  ;;  %v1669_v63 = vrot.slane %v1547_v40, 1  ;;  %v1670_v45 = vrot.slane %v3433_v22, 1 }
 0x117   : > { %v1913_v46 = vrot.slane %v1791_v24, 2  ;;  %v435_v52 = vmul.f32 %v2261_v33, %v3278_v31  ;;  %v680_v21 = vmul.f32 %v2263_v34, %v3278_v31  ;;  %v1914_v4 = vrot.slane %v3443_v0, 2 }
 0x118   : > { %v1985_v28 = vadd.f32 %v1912_v36, %v1741_v12  ;;  %v1186_v2 = vadd.f32 %v1115_v41, %v942_v42  ;;  %v993_v3 = vmul.f32 %v2273_v39, %v3371_v49  ;;  %v1359_v6 = vsel %vm735_vm3, %v1357_v20, %v1358_v29  ;;  %v3500_v41 = vld [vmem:[#allocation2 + $0x180] sm:$0xff] }
 0x119   : > { %v559_v5 = vrot.slane %v435_v52, 1  ;;  %v804_v53 = vrot.slane %v680_v21, 2  ;;  %v1237_v16 = vmul.f32 %v2281_v43, %v3371_v49  ;;  %v353_v31 = vmul.f32 %v2271_v38, %v3247_v25 }
 0x11a   : > { %2017 = vst.msk [vmem:[%s2393_s24 + $0xc8] sm:$0xff] %vm144_vm0, %v1985_v28  ;;  %v1430_v8 = vadd.f32 %v1359_v6, %v1186_v2  ;;  %v1116_v10 = vrot.slane %v993_v3, 1  ;;  %v1549_v17 = vmul.f32 %v2300_v54, %v3447_v57  ;;  %v1671_v13 = vsel %vm490_vm2, %v1669_v63, %v1670_v45  ;;  %v3502_v63 = vld [vmem:[#allocation2 + $0x188] sm:$0xff] }
 0x11b   : > { %v560_v56 = vsel %vm490_vm2, %v557_v62, %v559_v5  ;;  %v911_v11 = vmul.f32 %v2288_v47, %v3333_v61  ;;  %v1360_v60 = vrot.slane %v1237_v16, 2  ;;  %v1915_v58 = vsel %vm735_vm3, %v1913_v46, %v1914_v4 }
 0x11c   : > { %v1498_v59 = vadd.f32 %v1466_v32, %v1430_v8  ;;  %v630_v25 = vadd.f32 %v560_v56, %v353_v31  ;;  %v1467_v51 = vmul.f32 %v2290_v48, %v3416_v19  ;;  %v805_v26 = vsel %vm735_vm3, %v802_v18, %v804_v53 }
 0x11d   : > { %v1117_v27 = vsel %vm490_vm2, %v1114_v7, %v1116_v10  ;;  %v1793_v62 = vmul.f32 %v2302_v55, %v3447_v57  ;;  %v436_v23 = vmul.f32 %v2261_v33, %v3331_v35  ;;  %v1672_v1 = vrot.slane %v1549_v17, 1 }
 0x11e   : > { %v1742_v44 = vadd.f32 %v1671_v13, %v1498_v59  ;;  %v875_v9 = vadd.f32 %v805_v26, %v630_v25  ;;  %v437_v36 = vmul.f32 %v2261_v33, %v3333_v61  ;;  %v1361_v37 = vsel %vm735_vm3, %v1358_v29, %v1360_v60 }
 0x11f   : > { %v561_v40 = vrot.slane %v436_v23, 1  ;;  %v681_v18 = vmul.f32 %v2263_v34, %v3331_v35  ;;  %v3489_v7 = vmul.f32 %v2263_v34, %v3333_v61  ;;  %v354_v14 = vmul.f32 %v2271_v38, %v3331_v35 }
 0x120   : > { %v1986_v15 = vadd.f32 %v1915_v58, %v1742_v44  ;;  %v943_v30 = vadd.f32 %v911_v11, %v875_v9  ;;  %v562_v24 = vrot.slane %v437_v36, 1  ;;  %v994_v29 = vmul.f32 %v2273_v39, %v3414_v50  ;;  %v3540_v44 = vld [vmem:[#allocation2 + $0x190] sm:$0x3] }
 0x121   : > { %v806_v20 = vrot.slane %v681_v18, 2  ;;  %v807_v32 = vrot.slane %v3489_v7, 2  ;;  %v995_v12 = vmul.f32 %v2273_v39, %v3416_v19  ;;  %v1238_v35 = vmul.f32 %v2281_v43, %v3414_v50 }
 0x122   : > { %2018 = vst.msk [vmem:[%s2393_s24 + $0xd0] sm:$0xff] %vm144_vm0, %v1986_v15  ;;  %v1187_v42 = vadd.f32 %v1117_v27, %v943_v30  ;;  %v563_v46 = vsel %vm490_vm2, %v561_v40, %v562_v24  ;;  %v3509_v52 = vmul.f32 %v2281_v43, %v3416_v19  ;;  %v1916_v21 = vrot.slane %v1793_v62, 2 }
 0x123   : > { %v631_v28 = vadd.f32 %v563_v46, %v354_v14  ;;  %v1118_v2 = vrot.slane %v994_v29, 1  ;;  %v1119_v3 = vrot.slane %v995_v12, 1  ;;  %v808_v5 = vsel %vm735_vm3, %v806_v20, %v807_v32 }
 0x124   : > { %v1431_v6 = vadd.f32 %v1361_v37, %v1187_v42  ;;  %v1362_v53 = vrot.slane %v1238_v35, 2  ;;  %v1363_v16 = vrot.slane %v3509_v52, 2  ;;  %v912_v31 = vmul.f32 %v2288_v47, %v3414_v50 }
 0x125   : > { %v876_v8 = vadd.f32 %v808_v5, %v631_v28  ;;  %v1550_v10 = vmul.f32 %v2300_v54, %v3500_v41  ;;  %v3519_v17 = vmul.f32 %v2300_v54, %v3502_v63  ;;  %v1673_v56 = vsel %vm490_vm2, %v1670_v45, %v1672_v1 }
 0x126   : > { %v1499_v13 = vadd.f32 %v1467_v51, %v1431_v6  ;;  %v1794_v11 = vmul.f32 %v2302_v55, %v3500_v41  ;;  %v3528_v60 = vmul.f32 %v2302_v55, %v3502_v63  ;;  %v1917_v59 = vsel %vm735_vm3, %v1914_v4, %v1916_v21 }
 0x127   : > { %v944_v58 = vadd.f32 %v912_v31, %v876_v8  ;;  %v1120_v25 = vsel %vm490_vm2, %v1118_v2, %v1119_v3  ;;  %v1468_v51 = vmul.f32 %v2290_v48, %v3500_v41  ;;  %v1364_v45 = vsel %vm735_vm3, %v1362_v53, %v1363_v16 }
 0x128   : > { %v1743_v22 = vadd.f32 %v1673_v56, %v1499_v13  ;;  %v1674_v26 = vrot.slane %v1550_v10, 1  ;;  %v438_v27 = vmul.f32 %v2261_v33, %v3371_v49  ;;  %v1675_v23 = vrot.slane %v3519_v17, 1 }
 0x129   : > { %v1188_v62 = vadd.f32 %v1120_v25, %v944_v58  ;;  %v1918_v0 = vrot.slane %v1794_v11, 2  ;;  %v683_v4 = vmul.f32 %v2263_v34, %v3371_v49  ;;  %v1919_v1 = vrot.slane %v3528_v60, 2  ;;  %v316_v58 = vld [vmem:[#allocation2 + $0x198] sm:$0xff]  ;;  %v3581_v25 = vld [vmem:[#allocation2 + $0x1a0] sm:$0xff] }
 0x12a   : > { %v1987_v9 = vadd.f32 %v1917_v59, %v1743_v22  ;;  %v564_v36 = vrot.slane %v438_v27, 1  ;;  %v996_v37 = vmul.f32 %v2273_v39, %v3447_v57  ;;  %v355_v18 = vmul.f32 %v2271_v38, %v3333_v61 }
 0x12b   : > { %v1432_v40 = vadd.f32 %v1364_v45, %v1188_v62  ;;  %v809_v7 = vrot.slane %v683_v4, 2  ;;  %v1240_v15 = vmul.f32 %v2281_v43, %v3447_v57  ;;  %v1552_v14 = vmul.f32 %v2300_v54, %v3540_v44 }
 0x12c   : > { %2019 = vst.msk [vmem:[%s2393_s24 + $0xd8] sm:$0xff] %vm144_vm0, %v1987_v9  ;;  %v565_v30 = vsel %vm490_vm2, %v562_v24, %v564_v36  ;;  %v1121_v49 = vrot.slane %v996_v37, 1  ;;  %v1676_v29 = vsel %vm490_vm2, %v1674_v26, %v1675_v23  ;;  %v1920_v61 = vsel %vm735_vm3, %v1918_v0, %v1919_v1 }
 0x12d   : > { %v1500_v20 = vadd.f32 %v1468_v51, %v1432_v40  ;;  %v632_v12 = vadd.f32 %v565_v30, %v355_v18  ;;  %v810_v42 = vsel %vm735_vm3, %v807_v32, %v809_v7  ;;  %v913_v46 = vmul.f32 %v2288_v47, %v3416_v19 }
 0x12e   : > { %v1796_v24 = vmul.f32 %v2302_v55, %v3540_v44  ;;  %v1365_v21 = vrot.slane %v1240_v15, 2  ;;  %v439_v28 = vmul.f32 %v2261_v33, %v3414_v50  ;;  %v1122_v2 = vsel %vm490_vm2, %v1119_v3, %v1121_v49 }
 0x12f   : > { %v1744_v35 = vadd.f32 %v1676_v29, %v1500_v20  ;;  %v877_v52 = vadd.f32 %v810_v42, %v632_v12  ;;  %v1677_v6 = vrot.slane %v1552_v14, 1  ;;  %v440_v5 = vmul.f32 %v2261_v33, %v3416_v19 }
 0x130   : > { %v684_v32 = vmul.f32 %v2263_v34, %v3414_v50  ;;  %v566_v31 = vrot.slane %v439_v28, 1  ;;  %v685_v10 = vmul.f32 %v2263_v34, %v3416_v19  ;;  %v356_v17 = vmul.f32 %v2271_v38, %v3414_v50 }
 0x131   : > { %v1988_v53 = vadd.f32 %v1920_v61, %v1744_v35  ;;  %v945_v8 = vadd.f32 %v913_v46, %v877_v52  ;;  %v567_v13 = vrot.slane %v440_v5, 1  ;;  %v997_v3 = vmul.f32 %v2273_v39, %v3500_v41 }
 0x132   : > { %v811_v56 = vrot.slane %v684_v32, 2  ;;  %v1366_v59 = vsel %vm735_vm3, %v1363_v16, %v1365_v21  ;;  %v812_v51 = vrot.slane %v685_v10, 2  ;;  %v998_v22 = vmul.f32 %v2273_v39, %v3502_v63 }
 0x133   : > { %2020 = vst.msk [vmem:[%s2393_s24 + $0xe0] sm:$0xff] %vm144_vm0, %v1988_v53  ;;  %v1189_v11 = vadd.f32 %v1122_v2, %v945_v8  ;;  %v568_v45 = vsel %vm490_vm2, %v566_v31, %v567_v13  ;;  %v1123_v50 = vrot.slane %v997_v3, 1  ;;  %v1241_v26 = vmul.f32 %v2281_v43, %v3500_v41  ;;  %v318_v53 = vld [vmem:[#allocation2 + $0x1a8] sm:$0x3] }
 0x134   : > { %v1242_v27 = vmul.f32 %v2281_v43, %v3502_v63  ;;  %v1469_v16 = vmul.f32 %v2290_v48, %v3502_v63  ;;  %v633_v0 = vadd.f32 %v568_v45, %v356_v17  ;;  %v1124_v4 = vrot.slane %v998_v22, 1 }
 0x135   : > { %v1433_v62 = vadd.f32 %v1366_v59, %v1189_v11  ;;  %v1921_v9 = vrot.slane %v1796_v24, 2  ;;  %v813_v36 = vsel %vm735_vm3, %v811_v56, %v812_v51  ;;  %v1553_v37 = vmul.f32 %v2300_v54, %v316_v58 }
 0x136   : > { %v1554_v40 = vmul.f32 %v2300_v54, %v3581_v25  ;;  %v1678_v7 = vsel %vm490_vm2, %v1675_v23, %v1677_v6  ;;  %v878_v15 = vadd.f32 %v813_v36, %v633_v0  ;;  %v914_v30 = vmul.f32 %v2288_v47, %v3500_v41 }
 0x137   : > { %v1501_v18 = vadd.f32 %v1469_v16, %v1433_v62  ;;  %v1125_v49 = vsel %vm490_vm2, %v1123_v50, %v1124_v4  ;;  %v1367_v14 = vrot.slane %v1241_v26, 2  ;;  %v1368_v20 = vrot.slane %v1242_v27, 2 }
 0x138   : > { %v1797_v29 = vmul.f32 %v2302_v55, %v316_v58  ;;  %v946_v61 = vadd.f32 %v914_v30, %v878_v15  ;;  %v1679_v42 = vrot.slane %v1553_v37, 1  ;;  %v1680_v46 = vrot.slane %v1554_v40, 1 }
 0x139   : > { %v1745_v12 = vadd.f32 %v1678_v7, %v1501_v18  ;;  %v1922_v24 = vsel %vm735_vm3, %v1919_v1, %v1921_v9  ;;  %v1798_v23 = vmul.f32 %v2302_v55, %v3581_v25  ;;  %v441_v41 = vmul.f32 %v2261_v33, %v3447_v57 }
 0x13a   : > { %v686_v35 = vmul.f32 %v2263_v34, %v3447_v57  ;;  %v1190_v21 = vadd.f32 %v1125_v49, %v946_v61  ;;  %v1470_v28 = vmul.f32 %v2290_v48, %v316_v58  ;;  %v999_v2 = vmul.f32 %v2273_v39, %v3540_v44 }
 0x13b   : > { %v1989_v52 = vadd.f32 %v1922_v24, %v1745_v12  ;;  %v1369_v60 = vsel %vm735_vm3, %v1367_v14, %v1368_v20  ;;  %v569_v6 = vrot.slane %v441_v41, 1  ;;  %v1681_v32 = vsel %vm490_vm2, %v1679_v42, %v1680_v46 }
 0x13c   : > { %v814_v1 = vrot.slane %v686_v35, 2  ;;  %v1434_v5 = vadd.f32 %v1369_v60, %v1190_v21  ;;  %v1923_v33 = vrot.slane %v1797_v29, 2  ;;  %v357_v34 = vmul.f32 %v2271_v38, %v3416_v19 }
 0x13d   : > { %2021 = vst.msk [vmem:[%s2393_s24 + $0xe8] sm:$0xff] %vm144_vm0, %v1989_v52  ;;  %v1924_v57 = vrot.slane %v1798_v23, 2  ;;  %v570_v8 = vsel %vm490_vm2, %v567_v13, %v569_v6  ;;  %v1126_v31 = vrot.slane %v999_v2, 1  ;;  %v1243_v39 = vmul.f32 %v2281_v43, %v3540_v44 }
 0x13e   : > { %v1502_v10 = vadd.f32 %v1470_v28, %v1434_v5  ;;  %v634_v17 = vadd.f32 %v570_v8, %v357_v34  ;;  %v915_v56 = vmul.f32 %v2288_v47, %v3502_v63  ;;  %v815_v3 = vsel %vm735_vm3, %v812_v51, %v814_v1 }
 0x13f   : > { %v1555_v11 = vmul.f32 %v2300_v54, %v318_v53  ;;  %v1925_v38 = vsel %vm735_vm3, %v1923_v33, %v1924_v57  ;;  %v1127_v19 = vsel %vm490_vm2, %v1124_v4, %v1126_v31  ;;  %v1370_v13 = vrot.slane %v1243_v39, 2 }
 0x140   : > { %v1746_v59 = vadd.f32 %v1681_v32, %v1502_v10  ;;  %v879_v58 = vadd.f32 %v815_v3, %v634_v17  ;;  %v1799_v44 = vmul.f32 %v2302_v55, %v318_v53  ;;  %v1471_v63 = vmul.f32 %v2290_v48, %v3581_v25 }
 0x141   : > { %v1682_v43 = vrot.slane %v1555_v11, 1  ;;  %v1371_v54 = vsel %vm735_vm3, %v1368_v20, %v1370_v13 }
 0x142   : > { %v1990_v22 = vadd.f32 %v1925_v38, %v1746_v59  ;;  %v947_v45 = vadd.f32 %v915_v56, %v879_v58  ;;  %v1926_v26 = vrot.slane %v1799_v44, 2 }
 0x143   : > { %v1683_v50 = vsel %vm490_vm2, %v1680_v46, %v1682_v43 }
 0x144   : > { %2022 = vst.msk [vmem:[%s2393_s24 + $0xf0] sm:$0xff] %vm144_vm0, %v1990_v22  ;;  %v1191_v47 = vadd.f32 %v1127_v19, %v947_v45  ;;  %v1927_v16 = vsel %vm735_vm3, %v1924_v57, %v1926_v26 }
 0x146   : > { %v1435_v51 = vadd.f32 %v1371_v54, %v1191_v47 }
 0x148   : > { %v1503_v27 = vadd.f32 %v1471_v63, %v1435_v51 }
 0x14a   : > { %v1747_v62 = vadd.f32 %v1683_v50, %v1503_v27 }
 0x14c   : > { %v1991_v0 = vadd.f32 %v1927_v16, %v1747_v62 }
 0x14e   : > { %2023 = vst.msk [vmem:[%s2393_s24 + $0xf8] sm:$0xff] %vm144_vm0, %v1991_v0 }
 0x14f PF: > { %s12_s9 = sadd.s32 1, %s2107_s9  }
 0x150   : > { %p9_p4 = scmp.ge.s32.totalorder %s12_s9, 4  }
 0x152   :  { %11 = sbr.rel (!%p9_p4) target bundleno = 1 (0x1), region = 59 }

// kernel: conv_trans_block_fwd.14
= control target key start
LH: loop header
LB: loop body
LE: loop exit
PB: predicated region body
PF: predicated region fallthrough
CT: control target
= control target key end

     0   :  { %vm144_vm0 = vcmask 130048   ;;  %vm724_vm1 = vcmask 1043456   ;;  %vm627_vm2 = vcmask 64512   ;;  %vm1344_vm3 = vcmask 523264   ;;  %s3748_s3 = inlined_call_operand.vmem [shape: bf16[16,16], index: 3, kind: input, shape index: {}]   ;;  %s3749_s0 = inlined_call_operand.vmem [shape: f32[512,16], index: 0, kind: input, shape index: {}]   ;;  %s3750_s5 = inlined_call_operand.vmem [shape: bf16[8,16], index: 5, kind: input, shape index: {}]   ;;  %s3751_s7 = inlined_call_operand.vmem [shape: bf16[64,16], index: 7, kind: input, shape index: {}]   ;;  %s3752_s1 = inlined_call_operand.vmem [shape: f32[512,8], index: 1, kind: input, shape index: {}]   ;;  %s3753_s2 = inlined_call_operand.vmem [shape: f32[512,64], index: 2, kind: input, shape index: {}]   ;;  %s3754_s4 = inlined_call_operand.vmem [shape: f32[1,16], index: 4, kind: input, shape index: {}]   ;;  %s3755_s6 = inlined_call_operand.vmem [shape: f32[1,16], index: 6, kind: input, shape index: {}]   ;;  %s3756_s8 = inlined_call_operand.vmem [shape: f32[1,16], index: 8, kind: input, shape index: {}]   ;;  %s3757_s9 = inlined_call_operand.vmem [shape: f32[512,16], index: 9, kind: output, shape index: {}]  }
   0x1   :  { %v2346_v0 = vld [vmem:[%s3748_s3] sm:$0xff]   ;;  %v66_v2 = vld [vmem:[%s3749_s0 + $0x108] sm:$0xff]  ;;  %v67_v6 = vld [vmem:[%s3749_s0 + $0x110] sm:$0xff] }
   0x2   :  { %v65_v1 = vld [vmem:[%s3749_s0 + $0x100] sm:$0xff]  ;;  %2343 = vmatprep.subr.bf16.mxu1 %v2346_v0  ;;  %2139 = vmatprep.subr.bf16.mxu0 %v2346_v0  ;;  %v34_v5 = vld [vmem:[%s3749_s0 + $0x8] sm:$0xff]  ;;  %v68_v7 = vld [vmem:[%s3749_s0 + $0x118] sm:$0xff] }
   0x3   :  { %v33_v3 = vld [vmem:[%s3749_s0] sm:$0xff]  ;;  %v113_v4 = vpack.c.bf16 %v66_v2, %v65_v1  ;;  %2344 = vmatpush3.bf16.msra.mxu1 %v2346_v0  ;;  %2140 = vmatpush3.bf16.msra.mxu0 %v2346_v0  ;;  %v114_v9 = vpack.c.bf16 %v68_v7, %v67_v6  ;;  %v35_v11 = vld [vmem:[%s3749_s0 + $0x10] sm:$0xff]  ;;  %v36_v12 = vld [vmem:[%s3749_s0 + $0x18] sm:$0xff] }
   0x4   :  { %v97_v8 = vpack.c.bf16 %v34_v5, %v33_v3  ;;  %v626_v10 = vld [vmem:[%s3750_s5] sm:$0xf]  ;;  %v98_v13 = vpack.c.bf16 %v36_v12, %v35_v11  ;;  %v2347_v15 = vld [vmem:[%s3751_s7 + $0x18] sm:$0xff]   ;;  %v70_v17 = vld [vmem:[%s3749_s0 + $0x128] sm:$0xff] }
   0x5   :  { %2173 = vmatprep.mubr.msk.bf16.mxu1 %vm144_vm0, %v113_v4  ;;  %2345 = vmatprep.subr.msk.bf16.mxu1 %vm724_vm1, %v626_v10  ;;  %v726_v14 = vsel %vm724_vm1, %v626_v10, 0  ;;  %v69_v16 = vld [vmem:[%s3749_s0 + $0x120] sm:$0xff]  ;;  %v38_v20 = vld [vmem:[%s3749_s0 + $0x28] sm:$0xff]  ;;  %v71_v21 = vld [vmem:[%s3749_s0 + $0x130] sm:$0xff] }
   0x6   :  { %2141 = vmatprep.mubr.msk.bf16.mxu0 %vm144_vm0, %v97_v8  ;;  %v37_v18 = vld [vmem:[%s3749_s0 + $0x20] sm:$0xff]  ;;  %2174 = vmatmul.mubr.msk.bf16.vlgmr.msra.gmra.mxu1 %vm144_vm0, %v114_v9  ;;  %v115_v19 = vpack.c.bf16 %v70_v17, %v69_v16  ;;  %v72_v22 = vld [vmem:[%s3749_s0 + $0x138] sm:$0xff]  ;;  %v39_v24 = vld [vmem:[%s3749_s0 + $0x30] sm:$0xff] }
   0x7   :  { %2142 = vmatmul.mubr.msk.bf16.vlgmr.msra.gmra.mxu0 %vm144_vm0, %v98_v13  ;;  %2206 = vmatpush3.bf16.msra.mxu1 %v726_v14  ;;  %v99_v23 = vpack.c.bf16 %v38_v20, %v37_v18  ;;  %v40_v25 = vld [vmem:[%s3749_s0 + $0x38] sm:$0xff]  ;;  %v73_v26 = vld [vmem:[%s3749_s0 + $0x140] sm:$0xff]  ;;  %v74_v27 = vld [vmem:[%s3749_s0 + $0x148] sm:$0xff]  ;;  %v116_v30 = vpack.c.bf16 %v72_v22, %v71_v21 }
   0x8   :  { %2271 = vmatprep.subr.bf16.mxu0 %v2347_v15  ;;  %2177 = vmatprep.mubr.msk.bf16.mxu1 %vm144_vm0, %v115_v19  ;;  %v41_v28 = vld [vmem:[%s3749_s0 + $0x40] sm:$0xff]  ;;  %v42_v29 = vld [vmem:[%s3749_s0 + $0x48] sm:$0xff]  ;;  %v100_v31 = vpack.c.bf16 %v40_v25, %v39_v24  ;;  %v117_v32 = vpack.c.bf16 %v74_v27, %v73_v26  ;;  %v2348_v34 = vld [vmem:[%s3751_s7 + $0x10] sm:$0xff]  }
   0x9   :  { %2272 = vmatpush3.bf16.msra.mxu0 %v2347_v15  ;;  %2145 = vmatprep.mubr.msk.bf16.mxu0 %vm144_vm0, %v99_v23  ;;  %v101_v33 = vpack.c.bf16 %v42_v29, %v41_v28  ;;  %v75_v35 = vld [vmem:[%s3749_s0 + $0x150] sm:$0xff]  ;;  %v76_v36 = vld [vmem:[%s3749_s0 + $0x158] sm:$0xff]  ;;  %v77_v39 = vld [vmem:[%s3749_s0 + $0x160] sm:$0xff] }
   0xa   :  { %2273 = vmatprep.subr.bf16.mxu0 %v2348_v34  ;;  %v43_v37 = vld [vmem:[%s3749_s0 + $0x50] sm:$0xff]  ;;  %v44_v38 = vld [vmem:[%s3749_s0 + $0x58] sm:$0xff]  ;;  %v78_v40 = vld [vmem:[%s3749_s0 + $0x168] sm:$0xff]  ;;  %v118_v44 = vpack.c.bf16 %v76_v36, %v75_v35 }
   0xb   :  { %v45_v41 = vld [vmem:[%s3749_s0 + $0x60] sm:$0xff]  ;;  %v46_v42 = vld [vmem:[%s3749_s0 + $0x68] sm:$0xff]  ;;  %v102_v45 = vpack.c.bf16 %v44_v38, %v43_v37  ;;  %v119_v46 = vpack.c.bf16 %v78_v40, %v77_v39  ;;  %v79_v48 = vld [vmem:[%s3749_s0 + $0x170] sm:$0xff] }
   0xc   :  { %v2349_v43 = vld [vmem:[%s3751_s7 + $0x8] sm:$0xff]   ;;  %v103_v47 = vpack.c.bf16 %v46_v42, %v45_v41  ;;  %v80_v49 = vld [vmem:[%s3749_s0 + $0x178] sm:$0xff]  ;;  %v47_v50 = vld [vmem:[%s3749_s0 + $0x70] sm:$0xff] }
   0xd   :  { %2274 = vmatpush3.bf16.msra.mxu0 %v2348_v34  ;;  %v48_v51 = vld [vmem:[%s3749_s0 + $0x78] sm:$0xff]  ;;  %v81_v52 = vld [vmem:[%s3749_s0 + $0x180] sm:$0xff]  ;;  %v82_v54 = vld [vmem:[%s3749_s0 + $0x188] sm:$0xff]  ;;  %v120_v57 = vpack.c.bf16 %v80_v49, %v79_v48 }
   0xe   :  { %2178 = vmatmul.mubr.msk.bf16.gmra.mxu1 %vm144_vm0, %v116_v30  ;;  %2275 = vmatprep.subr.bf16.mxu0 %v2349_v43  ;;  %v2350_v53 = vld [vmem:[%s3751_s7] sm:$0xff]   ;;  %v50_v56 = vld [vmem:[%s3749_s0 + $0x88] sm:$0xff]  ;;  %v104_v58 = vpack.c.bf16 %v48_v51, %v47_v50  ;;  %v121_v59 = vpack.c.bf16 %v82_v54, %v81_v52  ;;  %v83_v61 = vld [vmem:[%s3749_s0 + $0x190] sm:$0xff] }
   0xf   :  { %2146 = vmatmul.mubr.msk.bf16.gmra.mxu0 %vm144_vm0, %v100_v31  ;;  %2181 = vmatprep.mubr.msk.bf16.mxu1 %vm144_vm0, %v117_v32  ;;  %v49_v55 = vld [vmem:[%s3749_s0 + $0x80] sm:$0xff]  ;;  %v84_v62 = vld [vmem:[%s3749_s0 + $0x198] sm:$0xff]  ;;  %v51_v63 = vld [vmem:[%s3749_s0 + $0x90] sm:$0xff] }
  0x10   :  { %2149 = vmatprep.mubr.msk.bf16.mxu0 %vm144_vm0, %v101_v33  ;;  %v105_v60 = vpack.c.bf16 %v50_v56, %v49_v55  ;;  %v52_v0 = vld [vmem:[%s3749_s0 + $0x98] sm:$0xff]  ;;  %v85_v1 = vld [vmem:[%s3749_s0 + $0x1a0] sm:$0xff]  ;;  %v86_v2 = vld [vmem:[%s3749_s0 + $0x1a8] sm:$0xff]  ;;  %v122_v5 = vpack.c.bf16 %v84_v62, %v83_v61 }
  0x11   :  { %2276 = vmatpush3.bf16.msra.mxu0 %v2349_v43  ;;  %v53_v3 = vld [vmem:[%s3749_s0 + $0xa0] sm:$0xff]  ;;  %v54_v4 = vld [vmem:[%s3749_s0 + $0xa8] sm:$0xff]  ;;  %v106_v6 = vpack.c.bf16 %v52_v0, %v51_v63  ;;  %v123_v7 = vpack.c.bf16 %v86_v2, %v85_v1  ;;  %v87_v9 = vld [vmem:[%s3749_s0 + $0x1b0] sm:$0xff] }
  0x12   :  { %2277 = vmatprep.subr.bf16.mxu0 %v2350_v53  ;;  %v107_v8 = vpack.c.bf16 %v54_v4, %v53_v3  ;;  %v88_v10 = vld [vmem:[%s3749_s0 + $0x1b8] sm:$0xff]  ;;  %v55_v11 = vld [vmem:[%s3749_s0 + $0xb0] sm:$0xff]  ;;  %v89_v13 = vld [vmem:[%s3749_s0 + $0x1c0] sm:$0xff] }
  0x13   :  { %v56_v12 = vld [vmem:[%s3749_s0 + $0xb8] sm:$0xff]  ;;  %v90_v14 = vld [vmem:[%s3749_s0 + $0x1c8] sm:$0xff]  ;;  %v57_v15 = vld [vmem:[%s3749_s0 + $0xc0] sm:$0xff]  ;;  %v124_v17 = vpack.c.bf16 %v88_v10, %v87_v9 }
  0x14   :  { %v58_v16 = vld [vmem:[%s3749_s0 + $0xc8] sm:$0xff]  ;;  %v108_v18 = vpack.c.bf16 %v56_v12, %v55_v11  ;;  %v125_v19 = vpack.c.bf16 %v90_v14, %v89_v13  ;;  %v91_v21 = vld [vmem:[%s3749_s0 + $0x1d0] sm:$0xff]  ;;  %v92_v22 = vld [vmem:[%s3749_s0 + $0x1d8] sm:$0xff] }
  0x15   :  { %2278 = vmatpush3.bf16.msra.mxu0 %v2350_v53  ;;  %v109_v20 = vpack.c.bf16 %v58_v16, %v57_v15  ;;  %v59_v23 = vld [vmem:[%s3749_s0 + $0xd0] sm:$0xff]  ;;  %v60_v24 = vld [vmem:[%s3749_s0 + $0xd8] sm:$0xff]  ;;  %v93_v25 = vld [vmem:[%s3749_s0 + $0x1e0] sm:$0xff]  ;;  %v126_v29 = vpack.c.bf16 %v92_v22, %v91_v21 }
  0x16   :  { %2182 = vmatmul.mubr.msk.bf16.gmra.mxu1 %vm144_vm0, %v118_v44  ;;  %v94_v26 = vld [vmem:[%s3749_s0 + $0x1e8] sm:$0xff]  ;;  %v61_v27 = vld [vmem:[%s3749_s0 + $0xe0] sm:$0xff]  ;;  %v110_v30 = vpack.c.bf16 %v60_v24, %v59_v23  ;;  %v95_v33 = vld [vmem:[%s3749_s0 + $0x1f0] sm:$0xff] }
  0x17   :  { %2150 = vmatmul.mubr.msk.bf16.gmra.mxu0 %vm144_vm0, %v102_v45  ;;  %2185 = vmatprep.mubr.msk.bf16.mxu1 %vm144_vm0, %v119_v46  ;;  %v62_v28 = vld [vmem:[%s3749_s0 + $0xe8] sm:$0xff]  ;;  %v127_v31 = vpack.c.bf16 %v94_v26, %v93_v25  ;;  %v96_v34 = vld [vmem:[%s3749_s0 + $0x1f8] sm:$0xff]  ;;  %v63_v35 = vld [vmem:[%s3749_s0 + $0xf0] sm:$0xff] }
  0x18   :  { %2153 = vmatprep.mubr.msk.bf16.mxu0 %vm144_vm0, %v103_v47  ;;  %v111_v32 = vpack.c.bf16 %v62_v28, %v61_v27  ;;  %v64_v36 = vld [vmem:[%s3749_s0 + $0xf8] sm:$0xff]  ;;  %v530_v37 = vld [vmem:[%s3752_s1] sm:$0xff]  ;;  %v531_v38 = vld [vmem:[%s3752_s1 + $0x8] sm:$0xff]  ;;  %v128_v41 = vpack.c.bf16 %v96_v34, %v95_v33 }
  0x19   :  { %v1216_v39 = vld [vmem:[%s3753_s2] sm:$0xff]  ;;  %v1217_v40 = vld [vmem:[%s3753_s2 + $0x8] sm:$0xff]  ;;  %v112_v42 = vpack.c.bf16 %v64_v36, %v63_v35  ;;  %v594_v43 = vpack.c.bf16 %v531_v38, %v530_v37  ;;  %v532_v45 = vld [vmem:[%s3752_s1 + $0x10] sm:$0xff] }
  0x1a   :  { %v1280_v44 = vpack.c.bf16 %v1217_v40, %v1216_v39  ;;  %v533_v46 = vld [vmem:[%s3752_s1 + $0x18] sm:$0xff]  ;;  %v1218_v47 = vld [vmem:[%s3753_s2 + $0x10] sm:$0xff]  ;;  %v534_v49 = vld [vmem:[%s3752_s1 + $0x20] sm:$0xff] }
  0x1b   :  { %v1219_v48 = vld [vmem:[%s3753_s2 + $0x18] sm:$0xff]  ;;  %v535_v50 = vld [vmem:[%s3752_s1 + $0x28] sm:$0xff]  ;;  %v1220_v51 = vld [vmem:[%s3753_s2 + $0x20] sm:$0xff]  ;;  %v595_v53 = vpack.c.bf16 %v533_v46, %v532_v45 }
  0x1c   :  { %v1221_v52 = vld [vmem:[%s3753_s2 + $0x28] sm:$0xff]  ;;  %v1281_v54 = vpack.c.bf16 %v1219_v48, %v1218_v47  ;;  %v596_v55 = vpack.c.bf16 %v535_v50, %v534_v49  ;;  %v538_v61 = vld [vmem:[%s3752_s1 + $0x40] sm:$0xff] }
  0x1d   :  { %v1282_v56 = vpack.c.bf16 %v1221_v52, %v1220_v51  ;;  %v539_v62 = vld [vmem:[%s3752_s1 + $0x48] sm:$0xff]  ;;  %v1224_v63 = vld [vmem:[%s3753_s2 + $0x40] sm:$0xff] }
  0x1e   :  { %2186 = vmatmul.mubr.msk.bf16.gmra.mxu1 %vm144_vm0, %v120_v57  ;;  %v536_v57 = vld [vmem:[%s3752_s1 + $0x30] sm:$0xff]  ;;  %v1225_v0 = vld [vmem:[%s3753_s2 + $0x48] sm:$0xff]  ;;  %v598_v3 = vpack.c.bf16 %v539_v62, %v538_v61  ;;  %v542_v9 = vld [vmem:[%s3752_s1 + $0x60] sm:$0xff] }
  0x1f   :  { %2154 = vmatmul.mubr.msk.bf16.gmra.mxu0 %vm144_vm0, %v104_v58  ;;  %2189 = vmatprep.mubr.msk.bf16.mxu1 %vm144_vm0, %v121_v59  ;;  %v537_v58 = vld [vmem:[%s3752_s1 + $0x38] sm:$0xff]  ;;  %v1222_v59 = vld [vmem:[%s3753_s2 + $0x30] sm:$0xff]  ;;  %v1284_v4 = vpack.c.bf16 %v1225_v0, %v1224_v63  ;;  %v543_v10 = vld [vmem:[%s3752_s1 + $0x68] sm:$0xff] }
  0x20   :  { %2157 = vmatprep.mubr.msk.bf16.mxu0 %vm144_vm0, %v105_v60  ;;  %v1223_v60 = vld [vmem:[%s3753_s2 + $0x38] sm:$0xff]  ;;  %v597_v1 = vpack.c.bf16 %v537_v58, %v536_v57  ;;  %v1228_v11 = vld [vmem:[%s3753_s2 + $0x60] sm:$0xff]  ;;  %v1229_v12 = vld [vmem:[%s3753_s2 + $0x68] sm:$0xff]  ;;  %v600_v15 = vpack.c.bf16 %v543_v10, %v542_v9 }
  0x21   :  { %v1283_v2 = vpack.c.bf16 %v1223_v60, %v1222_v59  ;;  %v1286_v16 = vpack.c.bf16 %v1229_v12, %v1228_v11  ;;  %v546_v21 = vld [vmem:[%s3752_s1 + $0x80] sm:$0xff]  ;;  %v547_v22 = vld [vmem:[%s3752_s1 + $0x88] sm:$0xff] }
  0x22   :  { %v1232_v23 = vld [vmem:[%s3753_s2 + $0x80] sm:$0xff]  ;;  %v1233_v24 = vld [vmem:[%s3753_s2 + $0x88] sm:$0xff]  ;;  %v602_v27 = vpack.c.bf16 %v547_v22, %v546_v21 }
  0x23   :  { %v1288_v28 = vpack.c.bf16 %v1233_v24, %v1232_v23  ;;  %v550_v33 = vld [vmem:[%s3752_s1 + $0xa0] sm:$0xff]  ;;  %v551_v34 = vld [vmem:[%s3752_s1 + $0xa8] sm:$0xff] }
  0x24   :  { %v1236_v35 = vld [vmem:[%s3753_s2 + $0xa0] sm:$0xff]  ;;  %v1237_v36 = vld [vmem:[%s3753_s2 + $0xa8] sm:$0xff]  ;;  %v604_v39 = vpack.c.bf16 %v551_v34, %v550_v33 }
  0x25   :  { %v1290_v40 = vpack.c.bf16 %v1237_v36, %v1236_v35  ;;  %v554_v45 = vld [vmem:[%s3752_s1 + $0xc0] sm:$0xff]  ;;  %v555_v46 = vld [vmem:[%s3752_s1 + $0xc8] sm:$0xff] }
  0x26   :  { %2190 = vmatmul.mubr.msk.bf16.gmra.mxu1 %vm144_vm0, %v122_v5  ;;  %v540_v5 = vld [vmem:[%s3752_s1 + $0x50] sm:$0xff]  ;;  %v1240_v47 = vld [vmem:[%s3753_s2 + $0xc0] sm:$0xff]  ;;  %v1241_v48 = vld [vmem:[%s3753_s2 + $0xc8] sm:$0xff]  ;;  %v606_v51 = vpack.c.bf16 %v555_v46, %v554_v45 }
  0x27   :  { %2158 = vmatmul.mubr.msk.bf16.gmra.mxu0 %vm144_vm0, %v106_v6  ;;  %2193 = vmatprep.mubr.msk.bf16.mxu1 %vm144_vm0, %v123_v7  ;;  %v541_v6 = vld [vmem:[%s3752_s1 + $0x58] sm:$0xff]  ;;  %v1226_v7 = vld [vmem:[%s3753_s2 + $0x50] sm:$0xff]  ;;  %v1292_v52 = vpack.c.bf16 %v1241_v48, %v1240_v47  ;;  %v558_v57 = vld [vmem:[%s3752_s1 + $0xe0] sm:$0xff] }
  0x28   :  { %2161 = vmatprep.mubr.msk.bf16.mxu0 %vm144_vm0, %v107_v8  ;;  %v1227_v8 = vld [vmem:[%s3753_s2 + $0x58] sm:$0xff]  ;;  %v599_v13 = vpack.c.bf16 %v541_v6, %v540_v5  ;;  %v559_v58 = vld [vmem:[%s3752_s1 + $0xe8] sm:$0xff]  ;;  %v1244_v59 = vld [vmem:[%s3753_s2 + $0xe0] sm:$0xff] }
  0x29   :  { %v1285_v14 = vpack.c.bf16 %v1227_v8, %v1226_v7  ;;  %v1245_v60 = vld [vmem:[%s3753_s2 + $0xe8] sm:$0xff]  ;;  %v608_v63 = vpack.c.bf16 %v559_v58, %v558_v57  ;;  %v562_v5 = vld [vmem:[%s3752_s1 + $0x100] sm:$0xff] }
  0x2a   :  { %v1294_v0 = vpack.c.bf16 %v1245_v60, %v1244_v59  ;;  %v563_v6 = vld [vmem:[%s3752_s1 + $0x108] sm:$0xff]  ;;  %v1248_v7 = vld [vmem:[%s3753_s2 + $0x100] sm:$0xff] }
  0x2b   :  { %v1249_v8 = vld [vmem:[%s3753_s2 + $0x108] sm:$0xff]  ;;  %v610_v11 = vpack.c.bf16 %v563_v6, %v562_v5 }
  0x2c   :  { %v1296_v12 = vpack.c.bf16 %v1249_v8, %v1248_v7 }
  0x2e   :  { %2194 = vmatmul.mubr.msk.bf16.gmra.mxu1 %vm144_vm0, %v124_v17  ;;  %v544_v17 = vld [vmem:[%s3752_s1 + $0x70] sm:$0xff] }
  0x2f   :  { %2162 = vmatmul.mubr.msk.bf16.gmra.mxu0 %vm144_vm0, %v108_v18  ;;  %2197 = vmatprep.mubr.msk.bf16.mxu1 %vm144_vm0, %v125_v19  ;;  %v545_v18 = vld [vmem:[%s3752_s1 + $0x78] sm:$0xff]  ;;  %v1230_v19 = vld [vmem:[%s3753_s2 + $0x70] sm:$0xff] }
  0x30   :  { %2165 = vmatprep.mubr.msk.bf16.mxu0 %vm144_vm0, %v109_v20  ;;  %v1231_v20 = vld [vmem:[%s3753_s2 + $0x78] sm:$0xff]  ;;  %v601_v25 = vpack.c.bf16 %v545_v18, %v544_v17  ;;  %v566_v17 = vld [vmem:[%s3752_s1 + $0x120] sm:$0xff]  ;;  %v567_v18 = vld [vmem:[%s3752_s1 + $0x128] sm:$0xff] }
  0x31   :  { %v1287_v26 = vpack.c.bf16 %v1231_v20, %v1230_v19  ;;  %v1252_v19 = vld [vmem:[%s3753_s2 + $0x120] sm:$0xff]  ;;  %v1253_v20 = vld [vmem:[%s3753_s2 + $0x128] sm:$0xff]  ;;  %v612_v23 = vpack.c.bf16 %v567_v18, %v566_v17 }
  0x32   :  { %v1298_v24 = vpack.c.bf16 %v1253_v20, %v1252_v19 }
  0x36   :  { %2198 = vmatmul.mubr.msk.bf16.gmra.mxu1 %vm144_vm0, %v126_v29  ;;  %v548_v29 = vld [vmem:[%s3752_s1 + $0x90] sm:$0xff] }
  0x37   :  { %2166 = vmatmul.mubr.msk.bf16.gmra.mxu0 %vm144_vm0, %v110_v30  ;;  %2201 = vmatprep.mubr.msk.bf16.mxu1 %vm144_vm0, %v127_v31  ;;  %v549_v30 = vld [vmem:[%s3752_s1 + $0x98] sm:$0xff]  ;;  %v1234_v31 = vld [vmem:[%s3753_s2 + $0x90] sm:$0xff] }
  0x38   :  { %2169 = vmatprep.mubr.msk.bf16.mxu0 %vm144_vm0, %v111_v32  ;;  %v1235_v32 = vld [vmem:[%s3753_s2 + $0x98] sm:$0xff]  ;;  %v603_v37 = vpack.c.bf16 %v549_v30, %v548_v29  ;;  %v570_v29 = vld [vmem:[%s3752_s1 + $0x140] sm:$0xff]  ;;  %v571_v30 = vld [vmem:[%s3752_s1 + $0x148] sm:$0xff] }
  0x39   :  { %v1289_v38 = vpack.c.bf16 %v1235_v32, %v1234_v31  ;;  %v1256_v31 = vld [vmem:[%s3753_s2 + $0x140] sm:$0xff]  ;;  %v1257_v32 = vld [vmem:[%s3753_s2 + $0x148] sm:$0xff]  ;;  %v614_v35 = vpack.c.bf16 %v571_v30, %v570_v29 }
  0x3a   :  { %v1300_v36 = vpack.c.bf16 %v1257_v32, %v1256_v31 }
  0x3e   :  { %2202 = vmatmul.mubr.msk.bf16.gmra.mxu1 %vm144_vm0, %v128_v41  ;;  %v552_v41 = vld [vmem:[%s3752_s1 + $0xb0] sm:$0xff] }
  0x3f   :  { %2170 = vmatmul.mubr.msk.bf16.gmra.mxu0 %vm144_vm0, %v112_v42  ;;  %2207 = vmatprep.mubr.msk.bf16.mxu1 %vm627_vm2, %v594_v43  ;;  %v553_v42 = vld [vmem:[%s3752_s1 + $0xb8] sm:$0xff]  ;;  %v1238_v43 = vld [vmem:[%s3753_s2 + $0xb0] sm:$0xff] }
  0x40   :  { %2279 = vmatprep.mubr.msk.bf16.mxu0 %vm1344_vm3, %v1280_v44  ;;  %v1239_v44 = vld [vmem:[%s3753_s2 + $0xb8] sm:$0xff]  ;;  %v605_v49 = vpack.c.bf16 %v553_v42, %v552_v41  ;;  %v574_v41 = vld [vmem:[%s3752_s1 + $0x160] sm:$0xff]  ;;  %v575_v42 = vld [vmem:[%s3752_s1 + $0x168] sm:$0xff] }
  0x41   :  { %v1291_v50 = vpack.c.bf16 %v1239_v44, %v1238_v43  ;;  %v1260_v43 = vld [vmem:[%s3753_s2 + $0x160] sm:$0xff]  ;;  %v1261_v44 = vld [vmem:[%s3753_s2 + $0x168] sm:$0xff]  ;;  %v616_v47 = vpack.c.bf16 %v575_v42, %v574_v41 }
  0x42   :  { %v1302_v48 = vpack.c.bf16 %v1261_v44, %v1260_v43 }
  0x46   :  { %2208 = vmatmul.mubr.msk.bf16.vlgmr.msra.gmra.mxu1 %vm627_vm2, %v595_v53  ;;  %v556_v53 = vld [vmem:[%s3752_s1 + $0xd0] sm:$0xff] }
  0x47   :  { %2280 = vmatmul.mubr.msk.bf16.vlgmr.msra.gmra.mxu0 %vm1344_vm3, %v1281_v54  ;;  %2211 = vmatprep.mubr.msk.bf16.mxu1 %vm627_vm2, %v596_v55  ;;  %v557_v54 = vld [vmem:[%s3752_s1 + $0xd8] sm:$0xff]  ;;  %v1242_v55 = vld [vmem:[%s3753_s2 + $0xd0] sm:$0xff] }
  0x48   :  { %2283 = vmatprep.mubr.msk.bf16.mxu0 %vm1344_vm3, %v1282_v56  ;;  %v1243_v56 = vld [vmem:[%s3753_s2 + $0xd8] sm:$0xff]  ;;  %v607_v61 = vpack.c.bf16 %v557_v54, %v556_v53  ;;  %v578_v53 = vld [vmem:[%s3752_s1 + $0x180] sm:$0xff]  ;;  %v579_v54 = vld [vmem:[%s3752_s1 + $0x188] sm:$0xff] }
  0x49   :  { %v1293_v62 = vpack.c.bf16 %v1243_v56, %v1242_v55  ;;  %v1264_v55 = vld [vmem:[%s3753_s2 + $0x180] sm:$0xff]  ;;  %v1265_v56 = vld [vmem:[%s3753_s2 + $0x188] sm:$0xff]  ;;  %v618_v59 = vpack.c.bf16 %v579_v54, %v578_v53 }
  0x4a   :  { %v1304_v60 = vpack.c.bf16 %v1265_v56, %v1264_v55 }
  0x4e   :  { %2212 = vmatmul.mubr.msk.bf16.gmra.mxu1 %vm627_vm2, %v597_v1  ;;  %v560_v1 = vld [vmem:[%s3752_s1 + $0xf0] sm:$0xff] }
  0x4f   :  { %2284 = vmatmul.mubr.msk.bf16.gmra.mxu0 %vm1344_vm3, %v1283_v2  ;;  %2215 = vmatprep.mubr.msk.bf16.mxu1 %vm627_vm2, %v598_v3  ;;  %v561_v2 = vld [vmem:[%s3752_s1 + $0xf8] sm:$0xff]  ;;  %v1246_v3 = vld [vmem:[%s3753_s2 + $0xf0] sm:$0xff] }
  0x50   :  { %2287 = vmatprep.mubr.msk.bf16.mxu0 %vm1344_vm3, %v1284_v4  ;;  %v1247_v4 = vld [vmem:[%s3753_s2 + $0xf8] sm:$0xff]  ;;  %v609_v9 = vpack.c.bf16 %v561_v2, %v560_v1  ;;  %v582_v1 = vld [vmem:[%s3752_s1 + $0x1a0] sm:$0xff]  ;;  %v583_v2 = vld [vmem:[%s3752_s1 + $0x1a8] sm:$0xff] }
  0x51   :  { %v1295_v10 = vpack.c.bf16 %v1247_v4, %v1246_v3  ;;  %v1268_v3 = vld [vmem:[%s3753_s2 + $0x1a0] sm:$0xff]  ;;  %v1269_v4 = vld [vmem:[%s3753_s2 + $0x1a8] sm:$0xff]  ;;  %v620_v7 = vpack.c.bf16 %v583_v2, %v582_v1 }
  0x52   :  { %v1306_v8 = vpack.c.bf16 %v1269_v4, %v1268_v3 }
  0x56   :  { %2216 = vmatmul.mubr.msk.bf16.gmra.mxu1 %vm627_vm2, %v599_v13  ;;  %v564_v13 = vld [vmem:[%s3752_s1 + $0x110] sm:$0xff] }
  0x57   :  { %2288 = vmatmul.mubr.msk.bf16.gmra.mxu0 %vm1344_vm3, %v1285_v14  ;;  %2219 = vmatprep.mubr.msk.bf16.mxu1 %vm627_vm2, %v600_v15  ;;  %v565_v14 = vld [vmem:[%s3752_s1 + $0x118] sm:$0xff]  ;;  %v1250_v15 = vld [vmem:[%s3753_s2 + $0x110] sm:$0xff] }
  0x58   :  { %2291 = vmatprep.mubr.msk.bf16.mxu0 %vm1344_vm3, %v1286_v16  ;;  %v1251_v16 = vld [vmem:[%s3753_s2 + $0x118] sm:$0xff]  ;;  %v611_v21 = vpack.c.bf16 %v565_v14, %v564_v13  ;;  %v586_v13 = vld [vmem:[%s3752_s1 + $0x1c0] sm:$0xff]  ;;  %v587_v14 = vld [vmem:[%s3752_s1 + $0x1c8] sm:$0xff] }
  0x59   :  { %v1297_v22 = vpack.c.bf16 %v1251_v16, %v1250_v15  ;;  %v1272_v15 = vld [vmem:[%s3753_s2 + $0x1c0] sm:$0xff]  ;;  %v1273_v16 = vld [vmem:[%s3753_s2 + $0x1c8] sm:$0xff]  ;;  %v622_v19 = vpack.c.bf16 %v587_v14, %v586_v13 }
  0x5a   :  { %v1308_v20 = vpack.c.bf16 %v1273_v16, %v1272_v15 }
  0x5e   :  { %2220 = vmatmul.mubr.msk.bf16.gmra.mxu1 %vm627_vm2, %v601_v25  ;;  %v568_v25 = vld [vmem:[%s3752_s1 + $0x130] sm:$0xff] }
  0x5f   :  { %2292 = vmatmul.mubr.msk.bf16.gmra.mxu0 %vm1344_vm3, %v1287_v26  ;;  %2223 = vmatprep.mubr.msk.bf16.mxu1 %vm627_vm2, %v602_v27  ;;  %v569_v26 = vld [vmem:[%s3752_s1 + $0x138] sm:$0xff]  ;;  %v1254_v27 = vld [vmem:[%s3753_s2 + $0x130] sm:$0xff] }
  0x60   :  { %2295 = vmatprep.mubr.msk.bf16.mxu0 %vm1344_vm3, %v1288_v28  ;;  %v1255_v28 = vld [vmem:[%s3753_s2 + $0x138] sm:$0xff]  ;;  %v613_v33 = vpack.c.bf16 %v569_v26, %v568_v25  ;;  %v590_v25 = vld [vmem:[%s3752_s1 + $0x1e0] sm:$0xff]  ;;  %v591_v26 = vld [vmem:[%s3752_s1 + $0x1e8] sm:$0xff] }
  0x61   :  { %v1299_v34 = vpack.c.bf16 %v1255_v28, %v1254_v27  ;;  %v1276_v27 = vld [vmem:[%s3753_s2 + $0x1e0] sm:$0xff]  ;;  %v1277_v28 = vld [vmem:[%s3753_s2 + $0x1e8] sm:$0xff]  ;;  %v624_v31 = vpack.c.bf16 %v591_v26, %v590_v25 }
  0x62   :  { %v1310_v32 = vpack.c.bf16 %v1277_v28, %v1276_v27 }
  0x66   :  { %2224 = vmatmul.mubr.msk.bf16.gmra.mxu1 %vm627_vm2, %v603_v37  ;;  %v572_v37 = vld [vmem:[%s3752_s1 + $0x150] sm:$0xff] }
  0x67   :  { %2296 = vmatmul.mubr.msk.bf16.gmra.mxu0 %vm1344_vm3, %v1289_v38  ;;  %2227 = vmatprep.mubr.msk.bf16.mxu1 %vm627_vm2, %v604_v39  ;;  %v573_v38 = vld [vmem:[%s3752_s1 + $0x158] sm:$0xff]  ;;  %v1258_v39 = vld [vmem:[%s3753_s2 + $0x150] sm:$0xff] }
  0x68   :  { %2299 = vmatprep.mubr.msk.bf16.mxu0 %vm1344_vm3, %v1290_v40  ;;  %v1259_v40 = vld [vmem:[%s3753_s2 + $0x158] sm:$0xff]  ;;  %v615_v45 = vpack.c.bf16 %v573_v38, %v572_v37 }
  0x69   :  { %v1301_v46 = vpack.c.bf16 %v1259_v40, %v1258_v39  ;;  %v3098_v39 = vld [vmem:[%s3754_s4] ss:$0 sm:$0xff] }
  0x6e   :  { %2228 = vmatmul.mubr.msk.bf16.gmra.mxu1 %vm627_vm2, %v605_v49  ;;  %v576_v49 = vld [vmem:[%s3752_s1 + $0x170] sm:$0xff] }
  0x6f   :  { %2300 = vmatmul.mubr.msk.bf16.gmra.mxu0 %vm1344_vm3, %v1291_v50  ;;  %2231 = vmatprep.mubr.msk.bf16.mxu1 %vm627_vm2, %v606_v51  ;;  %v577_v50 = vld [vmem:[%s3752_s1 + $0x178] sm:$0xff]  ;;  %v1262_v51 = vld [vmem:[%s3753_s2 + $0x170] sm:$0xff] }
  0x70   :  { %2303 = vmatprep.mubr.msk.bf16.mxu0 %vm1344_vm3, %v1292_v52  ;;  %v1263_v52 = vld [vmem:[%s3753_s2 + $0x178] sm:$0xff]  ;;  %v617_v57 = vpack.c.bf16 %v577_v50, %v576_v49 }
  0x71   :  { %v1303_v58 = vpack.c.bf16 %v1263_v52, %v1262_v51 }
  0x76   :  { %2232 = vmatmul.mubr.msk.bf16.gmra.mxu1 %vm627_vm2, %v607_v61  ;;  %v580_v61 = vld [vmem:[%s3752_s1 + $0x190] sm:$0xff] }
  0x77   :  { %2304 = vmatmul.mubr.msk.bf16.gmra.mxu0 %vm1344_vm3, %v1293_v62  ;;  %2235 = vmatprep.mubr.msk.bf16.mxu1 %vm627_vm2, %v608_v63  ;;  %v581_v62 = vld [vmem:[%s3752_s1 + $0x198] sm:$0xff]  ;;  %v1266_v63 = vld [vmem:[%s3753_s2 + $0x190] sm:$0xff] }
  0x78   :  { %2307 = vmatprep.mubr.msk.bf16.mxu0 %vm1344_vm3, %v1294_v0  ;;  %v1267_v0 = vld [vmem:[%s3753_s2 + $0x198] sm:$0xff]  ;;  %v619_v5 = vpack.c.bf16 %v581_v62, %v580_v61 }
  0x79   :  { %v1305_v6 = vpack.c.bf16 %v1267_v0, %v1266_v63 }
  0x7e   :  { %2236 = vmatmul.mubr.msk.bf16.gmra.mxu1 %vm627_vm2, %v609_v9  ;;  %v584_v9 = vld [vmem:[%s3752_s1 + $0x1b0] sm:$0xff] }
  0x7f   :  { %2308 = vmatmul.mubr.msk.bf16.gmra.mxu0 %vm1344_vm3, %v1295_v10  ;;  %2239 = vmatprep.mubr.msk.bf16.mxu1 %vm627_vm2, %v610_v11  ;;  %v585_v10 = vld [vmem:[%s3752_s1 + $0x1b8] sm:$0xff]  ;;  %v1270_v11 = vld [vmem:[%s3753_s2 + $0x1b0] sm:$0xff] }
  0x80   :  { %2311 = vmatprep.mubr.msk.bf16.mxu0 %vm1344_vm3, %v1296_v12  ;;  %v1271_v12 = vld [vmem:[%s3753_s2 + $0x1b8] sm:$0xff]  ;;  %v621_v17 = vpack.c.bf16 %v585_v10, %v584_v9 }
  0x81   :  { %v1307_v18 = vpack.c.bf16 %v1271_v12, %v1270_v11 }
  0x86   :  { %2240 = vmatmul.mubr.msk.bf16.gmra.mxu1 %vm627_vm2, %v611_v21  ;;  %v588_v21 = vld [vmem:[%s3752_s1 + $0x1d0] sm:$0xff] }
  0x87   :  { %2312 = vmatmul.mubr.msk.bf16.gmra.mxu0 %vm1344_vm3, %v1297_v22  ;;  %2243 = vmatprep.mubr.msk.bf16.mxu1 %vm627_vm2, %v612_v23  ;;  %v589_v22 = vld [vmem:[%s3752_s1 + $0x1d8] sm:$0xff]  ;;  %v1274_v23 = vld [vmem:[%s3753_s2 + $0x1d0] sm:$0xff] }
  0x88   :  { %2315 = vmatprep.mubr.msk.bf16.mxu0 %vm1344_vm3, %v1298_v24  ;;  %v1275_v24 = vld [vmem:[%s3753_s2 + $0x1d8] sm:$0xff]  ;;  %v623_v29 = vpack.c.bf16 %v589_v22, %v588_v21 }
  0x89   :  { %v1309_v30 = vpack.c.bf16 %v1275_v24, %v1274_v23 }
  0x8e   :  { %2244 = vmatmul.mubr.msk.bf16.gmra.mxu1 %vm627_vm2, %v613_v33  ;;  %v592_v33 = vld [vmem:[%s3752_s1 + $0x1f0] sm:$0xff] }
  0x8f   :  { %2316 = vmatmul.mubr.msk.bf16.gmra.mxu0 %vm1344_vm3, %v1299_v34  ;;  %2247 = vmatprep.mubr.msk.bf16.mxu1 %vm627_vm2, %v614_v35  ;;  %v593_v34 = vld [vmem:[%s3752_s1 + $0x1f8] sm:$0xff]  ;;  %v1278_v35 = vld [vmem:[%s3753_s2 + $0x1f0] sm:$0xff] }
  0x90   :  { %2319 = vmatprep.mubr.msk.bf16.mxu0 %vm1344_vm3, %v1300_v36  ;;  %v1279_v36 = vld [vmem:[%s3753_s2 + $0x1f8] sm:$0xff]  ;;  %v625_v37 = vpack.c.bf16 %v593_v34, %v592_v33 }
  0x91   :  { %v1311_v38 = vpack.c.bf16 %v1279_v36, %v1278_v35 }
  0x96   :  { %2248 = vmatmul.mubr.msk.bf16.gmra.mxu1 %vm627_vm2, %v615_v45 }
  0x97   :  { %2320 = vmatmul.mubr.msk.bf16.gmra.mxu0 %vm1344_vm3, %v1301_v46  ;;  %2251 = vmatprep.mubr.msk.bf16.mxu1 %vm627_vm2, %v616_v47 }
  0x98   :  { %2323 = vmatprep.mubr.msk.bf16.mxu0 %vm1344_vm3, %v1302_v48 }
  0x9e   :  { %2252 = vmatmul.mubr.msk.bf16.gmra.mxu1 %vm627_vm2, %v617_v57 }
  0x9f   :  { %2324 = vmatmul.mubr.msk.bf16.gmra.mxu0 %vm1344_vm3, %v1303_v58  ;;  %2255 = vmatprep.mubr.msk.bf16.mxu1 %vm627_vm2, %v618_v59 }
  0xa0   :  { %2327 = vmatprep.mubr.msk.bf16.mxu0 %vm1344_vm3, %v1304_v60 }
  0xa6   :  { %2256 = vmatmul.mubr.msk.bf16.gmra.mxu1 %vm627_vm2, %v619_v5 }
  0xa7   :  { %2328 = vmatmul.mubr.msk.bf16.gmra.mxu0 %vm1344_vm3, %v1305_v6  ;;  %2259 = vmatprep.mubr.msk.bf16.mxu1 %vm627_vm2, %v620_v7 }
  0xa8   :  { %2331 = vmatprep.mubr.msk.bf16.mxu0 %vm1344_vm3, %v1306_v8 }
  0xae   :  { %2260 = vmatmul.mubr.msk.bf16.gmra.mxu1 %vm627_vm2, %v621_v17 }
  0xaf   :  { %2332 = vmatmul.mubr.msk.bf16.gmra.mxu0 %vm1344_vm3, %v1307_v18  ;;  %2263 = vmatprep.mubr.msk.bf16.mxu1 %vm627_vm2, %v622_v19 }
  0xb0   :  { %2335 = vmatprep.mubr.msk.bf16.mxu0 %vm1344_vm3, %v1308_v20 }
  0xb6   :  { %2264 = vmatmul.mubr.msk.bf16.gmra.mxu1 %vm627_vm2, %v623_v29 }
  0xb7   :  { %2336 = vmatmul.mubr.msk.bf16.gmra.mxu0 %vm1344_vm3, %v1309_v30  ;;  %2267 = vmatprep.mubr.msk.bf16.mxu1 %vm627_vm2, %v624_v31 }
  0xb8   :  { %2339 = vmatprep.mubr.msk.bf16.mxu0 %vm1344_vm3, %v1310_v32 }
  0xbe   :  { %2268 = vmatmul.mubr.msk.bf16.gmra.mxu1 %vm627_vm2, %v625_v37 }
  0xbf   :  { %2340 = vmatmul.mubr.msk.bf16.gmra.mxu0 %vm1344_vm3, %v1311_v38 }
  0xc6   :  { %v2175_v40 = vpop.f32.mrf.mxu1 }
  0xc7   :  { %v3100_v41 = vpop.f32.mrf.mxu0  ;;  %v3103_v42 = vadd.f32 %v2175_v40, %v3098_v39 }
  0xc8   :  { %v403_v43 = vpop.f32.mrf.mxu1 }
  0xc9   :  { %v3105_v44 = vpop.f32.mrf.mxu0  ;;  %v3108_v45 = vadd.f32 %v3098_v39, %v403_v43 }
  0xca   :  { %v2176_v46 = vpop.f32.mrf.mxu1 }
  0xcb   :  { %v3110_v47 = vpop.f32.mrf.mxu0  ;;  %v3113_v48 = vadd.f32 %v2176_v46, %v3098_v39 }
  0xcc   :  { %v406_v49 = vpop.f32.mrf.mxu1 }
  0xcd   :  { %v3115_v50 = vpop.f32.mrf.mxu0  ;;  %v3118_v51 = vadd.f32 %v3098_v39, %v406_v49 }
  0xce   :  { %v2179_v52 = vpop.f32.mrf.mxu1 }
  0xcf   :  { %v3120_v53 = vpop.f32.mrf.mxu0  ;;  %v3123_v54 = vadd.f32 %v2179_v52, %v3098_v39 }
  0xd0   :  { %v419_v55 = vpop.f32.mrf.mxu1 }
  0xd1   :  { %v3125_v56 = vpop.f32.mrf.mxu0  ;;  %v3128_v57 = vadd.f32 %v3098_v39, %v419_v55 }
  0xd2   :  { %v2180_v58 = vpop.f32.mrf.mxu1 }
  0xd3   :  { %v3130_v59 = vpop.f32.mrf.mxu0  ;;  %v3133_v60 = vadd.f32 %v2180_v58, %v3098_v39 }
  0xd4   :  { %v422_v61 = vpop.f32.mrf.mxu1 }
  0xd5   :  { %v3135_v62 = vpop.f32.mrf.mxu0  ;;  %v3138_v63 = vadd.f32 %v3098_v39, %v422_v61 }
  0xd6   :  { %v2183_v0 = vpop.f32.mrf.mxu1 }
  0xd7   :  { %v3140_v1 = vpop.f32.mrf.mxu0  ;;  %v3143_v2 = vadd.f32 %v2183_v0, %v3098_v39 }
  0xd8   :  { %v435_v3 = vpop.f32.mrf.mxu1 }
  0xd9   :  { %v3145_v4 = vpop.f32.mrf.mxu0  ;;  %v3148_v5 = vadd.f32 %v3098_v39, %v435_v3 }
  0xda   :  { %v2184_v6 = vpop.f32.mrf.mxu1 }
  0xdb   :  { %v3150_v7 = vpop.f32.mrf.mxu0  ;;  %v3153_v8 = vadd.f32 %v2184_v6, %v3098_v39 }
  0xdc   :  { %v438_v9 = vpop.f32.mrf.mxu1 }
  0xdd   :  { %v3155_v10 = vpop.f32.mrf.mxu0  ;;  %v3158_v11 = vadd.f32 %v3098_v39, %v438_v9 }
  0xde   :  { %v2187_v12 = vpop.f32.mrf.mxu1 }
  0xdf   :  { %v3160_v13 = vpop.f32.mrf.mxu0  ;;  %v3163_v14 = vadd.f32 %v2187_v12, %v3098_v39 }
  0xe0   :  { %v451_v15 = vpop.f32.mrf.mxu1 }
  0xe1   :  { %3758 = vst [vmem:[#allocation2_spill] sm:$0xff] %v3163_v14  ;;  %v3165_v16 = vpop.f32.mrf.mxu0  ;;  %v3168_v17 = vadd.f32 %v3098_v39, %v451_v15 }
  0xe2   :  { %v2188_v18 = vpop.f32.mrf.mxu1 }
  0xe3   :  { %3759 = vst [vmem:[#allocation3_spill] sm:$0xff] %v3168_v17  ;;  %v3170_v19 = vpop.f32.mrf.mxu0  ;;  %v3173_v20 = vadd.f32 %v2188_v18, %v3098_v39 }
  0xe4   :  { %v454_v21 = vpop.f32.mrf.mxu1 }
  0xe5   :  { %3760 = vst [vmem:[#allocation4_spill] sm:$0xff] %v3173_v20  ;;  %v3175_v22 = vpop.f32.mrf.mxu0  ;;  %v3178_v23 = vadd.f32 %v3098_v39, %v454_v21 }
  0xe6   :  { %v2191_v24 = vpop.f32.mrf.mxu1 }
  0xe7   :  { %3761 = vst [vmem:[#allocation5_spill] sm:$0xff] %v3178_v23  ;;  %v3180_v25 = vpop.f32.mrf.mxu0  ;;  %v3183_v26 = vadd.f32 %v2191_v24, %v3098_v39 }
  0xe8   :  { %v467_v27 = vpop.f32.mrf.mxu1 }
  0xe9   :  { %3762 = vst [vmem:[#allocation6_spill] sm:$0xff] %v3183_v26  ;;  %v3185_v28 = vpop.f32.mrf.mxu0  ;;  %v3188_v29 = vadd.f32 %v3098_v39, %v467_v27 }
  0xea   :  { %v2192_v30 = vpop.f32.mrf.mxu1 }
  0xeb   :  { %3763 = vst [vmem:[#allocation7_spill] sm:$0xff] %v3188_v29  ;;  %v3190_v31 = vpop.f32.mrf.mxu0  ;;  %v3193_v32 = vadd.f32 %v2192_v30, %v3098_v39 }
  0xec   :  { %v470_v33 = vpop.f32.mrf.mxu1 }
  0xed   :  { %3764 = vst [vmem:[#allocation8_spill] sm:$0xff] %v3193_v32  ;;  %v3195_v34 = vpop.f32.mrf.mxu0  ;;  %v3198_v35 = vadd.f32 %v3098_v39, %v470_v33  ;;  %v279_v32 = vadd.f32 %v3098_v39, %v3115_v50  ;;  %v292_v50 = vadd.f32 %v3098_v39, %v3125_v56 }
  0xee   :  { %v2195_v36 = vpop.f32.mrf.mxu1 }
  0xef   :  { %3765 = vst [vmem:[#allocation9_spill] sm:$0xff] %v3198_v35  ;;  %v3200_v37 = vpop.f32.mrf.mxu0  ;;  %v3203_v38 = vadd.f32 %v2195_v36, %v3098_v39 }
  0xf0   :  { %v483_v40 = vpop.f32.mrf.mxu1 }
  0xf1   :  { %3766 = vst [vmem:[#allocation10_spill] sm:$0xff] %v3203_v38  ;;  %v3205_v43 = vpop.f32.mrf.mxu0  ;;  %v3208_v46 = vadd.f32 %v3098_v39, %v483_v40  ;;  %v287_v38 = vadd.f32 %v3110_v47, %v3098_v39 }
  0xf2   :  { %v2196_v49 = vpop.f32.mrf.mxu1 }
  0xf3   :  { %3767 = vst [vmem:[#allocation11_spill] sm:$0xff] %v3208_v46  ;;  %v3210_v52 = vpop.f32.mrf.mxu0  ;;  %v3213_v55 = vadd.f32 %v2196_v49, %v3098_v39 }
  0xf4   :  { %v486_v58 = vpop.f32.mrf.mxu1 }
  0xf5   :  { %3768 = vst [vmem:[#allocation12_spill] sm:$0xff] %v3213_v55  ;;  %v3215_v61 = vpop.f32.mrf.mxu0  ;;  %v3218_v0 = vadd.f32 %v3098_v39, %v486_v58 }
  0xf6   :  { %v2199_v3 = vpop.f32.mrf.mxu1 }
  0xf7   :  { %3769 = vst [vmem:[#allocation13_spill] sm:$0xff] %v3218_v0  ;;  %v3220_v6 = vpop.f32.mrf.mxu0  ;;  %v3223_v9 = vadd.f32 %v2199_v3, %v3098_v39  ;;  %v284_v0 = vadd.f32 %v3100_v41, %v3098_v39 }
  0xf8   :  { %v499_v12 = vpop.f32.mrf.mxu1 }
  0xf9   :  { %3770 = vst [vmem:[#allocation14_spill] sm:$0xff] %v3223_v9  ;;  %v3225_v15 = vpop.f32.mrf.mxu0  ;;  %v3228_v18 = vadd.f32 %v3098_v39, %v499_v12 }
  0xfa   :  { %v2200_v21 = vpop.f32.mrf.mxu1 }
  0xfb   :  { %3771 = vst [vmem:[#allocation15_spill] sm:$0xff] %v3228_v18  ;;  %v3230_v24 = vpop.f32.mrf.mxu0  ;;  %v3233_v27 = vadd.f32 %v2200_v21, %v3098_v39 }
  0xfc   :  { %v502_v30 = vpop.f32.mrf.mxu1 }
  0xfd   :  { %3772 = vst [vmem:[#allocation16_spill] sm:$0xff] %v3233_v27  ;;  %v3235_v33 = vpop.f32.mrf.mxu0  ;;  %v3238_v36 = vadd.f32 %v3098_v39, %v502_v30 }
  0xfe   :  { %v2203_v40 = vpop.f32.mrf.mxu1 }
  0xff   :  { %3773 = vst [vmem:[#allocation17_spill] sm:$0xff] %v3238_v36  ;;  %v3240_v49 = vpop.f32.mrf.mxu0  ;;  %v3243_v58 = vadd.f32 %v2203_v40, %v3098_v39 }
 0x100   :  { %v515_v3 = vpop.f32.mrf.mxu1 }
 0x101   :  { %3774 = vst [vmem:[#allocation18_spill] sm:$0xff] %v3243_v58  ;;  %v3245_v12 = vpop.f32.mrf.mxu0  ;;  %v3248_v18 = vadd.f32 %v3098_v39, %v515_v3  ;;  %v3265_v3 = vld [vmem:[%s3755_s6] ss:$0 sm:$0xff] }
 0x102   :  { %v2204_v21 = vpop.f32.mrf.mxu1 }
 0x103   :  { %3775 = vst [vmem:[#allocation19_spill] sm:$0xff] %v3248_v18  ;;  %v3250_v27 = vpop.f32.mrf.mxu0  ;;  %v3253_v9 = vadd.f32 %v2204_v21, %v3098_v39  ;;  %v276_v21 = vadd.f32 %v3098_v39, %v3105_v44  ;;  %v3278_v44 = vld [vmem:[%s3756_s8] ss:$0 sm:$0xff] }
 0x104   :  { %v518_v30 = vpop.f32.mrf.mxu1 }
 0x105   :  { %3776 = vst [vmem:[#allocation20_spill] sm:$0xff] %v3253_v9  ;;  %v3255_v36 = vpop.f32.mrf.mxu0  ;;  %v3260_v40 = vadd.f32 %v3098_v39, %v518_v30 }
 0x106   :  { %v2209_v58 = vpop.f32.mrf.mxu1 }
 0x107   :  { %3777 = vst [vmem:[#allocation21_spill] sm:$0xff] %v3260_v40  ;;  %v2281_v18 = vpop.f32.mrf.mxu0  ;;  %v1019_v9 = vadd.f32 %v2209_v58, %v284_v0 }
 0x108   :  { %v762_v55 = vpop.f32.mrf.mxu1 }
 0x109   :  { %v1475_v46 = vpop.f32.mrf.mxu0  ;;  %v1090_v41 = vadd.f32 %v3265_v3, %v1019_v9  ;;  %v1017_v30 = vadd.f32 %v762_v55, %v276_v21  ;;  %v300_v21 = vadd.f32 %v3120_v53, %v3098_v39 }
 0x10a   :  { %v2210_v40 = vpop.f32.mrf.mxu1 }
 0x10b   :  { %v2282_v35 = vpop.f32.mrf.mxu0  ;;  %v1154_v29 = vmax.f32 %v1090_v41, 0.0  ;;  %v1088_v26 = vadd.f32 %v3265_v3, %v1017_v30  ;;  %v1020_v23 = vadd.f32 %v2210_v40, %v287_v38 }
 0x10c   :  { %v765_v0 = vpop.f32.mrf.mxu1 }
 0x10d   :  { %v1478_v58 = vpop.f32.mrf.mxu0  ;;  %v1732_v47 = vadd.f32 %v2281_v18, %v1154_v29  ;;  %v1152_v20 = vmax.f32 %v1088_v26, 0.0  ;;  %v1091_v55 = vadd.f32 %v3265_v3, %v1020_v23  ;;  %v1018_v9 = vadd.f32 %v765_v0, %v279_v32 }
 0x10e   :  { %v2213_v41 = vpop.f32.mrf.mxu1  ;;  %v303_v26 = vadd.f32 %v3130_v59, %v3098_v39 }
 0x10f   :  { %v2285_v38 = vpop.f32.mrf.mxu0  ;;  %v1803_v40 = vadd.f32 %v3278_v44, %v1732_v47  ;;  %v1730_v30 = vadd.f32 %v1475_v46, %v1152_v20  ;;  %v1155_v17 = vmax.f32 %v1091_v55, 0.0  ;;  %v1089_v14 = vadd.f32 %v3265_v3, %v1018_v9 }
 0x110   :  { %v1023_v29 = vadd.f32 %v2213_v41, %v300_v21  ;;  %v778_v23 = vpop.f32.mrf.mxu1  ;;  %v295_v20 = vadd.f32 %v3098_v39, %v3135_v62 }
 0x111   :  { %v1491_v32 = vpop.f32.mrf.mxu0  ;;  %1867 = vst.msk [vmem:[%s3757_s9 + $0x10] sm:$0xff] %vm144_vm0, %v1803_v40  ;;  %v1801_v53 = vadd.f32 %v3278_v44, %v1730_v30  ;;  %v1733_v56 = vadd.f32 %v2282_v35, %v1155_v17  ;;  %v1153_v18 = vmax.f32 %v1089_v14, 0.0  ;;  %v1021_v0 = vadd.f32 %v778_v23, %v292_v50 }
 0x112   :  { %v1094_v46 = vadd.f32 %v3265_v3, %v1023_v29  ;;  %v2214_v47 = vpop.f32.mrf.mxu1  ;;  %v316_v14 = vadd.f32 %v3140_v1, %v3098_v39 }
 0x113   :  { %v2286_v59 = vpop.f32.mrf.mxu0  ;;  %1865 = vst.msk [vmem:[%s3757_s9] sm:$0xff] %vm144_vm0, %v1801_v53  ;;  %v1804_v55 = vadd.f32 %v3278_v44, %v1733_v56  ;;  %v1731_v9 = vadd.f32 %v1478_v58, %v1153_v18  ;;  %v1092_v21 = vadd.f32 %v3265_v3, %v1021_v0  ;;  %v1024_v17 = vadd.f32 %v2214_v47, %v303_v26 }
 0x114   :  { %v1158_v35 = vmax.f32 %v1094_v46, 0.0  ;;  %v781_v62 = vpop.f32.mrf.mxu1  ;;  %v308_v0 = vadd.f32 %v3098_v39, %v3145_v4  ;;  %v319_v46 = vadd.f32 %v3150_v7, %v3098_v39 }
 0x115   :  { %v1494_v50 = vpop.f32.mrf.mxu0  ;;  %1868 = vst.msk [vmem:[%s3757_s9 + $0x18] sm:$0xff] %vm144_vm0, %v1804_v55  ;;  %v1802_v41 = vadd.f32 %v3278_v44, %v1731_v9  ;;  %v1156_v40 = vmax.f32 %v1092_v21, 0.0  ;;  %v1095_v30 = vadd.f32 %v3265_v3, %v1024_v17  ;;  %v1022_v58 = vadd.f32 %v781_v62, %v295_v20 }
 0x116   :  { %v1736_v29 = vadd.f32 %v2285_v38, %v1158_v35  ;;  %v2217_v23 = vpop.f32.mrf.mxu1  ;;  %v311_v17 = vadd.f32 %v3098_v39, %v3155_v10  ;;  %v332_v10 = vadd.f32 %v3160_v13, %v3098_v39 }
 0x117   :  { %v2289_v26 = vpop.f32.mrf.mxu0  ;;  %1866 = vst.msk [vmem:[%s3757_s9 + $0x8] sm:$0xff] %vm144_vm0, %v1802_v41  ;;  %v1734_v1 = vadd.f32 %v1491_v32, %v1156_v40  ;;  %v1159_v53 = vmax.f32 %v1095_v30, 0.0  ;;  %v1093_v56 = vadd.f32 %v3265_v3, %v1022_v58  ;;  %v1027_v18 = vadd.f32 %v2217_v23, %v316_v14 }
 0x118   :  { %v1807_v38 = vadd.f32 %v3278_v44, %v1736_v29  ;;  %v794_v20 = vpop.f32.mrf.mxu1 }
 0x119   :  { %v1507_v47 = vpop.f32.mrf.mxu0  ;;  %v1805_v55 = vadd.f32 %v3278_v44, %v1734_v1  ;;  %v1737_v9 = vadd.f32 %v2286_v59, %v1159_v53  ;;  %v1157_v21 = vmax.f32 %v1093_v56, 0.0  ;;  %v1098_v32 = vadd.f32 %v3265_v3, %v1027_v18 }
 0x11a   :  { %1871 = vst.msk [vmem:[%s3757_s9 + $0x30] sm:$0xff] %vm144_vm0, %v1807_v38  ;;  %v1025_v4 = vadd.f32 %v794_v20, %v308_v0  ;;  %v2218_v7 = vpop.f32.mrf.mxu1  ;;  %v324_v53 = vadd.f32 %v3098_v39, %v3165_v16 }
 0x11b   :  { %v2290_v14 = vpop.f32.mrf.mxu0  ;;  %1869 = vst.msk [vmem:[%s3757_s9 + $0x20] sm:$0xff] %vm144_vm0, %v1805_v55  ;;  %v1808_v59 = vadd.f32 %v3278_v44, %v1737_v9  ;;  %v1735_v35 = vadd.f32 %v1494_v50, %v1157_v21  ;;  %v1162_v62 = vmax.f32 %v1098_v32, 0.0  ;;  %v1028_v41 = vadd.f32 %v2218_v7, %v319_v46 }
 0x11c   :  { %v1096_v40 = vadd.f32 %v3265_v3, %v1025_v4  ;;  %v797_v30 = vpop.f32.mrf.mxu1  ;;  %v335_v4 = vadd.f32 %v3170_v19, %v3098_v39  ;;  %v327_v7 = vadd.f32 %v3098_v39, %v3175_v22 }
 0x11d   :  { %v1510_v58 = vpop.f32.mrf.mxu0  ;;  %1872 = vst.msk [vmem:[%s3757_s9 + $0x38] sm:$0xff] %vm144_vm0, %v1808_v59  ;;  %v1806_v29 = vadd.f32 %v3278_v44, %v1735_v35  ;;  %v1740_v23 = vadd.f32 %v2289_v26, %v1162_v62  ;;  %v1099_v1 = vadd.f32 %v3265_v3, %v1028_v41  ;;  %v1026_v50 = vadd.f32 %v797_v30, %v311_v17 }
 0x11e   :  { %v1160_v56 = vmax.f32 %v1096_v40, 0.0  ;;  %v2221_v13 = vpop.f32.mrf.mxu1  ;;  %v348_v40 = vadd.f32 %v3180_v25, %v3098_v39  ;;  %v340_v25 = vadd.f32 %v3098_v39, %v3185_v28 }
 0x11f   :  { %v2293_v18 = vpop.f32.mrf.mxu0  ;;  %1870 = vst.msk [vmem:[%s3757_s9 + $0x28] sm:$0xff] %vm144_vm0, %v1806_v29  ;;  %v1811_v0 = vadd.f32 %v3278_v44, %v1740_v23  ;;  %v1163_v46 = vmax.f32 %v1099_v1, 0.0  ;;  %v1097_v38 = vadd.f32 %v3265_v3, %v1026_v50  ;;  %v1031_v26 = vadd.f32 %v2221_v13, %v332_v10 }
 0x120   :  { %v1738_v20 = vadd.f32 %v1507_v47, %v1160_v56  ;;  %v810_v55 = vpop.f32.mrf.mxu1 }
 0x121   :  { %v1523_v9 = vpop.f32.mrf.mxu0  ;;  %1875 = vst.msk [vmem:[%s3757_s9 + $0x50] sm:$0xff] %vm144_vm0, %v1811_v0  ;;  %v1741_v16 = vadd.f32 %v2290_v14, %v1163_v46  ;;  %v1161_v21 = vmax.f32 %v1097_v38, 0.0  ;;  %v1102_v32 = vadd.f32 %v3265_v3, %v1031_v26  ;;  %v1029_v17 = vadd.f32 %v810_v55, %v324_v53 }
 0x122   :  { %v1809_v47 = vadd.f32 %v3278_v44, %v1738_v20  ;;  %v2222_v59 = vpop.f32.mrf.mxu1  ;;  %v351_v38 = vadd.f32 %v3190_v31, %v3098_v39 }
 0x123   :  { %v2294_v35 = vpop.f32.mrf.mxu0  ;;  %v1812_v62 = vadd.f32 %v3278_v44, %v1741_v16  ;;  %v1739_v41 = vadd.f32 %v1510_v58, %v1161_v21  ;;  %v1166_v10 = vmax.f32 %v1102_v32, 0.0  ;;  %v1100_v14 = vadd.f32 %v3265_v3, %v1029_v17 }
 0x124   :  { %1873 = vst.msk [vmem:[%s3757_s9 + $0x40] sm:$0xff] %vm144_vm0, %v1809_v47  ;;  %v1032_v19 = vadd.f32 %v2222_v59, %v335_v4  ;;  %v813_v22 = vpop.f32.mrf.mxu1 }
 0x125   :  { %v1526_v30 = vpop.f32.mrf.mxu0  ;;  %1876 = vst.msk [vmem:[%s3757_s9 + $0x58] sm:$0xff] %vm144_vm0, %v1812_v62  ;;  %v1810_v58 = vadd.f32 %v3278_v44, %v1739_v41  ;;  %v1744_v29 = vadd.f32 %v2293_v18, %v1166_v10  ;;  %v1164_v23 = vmax.f32 %v1100_v14, 0.0  ;;  %v1030_v1 = vadd.f32 %v813_v22, %v327_v7 }
 0x126   :  { %v1103_v50 = vadd.f32 %v3265_v3, %v1032_v19  ;;  %v2225_v53 = vpop.f32.mrf.mxu1  ;;  %v343_v62 = vadd.f32 %v3098_v39, %v3195_v34  ;;  %v364_v41 = vadd.f32 %v3200_v37, %v3098_v39 }
 0x127   :  { %v2297_v56 = vpop.f32.mrf.mxu0  ;;  %1874 = vst.msk [vmem:[%s3757_s9 + $0x48] sm:$0xff] %vm144_vm0, %v1810_v58  ;;  %v1815_v13 = vadd.f32 %v3278_v44, %v1744_v29  ;;  %v1742_v0 = vadd.f32 %v1523_v9, %v1164_v23  ;;  %v1101_v46 = vadd.f32 %v3265_v3, %v1030_v1  ;;  %v1035_v18 = vadd.f32 %v2225_v53, %v348_v40 }
 0x128   :  { %v1167_v26 = vmax.f32 %v1103_v50, 0.0  ;;  %v826_v28 = vpop.f32.mrf.mxu1  ;;  %v356_v58 = vadd.f32 %v3098_v39, %v3205_v43  ;;  %v367_v43 = vadd.f32 %v3210_v52, %v3098_v39 }
 0x129   :  { %v1539_v20 = vpop.f32.mrf.mxu0  ;;  %1879 = vst.msk [vmem:[%s3757_s9 + $0x70] sm:$0xff] %vm144_vm0, %v1815_v13  ;;  %v1813_v55 = vadd.f32 %v3278_v44, %v1742_v0  ;;  %v1165_v16 = vmax.f32 %v1101_v46, 0.0  ;;  %v1106_v21 = vadd.f32 %v3265_v3, %v1035_v18  ;;  %v1033_v9 = vadd.f32 %v826_v28, %v340_v25 }
 0x12a   :  { %v1745_v32 = vadd.f32 %v2294_v35, %v1167_v26  ;;  %v2226_v17 = vpop.f32.mrf.mxu1  ;;  %v359_v26 = vadd.f32 %v3098_v39, %v3215_v61 }
 0x12b   :  { %v2298_v4 = vpop.f32.mrf.mxu0  ;;  %1877 = vst.msk [vmem:[%s3757_s9 + $0x60] sm:$0xff] %vm144_vm0, %v1813_v55  ;;  %v1743_v31 = vadd.f32 %v1526_v30, %v1165_v16  ;;  %v1170_v7 = vmax.f32 %v1106_v21, 0.0  ;;  %v1104_v47 = vadd.f32 %v3265_v3, %v1033_v9  ;;  %v1036_v59 = vadd.f32 %v2226_v17, %v351_v38 }
 0x12c   :  { %v1816_v35 = vadd.f32 %v3278_v44, %v1745_v32  ;;  %v829_v10 = vpop.f32.mrf.mxu1 }
 0x12d   :  { %v1542_v14 = vpop.f32.mrf.mxu0  ;;  %v1814_v40 = vadd.f32 %v3278_v44, %v1743_v31  ;;  %v1748_v19 = vadd.f32 %v2297_v56, %v1170_v7  ;;  %v1168_v22 = vmax.f32 %v1104_v47, 0.0  ;;  %v1107_v30 = vadd.f32 %v3265_v3, %v1036_v59 }
 0x12e   :  { %1880 = vst.msk [vmem:[%s3757_s9 + $0x78] sm:$0xff] %vm144_vm0, %v1816_v35  ;;  %v1034_v34 = vadd.f32 %v829_v10, %v343_v62  ;;  %v2229_v37 = vpop.f32.mrf.mxu1  ;;  %v380_v59 = vadd.f32 %v3220_v6, %v3098_v39  ;;  %v372_v62 = vadd.f32 %v3098_v39, %v3225_v15 }
 0x12f   :  { %v2301_v29 = vpop.f32.mrf.mxu0  ;;  %1878 = vst.msk [vmem:[%s3757_s9 + $0x68] sm:$0xff] %vm144_vm0, %v1814_v40  ;;  %v1819_v23 = vadd.f32 %v3278_v44, %v1748_v19  ;;  %v1746_v1 = vadd.f32 %v1539_v20, %v1168_v22  ;;  %v1171_v25 = vmax.f32 %v1107_v30, 0.0  ;;  %v1039_v50 = vadd.f32 %v2229_v37, %v364_v41 }
 0x130   :  { %v1105_v53 = vadd.f32 %v3265_v3, %v1034_v34  ;;  %v842_v56 = vpop.f32.mrf.mxu1  ;;  %v383_v30 = vadd.f32 %v3230_v24, %v3098_v39  ;;  %v375_v24 = vadd.f32 %v3098_v39, %v3235_v33 }
 0x131   :  { %v1555_v13 = vpop.f32.mrf.mxu0  ;;  %1883 = vst.msk [vmem:[%s3757_s9 + $0x90] sm:$0xff] %vm144_vm0, %v1819_v23  ;;  %v1817_v0 = vadd.f32 %v3278_v44, %v1746_v1  ;;  %v1749_v46 = vadd.f32 %v2298_v4, %v1171_v25  ;;  %v1110_v18 = vadd.f32 %v3265_v3, %v1039_v50  ;;  %v1037_v38 = vadd.f32 %v842_v56, %v356_v58 }
 0x132   :  { %v1169_v28 = vmax.f32 %v1105_v53, 0.0  ;;  %v2230_v52 = vpop.f32.mrf.mxu1 }
 0x133   :  { %v2302_v20 = vpop.f32.mrf.mxu0  ;;  %1881 = vst.msk [vmem:[%s3757_s9 + $0x80] sm:$0xff] %vm144_vm0, %v1817_v0  ;;  %v1820_v55 = vadd.f32 %v3278_v44, %v1749_v46  ;;  %v1174_v16 = vmax.f32 %v1110_v18, 0.0  ;;  %v1108_v21 = vadd.f32 %v3265_v3, %v1037_v38  ;;  %v1040_v9 = vadd.f32 %v2230_v52, %v367_v43 }
 0x134   :  { %v1747_v32 = vadd.f32 %v1542_v14, %v1169_v28  ;;  %v845_v17 = vpop.f32.mrf.mxu1  ;;  %v396_v0 = vadd.f32 %v3240_v49, %v3098_v39 }
 0x135   :  { %v1558_v4 = vpop.f32.mrf.mxu0  ;;  %1884 = vst.msk [vmem:[%s3757_s9 + $0x98] sm:$0xff] %vm144_vm0, %v1820_v55  ;;  %v1752_v61 = vadd.f32 %v2301_v29, %v1174_v16  ;;  %v1172_v31 = vmax.f32 %v1108_v21, 0.0  ;;  %v1111_v7 = vadd.f32 %v3265_v3, %v1040_v9  ;;  %v1038_v47 = vadd.f32 %v845_v17, %v359_v26 }
 0x136   :  { %v1818_v41 = vadd.f32 %v3278_v44, %v1747_v32  ;;  %v2233_v35 = vpop.f32.mrf.mxu1  ;;  %v388_v17 = vadd.f32 %v3098_v39, %v3245_v12 }
 0x137   :  { %v2305_v10 = vpop.f32.mrf.mxu0  ;;  %v1823_v14 = vadd.f32 %v3278_v44, %v1752_v61  ;;  %v1750_v40 = vadd.f32 %v1555_v13, %v1172_v31  ;;  %v1175_v19 = vmax.f32 %v1111_v7, 0.0  ;;  %v1109_v22 = vadd.f32 %v3265_v3, %v1038_v47 }
 0x138   :  { %1882 = vst.msk [vmem:[%s3757_s9 + $0x88] sm:$0xff] %vm144_vm0, %v1818_v41  ;;  %v1043_v6 = vadd.f32 %v2233_v35, %v380_v59  ;;  %v858_v15 = vpop.f32.mrf.mxu1  ;;  %v391_v35 = vadd.f32 %v3098_v39, %v3255_v36 }
 0x139   :  { %v1571_v58 = vpop.f32.mrf.mxu0  ;;  %1887 = vst.msk [vmem:[%s3757_s9 + $0xb0] sm:$0xff] %vm144_vm0, %v1823_v14  ;;  %v1821_v34 = vadd.f32 %v3278_v44, %v1750_v40  ;;  %v1753_v37 = vadd.f32 %v2302_v20, %v1175_v19  ;;  %v1173_v29 = vmax.f32 %v1109_v22, 0.0  ;;  %v1041_v23 = vadd.f32 %v858_v15, %v372_v62 }
 0x13a   :  { %v1114_v1 = vadd.f32 %v3265_v3, %v1043_v6  ;;  %v2234_v25 = vpop.f32.mrf.mxu1 }
 0x13b   :  { %v2306_v50 = vpop.f32.mrf.mxu0  ;;  %1885 = vst.msk [vmem:[%s3757_s9 + $0xa0] sm:$0xff] %vm144_vm0, %v1821_v34  ;;  %v1824_v43 = vadd.f32 %v3278_v44, %v1753_v37  ;;  %v1751_v53 = vadd.f32 %v1558_v4, %v1173_v29  ;;  %v1112_v56 = vadd.f32 %v3265_v3, %v1041_v23  ;;  %v1044_v13 = vadd.f32 %v2234_v25, %v383_v30 }
 0x13c   :  { %v1178_v46 = vmax.f32 %v1114_v1, 0.0  ;;  %v861_v33 = vpop.f32.mrf.mxu1  ;;  %v399_v4 = vadd.f32 %v3250_v27, %v3098_v39 }
 0x13d   :  { %v1574_v18 = vpop.f32.mrf.mxu0  ;;  %1888 = vst.msk [vmem:[%s3757_s9 + $0xb8] sm:$0xff] %vm144_vm0, %v1824_v43  ;;  %v1822_v38 = vadd.f32 %v3278_v44, %v1751_v53  ;;  %v1176_v26 = vmax.f32 %v1112_v56, 0.0  ;;  %v1115_v28 = vadd.f32 %v3265_v3, %v1044_v13  ;;  %v1042_v52 = vadd.f32 %v861_v33, %v375_v24 }
 0x13e   :  { %v1756_v20 = vadd.f32 %v2305_v10, %v1178_v46  ;;  %v2237_v55 = vpop.f32.mrf.mxu1 }
 0x13f   :  { %v2309_v16 = vpop.f32.mrf.mxu0  ;;  %1886 = vst.msk [vmem:[%s3757_s9 + $0xa8] sm:$0xff] %vm144_vm0, %v1822_v38  ;;  %v1754_v49 = vadd.f32 %v1571_v58, %v1176_v26  ;;  %v1179_v21 = vmax.f32 %v1115_v28, 0.0  ;;  %v1113_v9 = vadd.f32 %v3265_v3, %v1042_v52  ;;  %v1047_v32 = vadd.f32 %v2237_v55, %v396_v0 }
 0x140   :  { %v1827_v61 = vadd.f32 %v3278_v44, %v1756_v20  ;;  %v874_v31 = vpop.f32.mrf.mxu1 }
 0x141   :  { %v1587_v7 = vpop.f32.mrf.mxu0  ;;  %v1825_v47 = vadd.f32 %v3278_v44, %v1754_v49  ;;  %v1757_v59 = vadd.f32 %v2306_v50, %v1179_v21  ;;  %v1177_v62 = vmax.f32 %v1113_v9, 0.0  ;;  %v1118_v41 = vadd.f32 %v3265_v3, %v1047_v32 }
 0x142   :  { %1891 = vst.msk [vmem:[%s3757_s9 + $0xd0] sm:$0xff] %vm144_vm0, %v1827_v61  ;;  %v1045_v12 = vadd.f32 %v874_v31, %v388_v17  ;;  %v2238_v27 = vpop.f32.mrf.mxu1 }
 0x143   :  { %v2310_v10 = vpop.f32.mrf.mxu0  ;;  %1889 = vst.msk [vmem:[%s3757_s9 + $0xc0] sm:$0xff] %vm144_vm0, %v1825_v47  ;;  %v1828_v14 = vadd.f32 %v3278_v44, %v1757_v59  ;;  %v1755_v40 = vadd.f32 %v1574_v18, %v1177_v62  ;;  %v1182_v19 = vmax.f32 %v1118_v41, 0.0  ;;  %v1048_v22 = vadd.f32 %v2238_v27, %v399_v4 }
 0x144   :  { %v1116_v39 = vadd.f32 %v3265_v3, %v1045_v12  ;;  %v877_v36 = vpop.f32.mrf.mxu1 }
 0x145   :  { %v1590_v30 = vpop.f32.mrf.mxu0  ;;  %1892 = vst.msk [vmem:[%s3757_s9 + $0xd8] sm:$0xff] %vm144_vm0, %v1828_v14  ;;  %v1826_v6 = vadd.f32 %v3278_v44, %v1755_v40  ;;  %v1760_v15 = vadd.f32 %v2309_v16, %v1182_v19  ;;  %v1119_v58 = vadd.f32 %v3265_v3, %v1048_v22  ;;  %v1046_v34 = vadd.f32 %v877_v36, %v391_v35 }
 0x146   :  { %v1180_v37 = vmax.f32 %v1116_v39, 0.0  ;;  %v2241_v29 = vpop.f32.mrf.mxu1 }
 0x147   :  { %v2313_v23 = vpop.f32.mrf.mxu0  ;;  %1890 = vst.msk [vmem:[%s3757_s9 + $0xc8] sm:$0xff] %vm144_vm0, %v1826_v6  ;;  %v1831_v24 = vadd.f32 %v3278_v44, %v1760_v15  ;;  %v1183_v1 = vmax.f32 %v1119_v58, 0.0  ;;  %v1117_v25 = vadd.f32 %v3265_v3, %v1046_v34  ;;  %v1051_v50 = vadd.f32 %v2241_v29, %v3103_v42 }
 0x148   :  { %v1758_v43 = vadd.f32 %v1587_v7, %v1180_v37  ;;  %v890_v53 = vpop.f32.mrf.mxu1 }
 0x149   :  { %v1603_v56 = vpop.f32.mrf.mxu0  ;;  %1895 = vst.msk [vmem:[%s3757_s9 + $0xf0] sm:$0xff] %vm144_vm0, %v1831_v24  ;;  %v1761_v13 = vadd.f32 %v2310_v10, %v1183_v1  ;;  %v1181_v0 = vmax.f32 %v1117_v25, 0.0  ;;  %v1122_v46 = vadd.f32 %v3265_v3, %v1051_v50  ;;  %v1049_v33 = vadd.f32 %v890_v53, %v3108_v45 }
 0x14a   :  { %v1829_v18 = vadd.f32 %v3278_v44, %v1758_v43  ;;  %v2242_v38 = vpop.f32.mrf.mxu1 }
 0x14b   :  { %v2314_v26 = vpop.f32.mrf.mxu0  ;;  %v1832_v42 = vadd.f32 %v3278_v44, %v1761_v13  ;;  %v1759_v28 = vadd.f32 %v1590_v30, %v1181_v0  ;;  %v1186_v52 = vmax.f32 %v1122_v46, 0.0  ;;  %v1120_v20 = vadd.f32 %v3265_v3, %v1049_v33 }
 0x14c   :  { %1893 = vst.msk [vmem:[%s3757_s9 + $0xe0] sm:$0xff] %vm144_vm0, %v1829_v18  ;;  %v1052_v55 = vadd.f32 %v2242_v38, %v3113_v48  ;;  %v893_v16 = vpop.f32.mrf.mxu1 }
 0x14d   :  { %v1606_v49 = vpop.f32.mrf.mxu0  ;;  %1896 = vst.msk [vmem:[%s3757_s9 + $0xf8] sm:$0xff] %vm144_vm0, %v1832_v42  ;;  %v1830_v45 = vadd.f32 %v3278_v44, %v1759_v28  ;;  %v1764_v21 = vadd.f32 %v2313_v23, %v1186_v52  ;;  %v1184_v9 = vmax.f32 %v1120_v20, 0.0  ;;  %v1050_v32 = vadd.f32 %v893_v16, %v3118_v51 }
 0x14e   :  { %v1123_v17 = vadd.f32 %v3265_v3, %v1052_v55  ;;  %v2245_v4 = vpop.f32.mrf.mxu1 }
 0x14f   :  { %v2317_v61 = vpop.f32.mrf.mxu0  ;;  %1894 = vst.msk [vmem:[%s3757_s9 + $0xe8] sm:$0xff] %vm144_vm0, %v1830_v45  ;;  %v1835_v48 = vadd.f32 %v3278_v44, %v1764_v21  ;;  %v1762_v31 = vadd.f32 %v1603_v56, %v1184_v9  ;;  %v1121_v7 = vadd.f32 %v3265_v3, %v1050_v32  ;;  %v1055_v47 = vadd.f32 %v2245_v4, %v3123_v54 }
 0x150   :  { %v1187_v59 = vmax.f32 %v1123_v17, 0.0  ;;  %v906_v62 = vpop.f32.mrf.mxu1 }
 0x151   :  { %v1619_v41 = vpop.f32.mrf.mxu0  ;;  %1899 = vst.msk [vmem:[%s3757_s9 + $0x110] sm:$0xff] %vm144_vm0, %v1835_v48  ;;  %v1833_v51 = vadd.f32 %v3278_v44, %v1762_v31  ;;  %v1185_v35 = vmax.f32 %v1121_v7, 0.0  ;;  %v1126_v12 = vadd.f32 %v3265_v3, %v1055_v47  ;;  %v1053_v27 = vadd.f32 %v906_v62, %v3128_v57  ;;  %v3779_v62 = vld [vmem:[#allocation3_spill] sm:$0xff] }
 0x152   :  { %v1765_v10 = vadd.f32 %v2314_v26, %v1187_v59  ;;  %v2246_v14 = vpop.f32.mrf.mxu1 }
 0x153   :  { %v2318_v40 = vpop.f32.mrf.mxu0  ;;  %1897 = vst.msk [vmem:[%s3757_s9 + $0x100] sm:$0xff] %vm144_vm0, %v1833_v51  ;;  %v1763_v54 = vadd.f32 %v1606_v49, %v1185_v35  ;;  %v1190_v19 = vmax.f32 %v1126_v12, 0.0  ;;  %v1124_v22 = vadd.f32 %v3265_v3, %v1053_v27  ;;  %v1056_v39 = vadd.f32 %v2246_v14, %v3133_v60 }
 0x154   :  { %v1836_v36 = vadd.f32 %v3278_v44, %v1765_v10  ;;  %v909_v30 = vpop.f32.mrf.mxu1 }
 0x155   :  { %v1622_v6 = vpop.f32.mrf.mxu0  ;;  %v1834_v57 = vadd.f32 %v3278_v44, %v1763_v54  ;;  %v1768_v15 = vadd.f32 %v2317_v61, %v1190_v19  ;;  %v1188_v58 = vmax.f32 %v1124_v22, 0.0  ;;  %v1127_v34 = vadd.f32 %v3265_v3, %v1056_v39  ;;  %v3778_v61 = vld [vmem:[#allocation2_spill] sm:$0xff] }
 0x156   :  { %1900 = vst.msk [vmem:[%s3757_s9 + $0x118] sm:$0xff] %vm144_vm0, %v1836_v36  ;;  %v1054_v37 = vadd.f32 %v909_v30, %v3138_v63  ;;  %v2249_v29 = vpop.f32.mrf.mxu1 }
 0x157   :  { %v2321_v23 = vpop.f32.mrf.mxu0  ;;  %1898 = vst.msk [vmem:[%s3757_s9 + $0x108] sm:$0xff] %vm144_vm0, %v1834_v57  ;;  %v1839_v60 = vadd.f32 %v3278_v44, %v1768_v15  ;;  %v1766_v24 = vadd.f32 %v1619_v41, %v1188_v58  ;;  %v1191_v1 = vmax.f32 %v1127_v34, 0.0  ;;  %v1059_v25 = vadd.f32 %v2249_v29, %v3143_v2  ;;  %v3781_v57 = vld [vmem:[#allocation5_spill] sm:$0xff] }
 0x158   :  { %v1125_v50 = vadd.f32 %v3265_v3, %v1054_v37  ;;  %v922_v43 = vpop.f32.mrf.mxu1 }
 0x159   :  { %v1635_v53 = vpop.f32.mrf.mxu0  ;;  %1903 = vst.msk [vmem:[%s3757_s9 + $0x130] sm:$0xff] %vm144_vm0, %v1839_v60  ;;  %v1837_v63 = vadd.f32 %v3278_v44, %v1766_v24  ;;  %v1769_v56 = vadd.f32 %v2318_v40, %v1191_v1  ;;  %v1130_v13 = vadd.f32 %v3265_v3, %v1059_v25  ;;  %v1057_v0 = vadd.f32 %v922_v43, %v3148_v5  ;;  %v3780_v40 = vld [vmem:[#allocation4_spill] sm:$0xff]  ;;  %v3782_v24 = vld [vmem:[#allocation6_spill] sm:$0xff] }
 0x15a   :  { %v1189_v46 = vmax.f32 %v1125_v50, 0.0  ;;  %v2250_v33 = vpop.f32.mrf.mxu1 }
 0x15b   :  { %v2322_v18 = vpop.f32.mrf.mxu0  ;;  %1901 = vst.msk [vmem:[%s3757_s9 + $0x120] sm:$0xff] %vm144_vm0, %v1837_v63  ;;  %v1840_v2 = vadd.f32 %v3278_v44, %v1769_v56  ;;  %v1194_v38 = vmax.f32 %v1130_v13, 0.0  ;;  %v1128_v26 = vadd.f32 %v3265_v3, %v1057_v0  ;;  %v1060_v42 = vadd.f32 %v2250_v33, %v3153_v8  ;;  %v3783_v0 = vld [vmem:[#allocation7_spill] sm:$0xff] }
 0x15c   :  { %v1767_v28 = vadd.f32 %v1622_v6, %v1189_v46  ;;  %v925_v52 = vpop.f32.mrf.mxu1 }
 0x15d   :  { %v1638_v20 = vpop.f32.mrf.mxu0  ;;  %1904 = vst.msk [vmem:[%s3757_s9 + $0x138] sm:$0xff] %vm144_vm0, %v1840_v2  ;;  %v1772_v5 = vadd.f32 %v2321_v23, %v1194_v38  ;;  %v1192_v55 = vmax.f32 %v1128_v26, 0.0  ;;  %v1131_v16 = vadd.f32 %v3265_v3, %v1060_v42  ;;  %v1058_v49 = vadd.f32 %v925_v52, %v3158_v11  ;;  %v3784_v42 = vld [vmem:[#allocation8_spill] sm:$0xff] }
 0x15e   :  { %v1838_v45 = vadd.f32 %v3278_v44, %v1767_v28  ;;  %v2253_v21 = vpop.f32.mrf.mxu1 }
 0x15f   :  { %v2325_v9 = vpop.f32.mrf.mxu0  ;;  %v1843_v8 = vadd.f32 %v3278_v44, %v1772_v5  ;;  %v1770_v32 = vadd.f32 %v1635_v53, %v1192_v55  ;;  %v1195_v17 = vmax.f32 %v1131_v16, 0.0  ;;  %v1129_v4 = vadd.f32 %v3265_v3, %v1058_v49 }
 0x160   :  { %1902 = vst.msk [vmem:[%s3757_s9 + $0x128] sm:$0xff] %vm144_vm0, %v1838_v45  ;;  %v1063_v48 = vadd.f32 %v2253_v21, %v3778_v61  ;;  %v938_v31 = vpop.f32.mrf.mxu1  ;;  %v3785_v45 = vld [vmem:[#allocation9_spill] sm:$0xff] }
 0x161   :  { %v1651_v7 = vpop.f32.mrf.mxu0  ;;  %1907 = vst.msk [vmem:[%s3757_s9 + $0x150] sm:$0xff] %vm144_vm0, %v1843_v8  ;;  %v1841_v11 = vadd.f32 %v3278_v44, %v1770_v32  ;;  %v1773_v47 = vadd.f32 %v2322_v18, %v1195_v17  ;;  %v1193_v59 = vmax.f32 %v1129_v4, 0.0  ;;  %v1061_v41 = vadd.f32 %v938_v31, %v3779_v62 }
 0x162   :  { %v1134_v51 = vadd.f32 %v3265_v3, %v1063_v48  ;;  %v2254_v35 = vpop.f32.mrf.mxu1  ;;  %v3786_v48 = vld [vmem:[#allocation10_spill] sm:$0xff] }
 0x163   :  { %v2326_v12 = vpop.f32.mrf.mxu0  ;;  %1905 = vst.msk [vmem:[%s3757_s9 + $0x140] sm:$0xff] %vm144_vm0, %v1841_v11  ;;  %v1844_v27 = vadd.f32 %v3278_v44, %v1773_v47  ;;  %v1771_v10 = vadd.f32 %v1638_v20, %v1193_v59  ;;  %v1132_v14 = vadd.f32 %v3265_v3, %v1061_v41  ;;  %v1064_v54 = vadd.f32 %v2254_v35, %v3780_v40 }
 0x164   :  { %v1198_v19 = vmax.f32 %v1134_v51, 0.0  ;;  %v941_v22 = vpop.f32.mrf.mxu1  ;;  %v3787_v51 = vld [vmem:[#allocation11_spill] sm:$0xff] }
 0x165   :  { %v1654_v39 = vpop.f32.mrf.mxu0  ;;  %1908 = vst.msk [vmem:[%s3757_s9 + $0x158] sm:$0xff] %vm144_vm0, %v1844_v27  ;;  %v1842_v36 = vadd.f32 %v3278_v44, %v1771_v10  ;;  %v1196_v30 = vmax.f32 %v1132_v14, 0.0  ;;  %v1135_v6 = vadd.f32 %v3265_v3, %v1064_v54  ;;  %v1062_v15 = vadd.f32 %v941_v22, %v3781_v57  ;;  %v3788_v22 = vld [vmem:[#allocation12_spill] sm:$0xff] }
 0x166   :  { %v1776_v58 = vadd.f32 %v2325_v9, %v1198_v19  ;;  %v2257_v34 = vpop.f32.mrf.mxu1 }
 0x167   :  { %v2329_v37 = vpop.f32.mrf.mxu0  ;;  %1906 = vst.msk [vmem:[%s3757_s9 + $0x148] sm:$0xff] %vm144_vm0, %v1842_v36  ;;  %v1774_v29 = vadd.f32 %v1651_v7, %v1196_v30  ;;  %v1199_v23 = vmax.f32 %v1135_v6, 0.0  ;;  %v1133_v60 = vadd.f32 %v3265_v3, %v1062_v15  ;;  %v1067_v1 = vadd.f32 %v2257_v34, %v3782_v24 }
 0x168   :  { %v1847_v25 = vadd.f32 %v3278_v44, %v1776_v58  ;;  %v954_v50 = vpop.f32.mrf.mxu1  ;;  %v3789_v58 = vld [vmem:[#allocation13_spill] sm:$0xff] }
 0x169   :  { %v1667_v43 = vpop.f32.mrf.mxu0  ;;  %v1845_v53 = vadd.f32 %v3278_v44, %v1774_v29  ;;  %v1777_v63 = vadd.f32 %v2326_v12, %v1199_v23  ;;  %v1197_v56 = vmax.f32 %v1133_v60, 0.0  ;;  %v1138_v13 = vadd.f32 %v3265_v3, %v1067_v1 }
 0x16a   :  { %1911 = vst.msk [vmem:[%s3757_s9 + $0x170] sm:$0xff] %vm144_vm0, %v1847_v25  ;;  %v1065_v46 = vadd.f32 %v954_v50, %v3783_v0  ;;  %v2258_v33 = vpop.f32.mrf.mxu1  ;;  %v3790_v25 = vld [vmem:[#allocation14_spill] sm:$0xff] }
 0x16b   :  { %v2330_v18 = vpop.f32.mrf.mxu0  ;;  %1909 = vst.msk [vmem:[%s3757_s9 + $0x160] sm:$0xff] %vm144_vm0, %v1845_v53  ;;  %v1848_v2 = vadd.f32 %v3278_v44, %v1777_v63  ;;  %v1775_v38 = vadd.f32 %v1654_v39, %v1197_v56  ;;  %v1202_v26 = vmax.f32 %v1138_v13, 0.0  ;;  %v1068_v28 = vadd.f32 %v2258_v33, %v3784_v42 }
 0x16c   :  { %v1136_v52 = vadd.f32 %v3265_v3, %v1065_v46  ;;  %v957_v20 = vpop.f32.mrf.mxu1  ;;  %v3791_v46 = vld [vmem:[#allocation15_spill] sm:$0xff] }
 0x16d   :  { %v1670_v5 = vpop.f32.mrf.mxu0  ;;  %1912 = vst.msk [vmem:[%s3757_s9 + $0x178] sm:$0xff] %vm144_vm0, %v1848_v2  ;;  %v1846_v55 = vadd.f32 %v3278_v44, %v1775_v38  ;;  %v1780_v16 = vadd.f32 %v2329_v37, %v1202_v26  ;;  %v1139_v49 = vadd.f32 %v3265_v3, %v1068_v28  ;;  %v1066_v21 = vadd.f32 %v957_v20, %v3785_v45 }
 0x16e   :  { %v1200_v9 = vmax.f32 %v1136_v52, 0.0  ;;  %v2261_v8 = vpop.f32.mrf.mxu1  ;;  %v3792_v52 = vld [vmem:[#allocation16_spill] sm:$0xff] }
 0x16f   :  { %v2333_v32 = vpop.f32.mrf.mxu0  ;;  %1910 = vst.msk [vmem:[%s3757_s9 + $0x168] sm:$0xff] %vm144_vm0, %v1846_v55  ;;  %v1851_v17 = vadd.f32 %v3278_v44, %v1780_v16  ;;  %v1203_v4 = vmax.f32 %v1139_v49, 0.0  ;;  %v1137_v61 = vadd.f32 %v3265_v3, %v1066_v21  ;;  %v1071_v31 = vadd.f32 %v2261_v8, %v3786_v48  ;;  %v3793_v8 = vld [vmem:[#allocation17_spill] sm:$0xff] }
 0x170   :  { %v1778_v7 = vadd.f32 %v1667_v43, %v1200_v9  ;;  %v970_v11 = vpop.f32.mrf.mxu1 }
 0x171   :  { %v1683_v47 = vpop.f32.mrf.mxu0  ;;  %1915 = vst.msk [vmem:[%s3757_s9 + $0x190] sm:$0xff] %vm144_vm0, %v1851_v17  ;;  %v1781_v59 = vadd.f32 %v2330_v18, %v1203_v4  ;;  %v1201_v62 = vmax.f32 %v1137_v61, 0.0  ;;  %v1142_v41 = vadd.f32 %v3265_v3, %v1071_v31  ;;  %v1069_v35 = vadd.f32 %v970_v11, %v3787_v51 }
 0x172   :  { %v1849_v12 = vadd.f32 %v3278_v44, %v1778_v7  ;;  %v2262_v27 = vpop.f32.mrf.mxu1  ;;  %v3794_v7 = vld [vmem:[#allocation18_spill] sm:$0xff] }
 0x173   :  { %v2334_v10 = vpop.f32.mrf.mxu0  ;;  %v1852_v14 = vadd.f32 %v3278_v44, %v1781_v59  ;;  %v1779_v40 = vadd.f32 %v1670_v5, %v1201_v62  ;;  %v1206_v54 = vmax.f32 %v1142_v41, 0.0  ;;  %v1140_v19 = vadd.f32 %v3265_v3, %v1069_v35  ;;  %v3795_v35 = vld [vmem:[#allocation19_spill] sm:$0xff] }
 0x174   :  { %1913 = vst.msk [vmem:[%s3757_s9 + $0x180] sm:$0xff] %vm144_vm0, %v1849_v12  ;;  %v1072_v39 = vadd.f32 %v2262_v27, %v3788_v22  ;;  %v973_v36 = vpop.f32.mrf.mxu1 }
 0x175   :  { %v1686_v30 = vpop.f32.mrf.mxu0  ;;  %1916 = vst.msk [vmem:[%s3757_s9 + $0x198] sm:$0xff] %vm144_vm0, %v1852_v14  ;;  %v1850_v6 = vadd.f32 %v3278_v44, %v1779_v40  ;;  %v1784_v57 = vadd.f32 %v2333_v32, %v1206_v54  ;;  %v1204_v15 = vmax.f32 %v1140_v19, 0.0  ;;  %v1070_v34 = vadd.f32 %v973_v36, %v3789_v58  ;;  %v2351_v19 = vld [vmem:[%s3755_s6] ss:$0 sm:$0xff]  ;;  %v3797_v58 = vld [vmem:[#allocation21_spill] sm:$0xff] }
 0x176   :  { %v1143_v37 = vadd.f32 %v3265_v3, %v1072_v39  ;;  %v2265_v29 = vpop.f32.mrf.mxu1  ;;  %v3796_v39 = vld [vmem:[#allocation20_spill] sm:$0xff] }
 0x177   :  { %v2337_v23 = vpop.f32.mrf.mxu0  ;;  %1914 = vst.msk [vmem:[%s3757_s9 + $0x188] sm:$0xff] %vm144_vm0, %v1850_v6  ;;  %v1855_v60 = vadd.f32 %v3278_v44, %v1784_v57  ;;  %v1782_v24 = vadd.f32 %v1683_v47, %v1204_v15  ;;  %v1141_v1 = vadd.f32 %v3265_v3, %v1070_v34  ;;  %v1075_v50 = vadd.f32 %v2265_v29, %v3790_v25  ;;  %v2352_v34 = vld [vmem:[%s3756_s8] ss:$0 sm:$0xff] }
 0x178   :  { %v1207_v43 = vmax.f32 %v1143_v37, 0.0  ;;  %v986_v53 = vpop.f32.mrf.mxu1 }
 0x179   :  { %v1699_v63 = vpop.f32.mrf.mxu0  ;;  %1919 = vst.msk [vmem:[%s3757_s9 + $0x1b0] sm:$0xff] %vm144_vm0, %v1855_v60  ;;  %v1853_v56 = vadd.f32 %v3278_v44, %v1782_v24  ;;  %v1205_v13 = vmax.f32 %v1141_v1, 0.0  ;;  %v1146_v0 = vadd.f32 %v3265_v3, %v1075_v50  ;;  %v1073_v33 = vadd.f32 %v986_v53, %v3791_v46 }
 0x17a   :  { %v1785_v18 = vadd.f32 %v2334_v10, %v1207_v43  ;;  %v2266_v2 = vpop.f32.mrf.mxu1 }
 0x17b   :  { %v2338_v38 = vpop.f32.mrf.mxu0  ;;  %1917 = vst.msk [vmem:[%s3757_s9 + $0x1a0] sm:$0xff] %vm144_vm0, %v1853_v56  ;;  %v1783_v26 = vadd.f32 %v1686_v30, %v1205_v13  ;;  %v1210_v42 = vmax.f32 %v1146_v0, 0.0  ;;  %v1144_v28 = vadd.f32 %v3265_v3, %v1073_v33  ;;  %v1076_v20 = vadd.f32 %v2266_v2, %v3792_v52 }
 0x17c   :  { %v1856_v5 = vadd.f32 %v3278_v44, %v1785_v18  ;;  %v989_v55 = vpop.f32.mrf.mxu1 }
 0x17d   :  { %v1702_v16 = vpop.f32.mrf.mxu0  ;;  %v1854_v49 = vadd.f32 %v3278_v44, %v1783_v26  ;;  %v1788_v45 = vadd.f32 %v2337_v23, %v1210_v42  ;;  %v1208_v21 = vmax.f32 %v1144_v28, 0.0  ;;  %v1147_v9 = vadd.f32 %v3265_v3, %v1076_v20 }
 0x17e   :  { %1920 = vst.msk [vmem:[%s3757_s9 + $0x1b8] sm:$0xff] %vm144_vm0, %v1856_v5  ;;  %v1074_v32 = vadd.f32 %v989_v55, %v3793_v8  ;;  %v2269_v17 = vpop.f32.mrf.mxu1 }
 0x17f   :  { %v2341_v4 = vpop.f32.mrf.mxu0  ;;  %1918 = vst.msk [vmem:[%s3757_s9 + $0x1a8] sm:$0xff] %vm144_vm0, %v1854_v49  ;;  %v1859_v61 = vadd.f32 %v3278_v44, %v1788_v45  ;;  %v1786_v48 = vadd.f32 %v1699_v63, %v1208_v21  ;;  %v1211_v31 = vmax.f32 %v1147_v9, 0.0  ;;  %v1079_v11 = vadd.f32 %v2269_v17, %v3794_v7 }
 0x180   :  { %v1145_v47 = vadd.f32 %v3265_v3, %v1074_v32  ;;  %v1002_v59 = vpop.f32.mrf.mxu1 }
 0x181   :  { %1923 = vst.msk [vmem:[%s3757_s9 + $0x1d0] sm:$0xff] %vm144_vm0, %v1859_v61  ;;  %v1857_v62 = vadd.f32 %v3278_v44, %v1786_v48  ;;  %v1789_v41 = vadd.f32 %v2338_v38, %v1211_v31  ;;  %v1150_v51 = vadd.f32 %v3265_v3, %v1079_v11  ;;  %v1077_v12 = vadd.f32 %v1002_v59, %v3795_v35  ;;  %v1715_v10 = vpop.f32.mrf.mxu0 }
 0x182   :  { %v1209_v27 = vmax.f32 %v1145_v47, 0.0  ;;  %v2270_v14 = vpop.f32.mrf.mxu1 }
 0x183   :  { %1921 = vst.msk [vmem:[%s3757_s9 + $0x1c0] sm:$0xff] %vm144_vm0, %v1857_v62  ;;  %v1860_v40 = vadd.f32 %v3278_v44, %v1789_v41  ;;  %v1214_v54 = vmax.f32 %v1150_v51, 0.0  ;;  %v1148_v22 = vadd.f32 %v2351_v19, %v1077_v12  ;;  %v1080_v3 = vadd.f32 %v2270_v14, %v3796_v39  ;;  %v2342_v29 = vpop.f32.mrf.mxu0 }
 0x184   :  { %v1787_v36 = vadd.f32 %v1702_v16, %v1209_v27  ;;  %v1005_v30 = vpop.f32.mrf.mxu1 }
 0x185   :  { %1924 = vst.msk [vmem:[%s3757_s9 + $0x1d8] sm:$0xff] %vm144_vm0, %v1860_v40  ;;  %v1792_v6 = vadd.f32 %v2341_v4, %v1214_v54  ;;  %v1212_v57 = vmax.f32 %v1148_v22, 0.0  ;;  %v1151_v15 = vadd.f32 %v2351_v19, %v1080_v3  ;;  %v1078_v44 = vadd.f32 %v1005_v30, %v3797_v58  ;;  %v1718_v53 = vpop.f32.mrf.mxu0 }
 0x186   :  { %v1858_v37 = vadd.f32 %v2352_v34, %v1787_v36 }
 0x187   :  { %v1863_v23 = vadd.f32 %v2352_v34, %v1792_v6  ;;  %v1790_v60 = vadd.f32 %v1715_v10, %v1212_v57  ;;  %v1215_v24 = vmax.f32 %v1151_v15, 0.0  ;;  %v1149_v1 = vadd.f32 %v2351_v19, %v1078_v44 }
 0x188   :  { %1922 = vst.msk [vmem:[%s3757_s9 + $0x1c8] sm:$0xff] %vm144_vm0, %v1858_v37 }
 0x189   :  { %1927 = vst.msk [vmem:[%s3757_s9 + $0x1f0] sm:$0xff] %vm144_vm0, %v1863_v23  ;;  %v1861_v25 = vadd.f32 %v2352_v34, %v1790_v60  ;;  %v1793_v50 = vadd.f32 %v2342_v29, %v1215_v24  ;;  %v1213_v43 = vmax.f32 %v1149_v1, 0.0 }
 0x18b   :  { %1925 = vst.msk [vmem:[%s3757_s9 + $0x1e0] sm:$0xff] %vm144_vm0, %v1861_v25  ;;  %v1864_v63 = vadd.f32 %v2352_v34, %v1793_v50  ;;  %v1791_v56 = vadd.f32 %v1718_v53, %v1213_v43 }
 0x18d   :  { %1928 = vst.msk [vmem:[%s3757_s9 + $0x1f8] sm:$0xff] %vm144_vm0, %v1864_v63  ;;  %v1862_v13 = vadd.f32 %v2352_v34, %v1791_v56 }
 0x18f   :  { %1926 = vst.msk [vmem:[%s3757_s9 + $0x1e8] sm:$0xff] %vm144_vm0, %v1862_v13 }

// kernel: conv_trans_block_fwd.15
= control target key start
LH: loop header
LB: loop body
LE: loop exit
PB: predicated region body
PF: predicated region fallthrough
CT: control target
= control target key end

     0   :  { %vm42_vm0 = vcmask 130048   ;;  %vm100_vm1 = vcmask 261120   ;;  %s312_s1 = inlined_call_operand.vmem [shape: bf16[16,32], index: 1, kind: input, shape index: {}]   ;;  %s313_s0 = inlined_call_operand.vmem [shape: f32[32,16], index: 0, kind: input, shape index: {}]   ;;  %s314_s2 = inlined_call_operand.vmem [shape: f32[1,32], index: 2, kind: input, shape index: {}]   ;;  %s315_s3 = inlined_call_operand.vmem [shape: f32[1,32], index: 3, kind: input, shape index: {}]   ;;  %s316_s4 = inlined_call_operand.vmem [shape: f32[1,32], index: 4, kind: input, shape index: {}]   ;;  %s317_s5 = inlined_call_operand.vmem [shape: f32[32,32], index: 5, kind: output, shape index: {}]  }
   0x1   :  { %v217_v0 = vld [vmem:[%s312_s1] sm:$0xff]   ;;  %v22_v2 = vld [vmem:[%s313_s0 + $0x8] sm:$0xff]  ;;  %v23_v3 = vld [vmem:[%s313_s0 + $0x10] sm:$0xff] }
   0x2   :  { %v21_v1 = vld [vmem:[%s313_s0] sm:$0xff]  ;;  %211 = vmatprep.subr.bf16.mxu0 %v217_v0  ;;  %v24_v5 = vld [vmem:[%s313_s0 + $0x18] sm:$0xff] }
   0x3   :  { %v25_v4 = vpack.c.bf16 %v22_v2, %v21_v1  ;;  %212 = vmatpush3.bf16.msra.mxu0 %v217_v0  ;;  %v26_v6 = vpack.c.bf16 %v24_v5, %v23_v3  ;;  %v202_v7 = vld [vmem:[%s314_s2] ss:$0 sm:$0xff] }
   0x4   :  { %v206_v53 = vld [vmem:[%s315_s3] ss:$0 sm:$0xff] }
   0x5   :  { %213 = vmatprep.mubr.msk.bf16.mxu0 %vm42_vm0, %v25_v4  ;;  %v207_v55 = vld [vmem:[%s316_s4] ss:$0 sm:$0xff] }
   0x6   :  { %214 = vmatmul.mubr.msk.bf16.vlgmr.msra.gmra.mxu0 %vm42_vm0, %v26_v6 }
  0xc6   :  { %v215_v8 = vpop.f32.mrf.mxu0 }
  0xc7   :  { %v92_v9 = vadd.f32 %v215_v8, %v202_v7 }
  0xc8   :  { %v83_v10 = vpop.f32.mrf.mxu0 }
  0xc9   :  { %v84_v11 = vadd.f32 %v202_v7, %v83_v10  ;;  %v107_v12 = vsel %vm100_vm1, %v92_v9, 0.0 }
  0xca   :  { %108 = vadd.xlane.f32.xlu1 %v107_v12  ;;  %v216_v13 = vpop.f32.mrf.mxu0 }
  0xcb   :  { %v95_v14 = vadd.f32 %v216_v13, %v202_v7  ;;  %v101_v15 = vsel %vm100_vm1, %v84_v11, 0.0 }
  0xcc   :  { %v86_v16 = vpop.f32.mrf.mxu0  ;;  %102 = vadd.xlane.f32.xlu0 %v101_v15 }
  0xcd   :  { %v87_v17 = vadd.f32 %v202_v7, %v86_v16  ;;  %v110_v18 = vsel %vm100_vm1, %v95_v14, 0.0 }
  0xce   :  { %111 = vadd.xlane.f32.xlu1 %v110_v18 }
  0xcf   :  { %v104_v19 = vsel %vm100_vm1, %v87_v17, 0.0 }
  0xd0   :  { %105 = vadd.xlane.f32.xlu0 %v104_v19 }
 0x153   :  { %v109_v20 = vpop.xlane.xlu1 %108 }
 0x154   :  { %v116_v21 = vmul.f32 0.03125, %v109_v20 }
 0x155   :  { %v103_v22 = vpop.xlane.xlu0 %102 }
 0x156   :  { %v114_v23 = vmul.f32 0.03125, %v103_v22  ;;  %v120_v25 = vsub.f32 %v92_v9, %v116_v21 }
 0x157   :  { %v112_v24 = vpop.xlane.xlu1 %111 }
 0x158   :  { %v118_v26 = vsub.f32 %v84_v11, %v114_v23  ;;  %v117_v27 = vmul.f32 0.03125, %v112_v24  ;;  %v124_v34 = vmul.f32 %v120_v25, %v120_v25 }
 0x159   :  { %v106_v28 = vpop.xlane.xlu0 %105 }
 0x15a   :  { %v115_v29 = vmul.f32 0.03125, %v106_v28  ;;  %v122_v30 = vmul.f32 %v118_v26, %v118_v26  ;;  %v121_v31 = vsub.f32 %v95_v14, %v117_v27  ;;  %v132_v36 = vsel %vm100_vm1, %v124_v34, 0.0 }
 0x15c   :  { %v119_v32 = vsub.f32 %v87_v17, %v115_v29  ;;  %v126_v33 = vsel %vm100_vm1, %v122_v30, 0.0  ;;  %v125_v38 = vmul.f32 %v121_v31, %v121_v31 }
 0x15d   :  { %127 = vadd.xlane.f32.xlu0 %v126_v33 }
 0x15e   :  { %v123_v35 = vmul.f32 %v119_v32, %v119_v32  ;;  %v135_v39 = vsel %vm100_vm1, %v125_v38, 0.0 }
 0x160   :  { %v129_v37 = vsel %vm100_vm1, %v123_v35, 0.0 }
 0x161   :  { %133 = vadd.xlane.f32.xlu0 %v132_v36  ;;  %130 = vadd.xlane.f32.xlu1 %v129_v37 }
 0x165   :  { %136 = vadd.xlane.f32.xlu1 %v135_v39 }
 0x1e6   :  { %v128_v40 = vpop.xlane.xlu0 %127 }
 0x1e7   :  { %v138_v41 = vmul.f32 0.03125, %v128_v40 }
 0x1e9   :  { %v142_v42 = vadd.f32 1e-06, %v138_v41 }
 0x1ea   :  { %v131_v43 = vpop.xlane.xlu1 %130  ;;  %v134_v44 = vpop.xlane.xlu0 %133 }
 0x1eb   :  { %218 = vrsqrt.f32 %v142_v42  ;;  %v139_v45 = vmul.f32 0.03125, %v131_v43  ;;  %v140_v46 = vmul.f32 0.03125, %v134_v44 }
 0x1ed   :  { %v143_v47 = vadd.f32 1e-06, %v139_v45  ;;  %v144_v48 = vadd.f32 1e-06, %v140_v46 }
 0x1ee   :  { %v137_v49 = vpop.xlane.xlu1 %136 }
 0x1ef   :  { %220 = vrsqrt.f32 %v143_v47  ;;  %v141_v50 = vmul.f32 0.03125, %v137_v49 }
 0x1f0   :  { %222 = vrsqrt.f32 %v144_v48 }
 0x1f1   :  { %v145_v51 = vadd.f32 1e-06, %v141_v50 }
 0x1f3   :  { %224 = vrsqrt.f32 %v145_v51 }
 0x1f8   :  { %v219_v52 = vpop.eup %218 }
 0x1f9   :  { %v150_v54 = vmul.f32 %v219_v52, %v118_v26 }
 0x1fb   :  { %v160_v56 = vmul.f32 %v206_v53, %v150_v54 }
 0x1fc   :  { %v221_v57 = vpop.eup %220 }
 0x1fd   :  { %v223_v58 = vpop.eup %222  ;;  %v170_v59 = vadd.f32 %v207_v55, %v160_v56  ;;  %v151_v60 = vmul.f32 %v221_v57, %v119_v32 }
 0x1fe   :  { %v152_v61 = vmul.f32 %v223_v58, %v120_v25 }
 0x1ff   :  { %v178_v62 = vmul.f32 0.70710677, %v170_v59  ;;  %v161_v63 = vmul.f32 %v206_v53, %v151_v60  ;;  %v174_v11 = vmul.f32 0.5, %v170_v59 }
 0x200   :  { %v225_v0 = vpop.eup %224  ;;  %v162_v1 = vmul.f32 %v206_v53, %v152_v61 }
 0x201   :  { %226 = verf.f32 %v178_v62  ;;  %v171_v2 = vadd.f32 %v207_v55, %v161_v63  ;;  %v153_v3 = vmul.f32 %v225_v0, %v121_v31 }
 0x202   :  { %v172_v4 = vadd.f32 %v207_v55, %v162_v1 }
 0x203   :  { %v179_v5 = vmul.f32 0.70710677, %v171_v2  ;;  %v163_v6 = vmul.f32 %v206_v53, %v153_v3  ;;  %v175_v16 = vmul.f32 0.5, %v171_v2 }
 0x204   :  { %v180_v7 = vmul.f32 0.70710677, %v172_v4  ;;  %v176_v18 = vmul.f32 0.5, %v172_v4 }
 0x205   :  { %228 = verf.f32 %v179_v5  ;;  %v173_v8 = vadd.f32 %v207_v55, %v163_v6 }
 0x206   :  { %230 = verf.f32 %v180_v7 }
 0x207   :  { %v181_v9 = vmul.f32 0.70710677, %v173_v8  ;;  %v177_v23 = vmul.f32 0.5, %v173_v8 }
 0x209   :  { %232 = verf.f32 %v181_v9 }
 0x20e   :  { %v227_v10 = vpop.eup %226 }
 0x20f   :  { %v186_v12 = vadd.f32 1.0, %v227_v10 }
 0x211   :  { %v190_v13 = vmul.f32 %v186_v12, %v174_v11 }
 0x212   :  { %v229_v14 = vpop.eup %228 }
 0x213   :  { %v231_v15 = vpop.eup %230  ;;  %194 = vst.msk [vmem:[%s317_s5] sm:$0xff] %vm100_vm1, %v190_v13  ;;  %v187_v17 = vadd.f32 1.0, %v229_v14 }
 0x214   :  { %v188_v19 = vadd.f32 1.0, %v231_v15 }
 0x215   :  { %v191_v20 = vmul.f32 %v187_v17, %v175_v16 }
 0x216   :  { %v233_v21 = vpop.eup %232  ;;  %v192_v22 = vmul.f32 %v188_v19, %v176_v18 }
 0x217   :  { %195 = vst.msk [vmem:[%s317_s5 + $0x8] sm:$0xff] %vm100_vm1, %v191_v20  ;;  %v189_v24 = vadd.f32 1.0, %v233_v21 }
 0x218   :  { %196 = vst.msk [vmem:[%s317_s5 + $0x10] sm:$0xff] %vm100_vm1, %v192_v22 }
 0x219   :  { %v193_v25 = vmul.f32 %v189_v24, %v177_v23 }
 0x21b   :  { %197 = vst.msk [vmem:[%s317_s5 + $0x18] sm:$0xff] %vm100_vm1, %v193_v25 }

// kernel: conv_trans_block_fwd.17
= control target key start
LH: loop header
LB: loop body
LE: loop exit
PB: predicated region body
PF: predicated region fallthrough
CT: control target
= control target key end

     0   :  { %vm47_vm0 = vcmask 261120   ;;  %vm176_vm1 = vcmask 130048   ;;  %s296_s2 = inlined_call_operand.vmem [shape: bf16[32,16], index: 2, kind: input, shape index: {}]   ;;  %s297_s0 = inlined_call_operand.vmem [shape: f32[32,32], index: 0, kind: input, shape index: {}]   ;;  %s298_s1 = inlined_call_operand.vmem [shape: f32[32,32], index: 1, kind: input, shape index: {}]   ;;  %s299_s3 = inlined_call_operand.vmem [shape: f32[1,16], index: 3, kind: input, shape index: {}]   ;;  %s300_s4 = inlined_call_operand.vmem [shape: f32[32,16], index: 4, kind: output, shape index: {}]  }
   0x1   :  { %v216_v0 = vld [vmem:[%s296_s2 + $0x8] sm:$0xff]   ;;  %v217_v1 = vld [vmem:[%s296_s2] sm:$0xff]   ;;  %v25_v7 = vld [vmem:[%s297_s0 + $0x10] sm:$0xff] }
   0x2   :  { %200 = vmatprep.subr.bf16.mxu0 %v216_v0  ;;  %208 = vmatprep.subr.bf16.mxu1 %v216_v0  ;;  %v23_v2 = vld [vmem:[%s297_s0] sm:$0xff]  ;;  %v24_v3 = vld [vmem:[%s297_s0 + $0x8] sm:$0xff]  ;;  %v26_v8 = vld [vmem:[%s297_s0 + $0x18] sm:$0xff] }
   0x3   :  { %v103_v4 = vld [vmem:[%s298_s1] sm:$0xff]  ;;  %201 = vmatpush3.bf16.msra.mxu0 %v216_v0  ;;  %209 = vmatpush3.bf16.msra.mxu1 %v216_v0  ;;  %v27_v5 = vpack.c.bf16 %v24_v3, %v23_v2  ;;  %v104_v6 = vld [vmem:[%s298_s1 + $0x8] sm:$0xff]  ;;  %v105_v10 = vld [vmem:[%s298_s1 + $0x10] sm:$0xff]  ;;  %v28_v12 = vpack.c.bf16 %v26_v8, %v25_v7 }
   0x4   :  { %202 = vmatprep.subr.bf16.mxu0 %v217_v1  ;;  %210 = vmatprep.subr.bf16.mxu1 %v217_v1  ;;  %v107_v9 = vpack.c.bf16 %v104_v6, %v103_v4  ;;  %v106_v11 = vld [vmem:[%s298_s1 + $0x18] sm:$0xff]  ;;  %v185_v14 = vld [vmem:[%s299_s3] ss:$0 sm:$0xff] }
   0x5   :  { %204 = vmatprep.mubr.msk.bf16.mxu0 %vm47_vm0, %v27_v5  ;;  %v108_v13 = vpack.c.bf16 %v106_v11, %v105_v10 }
   0x6   :  { %212 = vmatprep.mubr.msk.bf16.mxu1 %vm47_vm0, %v107_v9 }
   0x7   :  { %203 = vmatpush3.bf16.msra.mxu0 %v217_v1  ;;  %211 = vmatpush3.bf16.msra.mxu1 %v217_v1 }
   0xa   :  { %205 = vmatmul.mubr.msk.bf16.vlgmr.msra.gmra.mxu0 %vm47_vm0, %v28_v12  ;;  %213 = vmatmul.mubr.msk.bf16.vlgmr.msra.gmra.mxu1 %vm47_vm0, %v108_v13 }
  0xca   :  { %v206_v15 = vpop.f32.mrf.mxu0  ;;  %v214_v16 = vpop.f32.mrf.mxu1 }
  0xcb   :  { %v97_v17 = vadd.f32 %v206_v15, %v185_v14  ;;  %v158_v18 = vadd.f32 %v214_v16, %v185_v14 }
  0xcc   :  { %v88_v19 = vpop.f32.mrf.mxu0  ;;  %v149_v20 = vpop.f32.mrf.mxu1 }
  0xcd   :  { %v166_v21 = vmax.f32 %v97_v17, 0.0  ;;  %v170_v22 = vmax.f32 %v158_v18, 0.0  ;;  %v89_v23 = vadd.f32 %v185_v14, %v88_v19  ;;  %v150_v24 = vadd.f32 %v185_v14, %v149_v20 }
  0xce   :  { %v207_v25 = vpop.f32.mrf.mxu0  ;;  %v215_v26 = vpop.f32.mrf.mxu1 }
  0xcf   :  { %v174_v27 = vadd.f32 %v170_v22, %v166_v21  ;;  %v164_v28 = vmax.f32 %v89_v23, 0.0  ;;  %v168_v29 = vmax.f32 %v150_v24, 0.0  ;;  %v100_v30 = vadd.f32 %v207_v25, %v185_v14 }
  0xd0   :  { %v161_v31 = vadd.f32 %v215_v26, %v185_v14  ;;  %v91_v32 = vpop.f32.mrf.mxu0  ;;  %v152_v33 = vpop.f32.mrf.mxu1 }
  0xd1   :  { %179 = vst.msk [vmem:[%s300_s4 + $0x10] sm:$0xff] %vm176_vm1, %v174_v27  ;;  %v172_v34 = vadd.f32 %v168_v29, %v164_v28  ;;  %v167_v35 = vmax.f32 %v100_v30, 0.0  ;;  %v92_v36 = vadd.f32 %v185_v14, %v91_v32  ;;  %v153_v37 = vadd.f32 %v185_v14, %v152_v33 }
  0xd2   :  { %v171_v38 = vmax.f32 %v161_v31, 0.0 }
  0xd3   :  { %177 = vst.msk [vmem:[%s300_s4] sm:$0xff] %vm176_vm1, %v172_v34  ;;  %v165_v39 = vmax.f32 %v92_v36, 0.0  ;;  %v169_v40 = vmax.f32 %v153_v37, 0.0 }
  0xd4   :  { %v175_v41 = vadd.f32 %v171_v38, %v167_v35 }
  0xd5   :  { %v173_v42 = vadd.f32 %v169_v40, %v165_v39 }
  0xd6   :  { %180 = vst.msk [vmem:[%s300_s4 + $0x18] sm:$0xff] %vm176_vm1, %v175_v41 }
  0xd7   :  { %178 = vst.msk [vmem:[%s300_s4 + $0x8] sm:$0xff] %vm176_vm1, %v173_v42 }

// kernel: conv_trans_block_fwd.16
= control target key start
LH: loop header
LB: loop body
LE: loop exit
PB: predicated region body
PF: predicated region fallthrough
CT: control target
= control target key end

     0   :  { %s2400_s29 = smov 0   ;;  %s2673_s0 = inlined_call_operand.vmem [shape: f32[4,17,32], index: 0, kind: input, shape index: {}]   ;;  %s2674_s1 = inlined_call_operand.vmem [shape: f32[4,17,32], index: 1, kind: input, shape index: {}]   ;;  %s2675_s2 = inlined_call_operand.vmem [shape: f32[4,17,32], index: 2, kind: input, shape index: {}]   ;;  %s2676_s3 = inlined_call_operand.vmem [shape: bf16[32,64], index: 3, kind: input, shape index: {}]   ;;  %s2677_s4 = inlined_call_operand.vmem [shape: bf16[32,32], index: 4, kind: input, shape index: {}]   ;;  %s2678_s5 = inlined_call_operand.vmem [shape: f32[1,32], index: 5, kind: input, shape index: {}]   ;;  %s2679_s6 = inlined_call_operand.vmem [shape: f32[1,32], index: 6, kind: input, shape index: {}]   ;;  %s2680_s7 = inlined_call_operand.vmem [shape: f32[1,32], index: 7, kind: input, shape index: {}]   ;;  %s2681_s8 = inlined_call_operand.vmem [shape: f32[1,32], index: 8, kind: input, shape index: {}]   ;;  %s2682_s9 = inlined_call_operand.vmem [shape: f32[1,32], index: 9, kind: input, shape index: {}]   ;;  %s2683_s10 = inlined_call_operand.vmem [shape: bf16[32,128], index: 10, kind: input, shape index: {}]   ;;  %s2684_s11 = inlined_call_operand.vmem [shape: f32[1,128], index: 11, kind: input, shape index: {}]   ;;  %s2685_s12 = inlined_call_operand.vmem [shape: bf16[128,32], index: 12, kind: input, shape index: {}]   ;;  %s2686_s13 = inlined_call_operand.vmem [shape: f32[1,32], index: 13, kind: input, shape index: {}]   ;;  %s2687_s14 = inlined_call_operand.vmem [shape: f32[4,17,32], index: 14, kind: output, shape index: {}]  }
   0x1 LB: > { %s1958_s30 = sadd.s32 4294967295, %s2315_s29   ;;  %p1962_p0 = scmp.ge.s32.totalorder %s2315_s29, 1  ;;  %s2315_s29 = sphi %s2400_s29, %s24_s29  }
   0x2   : > { %p432_p1 = scmp.lt.s32.totalorder %s2315_s29, 5 }
   0x4   : > { %p433_p2 = pnand %p1962_p0, %p432_p1 }
   0x5   : > { %p488_p3 = scmp.lt.s32.totalorder (!%p433_p2), %s1958_s30, 3  ;;  %s2317_s19 = smov (!%p433_p2), 96  }
   0x6   : > { %436 = sbr.rel (%p433_p2) target bundleno = 3273 (0xcc9), region = 76  ;;  %s2318_s20 = smov (!%p433_p2), 120  }
   0x7   : > { %s2321_s24 = smov (!%p433_p2), 88   ;;  %s2322_s25 = smov (!%p433_p2), 104  }
   0x8   : > { %s2323_s28 = smov (!%p433_p2), 80  }
   0xb   : > { %s2689_s30 = smov (!%p488_p3, %s1958_s30), 3  ;;  %vm520_vm0 = vcmask 261120   ;;  %vm527_vm1 = vcmask 253952   ;;  %v2231_v27 = vld [vmem:[%s2676_s3 + $0x8] sm:$0xff]   ;;  %v2232_v28 = vld [vmem:[%s2676_s3] sm:$0xff]   ;;  %vm669_vm2 = vcmask 64512  }
   0xc   : > { %s2408_s15 = smul.u32 24, %s2689_s30  ;;  %2078 = vmatprep.subr.bf16.mxu1 %v2231_v27  ;;  %v1967_v40 = vld [vmem:[%s2679_s6] ss:$0 sm:$0xff]  ;;  %vm733_vm3 = vcmask 138240   ;;  %vm740_vm4 = vcmask 131072   ;;  %vm783_vm5 = vcmask 1040384  }
   0xd   : > { %2079 = vmatpush3.bf16.msra.mxu1 %v2231_v27  ;;  %v1968_v46 = vld [vmem:[%s2680_s7] ss:$0 sm:$0xff]  ;;  %vm846_vm6 = vcmask 1043456  }
   0xe   : > { %s492_s18 = scalar_lea.vmem %s2673_s0, %s2408_s15  ;;  %s497_s21 = scalar_lea.vmem %s2674_s1, %s2408_s15  ;;  %2080 = vmatprep.subr.bf16.mxu1 %v2232_v28 }
   0xf   : > { %v509_v0 = vld [vmem:[%s492_s18] sm:$0xff]  ;;  %v511_v2 = vld [vmem:[%s492_s18 + $0x10] sm:$0x1]  ;;  %v510_v5 = vld [vmem:[%s492_s18 + $0x8] sm:$0xff]  ;;  %s502_s18 = scalar_lea.vmem %s2675_s2, %s2408_s15 }
  0x10   : > { %v512_v1 = vld [vmem:[%s497_s21] sm:$0xff]  ;;  %v514_v4 = vld [vmem:[%s497_s21 + $0x10] sm:$0x1]  ;;  %v513_v6 = vld [vmem:[%s497_s21 + $0x8] sm:$0xff]  ;;  %s2319_s21 = smov 112  }
  0x11   : > { %v2418_v3 = vadd.f32 %v512_v1, %v509_v0  ;;  %v2420_v7 = vadd.f32 %v514_v4, %v511_v2  ;;  %v2422_v8 = vadd.f32 %v513_v6, %v510_v5  ;;  %2081 = vmatpush3.bf16.msra.mxu1 %v2232_v28  ;;  %v652_v54 = vld [vmem:[%s502_s18] sm:$0xff]  ;;  %v653_v55 = vld [vmem:[%s502_s18 + $0x8] sm:$0xff]  ;;  %v654_v1 = vld [vmem:[%s502_s18 + $0x10] sm:$0x1] }
  0x12   : > { %v2454_v56 = vpack.c.bf16 %v653_v55, %v652_v54  ;;  %v2470_v2 = vpack.c.bf16 %v654_v1, %v654_v1 }
  0x13   : > { %v521_v9 = vsel %vm520_vm0, %v2418_v3, 0.0  ;;  %v528_v10 = vsel %vm527_vm1, %v2420_v7, 0.0  ;;  %v524_v11 = vsel %vm520_vm0, %v2422_v8, 0.0 }
  0x14   : > { %522 = vadd.xlane.f32.xlu0 %v521_v9  ;;  %529 = vadd.xlane.f32.xlu1 %v528_v10 }
  0x18   : > { %525 = vadd.xlane.f32.xlu0 %v524_v11 }
  0x9d   : > { %v523_v12 = vpop.xlane.xlu0 %522  ;;  %v530_v14 = vpop.xlane.xlu1 %529 }
  0x9e   : > { %v532_v13 = vmul.f32 0.03125, %v523_v12  ;;  %v534_v15 = vmul.f32 0.03125, %v530_v14 }
  0xa0   : > { %v535_v16 = vsub.f32 %v2418_v3, %v532_v13  ;;  %v537_v17 = vsub.f32 %v2420_v7, %v534_v15 }
  0xa1   : > { %v526_v18 = vpop.xlane.xlu0 %525 }
  0xa2   : > { %v533_v19 = vmul.f32 0.03125, %v526_v18  ;;  %v538_v20 = vmul.f32 %v535_v16, %v535_v16  ;;  %v540_v21 = vmul.f32 %v537_v17, %v537_v17 }
  0xa4   : > { %v536_v22 = vsub.f32 %v2422_v8, %v533_v19  ;;  %v541_v23 = vsel %vm520_vm0, %v538_v20, 0.0  ;;  %v547_v24 = vsel %vm527_vm1, %v540_v21, 0.0 }
  0xa5   : > { %542 = vadd.xlane.f32.xlu1 %v541_v23 }
  0xa6   : > { %v539_v25 = vmul.f32 %v536_v22, %v536_v22 }
  0xa8   : > { %v544_v26 = vsel %vm520_vm0, %v539_v25, 0.0 }
  0xa9   : > { %548 = vadd.xlane.f32.xlu1 %v547_v24  ;;  %545 = vadd.xlane.f32.xlu0 %v544_v26 }
 0x12e   : > { %v543_v29 = vpop.xlane.xlu1 %542 }
 0x12f   : > { %v550_v30 = vmul.f32 0.03125, %v543_v29 }
 0x131   : > { %v553_v31 = vadd.f32 1e-05, %v550_v30 }
 0x132   : > { %v549_v32 = vpop.xlane.xlu1 %548  ;;  %v546_v33 = vpop.xlane.xlu0 %545 }
 0x133   : > { %2243 = vrsqrt.f32 %v553_v31  ;;  %v552_v34 = vmul.f32 0.03125, %v549_v32  ;;  %v551_v35 = vmul.f32 0.03125, %v546_v33  ;;  %v2320_v33 = vmov 0  }
 0x135   : > { %v555_v36 = vadd.f32 1e-05, %v552_v34  ;;  %v554_v37 = vadd.f32 1e-05, %v551_v35  ;;  %v2490_v34 = vsel %vm783_vm5, 65535, %v2320_v33 }
 0x137   : > { %2245 = vrsqrt.f32 %v555_v36 }
 0x138   : > { %2247 = vrsqrt.f32 %v554_v37 }
 0x140   : > { %v2244_v38 = vpop.eup %2243 }
 0x141   : > { %v559_v39 = vmul.f32 %v2244_v38, %v535_v16 }
 0x143   : > { %v568_v45 = vmul.f32 %v1967_v40, %v559_v39 }
 0x144   : > { %v2246_v41 = vpop.eup %2245 }
 0x145   : > { %v2248_v42 = vpop.eup %2247  ;;  %v561_v43 = vmul.f32 %v2246_v41, %v537_v17  ;;  %v577_v50 = vadd.f32 %v1968_v46, %v568_v45 }
 0x146   : > { %v560_v44 = vmul.f32 %v2248_v42, %v536_v22 }
 0x147   : > { %v570_v47 = vmul.f32 %v1967_v40, %v561_v43 }
 0x148   : > { %v569_v48 = vmul.f32 %v1967_v40, %v560_v44 }
 0x149   : > { %v579_v49 = vadd.f32 %v1968_v46, %v570_v47 }
 0x14a   : > { %v578_v51 = vadd.f32 %v1968_v46, %v569_v48 }
 0x14b   : > { %v581_v52 = vpack.c.bf16 %v579_v49, %v579_v49 }
 0x14c   : > { %v580_v53 = vpack.c.bf16 %v578_v51, %v577_v50 }
 0x14e   : > { %2082 = vmatprep.mubr.msk.bf16.mxu1 %vm520_vm0, %v580_v53 }
 0x14f   : > { %2083 = vmatmul.mubr.msk.bf16.vlgmr.msra.gmra.mxu1 %vm520_vm0, %v581_v52 }
 0x150   : > { %2090 = vmatprep.mubr.msk.bf16.mxu1 %vm669_vm2, %v2454_v56 }
 0x20f   : > { %v2084_v57 = vpop.f32.mrf.mxu1 }
 0x210   : > { %v2458_v58 = vpack.c.bf16 %v2084_v57, %v2084_v57 }
 0x211   : > { %v638_v59 = vpop.f32.mrf.mxu1 }
 0x212   : > { %2202 = vmatprep.subr.msk.bf16.mxu1 %vm669_vm2, %v2458_v58  ;;  %v680_v60 = vsel %vm669_vm2, %v2458_v58, 0 }
 0x213   : > { %v2085_v61 = vpop.f32.mrf.mxu1  ;;  %2087 = vmatpush3.bf16.xpose.msra.mxu1 %v680_v60 }
 0x215   : > { %v641_v62 = vpop.f32.mrf.mxu1 }
 0x216   : > { %v2464_v63 = vpack.c.bf16 %v641_v62, %v638_v59  ;;  %v839_v59 = vld [vmem:[%s2677_s4] sm:$0xf] }
 0x217   : > { %2204 = vmatprep.subr.msk.bf16.mxu0 %vm846_vm6, %v839_v59  ;;  %v848_v60 = vsel %vm846_vm6, %v839_v59, 0 }
 0x218   : > { %2203 = vmatprep.subr.msk.bf16.mxu1 %vm669_vm2, %v2464_v63  ;;  %v677_v0 = vsel %vm669_vm2, %v2464_v63, 0  ;;  %2103 = vmatpush3.bf16.msra.mxu0 %v848_v60 }
 0x21b   : > { %2089 = vmatpush3.bf16.xpose.msra.mxu1 %v677_v0 }
 0x222   : > { %2091 = vmatmul.mubr.msk.bf16.vlgmr.msra.gmra.mxu1 %vm669_vm2, %v2470_v2 }
 0x2e2   : > { %v2092_v4 = vpop.f32.mrf.mxu1 }
 0x2e3   : > { %v732_v10 = vmul.f32 0.35355338, %v2092_v4 }
 0x2e4   : > { %v716_v5 = vpop.f32.mrf.mxu1 }
 0x2e5   : > { %v730_v6 = vmul.f32 0.35355338, %v716_v5  ;;  %v741_v14 = vsel %vm740_vm4, %v732_v10, -inf }
 0x2e6   : > { %v2093_v9 = vpop.f32.mrf.mxu1 }
 0x2e7   : > { %v734_v11 = vsel %vm733_vm3, %v730_v6, -inf }
 0x2e8   : > { %735 = vmax.xlane.f32.xlu0 %v734_v11  ;;  %v719_v12 = vpop.f32.mrf.mxu1 }
 0x2e9   : > { %v731_v13 = vmul.f32 0.35355338, %v719_v12 }
 0x2eb   : > { %v737_v15 = vsel %vm733_vm3, %v731_v13, -inf }
 0x2ec   : > { %742 = vmax.xlane.f32.xlu0 %v741_v14  ;;  %738 = vmax.xlane.f32.xlu1 %v737_v15 }
 0x371   : > { %v736_v16 = vpop.xlane.xlu0 %735 }
 0x372   : > { %v744_v17 = vsub.f32 %v730_v6, %v736_v16 }
 0x374   : > { %v747_v22 = vmul.f32 1.442695, %v744_v17 }
 0x375   : > { %v743_v18 = vpop.xlane.xlu0 %742  ;;  %v739_v19 = vpop.xlane.xlu1 %738 }
 0x376   : > { %v746_v20 = vsub.f32 %v732_v10, %v743_v18  ;;  %v745_v21 = vsub.f32 %v731_v13, %v739_v19 }
 0x378   : > { %v751_v23 = vmul.f32 1.442695, %v746_v20  ;;  %v749_v24 = vmul.f32 1.442695, %v745_v21 }
 0x37a   : > { %2249 = vpow2.f32 %v751_v23 }
 0x37b   : > { %2251 = vpow2.f32 %v749_v24 }
 0x37c   : > { %2253 = vpow2.f32 %v747_v22 }
 0x387   : > { %v2250_v25 = vpop.eup %2249 }
 0x388   : > { %v2252_v26 = vpop.eup %2251  ;;  %v759_v27 = vsel %vm740_vm4, %v2250_v25, 0.0 }
 0x389   : > { %v2254_v28 = vpop.eup %2253  ;;  %760 = vadd.xlane.f32.xlu1 %v759_v27  ;;  %v756_v29 = vsel %vm733_vm3, %v2252_v26, 0.0 }
 0x38a   : > { %757 = vadd.xlane.f32.xlu0 %v756_v29  ;;  %v753_v30 = vsel %vm733_vm3, %v2254_v28, 0.0 }
 0x38d   : > { %754 = vadd.xlane.f32.xlu1 %v753_v30 }
 0x39e   : > { %772 = vrot.lane.b32.xlu1 %v2464_v63, %s2317_s19 }
 0x3a0   : > { %774 = vrot.lane.b32.xlu0 %v2458_v58, %s2317_s19  ;;  %s2324_s19 = smov 72  }
 0x3a2   : > { %909 = vrot.lane.b32.xlu1 %v2458_v58, %s2318_s20 }
 0x3a4   : > { %903 = vrot.lane.b32.xlu0 %v2454_v56, %s2318_s20 }
 0x3a6   : > { %907 = vrot.lane.b32.xlu1 %v2464_v63, %s2318_s20 }
 0x3a8   : > { %1140 = vrot.lane.b32.xlu0 %v2458_v58, %s2319_s21 }
 0x3aa   : > { %905 = vrot.lane.b32.xlu1 %v2470_v2, %s2318_s20 }
 0x3ac   : > { %1134 = vrot.lane.b32.xlu0 %v2454_v56, %s2319_s21 }
 0x3ae   : > { %1138 = vrot.lane.b32.xlu1 %v2464_v63, %s2319_s21 }
 0x3b2   : > { %1136 = vrot.lane.b32.xlu1 %v2470_v2, %s2319_s21 }
 0x412   : > { %v761_v31 = vpop.xlane.xlu1 %760 }
 0x413   : > { %v758_v32 = vpop.xlane.xlu0 %757  ;;  %2255 = vrcp.f32 %v761_v31 }
 0x414   : > { %2257 = vrcp.f32 %v758_v32 }
 0x416   : > { %v755_v35 = vpop.xlane.xlu1 %754 }
 0x417   : > { %v775_v36 = vpop.permute.xlu0 %774  ;;  %2259 = vrcp.f32 %v755_v35 }
 0x418   : > { %v787_v37 = vand.u32 %v2490_v34, %v775_v36 }
 0x41a   : > { %2094 = vmatprep.subr.bf16.mxu1 %v787_v37  ;;  %v773_v38 = vpop.permute.xlu1 %772 }
 0x41b   : > { %2095 = vmatpush3.bf16.msra.mxu1 %v787_v37  ;;  %v904_v48 = vpop.permute.xlu0 %903 }
 0x41c   : > { %2096 = vmatprep.subr.bf16.mxu1 %v773_v38 }
 0x41e   : > { %v910_v39 = vpop.permute.xlu1 %909 }
 0x41f   : > { %2097 = vmatpush3.bf16.msra.mxu1 %v773_v38  ;;  %v921_v49 = vsel %vm669_vm2, %v910_v39, 0  ;;  %v1141_v52 = vpop.permute.xlu0 %1140 }
 0x420   : > { %2205 = vmatprep.subr.msk.bf16.mxu1 %vm669_vm2, %v910_v39  ;;  %v2256_v40 = vpop.eup %2255  ;;  %v1152_v54 = vsel %vm669_vm2, %v1141_v52, 0 }
 0x421   : > { %v2258_v41 = vpop.eup %2257  ;;  %v767_v43 = vmul.f32 %v2256_v40, %v2250_v25 }
 0x422   : > { %v766_v45 = vmul.f32 %v2258_v41, %v2252_v26  ;;  %v908_v50 = vpop.permute.xlu1 %907 }
 0x423   : > { %v769_v47 = vpack.c.bf16 %v767_v43, %v767_v43  ;;  %v918_v51 = vsel %vm669_vm2, %v908_v50, 0  ;;  %v1135_v61 = vpop.permute.xlu0 %1134 }
 0x424   : > { %v2260_v42 = vpop.eup %2259 }
 0x425   : > { %v765_v44 = vmul.f32 %v2260_v42, %v2254_v28 }
 0x426   : > { %v906_v53 = vpop.permute.xlu1 %905 }
 0x427   : > { %v768_v46 = vpack.c.bf16 %v766_v45, %v765_v44 }
 0x429   : > { %2098 = vmatprep.mubr.msk.bf16.mxu1 %vm733_vm3, %v768_v46 }
 0x42a   : > { %2099 = vmatmul.mubr.msk.bf16.vlgmr.msra.gmra.mxu1 %vm733_vm3, %v769_v47  ;;  %v1139_v55 = vpop.permute.xlu1 %1138 }
 0x42b   : > { %2109 = vmatpush3.bf16.xpose.msra.mxu1 %v921_v49  ;;  %2112 = vmatprep.mubr.msk.bf16.mxu1 %vm669_vm2, %v904_v48  ;;  %v1149_v57 = vsel %vm669_vm2, %v1139_v55, 0 }
 0x42c   : > { %2206 = vmatprep.subr.msk.bf16.mxu1 %vm669_vm2, %v908_v50 }
 0x42e   : > { %v1137_v62 = vpop.permute.xlu1 %1136 }
 0x433   : > { %2111 = vmatpush3.bf16.xpose.msra.mxu1 %v918_v51 }
 0x434   : > { %2208 = vmatprep.subr.msk.bf16.mxu1 %vm669_vm2, %v1141_v52 }
 0x43a   : > { %2113 = vmatmul.mubr.msk.bf16.vlgmr.msra.gmra.mxu1 %vm669_vm2, %v906_v53 }
 0x43b   : > { %2131 = vmatpush3.bf16.xpose.msra.mxu1 %v1152_v54  ;;  %2134 = vmatprep.mubr.msk.bf16.mxu1 %vm669_vm2, %v1135_v61 }
 0x43c   : > { %2209 = vmatprep.subr.msk.bf16.mxu1 %vm669_vm2, %v1139_v55 }
 0x443   : > { %2133 = vmatpush3.bf16.xpose.msra.mxu1 %v1149_v57 }
 0x44a   : > { %2135 = vmatmul.mubr.msk.bf16.vlgmr.msra.gmra.mxu1 %vm669_vm2, %v1137_v62 }
 0x4ea   : > { %v2100_v0 = vpop.f32.mrf.mxu1 }
 0x4eb   : > { %v838_v9 = vpack.c.bf16 %v2100_v0, %v2100_v0 }
 0x4ec   : > { %v823_v1 = vpop.f32.mrf.mxu1 }
 0x4ee   : > { %v2101_v4 = vpop.f32.mrf.mxu1 }
 0x4f0   : > { %v826_v5 = vpop.f32.mrf.mxu1 }
 0x4f1   : > { %v837_v6 = vpack.c.bf16 %v826_v5, %v823_v1 }
 0x4f3   : > { %2104 = vmatprep.mubr.msk.bf16.mxu0 %vm669_vm2, %v837_v6 }
 0x4f4   : > { %2105 = vmatmul.mubr.msk.bf16.vlgmr.msra.gmra.mxu0 %vm669_vm2, %v838_v9 }
 0x4fa   : > { %v2114_v10 = vpop.f32.mrf.mxu1 }
 0x4fb   : > { %v973_v14 = vmul.f32 0.35355338, %v2114_v10 }
 0x4fc   : > { %v957_v11 = vpop.f32.mrf.mxu1 }
 0x4fd   : > { %v971_v12 = vmul.f32 0.35355338, %v957_v11  ;;  %v980_v18 = vsel %vm740_vm4, %v973_v14, -inf }
 0x4fe   : > { %v2115_v13 = vpop.f32.mrf.mxu1 }
 0x4ff   : > { %v974_v15 = vsel %vm733_vm3, %v971_v12, -inf }
 0x500   : > { %975 = vmax.xlane.f32.xlu0 %v974_v15  ;;  %v960_v16 = vpop.f32.mrf.mxu1 }
 0x501   : > { %v972_v17 = vmul.f32 0.35355338, %v960_v16 }
 0x503   : > { %v977_v19 = vsel %vm733_vm3, %v972_v17, -inf }
 0x504   : > { %981 = vmax.xlane.f32.xlu0 %v980_v18  ;;  %978 = vmax.xlane.f32.xlu1 %v977_v19 }
 0x50a   : > { %v2136_v20 = vpop.f32.mrf.mxu1 }
 0x50b   : > { %v1204_v43 = vmul.f32 0.35355338, %v2136_v20 }
 0x50c   : > { %v1188_v21 = vpop.f32.mrf.mxu1 }
 0x50d   : > { %v1202_v42 = vmul.f32 0.35355338, %v1188_v21  ;;  %v1211_v47 = vsel %vm740_vm4, %v1204_v43, -inf }
 0x50e   : > { %v2137_v22 = vpop.f32.mrf.mxu1 }
 0x50f   : > { %v1205_v44 = vsel %vm733_vm3, %v1202_v42, -inf }
 0x510   : > { %v1191_v45 = vpop.f32.mrf.mxu1 }
 0x511   : > { %v1203_v46 = vmul.f32 0.35355338, %v1191_v45 }
 0x513   : > { %v1208_v48 = vsel %vm733_vm3, %v1203_v46, -inf }
 0x589   : > { %v976_v23 = vpop.xlane.xlu0 %975 }
 0x58a   : > { %v983_v24 = vsub.f32 %v971_v12, %v976_v23 }
 0x58c   : > { %v986_v25 = vmul.f32 1.442695, %v983_v24 }
 0x58d   : > { %v982_v26 = vpop.xlane.xlu0 %981  ;;  %v979_v27 = vpop.xlane.xlu1 %978 }
 0x58e   : > { %2261 = vpow2.f32 %v986_v25  ;;  %v985_v28 = vsub.f32 %v973_v14, %v982_v26  ;;  %v984_v29 = vsub.f32 %v972_v17, %v979_v27  ;;  %v1073_v25 = vld [vmem:[%s2677_s4 + $0x4] sm:$0xf] }
 0x58f   : > { %v1081_v26 = vsel %vm846_vm6, %v1073_v25, 0 }
 0x590   : > { %v990_v30 = vmul.f32 1.442695, %v985_v28  ;;  %v988_v31 = vmul.f32 1.442695, %v984_v29 }
 0x592   : > { %2263 = vpow2.f32 %v990_v30 }
 0x593   : > { %2265 = vpow2.f32 %v988_v31 }
 0x59b   : > { %v2262_v32 = vpop.eup %2261 }
 0x59c   : > { %v992_v33 = vsel %vm733_vm3, %v2262_v32, 0.0 }
 0x59d   : > { %993 = vadd.xlane.f32.xlu0 %v992_v33 }
 0x59f   : > { %v2264_v35 = vpop.eup %2263 }
 0x5a0   : > { %v2266_v36 = vpop.eup %2265  ;;  %v998_v37 = vsel %vm740_vm4, %v2264_v35, 0.0 }
 0x5a1   : > { %999 = vadd.xlane.f32.xlu1 %v998_v37  ;;  %v995_v38 = vsel %vm733_vm3, %v2266_v36, 0.0 }
 0x5a2   : > { %996 = vadd.xlane.f32.xlu0 %v995_v38 }
 0x5b2   : > { %1009 = vrot.lane.b32.xlu1 %v2464_v63, %s2321_s24 }
 0x5b4   : > { %v2521_v39 = vpop.f32.mrf.mxu0 }
 0x5b6   : > { %1371 = vrot.lane.b32.xlu1 %v2458_v58, %s2322_s25  ;;  %v2524_v40 = vpop.f32.mrf.mxu0 }
 0x5b8   : > { %1011 = vrot.lane.b32.xlu0 %v2458_v58, %s2321_s24  ;;  %v2107_v41 = vpop.f32.mrf.mxu0  ;;  %s507_s24 = scalar_lea.vmem %s2687_s14, %s2408_s15 }
 0x5ba   : > { %1369 = vrot.lane.b32.xlu1 %v2464_v63, %s2322_s25  ;;  %v2552_v27 = vpop.f32.mrf.mxu0 }
 0x5bc   : > { %1365 = vrot.lane.b32.xlu0 %v2454_v56, %s2322_s25 }
 0x5be   : > { %1367 = vrot.lane.b32.xlu1 %v2470_v2, %s2322_s25 }
 0x5db   : > { %1206 = vmax.xlane.f32.xlu0 %v1205_v44 }
 0x5df   : > { %1212 = vmax.xlane.f32.xlu0 %v1211_v47 }
 0x5e2   : > { %1209 = vmax.xlane.f32.xlu1 %v1208_v48 }
 0x626   : > { %v994_v49 = vpop.xlane.xlu0 %993 }
 0x627   : > { %2267 = vrcp.f32 %v994_v49 }
 0x62a   : > { %v1000_v50 = vpop.xlane.xlu1 %999 }
 0x62b   : > { %v997_v51 = vpop.xlane.xlu0 %996  ;;  %2269 = vrcp.f32 %v1000_v50 }
 0x62c   : > { %2271 = vrcp.f32 %v997_v51 }
 0x62e   : > { %v1010_v56 = vpop.permute.xlu1 %1009 }
 0x62f   : > { %v1012_v2 = vpop.permute.xlu0 %1011 }
 0x630   : > { %v1021_v52 = vand.u32 %v1012_v2, %v2490_v34 }
 0x632   : > { %2116 = vmatprep.subr.bf16.mxu0 %v1021_v52  ;;  %v1372_v53 = vpop.permute.xlu1 %1371 }
 0x633   : > { %2117 = vmatpush3.bf16.msra.mxu0 %v1021_v52  ;;  %v1383_v54 = vsel %vm669_vm2, %v1372_v53, 0  ;;  %2211 = vmatprep.subr.msk.bf16.mxu1 %vm669_vm2, %v1372_v53  ;;  %v1366_v55 = vpop.permute.xlu0 %1365 }
 0x634   : > { %2118 = vmatprep.subr.bf16.mxu0 %v1010_v56  ;;  %2153 = vmatpush3.bf16.xpose.msra.mxu1 %v1383_v54  ;;  %v2268_v59 = vpop.eup %2267 }
 0x635   : > { %2156 = vmatprep.mubr.msk.bf16.mxu1 %vm669_vm2, %v1366_v55  ;;  %v1004_v0 = vmul.f32 %v2268_v59, %v2262_v32 }
 0x636   : > { %v1370_v57 = vpop.permute.xlu1 %1369 }
 0x637   : > { %2119 = vmatpush3.bf16.msra.mxu0 %v1010_v56  ;;  %2212 = vmatprep.subr.msk.bf16.mxu1 %vm669_vm2, %v1370_v57  ;;  %v1380_v4 = vsel %vm669_vm2, %v1370_v57, 0 }
 0x638   : > { %v2270_v60 = vpop.eup %2269  ;;  %2207 = vmatprep.subr.msk.bf16.mxu0 %vm846_vm6, %v1073_v25 }
 0x639   : > { %v2272_v61 = vpop.eup %2271  ;;  %v1006_v62 = vmul.f32 %v2270_v60, %v2264_v35 }
 0x63a   : > { %v1005_v1 = vmul.f32 %v2272_v61, %v2266_v36  ;;  %v1368_v9 = vpop.permute.xlu1 %1367  ;;  %v1304_v61 = vld [vmem:[%s2677_s4 + $0x8] sm:$0xf] }
 0x63b   : > { %v1008_v5 = vpack.c.bf16 %v1006_v62, %v1006_v62  ;;  %v1312_v62 = vsel %vm846_vm6, %v1304_v61, 0 }
 0x63c   : > { %2155 = vmatpush3.bf16.xpose.msra.mxu1 %v1380_v4  ;;  %v1007_v6 = vpack.c.bf16 %v1005_v1, %v1004_v0 }
 0x63e   : > { %2120 = vmatprep.mubr.msk.bf16.mxu0 %vm733_vm3, %v1007_v6 }
 0x63f   : > { %2121 = vmatmul.mubr.msk.bf16.vlgmr.msra.gmra.mxu0 %vm733_vm3, %v1008_v5 }
 0x640   : > { %2125 = vmatpush3.bf16.msra.mxu0 %v1081_v26 }
 0x643   : > { %2157 = vmatmul.mubr.msk.bf16.vlgmr.msra.gmra.mxu1 %vm669_vm2, %v1368_v9 }
 0x664   : > { %v1207_v10 = vpop.xlane.xlu0 %1206 }
 0x665   : > { %v1214_v11 = vsub.f32 %v1202_v42, %v1207_v10 }
 0x667   : > { %v1217_v12 = vmul.f32 1.442695, %v1214_v11 }
 0x668   : > { %v1213_v13 = vpop.xlane.xlu0 %1212 }
 0x669   : > { %2273 = vpow2.f32 %v1217_v12  ;;  %v1216_v14 = vsub.f32 %v1204_v43, %v1213_v13 }
 0x66b   : > { %v1221_v15 = vmul.f32 1.442695, %v1216_v14  ;;  %v1210_v16 = vpop.xlane.xlu1 %1209 }
 0x66c   : > { %v1215_v17 = vsub.f32 %v1203_v46, %v1210_v16 }
 0x66d   : > { %2275 = vpow2.f32 %v1221_v15 }
 0x66e   : > { %v1219_v18 = vmul.f32 1.442695, %v1215_v17 }
 0x670   : > { %2277 = vpow2.f32 %v1219_v18 }
 0x676   : > { %v2274_v19 = vpop.eup %2273 }
 0x677   : > { %v1223_v20 = vsel %vm733_vm3, %v2274_v19, 0.0 }
 0x678   : > { %1224 = vadd.xlane.f32.xlu0 %v1223_v20 }
 0x67a   : > { %v2276_v21 = vpop.eup %2275 }
 0x67b   : > { %v1229_v22 = vsel %vm740_vm4, %v2276_v21, 0.0 }
 0x67c   : > { %1230 = vadd.xlane.f32.xlu1 %v1229_v22 }
 0x67d   : > { %v2278_v23 = vpop.eup %2277 }
 0x67e   : > { %v1226_v24 = vsel %vm733_vm3, %v2278_v23, 0.0 }
 0x67f   : > { %1227 = vadd.xlane.f32.xlu0 %v1226_v24 }
 0x68d   : > { %1240 = vrot.lane.b32.xlu1 %v2464_v63, %s2323_s28 }
 0x695   : > { %1242 = vrot.lane.b32.xlu0 %v2458_v58, %s2323_s28 }
 0x6ff   : > { %v2122_v28 = vpop.f32.mrf.mxu0 }
 0x700   : > { %v1072_v38 = vpack.c.bf16 %v2122_v28, %v2122_v28 }
 0x701   : > { %v1057_v29 = vpop.f32.mrf.mxu0  ;;  %v1225_v32 = vpop.xlane.xlu0 %1224 }
 0x703   : > { %v2123_v30 = vpop.f32.mrf.mxu0  ;;  %v2158_v31 = vpop.f32.mrf.mxu1 }
 0x704   : > { %v1435_v48 = vmul.f32 0.35355338, %v2158_v31 }
 0x705   : > { %v1060_v33 = vpop.f32.mrf.mxu0  ;;  %v1231_v35 = vpop.xlane.xlu1 %1230 }
 0x706   : > { %v1071_v36 = vpack.c.bf16 %v1060_v33, %v1057_v29  ;;  %2279 = vrcp.f32 %v1231_v35  ;;  %v1419_v37 = vpop.f32.mrf.mxu1  ;;  %v1442_v56 = vsel %vm740_vm4, %v1435_v48, -inf }
 0x707   : > { %2281 = vrcp.f32 %v1225_v32  ;;  %v1433_v41 = vmul.f32 0.35355338, %v1419_v37 }
 0x708   : > { %2126 = vmatprep.mubr.msk.bf16.mxu0 %vm669_vm2, %v1071_v36  ;;  %v2159_v42 = vpop.f32.mrf.mxu1  ;;  %v1228_v43 = vpop.xlane.xlu0 %1227 }
 0x709   : > { %2127 = vmatmul.mubr.msk.bf16.vlgmr.msra.gmra.mxu0 %vm669_vm2, %v1072_v38  ;;  %2283 = vrcp.f32 %v1228_v43  ;;  %v1436_v44 = vsel %vm733_vm3, %v1433_v41, -inf  ;;  %v1241_v51 = vpop.permute.xlu1 %1240 }
 0x70a   : > { %1437 = vmax.xlane.f32.xlu1 %v1436_v44  ;;  %v1422_v45 = vpop.f32.mrf.mxu1 }
 0x70b   : > { %v1434_v46 = vmul.f32 0.35355338, %v1422_v45 }
 0x70c   : > { %v1243_v47 = vpop.permute.xlu0 %1242 }
 0x70d   : > { %v1252_v49 = vand.u32 %v1243_v47, %v2490_v34  ;;  %v1439_v50 = vsel %vm733_vm3, %v1434_v46, -inf }
 0x70e   : > { %1440 = vmax.xlane.f32.xlu0 %v1439_v50 }
 0x70f   : > { %2138 = vmatprep.subr.bf16.mxu0 %v1252_v49 }
 0x710   : > { %2139 = vmatpush3.bf16.msra.mxu0 %v1252_v49 }
 0x711   : > { %2140 = vmatprep.subr.bf16.mxu0 %v1241_v51 }
 0x712   : > { %1443 = vmax.xlane.f32.xlu0 %v1442_v56 }
 0x713   : > { %v2280_v2 = vpop.eup %2279 }
 0x714   : > { %v2282_v52 = vpop.eup %2281  ;;  %2141 = vmatpush3.bf16.msra.mxu0 %v1241_v51  ;;  %v1237_v54 = vmul.f32 %v2280_v2, %v2276_v21 }
 0x715   : > { %v1235_v55 = vmul.f32 %v2282_v52, %v2274_v19  ;;  %2210 = vmatprep.subr.msk.bf16.mxu0 %vm846_vm6, %v1304_v61  ;;  %v2573_v19 = vld [vmem:[%s2678_s5] ss:$0 sm:$0xff] }
 0x716   : > { %v2284_v53 = vpop.eup %2283  ;;  %v1239_v60 = vpack.c.bf16 %v1237_v54, %v1237_v54  ;;  %v664_v20 = vadd.f32 %v2573_v19, %v2420_v7  ;;  %v662_v21 = vadd.f32 %v2573_v19, %v2418_v3  ;;  %v663_v61 = vadd.f32 %v2573_v19, %v2422_v8 }
 0x717   : > { %v1236_v57 = vmul.f32 %v2284_v53, %v2278_v23 }
 0x718   : > { %v900_v22 = vadd.f32 %v2521_v39, %v664_v20  ;;  %v898_v24 = vadd.f32 %v2524_v40, %v662_v21 }
 0x719   : > { %v1238_v59 = vpack.c.bf16 %v1236_v57, %v1235_v55 }
 0x71b   : > { %2142 = vmatprep.mubr.msk.bf16.mxu0 %vm733_vm3, %v1238_v59 }
 0x71c   : > { %2143 = vmatmul.mubr.msk.bf16.vlgmr.msra.gmra.mxu0 %vm733_vm3, %v1239_v60 }
 0x71d   : > { %2147 = vmatpush3.bf16.msra.mxu0 %v1312_v62 }
 0x793   : > { %v1438_v0 = vpop.xlane.xlu1 %1437 }
 0x794   : > { %v1445_v5 = vsub.f32 %v1433_v41, %v1438_v0  ;;  %v899_v0 = vadd.f32 %v2552_v27, %v663_v61  ;;  %v2000_v61 = vld [vmem:[%s2684_s11] ss:$0 sm:$0xff] }
 0x796   : > { %v1448_v11 = vmul.f32 1.442695, %v1445_v5 }
 0x797   : > { %v1441_v1 = vpop.xlane.xlu0 %1440 }
 0x798   : > { %v1446_v4 = vsub.f32 %v1434_v46, %v1441_v1 }
 0x79a   : > { %v1450_v6 = vmul.f32 1.442695, %v1446_v4 }
 0x79b   : > { %v1444_v9 = vpop.xlane.xlu0 %1443 }
 0x79c   : > { %2285 = vpow2.f32 %v1450_v6  ;;  %v1447_v10 = vsub.f32 %v1435_v48, %v1444_v9 }
 0x79e   : > { %v1452_v12 = vmul.f32 1.442695, %v1447_v10 }
 0x7a0   : > { %2287 = vpow2.f32 %v1452_v12 }
 0x7a1   : > { %2289 = vpow2.f32 %v1448_v11 }
 0x7a9   : > { %v2286_v13 = vpop.eup %2285 }
 0x7aa   : > { %v1457_v14 = vsel %vm733_vm3, %v2286_v13, 0.0 }
 0x7ab   : > { %1458 = vadd.xlane.f32.xlu0 %v1457_v14 }
 0x7ad   : > { %v2288_v15 = vpop.eup %2287 }
 0x7ae   : > { %v1460_v16 = vsel %vm740_vm4, %v2288_v15, 0.0  ;;  %v2290_v17 = vpop.eup %2289 }
 0x7af   : > { %1461 = vadd.xlane.f32.xlu1 %v1460_v16  ;;  %v1454_v18 = vsel %vm733_vm3, %v2290_v17, 0.0 }
 0x7b3   : > { %1455 = vadd.xlane.f32.xlu1 %v1454_v18 }
 0x7c1   : > { %1473 = vrot.lane.b32.xlu0 %v2458_v58, %s2324_s19 }
 0x7c4   : > { %1471 = vrot.lane.b32.xlu1 %v2464_v63, %s2324_s19 }
 0x7c9   : > { %v2128_v23 = vpop.f32.mrf.mxu0 }
 0x7ca   : > { %v1133_v25 = vadd.f32 %v2128_v23, %v900_v22 }
 0x7cb   : > { %v1117_v26 = vpop.f32.mrf.mxu0 }
 0x7cc   : > { %v1131_v28 = vadd.f32 %v1117_v26, %v898_v24 }
 0x7cd   : > { %v2129_v29 = vpop.f32.mrf.mxu0 }
 0x7cf   : > { %v1120_v30 = vpop.f32.mrf.mxu0 }
 0x7d0   : > { %v1132_v4 = vadd.f32 %v1120_v30, %v899_v0  ;;  %v2233_v30 = vld [vmem:[%s2683_s10 + $0x8] sm:$0xff]  }
 0x7d1   : > { %2174 = vmatprep.subr.bf16.mxu1 %v2233_v30 }
 0x7d2   : > { %2175 = vmatpush3.bf16.msra.mxu1 %v2233_v30  ;;  %v2013_v30 = vld [vmem:[%s2686_s13] ss:$0 sm:$0xff] }
 0x7dc   : > { %v2144_v31 = vpop.f32.mrf.mxu0 }
 0x7dd   : > { %v1303_v35 = vpack.c.bf16 %v2144_v31, %v2144_v31  ;;  %v2234_v31 = vld [vmem:[%s2683_s10] sm:$0xff]  }
 0x7de   : > { %v1288_v58 = vpop.f32.mrf.mxu0  ;;  %2176 = vmatprep.subr.bf16.mxu1 %v2234_v31 }
 0x7df   : > { %2177 = vmatpush3.bf16.msra.mxu1 %v2234_v31 }
 0x7e0   : > { %v2145_v32 = vpop.f32.mrf.mxu0 }
 0x7e2   : > { %v1291_v33 = vpop.f32.mrf.mxu0 }
 0x7e3   : > { %v1302_v7 = vpack.c.bf16 %v1291_v33, %v1288_v58 }
 0x7e5   : > { %2148 = vmatprep.mubr.msk.bf16.mxu0 %vm669_vm2, %v1302_v7 }
 0x7e6   : > { %2149 = vmatmul.mubr.msk.bf16.vlgmr.msra.gmra.mxu0 %vm669_vm2, %v1303_v35 }
 0x834   : > { %v1459_v3 = vpop.xlane.xlu0 %1458 }
 0x838   : > { %v1474_v63 = vpop.permute.xlu0 %1473  ;;  %v1462_v39 = vpop.xlane.xlu1 %1461 }
 0x839   : > { %v1483_v40 = vand.u32 %v1474_v63, %v2490_v34  ;;  %2291 = vrcp.f32 %v1462_v39  ;;  %v1535_v34 = vld [vmem:[%s2677_s4 + $0xc] sm:$0xf] }
 0x83a   : > { %2293 = vrcp.f32 %v1459_v3  ;;  %v1543_v48 = vsel %vm846_vm6, %v1535_v34, 0 }
 0x83b   : > { %2160 = vmatprep.subr.bf16.mxu0 %v1483_v40 }
 0x83c   : > { %2161 = vmatpush3.bf16.msra.mxu0 %v1483_v40  ;;  %v1456_v36 = vpop.xlane.xlu1 %1455 }
 0x83d   : > { %2295 = vrcp.f32 %v1456_v36 }
 0x840   : > { %v1472_v37 = vpop.permute.xlu1 %1471 }
 0x841   : > { %2162 = vmatprep.subr.bf16.mxu0 %v1472_v37 }
 0x842   : > { %2163 = vmatpush3.bf16.msra.mxu0 %v1472_v37 }
 0x843   : > { %2213 = vmatprep.subr.msk.bf16.mxu0 %vm846_vm6, %v1535_v34 }
 0x846   : > { %v2292_v38 = vpop.eup %2291 }
 0x847   : > { %v2294_v41 = vpop.eup %2293  ;;  %v1468_v43 = vmul.f32 %v2292_v38, %v2288_v15  ;;  %v1998_v38 = vld [vmem:[%s2681_s8] ss:$0 sm:$0xff] }
 0x848   : > { %v1467_v45 = vmul.f32 %v2294_v41, %v2286_v13 }
 0x849   : > { %v1470_v47 = vpack.c.bf16 %v1468_v43, %v1468_v43 }
 0x84a   : > { %v2296_v42 = vpop.eup %2295 }
 0x84b   : > { %v1466_v44 = vmul.f32 %v2296_v42, %v2290_v17 }
 0x84d   : > { %v1469_v46 = vpack.c.bf16 %v1467_v45, %v1466_v44  ;;  %v1999_v44 = vld [vmem:[%s2682_s9] ss:$0 sm:$0xff] }
 0x84f   : > { %2164 = vmatprep.mubr.msk.bf16.mxu0 %vm733_vm3, %v1469_v46 }
 0x850   : > { %2165 = vmatmul.mubr.msk.bf16.vlgmr.msra.gmra.mxu0 %vm733_vm3, %v1470_v47 }
 0x851   : > { %2169 = vmatpush3.bf16.msra.mxu0 %v1543_v48 }
 0x8a6   : > { %v2150_v49 = vpop.f32.mrf.mxu0 }
 0x8a7   : > { %v1364_v50 = vadd.f32 %v2150_v49, %v1133_v25 }
 0x8a8   : > { %v1348_v51 = vpop.f32.mrf.mxu0 }
 0x8a9   : > { %v1362_v56 = vadd.f32 %v1348_v51, %v1131_v28 }
 0x8aa   : > { %v2151_v2 = vpop.f32.mrf.mxu0 }
 0x8ab   : > { %v2235_v2 = vld [vmem:[%s2685_s12 + $0x38] sm:$0xff]  }
 0x8ac   : > { %v1351_v52 = vpop.f32.mrf.mxu0  ;;  %2182 = vmatprep.subr.bf16.mxu0 %v2235_v2 }
 0x8ad   : > { %v1363_v9 = vadd.f32 %v1351_v52, %v1132_v4  ;;  %v2236_v52 = vld [vmem:[%s2685_s12 + $0x30] sm:$0xff]  }
 0x910   : > { %v2166_v53 = vpop.f32.mrf.mxu0 }
 0x911   : > { %v1534_v60 = vpack.c.bf16 %v2166_v53, %v2166_v53  ;;  %v2237_v53 = vld [vmem:[%s2685_s12 + $0x28] sm:$0xff]  }
 0x912   : > { %v1519_v54 = vpop.f32.mrf.mxu0 }
 0x914   : > { %v2167_v55 = vpop.f32.mrf.mxu0 }
 0x915   : > { %v2239_v55 = vld [vmem:[%s2685_s12 + $0x18] sm:$0xff]  }
 0x916   : > { %v1522_v57 = vpop.f32.mrf.mxu0 }
 0x917   : > { %v1533_v59 = vpack.c.bf16 %v1522_v57, %v1519_v54  ;;  %v2238_v54 = vld [vmem:[%s2685_s12 + $0x20] sm:$0xff]   ;;  %v2240_v57 = vld [vmem:[%s2685_s12 + $0x10] sm:$0xff]  }
 0x919   : > { %2170 = vmatprep.mubr.msk.bf16.mxu0 %vm669_vm2, %v1533_v59  ;;  %v2241_v59 = vld [vmem:[%s2685_s12 + $0x8] sm:$0xff]  }
 0x91a   : > { %2171 = vmatmul.mubr.msk.bf16.vlgmr.msra.gmra.mxu0 %vm669_vm2, %v1534_v60  ;;  %v2242_v60 = vld [vmem:[%s2685_s12] sm:$0xff]  }
 0x91b   : > { %2183 = vmatpush3.bf16.msra.mxu0 %v2235_v2 }
 0x91c   : > { %2184 = vmatprep.subr.bf16.mxu0 %v2236_v52 }
 0x91f   : > { %2185 = vmatpush3.bf16.msra.mxu0 %v2236_v52 }
 0x920   : > { %2186 = vmatprep.subr.bf16.mxu0 %v2237_v53 }
 0x923   : > { %2187 = vmatpush3.bf16.msra.mxu0 %v2237_v53 }
 0x924   : > { %2188 = vmatprep.subr.bf16.mxu0 %v2238_v54 }
 0x927   : > { %2189 = vmatpush3.bf16.msra.mxu0 %v2238_v54 }
 0x928   : > { %2190 = vmatprep.subr.bf16.mxu0 %v2239_v55 }
 0x92b   : > { %2191 = vmatpush3.bf16.msra.mxu0 %v2239_v55 }
 0x92c   : > { %2192 = vmatprep.subr.bf16.mxu0 %v2240_v57 }
 0x92f   : > { %2193 = vmatpush3.bf16.msra.mxu0 %v2240_v57 }
 0x930   : > { %2194 = vmatprep.subr.bf16.mxu0 %v2241_v59 }
 0x933   : > { %2195 = vmatpush3.bf16.msra.mxu0 %v2241_v59 }
 0x934   : > { %2196 = vmatprep.subr.bf16.mxu0 %v2242_v60 }
 0x937   : > { %2197 = vmatpush3.bf16.msra.mxu0 %v2242_v60 }
 0x9da   : > { %v2172_v62 = vpop.f32.mrf.mxu0 }
 0x9db   : > { %v2604_v13 = vadd.f32 %v2172_v62, %v1364_v50 }
 0x9dc   : > { %v1579_v1 = vpop.f32.mrf.mxu0 }
 0x9dd   : > { %v2598_v5 = vadd.f32 %v1579_v1, %v1362_v56  ;;  %v1604_v27 = vsel %vm527_vm1, %v2604_v13, 0.0 }
 0x9de   : > { %v2173_v6 = vpop.f32.mrf.mxu0 }
 0x9df   : > { %v1598_v10 = vsel %vm520_vm0, %v2598_v5, 0.0 }
 0x9e0   : > { %1599 = vadd.xlane.f32.xlu1 %v1598_v10  ;;  %v1582_v11 = vpop.f32.mrf.mxu0 }
 0x9e1   : > { %v2602_v12 = vadd.f32 %v1582_v11, %v1363_v9 }
 0x9e3   : > { %v1601_v8 = vsel %vm520_vm0, %v2602_v12, 0.0 }
 0x9e4   : > { %1602 = vadd.xlane.f32.xlu0 %v1601_v8 }
 0x9e8   : > { %1605 = vadd.xlane.f32.xlu0 %v1604_v27 }
 0xa69   : > { %v1600_v14 = vpop.xlane.xlu1 %1599 }
 0xa6a   : > { %v1607_v15 = vmul.f32 0.03125, %v1600_v14 }
 0xa6c   : > { %v1610_v16 = vsub.f32 %v2598_v5, %v1607_v15 }
 0xa6d   : > { %v1603_v17 = vpop.xlane.xlu0 %1602 }
 0xa6e   : > { %v1608_v18 = vmul.f32 0.03125, %v1603_v17  ;;  %v1613_v19 = vmul.f32 %v1610_v16, %v1610_v16 }
 0xa70   : > { %v1611_v20 = vsub.f32 %v2602_v12, %v1608_v18  ;;  %v1616_v21 = vsel %vm520_vm0, %v1613_v19, 0.0 }
 0xa71   : > { %1617 = vadd.xlane.f32.xlu1 %v1616_v21  ;;  %v1606_v22 = vpop.xlane.xlu0 %1605 }
 0xa72   : > { %v1609_v23 = vmul.f32 0.03125, %v1606_v22  ;;  %v1614_v24 = vmul.f32 %v1611_v20, %v1611_v20 }
 0xa74   : > { %v1612_v25 = vsub.f32 %v2604_v13, %v1609_v23  ;;  %v1619_v26 = vsel %vm520_vm0, %v1614_v24, 0.0 }
 0xa75   : > { %1620 = vadd.xlane.f32.xlu0 %v1619_v26 }
 0xa76   : > { %v1615_v28 = vmul.f32 %v1612_v25, %v1612_v25 }
 0xa78   : > { %v1622_v29 = vsel %vm527_vm1, %v1615_v28, 0.0 }
 0xa79   : > { %1623 = vadd.xlane.f32.xlu1 %v1622_v29 }
 0xafa   : > { %v1618_v58 = vpop.xlane.xlu1 %1617 }
 0xafb   : > { %v1625_v32 = vmul.f32 0.03125, %v1618_v58 }
 0xafd   : > { %v1628_v33 = vadd.f32 1e-05, %v1625_v32 }
 0xafe   : > { %v1621_v7 = vpop.xlane.xlu0 %1620 }
 0xaff   : > { %2297 = vrsqrt.f32 %v1628_v33  ;;  %v1626_v35 = vmul.f32 0.03125, %v1621_v7 }
 0xb01   : > { %v1629_v3 = vadd.f32 1e-05, %v1626_v35 }
 0xb02   : > { %v1624_v63 = vpop.xlane.xlu1 %1623 }
 0xb03   : > { %2299 = vrsqrt.f32 %v1629_v3  ;;  %v1627_v39 = vmul.f32 0.03125, %v1624_v63 }
 0xb05   : > { %v1630_v40 = vadd.f32 1e-05, %v1627_v39 }
 0xb07   : > { %2301 = vrsqrt.f32 %v1630_v40 }
 0xb0c   : > { %v2298_v36 = vpop.eup %2297 }
 0xb0d   : > { %v1634_v37 = vmul.f32 %v2298_v36, %v1610_v16 }
 0xb0f   : > { %v1643_v43 = vmul.f32 %v1998_v38, %v1634_v37 }
 0xb10   : > { %v2300_v41 = vpop.eup %2299 }
 0xb11   : > { %v1635_v42 = vmul.f32 %v2300_v41, %v1611_v20  ;;  %v1652_v34 = vadd.f32 %v1999_v44, %v1643_v43 }
 0xb13   : > { %v1644_v45 = vmul.f32 %v1998_v38, %v1635_v42 }
 0xb14   : > { %v2302_v46 = vpop.eup %2301 }
 0xb15   : > { %v1636_v47 = vmul.f32 %v2302_v46, %v1612_v25  ;;  %v1653_v48 = vadd.f32 %v1999_v44, %v1644_v45 }
 0xb17   : > { %v1655_v49 = vpack.c.bf16 %v1653_v48, %v1652_v34  ;;  %v1645_v50 = vmul.f32 %v1998_v38, %v1636_v47 }
 0xb19   : > { %2178 = vmatprep.mubr.msk.bf16.mxu1 %vm520_vm0, %v1655_v49  ;;  %v1654_v51 = vadd.f32 %v1999_v44, %v1645_v50 }
 0xb1b   : > { %v1656_v56 = vpack.c.bf16 %v1654_v51, %v1654_v51 }
 0xb1d   : > { %2179 = vmatmul.mubr.msk.bf16.vlgmr.msra.gmra.mxu1 %vm520_vm0, %v1656_v56 }
 0xbdd   : > { %v2180_v62 = vpop.f32.mrf.mxu1 }
 0xbde   : > { %v1729_v0 = vadd.f32 %v2180_v62, %v2000_v61 }
 0xbdf   : > { %v1720_v1 = vpop.f32.mrf.mxu1 }
 0xbe0   : > { %v1739_v4 = vmul.f32 0.70710677, %v1729_v0  ;;  %v1721_v6 = vadd.f32 %v2000_v61, %v1720_v1  ;;  %v1736_v19 = vmul.f32 0.5, %v1729_v0 }
 0xbe1   : > { %v2181_v9 = vpop.f32.mrf.mxu1 }
 0xbe2   : > { %v1737_v10 = vmul.f32 0.70710677, %v1721_v6  ;;  %2303 = verf.f32 %v1739_v4  ;;  %v1734_v20 = vmul.f32 0.5, %v1721_v6 }
 0xbe3   : > { %v1723_v11 = vpop.f32.mrf.mxu1 }
 0xbe4   : > { %2305 = verf.f32 %v1737_v10  ;;  %v1724_v8 = vadd.f32 %v2000_v61, %v1723_v11 }
 0xbe6   : > { %v1738_v27 = vmul.f32 0.70710677, %v1724_v8  ;;  %v1735_v21 = vmul.f32 0.5, %v1724_v8 }
 0xbe8   : > { %2307 = verf.f32 %v1738_v27 }
 0xbef   : > { %v2304_v14 = vpop.eup %2303 }
 0xbf0   : > { %v1745_v16 = vadd.f32 1.0, %v2304_v14 }
 0xbf1   : > { %v2306_v15 = vpop.eup %2305 }
 0xbf2   : > { %v1743_v17 = vadd.f32 1.0, %v2306_v15  ;;  %v1748_v23 = vmul.f32 %v1745_v16, %v1736_v19 }
 0xbf4   : > { %v1746_v24 = vmul.f32 %v1743_v17, %v1734_v20  ;;  %v1750_v28 = vpack.c.bf16 %v1748_v23, %v1748_v23 }
 0xbf5   : > { %v2308_v18 = vpop.eup %2307 }
 0xbf6   : > { %v1744_v22 = vadd.f32 1.0, %v2308_v18 }
 0xbf8   : > { %v1747_v25 = vmul.f32 %v1744_v22, %v1735_v21 }
 0xbfa   : > { %v1749_v26 = vpack.c.bf16 %v1747_v25, %v1746_v24 }
 0xbfc   : > { %2198 = vmatprep.mubr.bf16.mxu0 %v1749_v26 }
 0xbfd   : > { %2199 = vmatmul.mubr.bf16.vlgmr.msra.gmra.mxu0 %v1750_v28 }
 0xcbd   : > { %v2200_v29 = vpop.f32.mrf.mxu0 }
 0xcbe   : > { %v1865_v31 = vadd.f32 %v2200_v29, %v2604_v13 }
 0xcbf   : > { %v1849_v58 = vpop.f32.mrf.mxu0 }
 0xcc0   : > { %v1875_v32 = vadd.f32 %v2013_v30, %v1865_v31  ;;  %v1863_v33 = vadd.f32 %v1849_v58, %v2598_v5 }
 0xcc1   : > { %v2201_v7 = vpop.f32.mrf.mxu0 }
 0xcc2   : > { %1878 = vst.msk [vmem:[%s507_s24 + $0x10] sm:$0x1] %vm527_vm1, %v1875_v32  ;;  %v1873_v35 = vadd.f32 %v2013_v30, %v1863_v33 }
 0xcc3   : > { %v1852_v3 = vpop.f32.mrf.mxu0 }
 0xcc4   : > { %1876 = vst.msk [vmem:[%s507_s24] sm:$0xff] %vm520_vm0, %v1873_v35  ;;  %v1864_v63 = vadd.f32 %v1852_v3, %v2602_v12 }
 0xcc6   : > { %v1874_v39 = vadd.f32 %v2013_v30, %v1864_v63 }
 0xcc8   : > { %1877 = vst.msk [vmem:[%s507_s24 + $0x8] sm:$0xff] %vm520_vm0, %v1874_v39 }
 0xcc9 PF: > { %s24_s29 = sadd.s32 1, %s2315_s29  }
 0xcca   : > { %p21_p4 = scmp.ge.s32.totalorder %s24_s29, 6  }
 0xccc   :  { %23 = sbr.rel (!%p21_p4) target bundleno = 1 (0x1), region = 112 }

// kernel: conv_trans_block_fwd.19
= control target key start
LH: loop header
LB: loop body
LE: loop exit
PB: predicated region body
PF: predicated region fallthrough
CT: control target
= control target key end

     0   :  { %vm129_vm0 = vcmask 130048   ;;  %s1680_s1 = inlined_call_operand.vmem [shape: bf16[16,16], index: 1, kind: input, shape index: {}]   ;;  %s1681_s0 = inlined_call_operand.vmem [shape: f32[512,16], index: 0, kind: input, shape index: {}]   ;;  %s1682_s2 = inlined_call_operand.vmem [shape: f32[1,16], index: 2, kind: input, shape index: {}]   ;;  %s1683_s3 = inlined_call_operand.vmem [shape: f32[512,16], index: 3, kind: input, shape index: {}]   ;;  %s1684_s4 = inlined_call_operand.vmem [shape: f32[512,16], index: 4, kind: output, shape index: {}]  }
   0x1   :  { %v910_v0 = vld [vmem:[%s1680_s1] sm:$0xff]   ;;  %v19_v2 = vld [vmem:[%s1681_s0 + $0x8] sm:$0xff]  ;;  %v20_v6 = vld [vmem:[%s1681_s0 + $0x10] sm:$0xff] }
   0x2   :  { %v18_v1 = vld [vmem:[%s1681_s0] sm:$0xff]  ;;  %842 = vmatprep.subr.bf16.mxu0 %v910_v0  ;;  %908 = vmatprep.subr.bf16.mxu1 %v910_v0  ;;  %v51_v5 = vld [vmem:[%s1681_s0 + $0x108] sm:$0xff]  ;;  %v21_v7 = vld [vmem:[%s1681_s0 + $0x18] sm:$0xff] }
   0x3   :  { %v50_v3 = vld [vmem:[%s1681_s0 + $0x100] sm:$0xff]  ;;  %v82_v4 = vpack.c.bf16 %v19_v2, %v18_v1  ;;  %843 = vmatpush3.bf16.msra.mxu0 %v910_v0  ;;  %909 = vmatpush3.bf16.msra.mxu1 %v910_v0  ;;  %v83_v9 = vpack.c.bf16 %v21_v7, %v20_v6  ;;  %v52_v10 = vld [vmem:[%s1681_s0 + $0x110] sm:$0xff]  ;;  %v53_v11 = vld [vmem:[%s1681_s0 + $0x118] sm:$0xff] }
   0x4   :  { %v98_v8 = vpack.c.bf16 %v51_v5, %v50_v3  ;;  %v22_v12 = vld [vmem:[%s1681_s0 + $0x20] sm:$0xff]  ;;  %v99_v13 = vpack.c.bf16 %v53_v11, %v52_v10  ;;  %v23_v14 = vld [vmem:[%s1681_s0 + $0x28] sm:$0xff]  ;;  %v24_v19 = vld [vmem:[%s1681_s0 + $0x30] sm:$0xff] }
   0x5   :  { %844 = vmatprep.mubr.msk.bf16.mxu0 %vm129_vm0, %v82_v4  ;;  %v54_v15 = vld [vmem:[%s1681_s0 + $0x120] sm:$0xff]  ;;  %v55_v16 = vld [vmem:[%s1681_s0 + $0x128] sm:$0xff]  ;;  %v84_v17 = vpack.c.bf16 %v23_v14, %v22_v12  ;;  %v25_v20 = vld [vmem:[%s1681_s0 + $0x38] sm:$0xff] }
   0x6   :  { %876 = vmatprep.mubr.msk.bf16.mxu1 %vm129_vm0, %v98_v8  ;;  %v100_v18 = vpack.c.bf16 %v55_v16, %v54_v15  ;;  %845 = vmatmul.mubr.msk.bf16.vlgmr.msra.gmra.mxu0 %vm129_vm0, %v83_v9  ;;  %v56_v21 = vld [vmem:[%s1681_s0 + $0x130] sm:$0xff]  ;;  %v57_v22 = vld [vmem:[%s1681_s0 + $0x138] sm:$0xff]  ;;  %v26_v23 = vld [vmem:[%s1681_s0 + $0x40] sm:$0xff]  ;;  %v85_v27 = vpack.c.bf16 %v25_v20, %v24_v19 }
   0x7   :  { %877 = vmatmul.mubr.msk.bf16.vlgmr.msra.gmra.mxu1 %vm129_vm0, %v99_v13  ;;  %848 = vmatprep.mubr.msk.bf16.mxu0 %vm129_vm0, %v84_v17  ;;  %v27_v24 = vld [vmem:[%s1681_s0 + $0x48] sm:$0xff]  ;;  %v58_v25 = vld [vmem:[%s1681_s0 + $0x140] sm:$0xff]  ;;  %v101_v28 = vpack.c.bf16 %v57_v22, %v56_v21  ;;  %v28_v31 = vld [vmem:[%s1681_s0 + $0x50] sm:$0xff] }
   0x8   :  { %880 = vmatprep.mubr.msk.bf16.mxu1 %vm129_vm0, %v100_v18  ;;  %v59_v26 = vld [vmem:[%s1681_s0 + $0x148] sm:$0xff]  ;;  %v86_v29 = vpack.c.bf16 %v27_v24, %v26_v23  ;;  %v29_v32 = vld [vmem:[%s1681_s0 + $0x58] sm:$0xff]  ;;  %v60_v33 = vld [vmem:[%s1681_s0 + $0x150] sm:$0xff] }
   0x9   :  { %v102_v30 = vpack.c.bf16 %v59_v26, %v58_v25  ;;  %v61_v34 = vld [vmem:[%s1681_s0 + $0x158] sm:$0xff]  ;;  %v30_v35 = vld [vmem:[%s1681_s0 + $0x60] sm:$0xff]  ;;  %v31_v36 = vld [vmem:[%s1681_s0 + $0x68] sm:$0xff]  ;;  %v87_v39 = vpack.c.bf16 %v29_v32, %v28_v31 }
   0xa   :  { %v62_v37 = vld [vmem:[%s1681_s0 + $0x160] sm:$0xff]  ;;  %v63_v38 = vld [vmem:[%s1681_s0 + $0x168] sm:$0xff]  ;;  %v103_v40 = vpack.c.bf16 %v61_v34, %v60_v33  ;;  %v88_v41 = vpack.c.bf16 %v31_v36, %v30_v35  ;;  %v32_v43 = vld [vmem:[%s1681_s0 + $0x70] sm:$0xff] }
   0xb   :  { %v104_v42 = vpack.c.bf16 %v63_v38, %v62_v37  ;;  %v33_v44 = vld [vmem:[%s1681_s0 + $0x78] sm:$0xff]  ;;  %v64_v45 = vld [vmem:[%s1681_s0 + $0x170] sm:$0xff]  ;;  %v34_v47 = vld [vmem:[%s1681_s0 + $0x80] sm:$0xff] }
   0xc   :  { %v65_v46 = vld [vmem:[%s1681_s0 + $0x178] sm:$0xff]  ;;  %v35_v48 = vld [vmem:[%s1681_s0 + $0x88] sm:$0xff]  ;;  %v66_v49 = vld [vmem:[%s1681_s0 + $0x180] sm:$0xff]  ;;  %v89_v51 = vpack.c.bf16 %v33_v44, %v32_v43 }
   0xd   :  { %v67_v50 = vld [vmem:[%s1681_s0 + $0x188] sm:$0xff]  ;;  %v105_v52 = vpack.c.bf16 %v65_v46, %v64_v45  ;;  %v90_v53 = vpack.c.bf16 %v35_v48, %v34_v47  ;;  %v36_v55 = vld [vmem:[%s1681_s0 + $0x90] sm:$0xff]  ;;  %v37_v56 = vld [vmem:[%s1681_s0 + $0x98] sm:$0xff] }
   0xe   :  { %849 = vmatmul.mubr.msk.bf16.gmra.mxu0 %vm129_vm0, %v85_v27  ;;  %v106_v54 = vpack.c.bf16 %v67_v50, %v66_v49  ;;  %v68_v57 = vld [vmem:[%s1681_s0 + $0x190] sm:$0xff]  ;;  %v69_v58 = vld [vmem:[%s1681_s0 + $0x198] sm:$0xff]  ;;  %v38_v59 = vld [vmem:[%s1681_s0 + $0xa0] sm:$0xff]  ;;  %v91_v63 = vpack.c.bf16 %v37_v56, %v36_v55 }
   0xf   :  { %881 = vmatmul.mubr.msk.bf16.gmra.mxu1 %vm129_vm0, %v101_v28  ;;  %852 = vmatprep.mubr.msk.bf16.mxu0 %vm129_vm0, %v86_v29  ;;  %v39_v60 = vld [vmem:[%s1681_s0 + $0xa8] sm:$0xff]  ;;  %v70_v61 = vld [vmem:[%s1681_s0 + $0x1a0] sm:$0xff]  ;;  %v107_v0 = vpack.c.bf16 %v69_v58, %v68_v57  ;;  %v40_v3 = vld [vmem:[%s1681_s0 + $0xb0] sm:$0xff] }
  0x10   :  { %884 = vmatprep.mubr.msk.bf16.mxu1 %vm129_vm0, %v102_v30  ;;  %v71_v62 = vld [vmem:[%s1681_s0 + $0x1a8] sm:$0xff]  ;;  %v92_v1 = vpack.c.bf16 %v39_v60, %v38_v59  ;;  %v41_v4 = vld [vmem:[%s1681_s0 + $0xb8] sm:$0xff]  ;;  %v72_v5 = vld [vmem:[%s1681_s0 + $0x1b0] sm:$0xff] }
  0x11   :  { %v108_v2 = vpack.c.bf16 %v71_v62, %v70_v61  ;;  %v73_v6 = vld [vmem:[%s1681_s0 + $0x1b8] sm:$0xff]  ;;  %v42_v7 = vld [vmem:[%s1681_s0 + $0xc0] sm:$0xff]  ;;  %v43_v8 = vld [vmem:[%s1681_s0 + $0xc8] sm:$0xff]  ;;  %v93_v11 = vpack.c.bf16 %v41_v4, %v40_v3 }
  0x12   :  { %v74_v9 = vld [vmem:[%s1681_s0 + $0x1c0] sm:$0xff]  ;;  %v75_v10 = vld [vmem:[%s1681_s0 + $0x1c8] sm:$0xff]  ;;  %v109_v12 = vpack.c.bf16 %v73_v6, %v72_v5  ;;  %v94_v13 = vpack.c.bf16 %v43_v8, %v42_v7  ;;  %v44_v15 = vld [vmem:[%s1681_s0 + $0xd0] sm:$0xff] }
  0x13   :  { %v110_v14 = vpack.c.bf16 %v75_v10, %v74_v9  ;;  %v45_v16 = vld [vmem:[%s1681_s0 + $0xd8] sm:$0xff]  ;;  %v76_v17 = vld [vmem:[%s1681_s0 + $0x1d0] sm:$0xff]  ;;  %v46_v19 = vld [vmem:[%s1681_s0 + $0xe0] sm:$0xff] }
  0x14   :  { %v77_v18 = vld [vmem:[%s1681_s0 + $0x1d8] sm:$0xff]  ;;  %v47_v20 = vld [vmem:[%s1681_s0 + $0xe8] sm:$0xff]  ;;  %v78_v21 = vld [vmem:[%s1681_s0 + $0x1e0] sm:$0xff]  ;;  %v95_v23 = vpack.c.bf16 %v45_v16, %v44_v15 }
  0x15   :  { %v79_v22 = vld [vmem:[%s1681_s0 + $0x1e8] sm:$0xff]  ;;  %v111_v24 = vpack.c.bf16 %v77_v18, %v76_v17  ;;  %v96_v25 = vpack.c.bf16 %v47_v20, %v46_v19  ;;  %v48_v27 = vld [vmem:[%s1681_s0 + $0xf0] sm:$0xff]  ;;  %v49_v28 = vld [vmem:[%s1681_s0 + $0xf8] sm:$0xff] }
  0x16   :  { %853 = vmatmul.mubr.msk.bf16.gmra.mxu0 %vm129_vm0, %v87_v39  ;;  %v112_v26 = vpack.c.bf16 %v79_v22, %v78_v21  ;;  %v80_v29 = vld [vmem:[%s1681_s0 + $0x1f0] sm:$0xff]  ;;  %v81_v30 = vld [vmem:[%s1681_s0 + $0x1f8] sm:$0xff]  ;;  %v97_v31 = vpack.c.bf16 %v49_v28, %v48_v27  ;;  %v1166_v33 = vld [vmem:[%s1682_s2] ss:$0 sm:$0xff] }
  0x17   :  { %885 = vmatmul.mubr.msk.bf16.gmra.mxu1 %vm129_vm0, %v103_v40  ;;  %856 = vmatprep.mubr.msk.bf16.mxu0 %vm129_vm0, %v88_v41  ;;  %v113_v32 = vpack.c.bf16 %v81_v30, %v80_v29  ;;  %v581_v38 = vld [vmem:[%s1683_s3 + $0x10] sm:$0xff]  ;;  %v579_v46 = vld [vmem:[%s1683_s3] sm:$0xff]  ;;  %v582_v60 = vld [vmem:[%s1683_s3 + $0x18] sm:$0xff] }
  0x18   :  { %888 = vmatprep.mubr.msk.bf16.mxu1 %vm129_vm0, %v104_v42  ;;  %v613_v39 = vld [vmem:[%s1683_s3 + $0x110] sm:$0xff]  ;;  %v611_v47 = vld [vmem:[%s1683_s3 + $0x100] sm:$0xff]  ;;  %v614_v61 = vld [vmem:[%s1683_s3 + $0x118] sm:$0xff] }
  0x19   :  { %v612_v3 = vld [vmem:[%s1683_s3 + $0x108] sm:$0xff]  ;;  %v615_v27 = vld [vmem:[%s1683_s3 + $0x120] sm:$0xff] }
  0x1e   :  { %857 = vmatmul.mubr.msk.bf16.gmra.mxu0 %vm129_vm0, %v89_v51 }
  0x1f   :  { %889 = vmatmul.mubr.msk.bf16.gmra.mxu1 %vm129_vm0, %v105_v52  ;;  %860 = vmatprep.mubr.msk.bf16.mxu0 %vm129_vm0, %v90_v53 }
  0x20   :  { %892 = vmatprep.mubr.msk.bf16.mxu1 %vm129_vm0, %v106_v54 }
  0x26   :  { %861 = vmatmul.mubr.msk.bf16.gmra.mxu0 %vm129_vm0, %v91_v63 }
  0x27   :  { %893 = vmatmul.mubr.msk.bf16.gmra.mxu1 %vm129_vm0, %v107_v0  ;;  %864 = vmatprep.mubr.msk.bf16.mxu0 %vm129_vm0, %v92_v1 }
  0x28   :  { %896 = vmatprep.mubr.msk.bf16.mxu1 %vm129_vm0, %v108_v2  ;;  %v580_v2 = vld [vmem:[%s1683_s3 + $0x8] sm:$0xff] }
  0x2e   :  { %865 = vmatmul.mubr.msk.bf16.gmra.mxu0 %vm129_vm0, %v93_v11 }
  0x2f   :  { %897 = vmatmul.mubr.msk.bf16.gmra.mxu1 %vm129_vm0, %v109_v12  ;;  %868 = vmatprep.mubr.msk.bf16.mxu0 %vm129_vm0, %v94_v13  ;;  %v585_v12 = vld [vmem:[%s1683_s3 + $0x30] sm:$0xff] }
  0x30   :  { %900 = vmatprep.mubr.msk.bf16.mxu1 %vm129_vm0, %v110_v14  ;;  %v617_v13 = vld [vmem:[%s1683_s3 + $0x130] sm:$0xff] }
  0x36   :  { %869 = vmatmul.mubr.msk.bf16.gmra.mxu0 %vm129_vm0, %v95_v23 }
  0x37   :  { %901 = vmatmul.mubr.msk.bf16.gmra.mxu1 %vm129_vm0, %v111_v24  ;;  %872 = vmatprep.mubr.msk.bf16.mxu0 %vm129_vm0, %v96_v25 }
  0x38   :  { %904 = vmatprep.mubr.msk.bf16.mxu1 %vm129_vm0, %v112_v26  ;;  %v583_v26 = vld [vmem:[%s1683_s3 + $0x20] sm:$0xff] }
  0x3e   :  { %873 = vmatmul.mubr.msk.bf16.gmra.mxu0 %vm129_vm0, %v97_v31 }
  0x3f   :  { %905 = vmatmul.mubr.msk.bf16.gmra.mxu1 %vm129_vm0, %v113_v32  ;;  %v586_v32 = vld [vmem:[%s1683_s3 + $0x38] sm:$0xff] }
  0xc6   :  { %v846_v34 = vpop.f32.mrf.mxu0 }
  0xc7   :  { %v878_v35 = vpop.f32.mrf.mxu1  ;;  %v269_v36 = vadd.f32 %v846_v34, %v1166_v33  ;;  %v618_v34 = vld [vmem:[%s1683_s3 + $0x138] sm:$0xff] }
  0xc8   :  { %v397_v37 = vadd.f32 %v878_v35, %v1166_v33  ;;  %v260_v40 = vpop.f32.mrf.mxu0 }
  0xc9   :  { %v388_v41 = vpop.f32.mrf.mxu1  ;;  %v517_v42 = vmax.f32 %v269_v36, 0.0  ;;  %v261_v44 = vadd.f32 %v1166_v33, %v260_v40 }
  0xca   :  { %v549_v43 = vmax.f32 %v397_v37, 0.0  ;;  %v389_v45 = vadd.f32 %v1166_v33, %v388_v41  ;;  %v847_v48 = vpop.f32.mrf.mxu0 }
  0xcb   :  { %v879_v49 = vpop.f32.mrf.mxu1  ;;  %v645_v50 = vadd.f32 %v581_v38, %v517_v42  ;;  %v515_v52 = vmax.f32 %v261_v44, 0.0  ;;  %v272_v54 = vadd.f32 %v847_v48, %v1166_v33  ;;  %v616_v44 = vld [vmem:[%s1683_s3 + $0x128] sm:$0xff] }
  0xcc   :  { %v677_v51 = vadd.f32 %v613_v39, %v549_v43  ;;  %v547_v53 = vmax.f32 %v389_v45, 0.0  ;;  %v400_v55 = vadd.f32 %v879_v49, %v1166_v33  ;;  %v263_v56 = vpop.f32.mrf.mxu0  ;;  %v584_v43 = vld [vmem:[%s1683_s3 + $0x28] sm:$0xff] }
  0xcd   :  { %v391_v57 = vpop.f32.mrf.mxu1  ;;  %709 = vst.msk [vmem:[%s1684_s4 + $0x10] sm:$0xff] %vm129_vm0, %v645_v50  ;;  %v643_v58 = vadd.f32 %v579_v46, %v515_v52  ;;  %v264_v62 = vadd.f32 %v1166_v33, %v263_v56  ;;  %v518_v0 = vmax.f32 %v272_v54, 0.0 }
  0xce   :  { %741 = vst.msk [vmem:[%s1684_s4 + $0x110] sm:$0xff] %vm129_vm0, %v677_v51  ;;  %v675_v59 = vadd.f32 %v611_v47, %v547_v53  ;;  %v392_v63 = vadd.f32 %v1166_v33, %v391_v57  ;;  %v550_v1 = vmax.f32 %v400_v55, 0.0  ;;  %v850_v4 = vpop.f32.mrf.mxu0  ;;  %v589_v57 = vld [vmem:[%s1683_s3 + $0x50] sm:$0xff] }
  0xcf   :  { %v882_v5 = vpop.f32.mrf.mxu1  ;;  %707 = vst.msk [vmem:[%s1684_s4] sm:$0xff] %vm129_vm0, %v643_v58  ;;  %v516_v6 = vmax.f32 %v264_v62, 0.0  ;;  %v285_v8 = vadd.f32 %v850_v4, %v1166_v33  ;;  %v646_v10 = vadd.f32 %v582_v60, %v518_v0  ;;  %v621_v58 = vld [vmem:[%s1683_s3 + $0x150] sm:$0xff]  ;;  %v619_v0 = vld [vmem:[%s1683_s3 + $0x140] sm:$0xff] }
  0xd0   :  { %739 = vst.msk [vmem:[%s1684_s4 + $0x100] sm:$0xff] %vm129_vm0, %v675_v59  ;;  %v548_v7 = vmax.f32 %v392_v63, 0.0  ;;  %v413_v9 = vadd.f32 %v882_v5, %v1166_v33  ;;  %v678_v11 = vadd.f32 %v614_v61, %v550_v1  ;;  %v276_v14 = vpop.f32.mrf.mxu0  ;;  %v587_v63 = vld [vmem:[%s1683_s3 + $0x40] sm:$0xff] }
  0xd1   :  { %v404_v15 = vpop.f32.mrf.mxu1  ;;  %v644_v16 = vadd.f32 %v580_v2, %v516_v6  ;;  %v521_v18 = vmax.f32 %v285_v8, 0.0  ;;  %710 = vst.msk [vmem:[%s1684_s4 + $0x18] sm:$0xff] %vm129_vm0, %v646_v10  ;;  %v277_v20 = vadd.f32 %v1166_v33, %v276_v14  ;;  %v622_v10 = vld [vmem:[%s1683_s3 + $0x158] sm:$0xff] }
  0xd2   :  { %v676_v17 = vadd.f32 %v612_v3, %v548_v7  ;;  %v553_v19 = vmax.f32 %v413_v9, 0.0  ;;  %742 = vst.msk [vmem:[%s1684_s4 + $0x118] sm:$0xff] %vm129_vm0, %v678_v11  ;;  %v405_v21 = vadd.f32 %v1166_v33, %v404_v15  ;;  %v851_v22 = vpop.f32.mrf.mxu0  ;;  %v590_v9 = vld [vmem:[%s1683_s3 + $0x58] sm:$0xff] }
  0xd3   :  { %v883_v23 = vpop.f32.mrf.mxu1  ;;  %708 = vst.msk [vmem:[%s1684_s4 + $0x8] sm:$0xff] %vm129_vm0, %v644_v16  ;;  %v649_v24 = vadd.f32 %v585_v12, %v521_v18  ;;  %v288_v28 = vadd.f32 %v851_v22, %v1166_v33  ;;  %v519_v30 = vmax.f32 %v277_v20, 0.0 }
  0xd4   :  { %740 = vst.msk [vmem:[%s1684_s4 + $0x108] sm:$0xff] %vm129_vm0, %v676_v17  ;;  %v681_v25 = vadd.f32 %v617_v13, %v553_v19  ;;  %v416_v29 = vadd.f32 %v883_v23, %v1166_v33  ;;  %v551_v31 = vmax.f32 %v405_v21, 0.0  ;;  %v279_v35 = vpop.f32.mrf.mxu0  ;;  %v588_v23 = vld [vmem:[%s1683_s3 + $0x48] sm:$0xff] }
  0xd5   :  { %v407_v36 = vpop.f32.mrf.mxu1  ;;  %713 = vst.msk [vmem:[%s1684_s4 + $0x30] sm:$0xff] %vm129_vm0, %v649_v24  ;;  %v522_v37 = vmax.f32 %v288_v28, 0.0  ;;  %v280_v39 = vadd.f32 %v1166_v33, %v279_v35  ;;  %v647_v41 = vadd.f32 %v583_v26, %v519_v30  ;;  %v620_v24 = vld [vmem:[%s1683_s3 + $0x148] sm:$0xff]  ;;  %v625_v30 = vld [vmem:[%s1683_s3 + $0x170] sm:$0xff] }
  0xd6   :  { %745 = vst.msk [vmem:[%s1684_s4 + $0x130] sm:$0xff] %vm129_vm0, %v681_v25  ;;  %v554_v38 = vmax.f32 %v416_v29, 0.0  ;;  %v408_v40 = vadd.f32 %v1166_v33, %v407_v36  ;;  %v679_v42 = vadd.f32 %v615_v27, %v551_v31  ;;  %v854_v45 = vpop.f32.mrf.mxu0  ;;  %v593_v29 = vld [vmem:[%s1683_s3 + $0x70] sm:$0xff] }
  0xd7   :  { %v886_v46 = vpop.f32.mrf.mxu1  ;;  %v650_v47 = vadd.f32 %v586_v32, %v522_v37  ;;  %v520_v49 = vmax.f32 %v280_v39, 0.0  ;;  %711 = vst.msk [vmem:[%s1684_s4 + $0x20] sm:$0xff] %vm129_vm0, %v647_v41  ;;  %v301_v51 = vadd.f32 %v854_v45, %v1166_v33  ;;  %v623_v41 = vld [vmem:[%s1683_s3 + $0x160] sm:$0xff] }
  0xd8   :  { %v682_v48 = vadd.f32 %v618_v34, %v554_v38  ;;  %v552_v50 = vmax.f32 %v408_v40, 0.0  ;;  %743 = vst.msk [vmem:[%s1684_s4 + $0x120] sm:$0xff] %vm129_vm0, %v679_v42  ;;  %v429_v52 = vadd.f32 %v886_v46, %v1166_v33  ;;  %v292_v53 = vpop.f32.mrf.mxu0  ;;  %v591_v40 = vld [vmem:[%s1683_s3 + $0x60] sm:$0xff] }
  0xd9   :  { %v420_v54 = vpop.f32.mrf.mxu1  ;;  %714 = vst.msk [vmem:[%s1684_s4 + $0x38] sm:$0xff] %vm129_vm0, %v650_v47  ;;  %v648_v55 = vadd.f32 %v584_v43, %v520_v49  ;;  %v293_v59 = vadd.f32 %v1166_v33, %v292_v53  ;;  %v525_v61 = vmax.f32 %v301_v51, 0.0 }
  0xda   :  { %746 = vst.msk [vmem:[%s1684_s4 + $0x138] sm:$0xff] %vm129_vm0, %v682_v48  ;;  %v680_v56 = vadd.f32 %v616_v44, %v552_v50  ;;  %v421_v60 = vadd.f32 %v1166_v33, %v420_v54  ;;  %v557_v62 = vmax.f32 %v429_v52, 0.0  ;;  %v855_v1 = vpop.f32.mrf.mxu0  ;;  %v594_v54 = vld [vmem:[%s1683_s3 + $0x78] sm:$0xff] }
  0xdb   :  { %v887_v2 = vpop.f32.mrf.mxu1  ;;  %712 = vst.msk [vmem:[%s1684_s4 + $0x28] sm:$0xff] %vm129_vm0, %v648_v55  ;;  %v523_v3 = vmax.f32 %v293_v59, 0.0  ;;  %v304_v5 = vadd.f32 %v855_v1, %v1166_v33  ;;  %v653_v7 = vadd.f32 %v589_v57, %v525_v61  ;;  %v626_v55 = vld [vmem:[%s1683_s3 + $0x178] sm:$0xff]  ;;  %v624_v61 = vld [vmem:[%s1683_s3 + $0x168] sm:$0xff] }
  0xdc   :  { %744 = vst.msk [vmem:[%s1684_s4 + $0x128] sm:$0xff] %vm129_vm0, %v680_v56  ;;  %v555_v4 = vmax.f32 %v421_v60, 0.0  ;;  %v432_v6 = vadd.f32 %v887_v2, %v1166_v33  ;;  %v685_v8 = vadd.f32 %v621_v58, %v557_v62  ;;  %v295_v11 = vpop.f32.mrf.mxu0  ;;  %v592_v60 = vld [vmem:[%s1683_s3 + $0x68] sm:$0xff] }
  0xdd   :  { %v423_v12 = vpop.f32.mrf.mxu1  ;;  %v651_v13 = vadd.f32 %v587_v63, %v523_v3  ;;  %v526_v15 = vmax.f32 %v304_v5, 0.0  ;;  %717 = vst.msk [vmem:[%s1684_s4 + $0x50] sm:$0xff] %vm129_vm0, %v653_v7  ;;  %v296_v17 = vadd.f32 %v1166_v33, %v295_v11  ;;  %v629_v7 = vld [vmem:[%s1683_s3 + $0x190] sm:$0xff] }
  0xde   :  { %v683_v14 = vadd.f32 %v619_v0, %v555_v4  ;;  %v558_v16 = vmax.f32 %v432_v6, 0.0  ;;  %749 = vst.msk [vmem:[%s1684_s4 + $0x150] sm:$0xff] %vm129_vm0, %v685_v8  ;;  %v424_v18 = vadd.f32 %v1166_v33, %v423_v12  ;;  %v858_v19 = vpop.f32.mrf.mxu0  ;;  %v597_v6 = vld [vmem:[%s1683_s3 + $0x90] sm:$0xff] }
  0xdf   :  { %v890_v20 = vpop.f32.mrf.mxu1  ;;  %715 = vst.msk [vmem:[%s1684_s4 + $0x40] sm:$0xff] %vm129_vm0, %v651_v13  ;;  %v654_v21 = vadd.f32 %v590_v9, %v526_v15  ;;  %v317_v25 = vadd.f32 %v858_v19, %v1166_v33  ;;  %v524_v27 = vmax.f32 %v296_v17, 0.0 }
  0xe0   :  { %747 = vst.msk [vmem:[%s1684_s4 + $0x140] sm:$0xff] %vm129_vm0, %v683_v14  ;;  %v686_v22 = vadd.f32 %v622_v10, %v558_v16  ;;  %v445_v26 = vadd.f32 %v890_v20, %v1166_v33  ;;  %v556_v28 = vmax.f32 %v424_v18, 0.0  ;;  %v308_v31 = vpop.f32.mrf.mxu0  ;;  %v595_v20 = vld [vmem:[%s1683_s3 + $0x80] sm:$0xff] }
  0xe1   :  { %v436_v32 = vpop.f32.mrf.mxu1  ;;  %718 = vst.msk [vmem:[%s1684_s4 + $0x58] sm:$0xff] %vm129_vm0, %v654_v21  ;;  %v529_v34 = vmax.f32 %v317_v25, 0.0  ;;  %v309_v36 = vadd.f32 %v1166_v33, %v308_v31  ;;  %v652_v38 = vadd.f32 %v588_v23, %v524_v27  ;;  %v627_v21 = vld [vmem:[%s1683_s3 + $0x180] sm:$0xff]  ;;  %v630_v27 = vld [vmem:[%s1683_s3 + $0x198] sm:$0xff] }
  0xe2   :  { %750 = vst.msk [vmem:[%s1684_s4 + $0x158] sm:$0xff] %vm129_vm0, %v686_v22  ;;  %v561_v35 = vmax.f32 %v445_v26, 0.0  ;;  %v437_v37 = vadd.f32 %v1166_v33, %v436_v32  ;;  %v684_v39 = vadd.f32 %v620_v24, %v556_v28  ;;  %v859_v42 = vpop.f32.mrf.mxu0  ;;  %v598_v26 = vld [vmem:[%s1683_s3 + $0x98] sm:$0xff] }
  0xe3   :  { %v891_v43 = vpop.f32.mrf.mxu1  ;;  %v657_v44 = vadd.f32 %v593_v29, %v529_v34  ;;  %v527_v46 = vmax.f32 %v309_v36, 0.0  ;;  %716 = vst.msk [vmem:[%s1684_s4 + $0x48] sm:$0xff] %vm129_vm0, %v652_v38  ;;  %v320_v48 = vadd.f32 %v859_v42, %v1166_v33  ;;  %v628_v38 = vld [vmem:[%s1683_s3 + $0x188] sm:$0xff] }
  0xe4   :  { %v689_v45 = vadd.f32 %v625_v30, %v561_v35  ;;  %v559_v47 = vmax.f32 %v437_v37, 0.0  ;;  %748 = vst.msk [vmem:[%s1684_s4 + $0x148] sm:$0xff] %vm129_vm0, %v684_v39  ;;  %v448_v49 = vadd.f32 %v891_v43, %v1166_v33  ;;  %v311_v50 = vpop.f32.mrf.mxu0  ;;  %v596_v37 = vld [vmem:[%s1683_s3 + $0x88] sm:$0xff] }
  0xe5   :  { %v439_v51 = vpop.f32.mrf.mxu1  ;;  %721 = vst.msk [vmem:[%s1684_s4 + $0x70] sm:$0xff] %vm129_vm0, %v657_v44  ;;  %v655_v52 = vadd.f32 %v591_v40, %v527_v46  ;;  %v312_v56 = vadd.f32 %v1166_v33, %v311_v50  ;;  %v530_v58 = vmax.f32 %v320_v48, 0.0 }
  0xe6   :  { %753 = vst.msk [vmem:[%s1684_s4 + $0x170] sm:$0xff] %vm129_vm0, %v689_v45  ;;  %v687_v53 = vadd.f32 %v623_v41, %v559_v47  ;;  %v440_v57 = vadd.f32 %v1166_v33, %v439_v51  ;;  %v562_v59 = vmax.f32 %v448_v49, 0.0  ;;  %v862_v62 = vpop.f32.mrf.mxu0  ;;  %v601_v51 = vld [vmem:[%s1683_s3 + $0xb0] sm:$0xff] }
  0xe7   :  { %v894_v63 = vpop.f32.mrf.mxu1  ;;  %719 = vst.msk [vmem:[%s1684_s4 + $0x60] sm:$0xff] %vm129_vm0, %v655_v52  ;;  %v528_v0 = vmax.f32 %v312_v56, 0.0  ;;  %v333_v2 = vadd.f32 %v862_v62, %v1166_v33  ;;  %v658_v4 = vadd.f32 %v594_v54, %v530_v58  ;;  %v633_v52 = vld [vmem:[%s1683_s3 + $0x1b0] sm:$0xff]  ;;  %v631_v58 = vld [vmem:[%s1683_s3 + $0x1a0] sm:$0xff] }
  0xe8   :  { %751 = vst.msk [vmem:[%s1684_s4 + $0x160] sm:$0xff] %vm129_vm0, %v687_v53  ;;  %v560_v1 = vmax.f32 %v440_v57, 0.0  ;;  %v461_v3 = vadd.f32 %v894_v63, %v1166_v33  ;;  %v690_v5 = vadd.f32 %v626_v55, %v562_v59  ;;  %v324_v8 = vpop.f32.mrf.mxu0  ;;  %v599_v57 = vld [vmem:[%s1683_s3 + $0xa0] sm:$0xff] }
  0xe9   :  { %v452_v9 = vpop.f32.mrf.mxu1  ;;  %v656_v10 = vadd.f32 %v592_v60, %v528_v0  ;;  %v533_v12 = vmax.f32 %v333_v2, 0.0  ;;  %722 = vst.msk [vmem:[%s1684_s4 + $0x78] sm:$0xff] %vm129_vm0, %v658_v4  ;;  %v325_v14 = vadd.f32 %v1166_v33, %v324_v8  ;;  %v634_v4 = vld [vmem:[%s1683_s3 + $0x1b8] sm:$0xff] }
  0xea   :  { %v688_v11 = vadd.f32 %v624_v61, %v560_v1  ;;  %v565_v13 = vmax.f32 %v461_v3, 0.0  ;;  %754 = vst.msk [vmem:[%s1684_s4 + $0x178] sm:$0xff] %vm129_vm0, %v690_v5  ;;  %v453_v15 = vadd.f32 %v1166_v33, %v452_v9  ;;  %v863_v16 = vpop.f32.mrf.mxu0  ;;  %v602_v3 = vld [vmem:[%s1683_s3 + $0xb8] sm:$0xff] }
  0xeb   :  { %v895_v17 = vpop.f32.mrf.mxu1  ;;  %720 = vst.msk [vmem:[%s1684_s4 + $0x68] sm:$0xff] %vm129_vm0, %v656_v10  ;;  %v661_v18 = vadd.f32 %v597_v6, %v533_v12  ;;  %v336_v22 = vadd.f32 %v863_v16, %v1166_v33  ;;  %v531_v24 = vmax.f32 %v325_v14, 0.0 }
  0xec   :  { %752 = vst.msk [vmem:[%s1684_s4 + $0x168] sm:$0xff] %vm129_vm0, %v688_v11  ;;  %v693_v19 = vadd.f32 %v629_v7, %v565_v13  ;;  %v464_v23 = vadd.f32 %v895_v17, %v1166_v33  ;;  %v563_v25 = vmax.f32 %v453_v15, 0.0  ;;  %v327_v28 = vpop.f32.mrf.mxu0  ;;  %v600_v17 = vld [vmem:[%s1683_s3 + $0xa8] sm:$0xff] }
  0xed   :  { %v455_v29 = vpop.f32.mrf.mxu1  ;;  %725 = vst.msk [vmem:[%s1684_s4 + $0x90] sm:$0xff] %vm129_vm0, %v661_v18  ;;  %v534_v30 = vmax.f32 %v336_v22, 0.0  ;;  %v328_v32 = vadd.f32 %v1166_v33, %v327_v28  ;;  %v659_v35 = vadd.f32 %v595_v20, %v531_v24  ;;  %v632_v18 = vld [vmem:[%s1683_s3 + $0x1a8] sm:$0xff]  ;;  %v637_v24 = vld [vmem:[%s1683_s3 + $0x1d0] sm:$0xff] }
  0xee   :  { %757 = vst.msk [vmem:[%s1684_s4 + $0x190] sm:$0xff] %vm129_vm0, %v693_v19  ;;  %v566_v31 = vmax.f32 %v464_v23, 0.0  ;;  %v456_v34 = vadd.f32 %v1166_v33, %v455_v29  ;;  %v691_v36 = vadd.f32 %v627_v21, %v563_v25  ;;  %v866_v39 = vpop.f32.mrf.mxu0  ;;  %v605_v23 = vld [vmem:[%s1683_s3 + $0xd0] sm:$0xff] }
  0xef   :  { %v898_v40 = vpop.f32.mrf.mxu1  ;;  %v662_v41 = vadd.f32 %v598_v26, %v534_v30  ;;  %v532_v43 = vmax.f32 %v328_v32, 0.0  ;;  %723 = vst.msk [vmem:[%s1684_s4 + $0x80] sm:$0xff] %vm129_vm0, %v659_v35  ;;  %v349_v45 = vadd.f32 %v866_v39, %v1166_v33  ;;  %v635_v35 = vld [vmem:[%s1683_s3 + $0x1c0] sm:$0xff] }
  0xf0   :  { %v694_v42 = vadd.f32 %v630_v27, %v566_v31  ;;  %v564_v44 = vmax.f32 %v456_v34, 0.0  ;;  %755 = vst.msk [vmem:[%s1684_s4 + $0x180] sm:$0xff] %vm129_vm0, %v691_v36  ;;  %v477_v46 = vadd.f32 %v898_v40, %v1166_v33  ;;  %v340_v47 = vpop.f32.mrf.mxu0  ;;  %v603_v34 = vld [vmem:[%s1683_s3 + $0xc0] sm:$0xff] }
  0xf1   :  { %v468_v48 = vpop.f32.mrf.mxu1  ;;  %726 = vst.msk [vmem:[%s1684_s4 + $0x98] sm:$0xff] %vm129_vm0, %v662_v41  ;;  %v660_v49 = vadd.f32 %v596_v37, %v532_v43  ;;  %v341_v53 = vadd.f32 %v1166_v33, %v340_v47  ;;  %v537_v55 = vmax.f32 %v349_v45, 0.0 }
  0xf2   :  { %758 = vst.msk [vmem:[%s1684_s4 + $0x198] sm:$0xff] %vm129_vm0, %v694_v42  ;;  %v692_v50 = vadd.f32 %v628_v38, %v564_v44  ;;  %v469_v54 = vadd.f32 %v1166_v33, %v468_v48  ;;  %v569_v56 = vmax.f32 %v477_v46, 0.0  ;;  %v867_v59 = vpop.f32.mrf.mxu0  ;;  %v606_v48 = vld [vmem:[%s1683_s3 + $0xd8] sm:$0xff] }
  0xf3   :  { %v899_v60 = vpop.f32.mrf.mxu1  ;;  %724 = vst.msk [vmem:[%s1684_s4 + $0x88] sm:$0xff] %vm129_vm0, %v660_v49  ;;  %v535_v61 = vmax.f32 %v341_v53, 0.0  ;;  %v352_v63 = vadd.f32 %v867_v59, %v1166_v33  ;;  %v665_v1 = vadd.f32 %v601_v51, %v537_v55  ;;  %v638_v49 = vld [vmem:[%s1683_s3 + $0x1d8] sm:$0xff]  ;;  %v636_v55 = vld [vmem:[%s1683_s3 + $0x1c8] sm:$0xff] }
  0xf4   :  { %756 = vst.msk [vmem:[%s1684_s4 + $0x188] sm:$0xff] %vm129_vm0, %v692_v50  ;;  %v567_v62 = vmax.f32 %v469_v54, 0.0  ;;  %v480_v0 = vadd.f32 %v899_v60, %v1166_v33  ;;  %v697_v2 = vadd.f32 %v633_v52, %v569_v56  ;;  %v343_v5 = vpop.f32.mrf.mxu0  ;;  %v604_v54 = vld [vmem:[%s1683_s3 + $0xc8] sm:$0xff] }
  0xf5   :  { %v471_v6 = vpop.f32.mrf.mxu1  ;;  %v663_v7 = vadd.f32 %v599_v57, %v535_v61  ;;  %v538_v9 = vmax.f32 %v352_v63, 0.0  ;;  %729 = vst.msk [vmem:[%s1684_s4 + $0xb0] sm:$0xff] %vm129_vm0, %v665_v1  ;;  %v344_v11 = vadd.f32 %v1166_v33, %v343_v5  ;;  %v641_v1 = vld [vmem:[%s1683_s3 + $0x1f0] sm:$0xff] }
  0xf6   :  { %v695_v8 = vadd.f32 %v631_v58, %v567_v62  ;;  %v570_v10 = vmax.f32 %v480_v0, 0.0  ;;  %761 = vst.msk [vmem:[%s1684_s4 + $0x1b0] sm:$0xff] %vm129_vm0, %v697_v2  ;;  %v472_v12 = vadd.f32 %v1166_v33, %v471_v6  ;;  %v870_v13 = vpop.f32.mrf.mxu0  ;;  %v609_v0 = vld [vmem:[%s1683_s3 + $0xf0] sm:$0xff] }
  0xf7   :  { %v902_v14 = vpop.f32.mrf.mxu1  ;;  %727 = vst.msk [vmem:[%s1684_s4 + $0xa0] sm:$0xff] %vm129_vm0, %v663_v7  ;;  %v666_v15 = vadd.f32 %v602_v3, %v538_v9  ;;  %v365_v19 = vadd.f32 %v870_v13, %v1166_v33  ;;  %v536_v21 = vmax.f32 %v344_v11, 0.0 }
  0xf8   :  { %759 = vst.msk [vmem:[%s1684_s4 + $0x1a0] sm:$0xff] %vm129_vm0, %v695_v8  ;;  %v698_v16 = vadd.f32 %v634_v4, %v570_v10  ;;  %v493_v20 = vadd.f32 %v902_v14, %v1166_v33  ;;  %v568_v22 = vmax.f32 %v472_v12, 0.0  ;;  %v356_v25 = vpop.f32.mrf.mxu0  ;;  %v607_v14 = vld [vmem:[%s1683_s3 + $0xe0] sm:$0xff] }
  0xf9   :  { %v484_v26 = vpop.f32.mrf.mxu1  ;;  %730 = vst.msk [vmem:[%s1684_s4 + $0xb8] sm:$0xff] %vm129_vm0, %v666_v15  ;;  %v541_v27 = vmax.f32 %v365_v19, 0.0  ;;  %v357_v29 = vadd.f32 %v1166_v33, %v356_v25  ;;  %v664_v31 = vadd.f32 %v600_v17, %v536_v21  ;;  %v639_v15 = vld [vmem:[%s1683_s3 + $0x1e0] sm:$0xff]  ;;  %v642_v21 = vld [vmem:[%s1683_s3 + $0x1f8] sm:$0xff] }
  0xfa   :  { %762 = vst.msk [vmem:[%s1684_s4 + $0x1b8] sm:$0xff] %vm129_vm0, %v698_v16  ;;  %v573_v28 = vmax.f32 %v493_v20, 0.0  ;;  %v485_v30 = vadd.f32 %v1166_v33, %v484_v26  ;;  %v696_v32 = vadd.f32 %v632_v18, %v568_v22  ;;  %v871_v36 = vpop.f32.mrf.mxu0  ;;  %v610_v20 = vld [vmem:[%s1683_s3 + $0xf8] sm:$0xff] }
  0xfb   :  { %v903_v37 = vpop.f32.mrf.mxu1  ;;  %v669_v38 = vadd.f32 %v605_v23, %v541_v27  ;;  %v539_v40 = vmax.f32 %v357_v29, 0.0  ;;  %728 = vst.msk [vmem:[%s1684_s4 + $0xa8] sm:$0xff] %vm129_vm0, %v664_v31  ;;  %v368_v42 = vadd.f32 %v871_v36, %v1166_v33  ;;  %v640_v31 = vld [vmem:[%s1683_s3 + $0x1e8] sm:$0xff] }
  0xfc   :  { %v701_v39 = vadd.f32 %v637_v24, %v573_v28  ;;  %v571_v41 = vmax.f32 %v485_v30, 0.0  ;;  %760 = vst.msk [vmem:[%s1684_s4 + $0x1a8] sm:$0xff] %vm129_vm0, %v696_v32  ;;  %v496_v43 = vadd.f32 %v903_v37, %v1166_v33  ;;  %v359_v44 = vpop.f32.mrf.mxu0  ;;  %v608_v30 = vld [vmem:[%s1683_s3 + $0xe8] sm:$0xff] }
  0xfd   :  { %v487_v45 = vpop.f32.mrf.mxu1  ;;  %733 = vst.msk [vmem:[%s1684_s4 + $0xd0] sm:$0xff] %vm129_vm0, %v669_v38  ;;  %v667_v46 = vadd.f32 %v603_v34, %v539_v40  ;;  %v360_v50 = vadd.f32 %v1166_v33, %v359_v44  ;;  %v542_v52 = vmax.f32 %v368_v42, 0.0 }
  0xfe   :  { %765 = vst.msk [vmem:[%s1684_s4 + $0x1d0] sm:$0xff] %vm129_vm0, %v701_v39  ;;  %v699_v47 = vadd.f32 %v635_v35, %v571_v41  ;;  %v488_v51 = vadd.f32 %v1166_v33, %v487_v45  ;;  %v574_v53 = vmax.f32 %v496_v43, 0.0  ;;  %v874_v56 = vpop.f32.mrf.mxu0 }
  0xff   :  { %v906_v57 = vpop.f32.mrf.mxu1  ;;  %731 = vst.msk [vmem:[%s1684_s4 + $0xc0] sm:$0xff] %vm129_vm0, %v667_v46  ;;  %v540_v58 = vmax.f32 %v360_v50, 0.0  ;;  %v381_v60 = vadd.f32 %v874_v56, %v1166_v33  ;;  %v670_v62 = vadd.f32 %v606_v48, %v542_v52 }
 0x100   :  { %763 = vst.msk [vmem:[%s1684_s4 + $0x1c0] sm:$0xff] %vm129_vm0, %v699_v47  ;;  %v572_v59 = vmax.f32 %v488_v51, 0.0  ;;  %v509_v61 = vadd.f32 %v906_v57, %v1166_v33  ;;  %v702_v63 = vadd.f32 %v638_v49, %v574_v53  ;;  %v372_v2 = vpop.f32.mrf.mxu0 }
 0x101   :  { %v500_v3 = vpop.f32.mrf.mxu1  ;;  %v668_v4 = vadd.f32 %v604_v54, %v540_v58  ;;  %v545_v6 = vmax.f32 %v381_v60, 0.0  ;;  %734 = vst.msk [vmem:[%s1684_s4 + $0xd8] sm:$0xff] %vm129_vm0, %v670_v62  ;;  %v373_v8 = vadd.f32 %v1166_v33, %v372_v2 }
 0x102   :  { %v700_v5 = vadd.f32 %v636_v55, %v572_v59  ;;  %v577_v7 = vmax.f32 %v509_v61, 0.0  ;;  %766 = vst.msk [vmem:[%s1684_s4 + $0x1d8] sm:$0xff] %vm129_vm0, %v702_v63  ;;  %v501_v9 = vadd.f32 %v1166_v33, %v500_v3  ;;  %v875_v10 = vpop.f32.mrf.mxu0 }
 0x103   :  { %v907_v11 = vpop.f32.mrf.mxu1  ;;  %732 = vst.msk [vmem:[%s1684_s4 + $0xc8] sm:$0xff] %vm129_vm0, %v668_v4  ;;  %v673_v12 = vadd.f32 %v609_v0, %v545_v6  ;;  %v384_v16 = vadd.f32 %v875_v10, %v1166_v33  ;;  %v543_v18 = vmax.f32 %v373_v8, 0.0 }
 0x104   :  { %764 = vst.msk [vmem:[%s1684_s4 + $0x1c8] sm:$0xff] %vm129_vm0, %v700_v5  ;;  %v705_v13 = vadd.f32 %v641_v1, %v577_v7  ;;  %v512_v17 = vadd.f32 %v907_v11, %v1166_v33  ;;  %v575_v19 = vmax.f32 %v501_v9, 0.0  ;;  %v375_v22 = vpop.f32.mrf.mxu0 }
 0x105   :  { %v503_v23 = vpop.f32.mrf.mxu1  ;;  %737 = vst.msk [vmem:[%s1684_s4 + $0xf0] sm:$0xff] %vm129_vm0, %v673_v12  ;;  %v546_v24 = vmax.f32 %v384_v16, 0.0  ;;  %v376_v26 = vadd.f32 %v1166_v33, %v375_v22  ;;  %v671_v28 = vadd.f32 %v607_v14, %v543_v18 }
 0x106   :  { %769 = vst.msk [vmem:[%s1684_s4 + $0x1f0] sm:$0xff] %vm129_vm0, %v705_v13  ;;  %v578_v25 = vmax.f32 %v512_v17, 0.0  ;;  %v504_v27 = vadd.f32 %v1166_v33, %v503_v23  ;;  %v703_v29 = vadd.f32 %v639_v15, %v575_v19 }
 0x107   :  { %v674_v32 = vadd.f32 %v610_v20, %v546_v24  ;;  %v544_v35 = vmax.f32 %v376_v26, 0.0  ;;  %735 = vst.msk [vmem:[%s1684_s4 + $0xe0] sm:$0xff] %vm129_vm0, %v671_v28 }
 0x108   :  { %v706_v34 = vadd.f32 %v642_v21, %v578_v25  ;;  %v576_v36 = vmax.f32 %v504_v27, 0.0  ;;  %767 = vst.msk [vmem:[%s1684_s4 + $0x1e0] sm:$0xff] %vm129_vm0, %v703_v29 }
 0x109   :  { %738 = vst.msk [vmem:[%s1684_s4 + $0xf8] sm:$0xff] %vm129_vm0, %v674_v32  ;;  %v672_v33 = vadd.f32 %v608_v30, %v544_v35 }
 0x10a   :  { %770 = vst.msk [vmem:[%s1684_s4 + $0x1f8] sm:$0xff] %vm129_vm0, %v706_v34  ;;  %v704_v37 = vadd.f32 %v640_v31, %v576_v36 }
 0x10b   :  { %736 = vst.msk [vmem:[%s1684_s4 + $0xe8] sm:$0xff] %vm129_vm0, %v672_v33 }
 0x10c   :  { %768 = vst.msk [vmem:[%s1684_s4 + $0x1e8] sm:$0xff] %vm129_vm0, %v704_v37 }

// kernel: conv_trans_block_fwd.21
= control target key start
LH: loop header
LB: loop body
LE: loop exit
PB: predicated region body
PF: predicated region fallthrough
CT: control target
= control target key end

     0   :  { %vm135_vm0 = vcmask 130048   ;;  %s2428_s2 = inlined_call_operand.vmem [shape: bf16[16,16], index: 2, kind: input, shape index: {}]   ;;  %s2429_s4 = inlined_call_operand.vmem [shape: bf16[16,16], index: 4, kind: input, shape index: {}]   ;;  %s2430_s0 = inlined_call_operand.vmem [shape: f32[512,16], index: 0, kind: input, shape index: {}]   ;;  %s2431_s1 = inlined_call_operand.vmem [shape: f32[512,16], index: 1, kind: input, shape index: {}]   ;;  %s2432_s3 = inlined_call_operand.vmem [shape: f32[1,16], index: 3, kind: input, shape index: {}]   ;;  %s2433_s5 = inlined_call_operand.vmem [shape: f32[1,16], index: 5, kind: input, shape index: {}]   ;;  %s2434_s6 = inlined_call_operand.vmem [shape: f32[512,16], index: 6, kind: output, shape index: {}]  }
   0x1   :  { %v1543_v0 = vld [vmem:[%s2428_s2] sm:$0xff]   ;;  %v25_v3 = vld [vmem:[%s2430_s0 + $0x8] sm:$0xff]  ;;  %v26_v7 = vld [vmem:[%s2430_s0 + $0x10] sm:$0xff] }
   0x2   :  { %v1544_v1 = vld [vmem:[%s2429_s4] sm:$0xff]   ;;  %1411 = vmatprep.subr.bf16.mxu0 %v1543_v0  ;;  %v522_v6 = vld [vmem:[%s2431_s1 + $0x8] sm:$0xff]  ;;  %v27_v8 = vld [vmem:[%s2430_s0 + $0x18] sm:$0xff] }
   0x3   :  { %v24_v2 = vld [vmem:[%s2430_s0] sm:$0xff]  ;;  %1477 = vmatprep.subr.bf16.mxu1 %v1544_v1  ;;  %1412 = vmatpush3.bf16.msra.mxu0 %v1543_v0  ;;  %v89_v10 = vpack.c.bf16 %v27_v8, %v26_v7  ;;  %v523_v11 = vld [vmem:[%s2431_s1 + $0x10] sm:$0xff]  ;;  %v524_v12 = vld [vmem:[%s2431_s1 + $0x18] sm:$0xff] }
   0x4   :  { %v521_v4 = vld [vmem:[%s2431_s1] sm:$0xff]  ;;  %v88_v5 = vpack.c.bf16 %v25_v3, %v24_v2  ;;  %1478 = vmatpush3.bf16.msra.mxu1 %v1544_v1  ;;  %v586_v14 = vpack.c.bf16 %v524_v12, %v523_v11  ;;  %v29_v15 = vld [vmem:[%s2430_s0 + $0x28] sm:$0xff]  ;;  %v30_v20 = vld [vmem:[%s2430_s0 + $0x30] sm:$0xff] }
   0x5   :  { %v585_v9 = vpack.c.bf16 %v522_v6, %v521_v4  ;;  %v28_v13 = vld [vmem:[%s2430_s0 + $0x20] sm:$0xff]  ;;  %v526_v17 = vld [vmem:[%s2431_s1 + $0x28] sm:$0xff]  ;;  %v31_v21 = vld [vmem:[%s2430_s0 + $0x38] sm:$0xff] }
   0x6   :  { %1413 = vmatprep.mubr.msk.bf16.mxu0 %vm135_vm0, %v88_v5  ;;  %v525_v16 = vld [vmem:[%s2431_s1 + $0x20] sm:$0xff]  ;;  %v90_v18 = vpack.c.bf16 %v29_v15, %v28_v13  ;;  %v527_v22 = vld [vmem:[%s2431_s1 + $0x30] sm:$0xff]  ;;  %v528_v23 = vld [vmem:[%s2431_s1 + $0x38] sm:$0xff]  ;;  %v91_v28 = vpack.c.bf16 %v31_v21, %v30_v20 }
   0x7   :  { %1479 = vmatprep.mubr.msk.bf16.mxu1 %vm135_vm0, %v585_v9  ;;  %1414 = vmatmul.mubr.msk.bf16.vlgmr.msra.gmra.mxu0 %vm135_vm0, %v89_v10  ;;  %v587_v19 = vpack.c.bf16 %v526_v17, %v525_v16  ;;  %v32_v24 = vld [vmem:[%s2430_s0 + $0x40] sm:$0xff]  ;;  %v33_v25 = vld [vmem:[%s2430_s0 + $0x48] sm:$0xff]  ;;  %v588_v29 = vpack.c.bf16 %v528_v23, %v527_v22  ;;  %v34_v32 = vld [vmem:[%s2430_s0 + $0x50] sm:$0xff] }
   0x8   :  { %1480 = vmatmul.mubr.msk.bf16.vlgmr.msra.gmra.mxu1 %vm135_vm0, %v586_v14  ;;  %1417 = vmatprep.mubr.msk.bf16.mxu0 %vm135_vm0, %v90_v18  ;;  %v529_v26 = vld [vmem:[%s2431_s1 + $0x40] sm:$0xff]  ;;  %v530_v27 = vld [vmem:[%s2431_s1 + $0x48] sm:$0xff]  ;;  %v92_v30 = vpack.c.bf16 %v33_v25, %v32_v24  ;;  %v35_v33 = vld [vmem:[%s2430_s0 + $0x58] sm:$0xff] }
   0x9   :  { %1483 = vmatprep.mubr.msk.bf16.mxu1 %vm135_vm0, %v587_v19  ;;  %v589_v31 = vpack.c.bf16 %v530_v27, %v529_v26  ;;  %v531_v34 = vld [vmem:[%s2431_s1 + $0x50] sm:$0xff]  ;;  %v532_v35 = vld [vmem:[%s2431_s1 + $0x58] sm:$0xff]  ;;  %v36_v36 = vld [vmem:[%s2430_s0 + $0x60] sm:$0xff]  ;;  %v93_v40 = vpack.c.bf16 %v35_v33, %v34_v32 }
   0xa   :  { %v37_v37 = vld [vmem:[%s2430_s0 + $0x68] sm:$0xff]  ;;  %v533_v38 = vld [vmem:[%s2431_s1 + $0x60] sm:$0xff]  ;;  %v590_v41 = vpack.c.bf16 %v532_v35, %v531_v34  ;;  %v38_v44 = vld [vmem:[%s2430_s0 + $0x70] sm:$0xff] }
   0xb   :  { %v534_v39 = vld [vmem:[%s2431_s1 + $0x68] sm:$0xff]  ;;  %v94_v42 = vpack.c.bf16 %v37_v37, %v36_v36  ;;  %v39_v45 = vld [vmem:[%s2430_s0 + $0x78] sm:$0xff]  ;;  %v535_v46 = vld [vmem:[%s2431_s1 + $0x70] sm:$0xff] }
   0xc   :  { %v591_v43 = vpack.c.bf16 %v534_v39, %v533_v38  ;;  %v536_v47 = vld [vmem:[%s2431_s1 + $0x78] sm:$0xff]  ;;  %v40_v48 = vld [vmem:[%s2430_s0 + $0x80] sm:$0xff]  ;;  %v41_v49 = vld [vmem:[%s2430_s0 + $0x88] sm:$0xff]  ;;  %v95_v52 = vpack.c.bf16 %v39_v45, %v38_v44 }
   0xd   :  { %v537_v50 = vld [vmem:[%s2431_s1 + $0x80] sm:$0xff]  ;;  %v538_v51 = vld [vmem:[%s2431_s1 + $0x88] sm:$0xff]  ;;  %v592_v53 = vpack.c.bf16 %v536_v47, %v535_v46  ;;  %v96_v54 = vpack.c.bf16 %v41_v49, %v40_v48  ;;  %v42_v56 = vld [vmem:[%s2430_s0 + $0x90] sm:$0xff] }
   0xe   :  { %v593_v55 = vpack.c.bf16 %v538_v51, %v537_v50  ;;  %v43_v57 = vld [vmem:[%s2430_s0 + $0x98] sm:$0xff]  ;;  %v539_v58 = vld [vmem:[%s2431_s1 + $0x90] sm:$0xff]  ;;  %v44_v60 = vld [vmem:[%s2430_s0 + $0xa0] sm:$0xff] }
   0xf   :  { %1418 = vmatmul.mubr.msk.bf16.gmra.mxu0 %vm135_vm0, %v91_v28  ;;  %v540_v59 = vld [vmem:[%s2431_s1 + $0x98] sm:$0xff]  ;;  %v45_v61 = vld [vmem:[%s2430_s0 + $0xa8] sm:$0xff]  ;;  %v541_v62 = vld [vmem:[%s2431_s1 + $0xa0] sm:$0xff]  ;;  %v97_v0 = vpack.c.bf16 %v43_v57, %v42_v56 }
  0x10   :  { %1484 = vmatmul.mubr.msk.bf16.gmra.mxu1 %vm135_vm0, %v588_v29  ;;  %1421 = vmatprep.mubr.msk.bf16.mxu0 %vm135_vm0, %v92_v30  ;;  %v542_v63 = vld [vmem:[%s2431_s1 + $0xa8] sm:$0xff]  ;;  %v594_v1 = vpack.c.bf16 %v540_v59, %v539_v58  ;;  %v98_v2 = vpack.c.bf16 %v45_v61, %v44_v60  ;;  %v46_v4 = vld [vmem:[%s2430_s0 + $0xb0] sm:$0xff]  ;;  %v47_v5 = vld [vmem:[%s2430_s0 + $0xb8] sm:$0xff] }
  0x11   :  { %1487 = vmatprep.mubr.msk.bf16.mxu1 %vm135_vm0, %v589_v31  ;;  %v595_v3 = vpack.c.bf16 %v542_v63, %v541_v62  ;;  %v543_v6 = vld [vmem:[%s2431_s1 + $0xb0] sm:$0xff]  ;;  %v544_v7 = vld [vmem:[%s2431_s1 + $0xb8] sm:$0xff]  ;;  %v48_v8 = vld [vmem:[%s2430_s0 + $0xc0] sm:$0xff]  ;;  %v99_v12 = vpack.c.bf16 %v47_v5, %v46_v4 }
  0x12   :  { %v49_v9 = vld [vmem:[%s2430_s0 + $0xc8] sm:$0xff]  ;;  %v545_v10 = vld [vmem:[%s2431_s1 + $0xc0] sm:$0xff]  ;;  %v596_v13 = vpack.c.bf16 %v544_v7, %v543_v6  ;;  %v50_v16 = vld [vmem:[%s2430_s0 + $0xd0] sm:$0xff] }
  0x13   :  { %v546_v11 = vld [vmem:[%s2431_s1 + $0xc8] sm:$0xff]  ;;  %v100_v14 = vpack.c.bf16 %v49_v9, %v48_v8  ;;  %v51_v17 = vld [vmem:[%s2430_s0 + $0xd8] sm:$0xff]  ;;  %v547_v18 = vld [vmem:[%s2431_s1 + $0xd0] sm:$0xff] }
  0x14   :  { %v597_v15 = vpack.c.bf16 %v546_v11, %v545_v10  ;;  %v548_v19 = vld [vmem:[%s2431_s1 + $0xd8] sm:$0xff]  ;;  %v52_v20 = vld [vmem:[%s2430_s0 + $0xe0] sm:$0xff]  ;;  %v53_v21 = vld [vmem:[%s2430_s0 + $0xe8] sm:$0xff]  ;;  %v101_v24 = vpack.c.bf16 %v51_v17, %v50_v16 }
  0x15   :  { %v549_v22 = vld [vmem:[%s2431_s1 + $0xe0] sm:$0xff]  ;;  %v550_v23 = vld [vmem:[%s2431_s1 + $0xe8] sm:$0xff]  ;;  %v598_v25 = vpack.c.bf16 %v548_v19, %v547_v18  ;;  %v102_v26 = vpack.c.bf16 %v53_v21, %v52_v20  ;;  %v54_v28 = vld [vmem:[%s2430_s0 + $0xf0] sm:$0xff] }
  0x16   :  { %v599_v27 = vpack.c.bf16 %v550_v23, %v549_v22  ;;  %v55_v29 = vld [vmem:[%s2430_s0 + $0xf8] sm:$0xff]  ;;  %v551_v30 = vld [vmem:[%s2431_s1 + $0xf0] sm:$0xff]  ;;  %v56_v32 = vld [vmem:[%s2430_s0 + $0x100] sm:$0xff] }
  0x17   :  { %1422 = vmatmul.mubr.msk.bf16.gmra.mxu0 %vm135_vm0, %v93_v40  ;;  %v552_v31 = vld [vmem:[%s2431_s1 + $0xf8] sm:$0xff]  ;;  %v57_v33 = vld [vmem:[%s2430_s0 + $0x108] sm:$0xff]  ;;  %v553_v34 = vld [vmem:[%s2431_s1 + $0x100] sm:$0xff]  ;;  %v103_v36 = vpack.c.bf16 %v55_v29, %v54_v28 }
  0x18   :  { %1488 = vmatmul.mubr.msk.bf16.gmra.mxu1 %vm135_vm0, %v590_v41  ;;  %1425 = vmatprep.mubr.msk.bf16.mxu0 %vm135_vm0, %v94_v42  ;;  %v554_v35 = vld [vmem:[%s2431_s1 + $0x108] sm:$0xff]  ;;  %v600_v37 = vpack.c.bf16 %v552_v31, %v551_v30  ;;  %v104_v38 = vpack.c.bf16 %v57_v33, %v56_v32  ;;  %v58_v40 = vld [vmem:[%s2430_s0 + $0x110] sm:$0xff]  ;;  %v59_v41 = vld [vmem:[%s2430_s0 + $0x118] sm:$0xff] }
  0x19   :  { %1491 = vmatprep.mubr.msk.bf16.mxu1 %vm135_vm0, %v591_v43  ;;  %v601_v39 = vpack.c.bf16 %v554_v35, %v553_v34  ;;  %v555_v42 = vld [vmem:[%s2431_s1 + $0x110] sm:$0xff]  ;;  %v556_v43 = vld [vmem:[%s2431_s1 + $0x118] sm:$0xff]  ;;  %v60_v44 = vld [vmem:[%s2430_s0 + $0x120] sm:$0xff]  ;;  %v105_v48 = vpack.c.bf16 %v59_v41, %v58_v40 }
  0x1a   :  { %v61_v45 = vld [vmem:[%s2430_s0 + $0x128] sm:$0xff]  ;;  %v557_v46 = vld [vmem:[%s2431_s1 + $0x120] sm:$0xff]  ;;  %v602_v49 = vpack.c.bf16 %v556_v43, %v555_v42 }
  0x1b   :  { %v558_v47 = vld [vmem:[%s2431_s1 + $0x128] sm:$0xff]  ;;  %v106_v50 = vpack.c.bf16 %v61_v45, %v60_v44  ;;  %v64_v56 = vld [vmem:[%s2430_s0 + $0x140] sm:$0xff] }
  0x1c   :  { %v603_v51 = vpack.c.bf16 %v558_v47, %v557_v46  ;;  %v65_v57 = vld [vmem:[%s2430_s0 + $0x148] sm:$0xff]  ;;  %v561_v58 = vld [vmem:[%s2431_s1 + $0x140] sm:$0xff] }
  0x1d   :  { %v562_v59 = vld [vmem:[%s2431_s1 + $0x148] sm:$0xff]  ;;  %v108_v62 = vpack.c.bf16 %v65_v57, %v64_v56  ;;  %v68_v4 = vld [vmem:[%s2430_s0 + $0x160] sm:$0xff] }
  0x1e   :  { %v605_v63 = vpack.c.bf16 %v562_v59, %v561_v58  ;;  %v69_v5 = vld [vmem:[%s2430_s0 + $0x168] sm:$0xff]  ;;  %v565_v6 = vld [vmem:[%s2431_s1 + $0x160] sm:$0xff] }
  0x1f   :  { %1426 = vmatmul.mubr.msk.bf16.gmra.mxu0 %vm135_vm0, %v95_v52  ;;  %v62_v52 = vld [vmem:[%s2430_s0 + $0x130] sm:$0xff]  ;;  %v566_v7 = vld [vmem:[%s2431_s1 + $0x168] sm:$0xff]  ;;  %v110_v10 = vpack.c.bf16 %v69_v5, %v68_v4  ;;  %v72_v16 = vld [vmem:[%s2430_s0 + $0x180] sm:$0xff] }
  0x20   :  { %1492 = vmatmul.mubr.msk.bf16.gmra.mxu1 %vm135_vm0, %v592_v53  ;;  %1429 = vmatprep.mubr.msk.bf16.mxu0 %vm135_vm0, %v96_v54  ;;  %v63_v53 = vld [vmem:[%s2430_s0 + $0x138] sm:$0xff]  ;;  %v559_v54 = vld [vmem:[%s2431_s1 + $0x130] sm:$0xff]  ;;  %v607_v11 = vpack.c.bf16 %v566_v7, %v565_v6  ;;  %v73_v17 = vld [vmem:[%s2430_s0 + $0x188] sm:$0xff] }
  0x21   :  { %1495 = vmatprep.mubr.msk.bf16.mxu1 %vm135_vm0, %v593_v55  ;;  %v560_v55 = vld [vmem:[%s2431_s1 + $0x138] sm:$0xff]  ;;  %v107_v60 = vpack.c.bf16 %v63_v53, %v62_v52  ;;  %v569_v18 = vld [vmem:[%s2431_s1 + $0x180] sm:$0xff]  ;;  %v570_v19 = vld [vmem:[%s2431_s1 + $0x188] sm:$0xff]  ;;  %v112_v22 = vpack.c.bf16 %v73_v17, %v72_v16 }
  0x22   :  { %v604_v61 = vpack.c.bf16 %v560_v55, %v559_v54  ;;  %v609_v23 = vpack.c.bf16 %v570_v19, %v569_v18  ;;  %v76_v28 = vld [vmem:[%s2430_s0 + $0x1a0] sm:$0xff]  ;;  %v77_v29 = vld [vmem:[%s2430_s0 + $0x1a8] sm:$0xff] }
  0x23   :  { %v573_v30 = vld [vmem:[%s2431_s1 + $0x1a0] sm:$0xff]  ;;  %v574_v31 = vld [vmem:[%s2431_s1 + $0x1a8] sm:$0xff]  ;;  %v114_v34 = vpack.c.bf16 %v77_v29, %v76_v28 }
  0x24   :  { %v611_v35 = vpack.c.bf16 %v574_v31, %v573_v30  ;;  %v80_v40 = vld [vmem:[%s2430_s0 + $0x1c0] sm:$0xff]  ;;  %v81_v41 = vld [vmem:[%s2430_s0 + $0x1c8] sm:$0xff] }
  0x25   :  { %v577_v42 = vld [vmem:[%s2431_s1 + $0x1c0] sm:$0xff]  ;;  %v578_v43 = vld [vmem:[%s2431_s1 + $0x1c8] sm:$0xff]  ;;  %v116_v46 = vpack.c.bf16 %v81_v41, %v80_v40 }
  0x26   :  { %v613_v47 = vpack.c.bf16 %v578_v43, %v577_v42  ;;  %v84_v52 = vld [vmem:[%s2430_s0 + $0x1e0] sm:$0xff]  ;;  %v85_v53 = vld [vmem:[%s2430_s0 + $0x1e8] sm:$0xff] }
  0x27   :  { %1430 = vmatmul.mubr.msk.bf16.gmra.mxu0 %vm135_vm0, %v97_v0  ;;  %v66_v0 = vld [vmem:[%s2430_s0 + $0x150] sm:$0xff]  ;;  %v581_v54 = vld [vmem:[%s2431_s1 + $0x1e0] sm:$0xff]  ;;  %v582_v55 = vld [vmem:[%s2431_s1 + $0x1e8] sm:$0xff]  ;;  %v118_v58 = vpack.c.bf16 %v85_v53, %v84_v52 }
  0x28   :  { %1496 = vmatmul.mubr.msk.bf16.gmra.mxu1 %vm135_vm0, %v594_v1  ;;  %1433 = vmatprep.mubr.msk.bf16.mxu0 %vm135_vm0, %v98_v2  ;;  %v67_v1 = vld [vmem:[%s2430_s0 + $0x158] sm:$0xff]  ;;  %v563_v2 = vld [vmem:[%s2431_s1 + $0x150] sm:$0xff]  ;;  %v615_v59 = vpack.c.bf16 %v582_v55, %v581_v54  ;;  %v2043_v6 = vld [vmem:[%s2433_s5] ss:$0 sm:$0xff] }
  0x29   :  { %1499 = vmatprep.mubr.msk.bf16.mxu1 %vm135_vm0, %v595_v3  ;;  %v564_v3 = vld [vmem:[%s2431_s1 + $0x158] sm:$0xff]  ;;  %v109_v8 = vpack.c.bf16 %v67_v1, %v66_v0 }
  0x2a   :  { %v606_v9 = vpack.c.bf16 %v564_v3, %v563_v2  ;;  %v2037_v2 = vld [vmem:[%s2432_s3] ss:$0 sm:$0xff] }
  0x2f   :  { %1434 = vmatmul.mubr.msk.bf16.gmra.mxu0 %vm135_vm0, %v99_v12  ;;  %v70_v12 = vld [vmem:[%s2430_s0 + $0x170] sm:$0xff] }
  0x30   :  { %1500 = vmatmul.mubr.msk.bf16.gmra.mxu1 %vm135_vm0, %v596_v13  ;;  %1437 = vmatprep.mubr.msk.bf16.mxu0 %vm135_vm0, %v100_v14  ;;  %v71_v13 = vld [vmem:[%s2430_s0 + $0x178] sm:$0xff]  ;;  %v567_v14 = vld [vmem:[%s2431_s1 + $0x170] sm:$0xff] }
  0x31   :  { %1503 = vmatprep.mubr.msk.bf16.mxu1 %vm135_vm0, %v597_v15  ;;  %v568_v15 = vld [vmem:[%s2431_s1 + $0x178] sm:$0xff]  ;;  %v111_v20 = vpack.c.bf16 %v71_v13, %v70_v12 }
  0x32   :  { %v608_v21 = vpack.c.bf16 %v568_v15, %v567_v14 }
  0x37   :  { %1438 = vmatmul.mubr.msk.bf16.gmra.mxu0 %vm135_vm0, %v101_v24  ;;  %v74_v24 = vld [vmem:[%s2430_s0 + $0x190] sm:$0xff] }
  0x38   :  { %1504 = vmatmul.mubr.msk.bf16.gmra.mxu1 %vm135_vm0, %v598_v25  ;;  %1441 = vmatprep.mubr.msk.bf16.mxu0 %vm135_vm0, %v102_v26  ;;  %v75_v25 = vld [vmem:[%s2430_s0 + $0x198] sm:$0xff]  ;;  %v571_v26 = vld [vmem:[%s2431_s1 + $0x190] sm:$0xff] }
  0x39   :  { %1507 = vmatprep.mubr.msk.bf16.mxu1 %vm135_vm0, %v599_v27  ;;  %v572_v27 = vld [vmem:[%s2431_s1 + $0x198] sm:$0xff]  ;;  %v113_v32 = vpack.c.bf16 %v75_v25, %v74_v24 }
  0x3a   :  { %v610_v33 = vpack.c.bf16 %v572_v27, %v571_v26 }
  0x3f   :  { %1442 = vmatmul.mubr.msk.bf16.gmra.mxu0 %vm135_vm0, %v103_v36  ;;  %v78_v36 = vld [vmem:[%s2430_s0 + $0x1b0] sm:$0xff] }
  0x40   :  { %1508 = vmatmul.mubr.msk.bf16.gmra.mxu1 %vm135_vm0, %v600_v37  ;;  %1445 = vmatprep.mubr.msk.bf16.mxu0 %vm135_vm0, %v104_v38  ;;  %v79_v37 = vld [vmem:[%s2430_s0 + $0x1b8] sm:$0xff]  ;;  %v575_v38 = vld [vmem:[%s2431_s1 + $0x1b0] sm:$0xff] }
  0x41   :  { %1511 = vmatprep.mubr.msk.bf16.mxu1 %vm135_vm0, %v601_v39  ;;  %v576_v39 = vld [vmem:[%s2431_s1 + $0x1b8] sm:$0xff]  ;;  %v115_v44 = vpack.c.bf16 %v79_v37, %v78_v36 }
  0x42   :  { %v612_v45 = vpack.c.bf16 %v576_v39, %v575_v38 }
  0x47   :  { %1446 = vmatmul.mubr.msk.bf16.gmra.mxu0 %vm135_vm0, %v105_v48  ;;  %v82_v48 = vld [vmem:[%s2430_s0 + $0x1d0] sm:$0xff] }
  0x48   :  { %1512 = vmatmul.mubr.msk.bf16.gmra.mxu1 %vm135_vm0, %v602_v49  ;;  %1449 = vmatprep.mubr.msk.bf16.mxu0 %vm135_vm0, %v106_v50  ;;  %v83_v49 = vld [vmem:[%s2430_s0 + $0x1d8] sm:$0xff]  ;;  %v579_v50 = vld [vmem:[%s2431_s1 + $0x1d0] sm:$0xff] }
  0x49   :  { %1515 = vmatprep.mubr.msk.bf16.mxu1 %vm135_vm0, %v603_v51  ;;  %v580_v51 = vld [vmem:[%s2431_s1 + $0x1d8] sm:$0xff]  ;;  %v117_v56 = vpack.c.bf16 %v83_v49, %v82_v48 }
  0x4a   :  { %v614_v57 = vpack.c.bf16 %v580_v51, %v579_v50 }
  0x4f   :  { %1450 = vmatmul.mubr.msk.bf16.gmra.mxu0 %vm135_vm0, %v107_v60  ;;  %v86_v60 = vld [vmem:[%s2430_s0 + $0x1f0] sm:$0xff] }
  0x50   :  { %1516 = vmatmul.mubr.msk.bf16.gmra.mxu1 %vm135_vm0, %v604_v61  ;;  %1453 = vmatprep.mubr.msk.bf16.mxu0 %vm135_vm0, %v108_v62  ;;  %v87_v61 = vld [vmem:[%s2430_s0 + $0x1f8] sm:$0xff]  ;;  %v583_v62 = vld [vmem:[%s2431_s1 + $0x1f0] sm:$0xff] }
  0x51   :  { %1519 = vmatprep.mubr.msk.bf16.mxu1 %vm135_vm0, %v605_v63  ;;  %v584_v63 = vld [vmem:[%s2431_s1 + $0x1f8] sm:$0xff]  ;;  %v119_v0 = vpack.c.bf16 %v87_v61, %v86_v60 }
  0x52   :  { %v616_v1 = vpack.c.bf16 %v584_v63, %v583_v62 }
  0x57   :  { %1454 = vmatmul.mubr.msk.bf16.gmra.mxu0 %vm135_vm0, %v109_v8 }
  0x58   :  { %1520 = vmatmul.mubr.msk.bf16.gmra.mxu1 %vm135_vm0, %v606_v9  ;;  %1457 = vmatprep.mubr.msk.bf16.mxu0 %vm135_vm0, %v110_v10 }
  0x59   :  { %1523 = vmatprep.mubr.msk.bf16.mxu1 %vm135_vm0, %v607_v11 }
  0x5f   :  { %1458 = vmatmul.mubr.msk.bf16.gmra.mxu0 %vm135_vm0, %v111_v20 }
  0x60   :  { %1524 = vmatmul.mubr.msk.bf16.gmra.mxu1 %vm135_vm0, %v608_v21  ;;  %1461 = vmatprep.mubr.msk.bf16.mxu0 %vm135_vm0, %v112_v22 }
  0x61   :  { %1527 = vmatprep.mubr.msk.bf16.mxu1 %vm135_vm0, %v609_v23 }
  0x67   :  { %1462 = vmatmul.mubr.msk.bf16.gmra.mxu0 %vm135_vm0, %v113_v32 }
  0x68   :  { %1528 = vmatmul.mubr.msk.bf16.gmra.mxu1 %vm135_vm0, %v610_v33  ;;  %1465 = vmatprep.mubr.msk.bf16.mxu0 %vm135_vm0, %v114_v34 }
  0x69   :  { %1531 = vmatprep.mubr.msk.bf16.mxu1 %vm135_vm0, %v611_v35 }
  0x6f   :  { %1466 = vmatmul.mubr.msk.bf16.gmra.mxu0 %vm135_vm0, %v115_v44 }
  0x70   :  { %1532 = vmatmul.mubr.msk.bf16.gmra.mxu1 %vm135_vm0, %v612_v45  ;;  %1469 = vmatprep.mubr.msk.bf16.mxu0 %vm135_vm0, %v116_v46 }
  0x71   :  { %1535 = vmatprep.mubr.msk.bf16.mxu1 %vm135_vm0, %v613_v47 }
  0x77   :  { %1470 = vmatmul.mubr.msk.bf16.gmra.mxu0 %vm135_vm0, %v117_v56 }
  0x78   :  { %1536 = vmatmul.mubr.msk.bf16.gmra.mxu1 %vm135_vm0, %v614_v57  ;;  %1473 = vmatprep.mubr.msk.bf16.mxu0 %vm135_vm0, %v118_v58 }
  0x79   :  { %1539 = vmatprep.mubr.msk.bf16.mxu1 %vm135_vm0, %v615_v59 }
  0x7f   :  { %1474 = vmatmul.mubr.msk.bf16.gmra.mxu0 %vm135_vm0, %v119_v0 }
  0x80   :  { %1540 = vmatmul.mubr.msk.bf16.gmra.mxu1 %vm135_vm0, %v616_v1 }
  0xc7   :  { %v1415_v3 = vpop.f32.mrf.mxu0 }
  0xc8   :  { %v275_v4 = vadd.f32 %v1415_v3, %v2037_v2  ;;  %v1481_v5 = vpop.f32.mrf.mxu1 }
  0xc9   :  { %v266_v7 = vpop.f32.mrf.mxu0 }
  0xca   :  { %v1012_v8 = vadd.f32 %v1481_v5, %v275_v4  ;;  %v267_v9 = vadd.f32 %v2037_v2, %v266_v7  ;;  %v755_v10 = vpop.f32.mrf.mxu1 }
  0xcb   :  { %v1416_v11 = vpop.f32.mrf.mxu0 }
  0xcc   :  { %v1083_v12 = vadd.f32 %v2043_v6, %v1012_v8  ;;  %v1010_v13 = vadd.f32 %v755_v10, %v267_v9  ;;  %v278_v14 = vadd.f32 %v1416_v11, %v2037_v2  ;;  %v1482_v15 = vpop.f32.mrf.mxu1 }
  0xcd   :  { %v269_v16 = vpop.f32.mrf.mxu0 }
  0xce   :  { %v1147_v17 = vmax.f32 %v1083_v12, 0.0  ;;  %v1081_v18 = vadd.f32 %v2043_v6, %v1010_v13  ;;  %v1013_v19 = vadd.f32 %v1482_v15, %v278_v14  ;;  %v270_v20 = vadd.f32 %v2037_v2, %v269_v16  ;;  %v758_v21 = vpop.f32.mrf.mxu1 }
  0xcf   :  { %v1419_v22 = vpop.f32.mrf.mxu0 }
  0xd0   :  { %1211 = vst.msk [vmem:[%s2434_s6 + $0x10] sm:$0xff] %vm135_vm0, %v1147_v17  ;;  %v1145_v23 = vmax.f32 %v1081_v18, 0.0  ;;  %v1084_v24 = vadd.f32 %v2043_v6, %v1013_v19  ;;  %v1011_v25 = vadd.f32 %v758_v21, %v270_v20  ;;  %v291_v26 = vadd.f32 %v1419_v22, %v2037_v2  ;;  %v1485_v27 = vpop.f32.mrf.mxu1 }
  0xd1   :  { %v282_v28 = vpop.f32.mrf.mxu0 }
  0xd2   :  { %1209 = vst.msk [vmem:[%s2434_s6] sm:$0xff] %vm135_vm0, %v1145_v23  ;;  %v1148_v29 = vmax.f32 %v1084_v24, 0.0  ;;  %v1082_v30 = vadd.f32 %v2043_v6, %v1011_v25  ;;  %v1016_v31 = vadd.f32 %v1485_v27, %v291_v26  ;;  %v283_v32 = vadd.f32 %v2037_v2, %v282_v28  ;;  %v771_v33 = vpop.f32.mrf.mxu1 }
  0xd3   :  { %v1420_v34 = vpop.f32.mrf.mxu0 }
  0xd4   :  { %1212 = vst.msk [vmem:[%s2434_s6 + $0x18] sm:$0xff] %vm135_vm0, %v1148_v29  ;;  %v1146_v35 = vmax.f32 %v1082_v30, 0.0  ;;  %v1087_v36 = vadd.f32 %v2043_v6, %v1016_v31  ;;  %v1014_v37 = vadd.f32 %v771_v33, %v283_v32  ;;  %v294_v38 = vadd.f32 %v1420_v34, %v2037_v2  ;;  %v1486_v39 = vpop.f32.mrf.mxu1 }
  0xd5   :  { %v285_v40 = vpop.f32.mrf.mxu0 }
  0xd6   :  { %1210 = vst.msk [vmem:[%s2434_s6 + $0x8] sm:$0xff] %vm135_vm0, %v1146_v35  ;;  %v1151_v41 = vmax.f32 %v1087_v36, 0.0  ;;  %v1085_v42 = vadd.f32 %v2043_v6, %v1014_v37  ;;  %v1017_v43 = vadd.f32 %v1486_v39, %v294_v38  ;;  %v286_v44 = vadd.f32 %v2037_v2, %v285_v40  ;;  %v774_v45 = vpop.f32.mrf.mxu1 }
  0xd7   :  { %v1423_v46 = vpop.f32.mrf.mxu0 }
  0xd8   :  { %1215 = vst.msk [vmem:[%s2434_s6 + $0x30] sm:$0xff] %vm135_vm0, %v1151_v41  ;;  %v1149_v47 = vmax.f32 %v1085_v42, 0.0  ;;  %v1088_v48 = vadd.f32 %v2043_v6, %v1017_v43  ;;  %v1015_v49 = vadd.f32 %v774_v45, %v286_v44  ;;  %v307_v50 = vadd.f32 %v1423_v46, %v2037_v2  ;;  %v1489_v51 = vpop.f32.mrf.mxu1 }
  0xd9   :  { %v298_v52 = vpop.f32.mrf.mxu0 }
  0xda   :  { %1213 = vst.msk [vmem:[%s2434_s6 + $0x20] sm:$0xff] %vm135_vm0, %v1149_v47  ;;  %v1152_v53 = vmax.f32 %v1088_v48, 0.0  ;;  %v1086_v54 = vadd.f32 %v2043_v6, %v1015_v49  ;;  %v1020_v55 = vadd.f32 %v1489_v51, %v307_v50  ;;  %v299_v56 = vadd.f32 %v2037_v2, %v298_v52  ;;  %v787_v57 = vpop.f32.mrf.mxu1 }
  0xdb   :  { %v1424_v58 = vpop.f32.mrf.mxu0 }
  0xdc   :  { %1216 = vst.msk [vmem:[%s2434_s6 + $0x38] sm:$0xff] %vm135_vm0, %v1152_v53  ;;  %v1150_v59 = vmax.f32 %v1086_v54, 0.0  ;;  %v1091_v60 = vadd.f32 %v2043_v6, %v1020_v55  ;;  %v1018_v61 = vadd.f32 %v787_v57, %v299_v56  ;;  %v310_v62 = vadd.f32 %v1424_v58, %v2037_v2  ;;  %v1490_v63 = vpop.f32.mrf.mxu1 }
  0xdd   :  { %v301_v0 = vpop.f32.mrf.mxu0 }
  0xde   :  { %1214 = vst.msk [vmem:[%s2434_s6 + $0x28] sm:$0xff] %vm135_vm0, %v1150_v59  ;;  %v1155_v1 = vmax.f32 %v1091_v60, 0.0  ;;  %v1089_v3 = vadd.f32 %v2043_v6, %v1018_v61  ;;  %v1021_v4 = vadd.f32 %v1490_v63, %v310_v62  ;;  %v302_v5 = vadd.f32 %v2037_v2, %v301_v0  ;;  %v790_v7 = vpop.f32.mrf.mxu1 }
  0xdf   :  { %v1427_v8 = vpop.f32.mrf.mxu0 }
  0xe0   :  { %1219 = vst.msk [vmem:[%s2434_s6 + $0x50] sm:$0xff] %vm135_vm0, %v1155_v1  ;;  %v1153_v9 = vmax.f32 %v1089_v3, 0.0  ;;  %v1092_v10 = vadd.f32 %v2043_v6, %v1021_v4  ;;  %v1019_v11 = vadd.f32 %v790_v7, %v302_v5  ;;  %v323_v12 = vadd.f32 %v1427_v8, %v2037_v2  ;;  %v1493_v13 = vpop.f32.mrf.mxu1 }
  0xe1   :  { %v314_v14 = vpop.f32.mrf.mxu0 }
  0xe2   :  { %1217 = vst.msk [vmem:[%s2434_s6 + $0x40] sm:$0xff] %vm135_vm0, %v1153_v9  ;;  %v1156_v15 = vmax.f32 %v1092_v10, 0.0  ;;  %v1090_v16 = vadd.f32 %v2043_v6, %v1019_v11  ;;  %v1024_v17 = vadd.f32 %v1493_v13, %v323_v12  ;;  %v315_v18 = vadd.f32 %v2037_v2, %v314_v14  ;;  %v803_v19 = vpop.f32.mrf.mxu1 }
  0xe3   :  { %v1428_v20 = vpop.f32.mrf.mxu0 }
  0xe4   :  { %1220 = vst.msk [vmem:[%s2434_s6 + $0x58] sm:$0xff] %vm135_vm0, %v1156_v15  ;;  %v1154_v21 = vmax.f32 %v1090_v16, 0.0  ;;  %v1095_v22 = vadd.f32 %v2043_v6, %v1024_v17  ;;  %v1022_v23 = vadd.f32 %v803_v19, %v315_v18  ;;  %v326_v24 = vadd.f32 %v1428_v20, %v2037_v2  ;;  %v1494_v25 = vpop.f32.mrf.mxu1 }
  0xe5   :  { %v317_v26 = vpop.f32.mrf.mxu0 }
  0xe6   :  { %1218 = vst.msk [vmem:[%s2434_s6 + $0x48] sm:$0xff] %vm135_vm0, %v1154_v21  ;;  %v1159_v27 = vmax.f32 %v1095_v22, 0.0  ;;  %v1093_v28 = vadd.f32 %v2043_v6, %v1022_v23  ;;  %v1025_v29 = vadd.f32 %v1494_v25, %v326_v24  ;;  %v318_v30 = vadd.f32 %v2037_v2, %v317_v26  ;;  %v806_v31 = vpop.f32.mrf.mxu1 }
  0xe7   :  { %v1431_v32 = vpop.f32.mrf.mxu0 }
  0xe8   :  { %1223 = vst.msk [vmem:[%s2434_s6 + $0x70] sm:$0xff] %vm135_vm0, %v1159_v27  ;;  %v1157_v33 = vmax.f32 %v1093_v28, 0.0  ;;  %v1096_v34 = vadd.f32 %v2043_v6, %v1025_v29  ;;  %v1023_v35 = vadd.f32 %v806_v31, %v318_v30  ;;  %v339_v36 = vadd.f32 %v1431_v32, %v2037_v2  ;;  %v1497_v37 = vpop.f32.mrf.mxu1 }
  0xe9   :  { %v330_v38 = vpop.f32.mrf.mxu0 }
  0xea   :  { %1221 = vst.msk [vmem:[%s2434_s6 + $0x60] sm:$0xff] %vm135_vm0, %v1157_v33  ;;  %v1160_v39 = vmax.f32 %v1096_v34, 0.0  ;;  %v1094_v40 = vadd.f32 %v2043_v6, %v1023_v35  ;;  %v1028_v41 = vadd.f32 %v1497_v37, %v339_v36  ;;  %v331_v42 = vadd.f32 %v2037_v2, %v330_v38  ;;  %v819_v43 = vpop.f32.mrf.mxu1 }
  0xeb   :  { %v1432_v44 = vpop.f32.mrf.mxu0 }
  0xec   :  { %1224 = vst.msk [vmem:[%s2434_s6 + $0x78] sm:$0xff] %vm135_vm0, %v1160_v39  ;;  %v1158_v45 = vmax.f32 %v1094_v40, 0.0  ;;  %v1099_v46 = vadd.f32 %v2043_v6, %v1028_v41  ;;  %v1026_v47 = vadd.f32 %v819_v43, %v331_v42  ;;  %v342_v48 = vadd.f32 %v1432_v44, %v2037_v2  ;;  %v1498_v49 = vpop.f32.mrf.mxu1 }
  0xed   :  { %v333_v50 = vpop.f32.mrf.mxu0 }
  0xee   :  { %1222 = vst.msk [vmem:[%s2434_s6 + $0x68] sm:$0xff] %vm135_vm0, %v1158_v45  ;;  %v1163_v51 = vmax.f32 %v1099_v46, 0.0  ;;  %v1097_v52 = vadd.f32 %v2043_v6, %v1026_v47  ;;  %v1029_v53 = vadd.f32 %v1498_v49, %v342_v48  ;;  %v334_v54 = vadd.f32 %v2037_v2, %v333_v50  ;;  %v822_v55 = vpop.f32.mrf.mxu1 }
  0xef   :  { %v1435_v56 = vpop.f32.mrf.mxu0 }
  0xf0   :  { %1227 = vst.msk [vmem:[%s2434_s6 + $0x90] sm:$0xff] %vm135_vm0, %v1163_v51  ;;  %v1161_v57 = vmax.f32 %v1097_v52, 0.0  ;;  %v1100_v58 = vadd.f32 %v2043_v6, %v1029_v53  ;;  %v1027_v59 = vadd.f32 %v822_v55, %v334_v54  ;;  %v355_v60 = vadd.f32 %v1435_v56, %v2037_v2  ;;  %v1501_v61 = vpop.f32.mrf.mxu1 }
  0xf1   :  { %v346_v62 = vpop.f32.mrf.mxu0 }
  0xf2   :  { %1225 = vst.msk [vmem:[%s2434_s6 + $0x80] sm:$0xff] %vm135_vm0, %v1161_v57  ;;  %v1164_v63 = vmax.f32 %v1100_v58, 0.0  ;;  %v1098_v0 = vadd.f32 %v2043_v6, %v1027_v59  ;;  %v1032_v1 = vadd.f32 %v1501_v61, %v355_v60  ;;  %v347_v3 = vadd.f32 %v2037_v2, %v346_v62  ;;  %v835_v4 = vpop.f32.mrf.mxu1 }
  0xf3   :  { %v1436_v5 = vpop.f32.mrf.mxu0 }
  0xf4   :  { %1228 = vst.msk [vmem:[%s2434_s6 + $0x98] sm:$0xff] %vm135_vm0, %v1164_v63  ;;  %v1162_v7 = vmax.f32 %v1098_v0, 0.0  ;;  %v1103_v8 = vadd.f32 %v2043_v6, %v1032_v1  ;;  %v1030_v9 = vadd.f32 %v835_v4, %v347_v3  ;;  %v358_v10 = vadd.f32 %v1436_v5, %v2037_v2  ;;  %v1502_v11 = vpop.f32.mrf.mxu1 }
  0xf5   :  { %v349_v12 = vpop.f32.mrf.mxu0 }
  0xf6   :  { %1226 = vst.msk [vmem:[%s2434_s6 + $0x88] sm:$0xff] %vm135_vm0, %v1162_v7  ;;  %v1167_v13 = vmax.f32 %v1103_v8, 0.0  ;;  %v1101_v14 = vadd.f32 %v2043_v6, %v1030_v9  ;;  %v1033_v15 = vadd.f32 %v1502_v11, %v358_v10  ;;  %v350_v16 = vadd.f32 %v2037_v2, %v349_v12  ;;  %v838_v17 = vpop.f32.mrf.mxu1 }
  0xf7   :  { %v1439_v18 = vpop.f32.mrf.mxu0 }
  0xf8   :  { %1231 = vst.msk [vmem:[%s2434_s6 + $0xb0] sm:$0xff] %vm135_vm0, %v1167_v13  ;;  %v1165_v19 = vmax.f32 %v1101_v14, 0.0  ;;  %v1104_v20 = vadd.f32 %v2043_v6, %v1033_v15  ;;  %v1031_v21 = vadd.f32 %v838_v17, %v350_v16  ;;  %v371_v22 = vadd.f32 %v1439_v18, %v2037_v2  ;;  %v1505_v23 = vpop.f32.mrf.mxu1 }
  0xf9   :  { %v362_v24 = vpop.f32.mrf.mxu0 }
  0xfa   :  { %1229 = vst.msk [vmem:[%s2434_s6 + $0xa0] sm:$0xff] %vm135_vm0, %v1165_v19  ;;  %v1168_v25 = vmax.f32 %v1104_v20, 0.0  ;;  %v1102_v26 = vadd.f32 %v2043_v6, %v1031_v21  ;;  %v1036_v27 = vadd.f32 %v1505_v23, %v371_v22  ;;  %v363_v28 = vadd.f32 %v2037_v2, %v362_v24  ;;  %v851_v29 = vpop.f32.mrf.mxu1 }
  0xfb   :  { %v1440_v30 = vpop.f32.mrf.mxu0 }
  0xfc   :  { %1232 = vst.msk [vmem:[%s2434_s6 + $0xb8] sm:$0xff] %vm135_vm0, %v1168_v25  ;;  %v1166_v31 = vmax.f32 %v1102_v26, 0.0  ;;  %v1107_v32 = vadd.f32 %v2043_v6, %v1036_v27  ;;  %v1034_v33 = vadd.f32 %v851_v29, %v363_v28  ;;  %v374_v34 = vadd.f32 %v1440_v30, %v2037_v2  ;;  %v1506_v35 = vpop.f32.mrf.mxu1 }
  0xfd   :  { %v365_v36 = vpop.f32.mrf.mxu0 }
  0xfe   :  { %1230 = vst.msk [vmem:[%s2434_s6 + $0xa8] sm:$0xff] %vm135_vm0, %v1166_v31  ;;  %v1171_v37 = vmax.f32 %v1107_v32, 0.0  ;;  %v1105_v38 = vadd.f32 %v2043_v6, %v1034_v33  ;;  %v1037_v39 = vadd.f32 %v1506_v35, %v374_v34  ;;  %v366_v40 = vadd.f32 %v2037_v2, %v365_v36  ;;  %v854_v41 = vpop.f32.mrf.mxu1 }
  0xff   :  { %v1443_v42 = vpop.f32.mrf.mxu0 }
 0x100   :  { %1235 = vst.msk [vmem:[%s2434_s6 + $0xd0] sm:$0xff] %vm135_vm0, %v1171_v37  ;;  %v1169_v43 = vmax.f32 %v1105_v38, 0.0  ;;  %v1108_v44 = vadd.f32 %v2043_v6, %v1037_v39  ;;  %v1035_v45 = vadd.f32 %v854_v41, %v366_v40  ;;  %v387_v46 = vadd.f32 %v1443_v42, %v2037_v2  ;;  %v1509_v47 = vpop.f32.mrf.mxu1 }
 0x101   :  { %v378_v48 = vpop.f32.mrf.mxu0 }
 0x102   :  { %1233 = vst.msk [vmem:[%s2434_s6 + $0xc0] sm:$0xff] %vm135_vm0, %v1169_v43  ;;  %v1172_v49 = vmax.f32 %v1108_v44, 0.0  ;;  %v1106_v50 = vadd.f32 %v2043_v6, %v1035_v45  ;;  %v1040_v51 = vadd.f32 %v1509_v47, %v387_v46  ;;  %v379_v52 = vadd.f32 %v2037_v2, %v378_v48  ;;  %v867_v53 = vpop.f32.mrf.mxu1 }
 0x103   :  { %v1444_v54 = vpop.f32.mrf.mxu0 }
 0x104   :  { %1236 = vst.msk [vmem:[%s2434_s6 + $0xd8] sm:$0xff] %vm135_vm0, %v1172_v49  ;;  %v1170_v55 = vmax.f32 %v1106_v50, 0.0  ;;  %v1111_v56 = vadd.f32 %v2043_v6, %v1040_v51  ;;  %v1038_v57 = vadd.f32 %v867_v53, %v379_v52  ;;  %v390_v58 = vadd.f32 %v1444_v54, %v2037_v2  ;;  %v1510_v59 = vpop.f32.mrf.mxu1 }
 0x105   :  { %v381_v60 = vpop.f32.mrf.mxu0 }
 0x106   :  { %1234 = vst.msk [vmem:[%s2434_s6 + $0xc8] sm:$0xff] %vm135_vm0, %v1170_v55  ;;  %v1175_v61 = vmax.f32 %v1111_v56, 0.0  ;;  %v1109_v62 = vadd.f32 %v2043_v6, %v1038_v57  ;;  %v1041_v63 = vadd.f32 %v1510_v59, %v390_v58  ;;  %v382_v0 = vadd.f32 %v2037_v2, %v381_v60  ;;  %v870_v1 = vpop.f32.mrf.mxu1 }
 0x107   :  { %v1447_v3 = vpop.f32.mrf.mxu0 }
 0x108   :  { %1239 = vst.msk [vmem:[%s2434_s6 + $0xf0] sm:$0xff] %vm135_vm0, %v1175_v61  ;;  %v1173_v4 = vmax.f32 %v1109_v62, 0.0  ;;  %v1112_v5 = vadd.f32 %v2043_v6, %v1041_v63  ;;  %v1039_v7 = vadd.f32 %v870_v1, %v382_v0  ;;  %v403_v8 = vadd.f32 %v1447_v3, %v2037_v2  ;;  %v1513_v9 = vpop.f32.mrf.mxu1 }
 0x109   :  { %v394_v10 = vpop.f32.mrf.mxu0 }
 0x10a   :  { %1237 = vst.msk [vmem:[%s2434_s6 + $0xe0] sm:$0xff] %vm135_vm0, %v1173_v4  ;;  %v1176_v11 = vmax.f32 %v1112_v5, 0.0  ;;  %v1110_v12 = vadd.f32 %v2043_v6, %v1039_v7  ;;  %v1044_v13 = vadd.f32 %v1513_v9, %v403_v8  ;;  %v395_v14 = vadd.f32 %v2037_v2, %v394_v10  ;;  %v883_v15 = vpop.f32.mrf.mxu1 }
 0x10b   :  { %v1448_v16 = vpop.f32.mrf.mxu0 }
 0x10c   :  { %1240 = vst.msk [vmem:[%s2434_s6 + $0xf8] sm:$0xff] %vm135_vm0, %v1176_v11  ;;  %v1174_v17 = vmax.f32 %v1110_v12, 0.0  ;;  %v1115_v18 = vadd.f32 %v2043_v6, %v1044_v13  ;;  %v1042_v19 = vadd.f32 %v883_v15, %v395_v14  ;;  %v406_v20 = vadd.f32 %v1448_v16, %v2037_v2  ;;  %v1514_v21 = vpop.f32.mrf.mxu1 }
 0x10d   :  { %v397_v22 = vpop.f32.mrf.mxu0 }
 0x10e   :  { %1238 = vst.msk [vmem:[%s2434_s6 + $0xe8] sm:$0xff] %vm135_vm0, %v1174_v17  ;;  %v1179_v23 = vmax.f32 %v1115_v18, 0.0  ;;  %v1113_v24 = vadd.f32 %v2043_v6, %v1042_v19  ;;  %v1045_v25 = vadd.f32 %v1514_v21, %v406_v20  ;;  %v398_v26 = vadd.f32 %v2037_v2, %v397_v22  ;;  %v886_v27 = vpop.f32.mrf.mxu1 }
 0x10f   :  { %v1451_v28 = vpop.f32.mrf.mxu0 }
 0x110   :  { %1243 = vst.msk [vmem:[%s2434_s6 + $0x110] sm:$0xff] %vm135_vm0, %v1179_v23  ;;  %v1177_v29 = vmax.f32 %v1113_v24, 0.0  ;;  %v1116_v30 = vadd.f32 %v2043_v6, %v1045_v25  ;;  %v1043_v31 = vadd.f32 %v886_v27, %v398_v26  ;;  %v419_v32 = vadd.f32 %v1451_v28, %v2037_v2  ;;  %v1517_v33 = vpop.f32.mrf.mxu1 }
 0x111   :  { %v410_v34 = vpop.f32.mrf.mxu0 }
 0x112   :  { %1241 = vst.msk [vmem:[%s2434_s6 + $0x100] sm:$0xff] %vm135_vm0, %v1177_v29  ;;  %v1180_v35 = vmax.f32 %v1116_v30, 0.0  ;;  %v1114_v36 = vadd.f32 %v2043_v6, %v1043_v31  ;;  %v1048_v37 = vadd.f32 %v1517_v33, %v419_v32  ;;  %v411_v38 = vadd.f32 %v2037_v2, %v410_v34  ;;  %v899_v39 = vpop.f32.mrf.mxu1 }
 0x113   :  { %v1452_v40 = vpop.f32.mrf.mxu0 }
 0x114   :  { %1244 = vst.msk [vmem:[%s2434_s6 + $0x118] sm:$0xff] %vm135_vm0, %v1180_v35  ;;  %v1178_v41 = vmax.f32 %v1114_v36, 0.0  ;;  %v1119_v42 = vadd.f32 %v2043_v6, %v1048_v37  ;;  %v1046_v43 = vadd.f32 %v899_v39, %v411_v38  ;;  %v422_v44 = vadd.f32 %v1452_v40, %v2037_v2  ;;  %v1518_v45 = vpop.f32.mrf.mxu1 }
 0x115   :  { %v413_v46 = vpop.f32.mrf.mxu0 }
 0x116   :  { %1242 = vst.msk [vmem:[%s2434_s6 + $0x108] sm:$0xff] %vm135_vm0, %v1178_v41  ;;  %v1183_v47 = vmax.f32 %v1119_v42, 0.0  ;;  %v1117_v48 = vadd.f32 %v2043_v6, %v1046_v43  ;;  %v1049_v49 = vadd.f32 %v1518_v45, %v422_v44  ;;  %v414_v50 = vadd.f32 %v2037_v2, %v413_v46  ;;  %v902_v51 = vpop.f32.mrf.mxu1 }
 0x117   :  { %v1455_v52 = vpop.f32.mrf.mxu0 }
 0x118   :  { %1247 = vst.msk [vmem:[%s2434_s6 + $0x130] sm:$0xff] %vm135_vm0, %v1183_v47  ;;  %v1181_v53 = vmax.f32 %v1117_v48, 0.0  ;;  %v1120_v54 = vadd.f32 %v2043_v6, %v1049_v49  ;;  %v1047_v55 = vadd.f32 %v902_v51, %v414_v50  ;;  %v435_v56 = vadd.f32 %v1455_v52, %v2037_v2  ;;  %v1521_v57 = vpop.f32.mrf.mxu1 }
 0x119   :  { %v426_v58 = vpop.f32.mrf.mxu0 }
 0x11a   :  { %1245 = vst.msk [vmem:[%s2434_s6 + $0x120] sm:$0xff] %vm135_vm0, %v1181_v53  ;;  %v1184_v59 = vmax.f32 %v1120_v54, 0.0  ;;  %v1118_v60 = vadd.f32 %v2043_v6, %v1047_v55  ;;  %v1052_v61 = vadd.f32 %v1521_v57, %v435_v56  ;;  %v427_v62 = vadd.f32 %v2037_v2, %v426_v58  ;;  %v915_v63 = vpop.f32.mrf.mxu1 }
 0x11b   :  { %v1456_v0 = vpop.f32.mrf.mxu0 }
 0x11c   :  { %1248 = vst.msk [vmem:[%s2434_s6 + $0x138] sm:$0xff] %vm135_vm0, %v1184_v59  ;;  %v1182_v1 = vmax.f32 %v1118_v60, 0.0  ;;  %v1123_v3 = vadd.f32 %v2043_v6, %v1052_v61  ;;  %v1050_v4 = vadd.f32 %v915_v63, %v427_v62  ;;  %v438_v5 = vadd.f32 %v1456_v0, %v2037_v2  ;;  %v1522_v7 = vpop.f32.mrf.mxu1 }
 0x11d   :  { %v429_v8 = vpop.f32.mrf.mxu0 }
 0x11e   :  { %1246 = vst.msk [vmem:[%s2434_s6 + $0x128] sm:$0xff] %vm135_vm0, %v1182_v1  ;;  %v1187_v9 = vmax.f32 %v1123_v3, 0.0  ;;  %v1121_v10 = vadd.f32 %v2043_v6, %v1050_v4  ;;  %v1053_v11 = vadd.f32 %v1522_v7, %v438_v5  ;;  %v430_v12 = vadd.f32 %v2037_v2, %v429_v8  ;;  %v918_v13 = vpop.f32.mrf.mxu1 }
 0x11f   :  { %v1459_v14 = vpop.f32.mrf.mxu0 }
 0x120   :  { %1251 = vst.msk [vmem:[%s2434_s6 + $0x150] sm:$0xff] %vm135_vm0, %v1187_v9  ;;  %v1185_v15 = vmax.f32 %v1121_v10, 0.0  ;;  %v1124_v16 = vadd.f32 %v2043_v6, %v1053_v11  ;;  %v1051_v17 = vadd.f32 %v918_v13, %v430_v12  ;;  %v451_v18 = vadd.f32 %v1459_v14, %v2037_v2  ;;  %v1525_v19 = vpop.f32.mrf.mxu1 }
 0x121   :  { %v442_v20 = vpop.f32.mrf.mxu0 }
 0x122   :  { %1249 = vst.msk [vmem:[%s2434_s6 + $0x140] sm:$0xff] %vm135_vm0, %v1185_v15  ;;  %v1188_v21 = vmax.f32 %v1124_v16, 0.0  ;;  %v1122_v22 = vadd.f32 %v2043_v6, %v1051_v17  ;;  %v1056_v23 = vadd.f32 %v1525_v19, %v451_v18  ;;  %v443_v24 = vadd.f32 %v2037_v2, %v442_v20  ;;  %v931_v25 = vpop.f32.mrf.mxu1 }
 0x123   :  { %v1460_v26 = vpop.f32.mrf.mxu0 }
 0x124   :  { %1252 = vst.msk [vmem:[%s2434_s6 + $0x158] sm:$0xff] %vm135_vm0, %v1188_v21  ;;  %v1186_v27 = vmax.f32 %v1122_v22, 0.0  ;;  %v1127_v28 = vadd.f32 %v2043_v6, %v1056_v23  ;;  %v1054_v29 = vadd.f32 %v931_v25, %v443_v24  ;;  %v454_v30 = vadd.f32 %v1460_v26, %v2037_v2  ;;  %v1526_v31 = vpop.f32.mrf.mxu1 }
 0x125   :  { %v445_v32 = vpop.f32.mrf.mxu0 }
 0x126   :  { %1250 = vst.msk [vmem:[%s2434_s6 + $0x148] sm:$0xff] %vm135_vm0, %v1186_v27  ;;  %v1191_v33 = vmax.f32 %v1127_v28, 0.0  ;;  %v1125_v34 = vadd.f32 %v2043_v6, %v1054_v29  ;;  %v1057_v35 = vadd.f32 %v1526_v31, %v454_v30  ;;  %v446_v36 = vadd.f32 %v2037_v2, %v445_v32  ;;  %v934_v37 = vpop.f32.mrf.mxu1 }
 0x127   :  { %v1463_v38 = vpop.f32.mrf.mxu0 }
 0x128   :  { %1255 = vst.msk [vmem:[%s2434_s6 + $0x170] sm:$0xff] %vm135_vm0, %v1191_v33  ;;  %v1189_v39 = vmax.f32 %v1125_v34, 0.0  ;;  %v1128_v40 = vadd.f32 %v2043_v6, %v1057_v35  ;;  %v1055_v41 = vadd.f32 %v934_v37, %v446_v36  ;;  %v467_v42 = vadd.f32 %v1463_v38, %v2037_v2  ;;  %v1529_v43 = vpop.f32.mrf.mxu1 }
 0x129   :  { %v458_v44 = vpop.f32.mrf.mxu0 }
 0x12a   :  { %1253 = vst.msk [vmem:[%s2434_s6 + $0x160] sm:$0xff] %vm135_vm0, %v1189_v39  ;;  %v1192_v45 = vmax.f32 %v1128_v40, 0.0  ;;  %v1126_v46 = vadd.f32 %v2043_v6, %v1055_v41  ;;  %v1060_v47 = vadd.f32 %v1529_v43, %v467_v42  ;;  %v459_v48 = vadd.f32 %v2037_v2, %v458_v44  ;;  %v947_v49 = vpop.f32.mrf.mxu1 }
 0x12b   :  { %v1464_v50 = vpop.f32.mrf.mxu0 }
 0x12c   :  { %1256 = vst.msk [vmem:[%s2434_s6 + $0x178] sm:$0xff] %vm135_vm0, %v1192_v45  ;;  %v1190_v51 = vmax.f32 %v1126_v46, 0.0  ;;  %v1131_v52 = vadd.f32 %v2043_v6, %v1060_v47  ;;  %v1058_v53 = vadd.f32 %v947_v49, %v459_v48  ;;  %v470_v54 = vadd.f32 %v1464_v50, %v2037_v2  ;;  %v1530_v55 = vpop.f32.mrf.mxu1 }
 0x12d   :  { %v461_v56 = vpop.f32.mrf.mxu0 }
 0x12e   :  { %1254 = vst.msk [vmem:[%s2434_s6 + $0x168] sm:$0xff] %vm135_vm0, %v1190_v51  ;;  %v1195_v57 = vmax.f32 %v1131_v52, 0.0  ;;  %v1129_v58 = vadd.f32 %v2043_v6, %v1058_v53  ;;  %v1061_v59 = vadd.f32 %v1530_v55, %v470_v54  ;;  %v462_v60 = vadd.f32 %v2037_v2, %v461_v56  ;;  %v950_v61 = vpop.f32.mrf.mxu1 }
 0x12f   :  { %v1467_v62 = vpop.f32.mrf.mxu0 }
 0x130   :  { %1259 = vst.msk [vmem:[%s2434_s6 + $0x190] sm:$0xff] %vm135_vm0, %v1195_v57  ;;  %v1193_v63 = vmax.f32 %v1129_v58, 0.0  ;;  %v1132_v0 = vadd.f32 %v2043_v6, %v1061_v59  ;;  %v1059_v1 = vadd.f32 %v950_v61, %v462_v60  ;;  %v483_v3 = vadd.f32 %v1467_v62, %v2037_v2  ;;  %v1533_v4 = vpop.f32.mrf.mxu1 }
 0x131   :  { %v474_v5 = vpop.f32.mrf.mxu0 }
 0x132   :  { %1257 = vst.msk [vmem:[%s2434_s6 + $0x180] sm:$0xff] %vm135_vm0, %v1193_v63  ;;  %v1196_v7 = vmax.f32 %v1132_v0, 0.0  ;;  %v1130_v8 = vadd.f32 %v2043_v6, %v1059_v1  ;;  %v1064_v9 = vadd.f32 %v1533_v4, %v483_v3  ;;  %v475_v10 = vadd.f32 %v2037_v2, %v474_v5  ;;  %v963_v11 = vpop.f32.mrf.mxu1 }
 0x133   :  { %v1468_v12 = vpop.f32.mrf.mxu0 }
 0x134   :  { %1260 = vst.msk [vmem:[%s2434_s6 + $0x198] sm:$0xff] %vm135_vm0, %v1196_v7  ;;  %v1194_v13 = vmax.f32 %v1130_v8, 0.0  ;;  %v1135_v14 = vadd.f32 %v2043_v6, %v1064_v9  ;;  %v1062_v15 = vadd.f32 %v963_v11, %v475_v10  ;;  %v486_v16 = vadd.f32 %v1468_v12, %v2037_v2  ;;  %v1534_v17 = vpop.f32.mrf.mxu1 }
 0x135   :  { %v477_v18 = vpop.f32.mrf.mxu0 }
 0x136   :  { %1258 = vst.msk [vmem:[%s2434_s6 + $0x188] sm:$0xff] %vm135_vm0, %v1194_v13  ;;  %v1199_v19 = vmax.f32 %v1135_v14, 0.0  ;;  %v1133_v20 = vadd.f32 %v2043_v6, %v1062_v15  ;;  %v1065_v21 = vadd.f32 %v1534_v17, %v486_v16  ;;  %v478_v22 = vadd.f32 %v2037_v2, %v477_v18  ;;  %v966_v23 = vpop.f32.mrf.mxu1 }
 0x137   :  { %v1471_v24 = vpop.f32.mrf.mxu0 }
 0x138   :  { %1263 = vst.msk [vmem:[%s2434_s6 + $0x1b0] sm:$0xff] %vm135_vm0, %v1199_v19  ;;  %v1197_v25 = vmax.f32 %v1133_v20, 0.0  ;;  %v1136_v26 = vadd.f32 %v2043_v6, %v1065_v21  ;;  %v1063_v27 = vadd.f32 %v966_v23, %v478_v22  ;;  %v499_v28 = vadd.f32 %v1471_v24, %v2037_v2  ;;  %v1537_v29 = vpop.f32.mrf.mxu1 }
 0x139   :  { %v490_v30 = vpop.f32.mrf.mxu0 }
 0x13a   :  { %1261 = vst.msk [vmem:[%s2434_s6 + $0x1a0] sm:$0xff] %vm135_vm0, %v1197_v25  ;;  %v1200_v31 = vmax.f32 %v1136_v26, 0.0  ;;  %v1134_v32 = vadd.f32 %v2043_v6, %v1063_v27  ;;  %v1068_v33 = vadd.f32 %v1537_v29, %v499_v28  ;;  %v491_v34 = vadd.f32 %v2037_v2, %v490_v30  ;;  %v979_v35 = vpop.f32.mrf.mxu1 }
 0x13b   :  { %v1472_v36 = vpop.f32.mrf.mxu0 }
 0x13c   :  { %1264 = vst.msk [vmem:[%s2434_s6 + $0x1b8] sm:$0xff] %vm135_vm0, %v1200_v31  ;;  %v1198_v37 = vmax.f32 %v1134_v32, 0.0  ;;  %v1139_v38 = vadd.f32 %v2043_v6, %v1068_v33  ;;  %v1066_v39 = vadd.f32 %v979_v35, %v491_v34  ;;  %v502_v40 = vadd.f32 %v1472_v36, %v2037_v2  ;;  %v1538_v41 = vpop.f32.mrf.mxu1 }
 0x13d   :  { %v493_v42 = vpop.f32.mrf.mxu0 }
 0x13e   :  { %1262 = vst.msk [vmem:[%s2434_s6 + $0x1a8] sm:$0xff] %vm135_vm0, %v1198_v37  ;;  %v1203_v43 = vmax.f32 %v1139_v38, 0.0  ;;  %v1137_v44 = vadd.f32 %v2043_v6, %v1066_v39  ;;  %v1069_v45 = vadd.f32 %v1538_v41, %v502_v40  ;;  %v494_v46 = vadd.f32 %v2037_v2, %v493_v42  ;;  %v982_v47 = vpop.f32.mrf.mxu1 }
 0x13f   :  { %v1475_v48 = vpop.f32.mrf.mxu0 }
 0x140   :  { %1267 = vst.msk [vmem:[%s2434_s6 + $0x1d0] sm:$0xff] %vm135_vm0, %v1203_v43  ;;  %v1201_v49 = vmax.f32 %v1137_v44, 0.0  ;;  %v1140_v50 = vadd.f32 %v2043_v6, %v1069_v45  ;;  %v1067_v51 = vadd.f32 %v982_v47, %v494_v46  ;;  %v515_v52 = vadd.f32 %v1475_v48, %v2037_v2  ;;  %v1541_v53 = vpop.f32.mrf.mxu1 }
 0x141   :  { %v506_v54 = vpop.f32.mrf.mxu0 }
 0x142   :  { %1265 = vst.msk [vmem:[%s2434_s6 + $0x1c0] sm:$0xff] %vm135_vm0, %v1201_v49  ;;  %v1204_v55 = vmax.f32 %v1140_v50, 0.0  ;;  %v1138_v56 = vadd.f32 %v2043_v6, %v1067_v51  ;;  %v1072_v57 = vadd.f32 %v1541_v53, %v515_v52  ;;  %v507_v58 = vadd.f32 %v2037_v2, %v506_v54  ;;  %v995_v59 = vpop.f32.mrf.mxu1 }
 0x143   :  { %v1476_v60 = vpop.f32.mrf.mxu0 }
 0x144   :  { %1268 = vst.msk [vmem:[%s2434_s6 + $0x1d8] sm:$0xff] %vm135_vm0, %v1204_v55  ;;  %v1202_v61 = vmax.f32 %v1138_v56, 0.0  ;;  %v1143_v62 = vadd.f32 %v2043_v6, %v1072_v57  ;;  %v1070_v63 = vadd.f32 %v995_v59, %v507_v58  ;;  %v518_v0 = vadd.f32 %v1476_v60, %v2037_v2  ;;  %v1542_v1 = vpop.f32.mrf.mxu1 }
 0x145   :  { %v509_v3 = vpop.f32.mrf.mxu0 }
 0x146   :  { %1266 = vst.msk [vmem:[%s2434_s6 + $0x1c8] sm:$0xff] %vm135_vm0, %v1202_v61  ;;  %v1207_v4 = vmax.f32 %v1143_v62, 0.0  ;;  %v1141_v5 = vadd.f32 %v2043_v6, %v1070_v63  ;;  %v1073_v7 = vadd.f32 %v1542_v1, %v518_v0  ;;  %v510_v8 = vadd.f32 %v2037_v2, %v509_v3  ;;  %v998_v9 = vpop.f32.mrf.mxu1 }
 0x148   :  { %1271 = vst.msk [vmem:[%s2434_s6 + $0x1f0] sm:$0xff] %vm135_vm0, %v1207_v4  ;;  %v1205_v10 = vmax.f32 %v1141_v5, 0.0  ;;  %v1144_v11 = vadd.f32 %v2043_v6, %v1073_v7  ;;  %v1071_v12 = vadd.f32 %v998_v9, %v510_v8 }
 0x14a   :  { %1269 = vst.msk [vmem:[%s2434_s6 + $0x1e0] sm:$0xff] %vm135_vm0, %v1205_v10  ;;  %v1208_v13 = vmax.f32 %v1144_v11, 0.0  ;;  %v1142_v14 = vadd.f32 %v2043_v6, %v1071_v12 }
 0x14c   :  { %1272 = vst.msk [vmem:[%s2434_s6 + $0x1f8] sm:$0xff] %vm135_vm0, %v1208_v13  ;;  %v1206_v2 = vmax.f32 %v1142_v14, 0.0 }
 0x14e   :  { %1270 = vst.msk [vmem:[%s2434_s6 + $0x1e8] sm:$0xff] %vm135_vm0, %v1206_v2 }

</bundles_post_ra>
